<compile_context>
chip_gen: v5e
topology: v5e:2x2
jax: 0.10.0
libtpu: 0.0.40
codegen_flags: <defaults>
</compile_context>

<pallas_src>
import numpy as np
import jax
import jax.numpy as jnp
from jax import lax
from jax.experimental import pallas as pl
from jax.experimental.pallas import tpu as pltpu


# Row-block sizes used inside the fused conv kernel (chosen so the per-block
# register accumulator stays at ~16-32 vregs for every layer).
_RB1, _RB2, _RB3 = 4, 8, 16
# Column offset where the interior of the padded inter-layer buffers starts
# (8 keeps all interior stores sublane-aligned; column 7 / W+8 are the zero border).
_COL0 = 8


# ---------------------------------------------------------------------------
# Fused conv1+conv2+conv3 kernel (one batch element per grid step).
# ---------------------------------------------------------------------------
def _fused_conv_kernel(x_ref, w1_ref, b1_ref, w2_ref, b2_ref, w3_ref, b3_ref,
                       o_ref, pad2_ref, pad3_ref, z1_ref, p1_ref, z2_ref,
                       p2_ref, z3_ref, p3_ref):
    f32 = jnp.float32
    H1 = x_ref.shape[1] - 2           # 64
    W1 = x_ref.shape[2] - 2           # 64
    Cin1 = x_ref.shape[3]             # 8 (input channel zero-padded 1 -> 8)
    C1 = w1_ref.shape[-1]             # 32
    C2 = w2_ref.shape[-1]             # 64
    C3 = w3_ref.shape[-1]             # 128
    H2, W2 = H1 // 2, W1 // 2         # 32
    H3, W3 = H2 // 2, W2 // 2         # 16

    # Zero the padded inter-layer buffers once (borders must be zero; interiors
    # are fully overwritten below).
    pad2_ref[...] = jnp.zeros_like(pad2_ref)
    pad3_ref[...] = jnp.zeros_like(pad3_ref)

    def conv_relu_pool(load, store, w_ref, b_ref, z_ref, p_ref, *,
                       H, W, Cin, Cout, RB):
        """3x3 conv (pad=1) + bias + ReLU + 2x2 maxpool over H//RB row blocks."""
        Wh, RBh = W // 2, RB // 2
        nb = H // RB

        def block(rb, carry):
            row0 = rb * RB
            # Register accumulation of the 9 taps; z_ref is written exactly once.
            acc = jnp.zeros((RB * W, Cout), f32)
            for t in range(9):
                kh, kw = t // 3, t % 3
                patch = load(row0 + kh, RB, kw, W)               # (RB, W, Cin)
                acc = acc + jnp.dot(patch.reshape(RB * W, Cin), w_ref[t],
                                    preferred_element_type=f32)
            z_ref[...] = jnp.maximum(acc + b_ref[...], 0.0)
            # 2x2 max pool: along W via stride-2 sublane reads, then along H.
            ev = z_ref[pl.ds(0, RB * Wh, stride=2), :]
            od = z_ref[pl.ds(1, RB * Wh, stride=2), :]
            p_ref[...] = jnp.maximum(ev, od).reshape(RB, Wh, Cout)
            top = p_ref[pl.ds(0, RBh, stride=2), :, :]
            bot = p_ref[pl.ds(1, RBh, stride=2), :, :]
            store(rb, jnp.maximum(top, bot))                     # (RBh, Wh, Cout)
            return carry

        if nb == 1:
            block(0, 0)
        else:
            lax.fori_loop(0, nb, block, 0)

    # -------- layer 1: (H1, W1, Cin1) -> (H2, W2, C1) into pad2 interior ------
    def load1(r, n, kw, w):
        return x_ref[0, pl.ds(r, n), pl.ds(kw, w), :]

    def store1(rb, v):                                           # (2, W2, C1)
        pad2_ref[pl.ds(1 + rb * (_RB1 // 2), _RB1 // 2),
                 _COL0:_COL0 + W2, :] = v

    conv_relu_pool(load1, store1, w1_ref, b1_ref, z1_ref, p1_ref,
                   H=H1, W=W1, Cin=Cin1, Cout=C1, RB=_RB1)

    # -------- layer 2: (H2, W2, C1) -> (H3, W3, C2) into pad3 interior --------
    def load2(r, n, kw, w):
        return pad2_ref[pl.ds(r, n), pl.ds(_COL0 - 1 + kw, w), :]

    def store2(rb, v):                                           # (4, W3, C2)
        pad3_ref[pl.ds(1 + rb * (_RB2 // 2), _RB2 // 2),
                 _COL0:_COL0 + W3, :] = v

    conv_relu_pool(load2, store2, w2_ref, b2_ref, z2_ref, p2_ref,
                   H=H2, W=W2, Cin=C1, Cout=C2, RB=_RB2)

    # -------- layer 3: (H3, W3, C2) -> (8, 8, C3) flattened into o_ref --------
    def load3(r, n, kw, w):
        return pad3_ref[pl.ds(r, n), pl.ds(_COL0 - 1 + kw, w), :]

    def store3(rb, v):                                           # (8, 8, C3)
        o_ref[0] = v.reshape((H3 // 2) * (W3 // 2), C3)          # lane-dense (64,128)

    conv_relu_pool(load3, store3, w3_ref, b3_ref, z3_ref, p3_ref,
                   H=H3, W=W3, Cin=C2, Cout=C3, RB=_RB3)


def fused_convs(xp, w1, b1, w2, b2, w3, b3):
    """xp: (B, H+2, W+2, Cin) zero-padded NHWC input -> (B, (H//8)*(W//8), C3)."""
    B, Hp, Wp, Cin = xp.shape
    H, W = Hp - 2, Wp - 2
    C1, C2, C3 = w1.shape[-1], w2.shape[-1], w3.shape[-1]
    H2, H3 = H // 2, H // 4
    assert H % (2 * _RB1) == 0 and H2 % (2 * _RB2) == 0 and H3 == _RB3
    out_rows = (H // 8) * (W // 8)
    return pl.pallas_call(
        _fused_conv_kernel,
        out_shape=jax.ShapeDtypeStruct((B, out_rows, C3), jnp.float32),
        grid_spec=pltpu.PrefetchScalarGridSpec(
            num_scalar_prefetch=0,
            grid=(B,),
            in_specs=[
                pl.BlockSpec((1, Hp, Wp, Cin), lambda b: (b, 0, 0, 0)),
                pl.BlockSpec(w1.shape, lambda b: (0, 0, 0)),
                pl.BlockSpec(b1.shape, lambda b: (0, 0)),
                pl.BlockSpec(w2.shape, lambda b: (0, 0, 0)),
                pl.BlockSpec(b2.shape, lambda b: (0, 0)),
                pl.BlockSpec(w3.shape, lambda b: (0, 0, 0)),
                pl.BlockSpec(b3.shape, lambda b: (0, 0)),
            ],
            out_specs=pl.BlockSpec((1, out_rows, C3), lambda b: (b, 0, 0)),
            scratch_shapes=[
                pltpu.VMEM((H2 + 2, 48, C1), jnp.float32),       # padded pool1 out
                pltpu.VMEM((H3 + 2, 32, C2), jnp.float32),       # padded pool2 out
                pltpu.VMEM((_RB1 * W, C1), jnp.float32),         # conv1 row-block act
                pltpu.VMEM((_RB1, W // 2, C1), jnp.float32),     # conv1 W-pooled
                pltpu.VMEM((_RB2 * (W // 2), C2), jnp.float32),  # conv2 row-block act
                pltpu.VMEM((_RB2, W // 4, C2), jnp.float32),     # conv2 W-pooled
                pltpu.VMEM((_RB3 * (W // 4), C3), jnp.float32),  # conv3 act
                pltpu.VMEM((_RB3, W // 8, C3), jnp.float32),     # conv3 W-pooled
            ],
        ),
        compiler_params=pltpu.CompilerParams(
            dimension_semantics=("parallel",)),                  # v7x: 2 TCs over batch
    )(xp, w1, b1, w2, b2, w3, b3)


# ---------------------------------------------------------------------------
# FC head: single-step fused fc1(+bf16 weight)+ReLU+fc2.
# ---------------------------------------------------------------------------
def _fc_head_kernel(x_ref, w1_ref, b1_ref, w2_ref, b2_ref, o_ref):
    h = jnp.dot(x_ref[...].astype(w1_ref.dtype), w1_ref[...],
                preferred_element_type=jnp.float32)
    h = jnp.maximum(h + b1_ref[...], 0.0)
    out = jnp.dot(h, w2_ref[...], preferred_element_type=jnp.float32) + b2_ref[...]
    o_ref[...] = out.astype(o_ref.dtype)


def fc_head(x, w1, b1, w2, b2):
    B, K = x.shape
    H4, O = w1.shape[1], w2.shape[1]
    return pl.pallas_call(
        _fc_head_kernel,
        out_shape=jax.ShapeDtypeStruct((B, O), jnp.float32),
        grid_spec=pltpu.PrefetchScalarGridSpec(
            num_scalar_prefetch=0,
            grid=(1,),
            in_specs=[
                pl.BlockSpec((B, K), lambda i: (0, 0)),
                pl.BlockSpec((K, H4), lambda i: (0, 0)),
                pl.BlockSpec((1, H4), lambda i: (0, 0)),
                pl.BlockSpec((H4, O), lambda i: (0, 0)),
                pl.BlockSpec((1, O), lambda i: (0, 0)),
            ],
            out_specs=pl.BlockSpec((B, O), lambda i: (0, 0)),
        ),
        compiler_params=pltpu.CompilerParams(dimension_semantics=("arbitrary",)),
    )(x, w1, b1, w2, b2)


# ---------------------------------------------------------------------------
# Parameters (deterministic synthetic init), one-time weight re-layout, forward.
# ---------------------------------------------------------------------------
def init_params(key, h1=32, h2=64, h3=128, h4=128, n_out=15):
    ks = jax.random.split(key, 10)

    def conv_w(k, cout, cin):
        return jax.random.normal(k, (cout, cin, 3, 3), jnp.float32) / np.sqrt(9 * cin)

    def lin_w(k, fin, fout):
        return jax.random.normal(k, (fin, fout), jnp.float32) / np.sqrt(fin)

    return dict(
        w_conv1=conv_w(ks[0], h1, 1),
        b_conv1=0.1 * jax.random.normal(ks[1], (h1,), jnp.float32),
        w_conv2=conv_w(ks[2], h2, h1),
        b_conv2=0.1 * jax.random.normal(ks[3], (h2,), jnp.float32),
        w_conv3=conv_w(ks[4], h3, h2),
        b_conv3=0.1 * jax.random.normal(ks[5], (h3,), jnp.float32),
        w_fc1=lin_w(ks[6], 8 * 8 * h3, h4),
        b_fc1=0.1 * jax.random.normal(ks[7], (h4,), jnp.float32),
        w_fc2=lin_w(ks[8], h4, n_out),
        b_fc2=0.1 * jax.random.normal(ks[9], (n_out,), jnp.float32),
    )


def prepare_params(p):
    """One-time (outside jit) re-layout of the PyTorch-style parameters."""
    def conv_w(w):                      # (Cout, Cin, 3, 3) -> (9, Cin, Cout)
        cout, cin = w.shape[0], w.shape[1]
        return jnp.transpose(w, (2, 3, 1, 0)).reshape(9, cin, cout)

    w1 = conv_w(p["w_conv1"])
    w1 = jnp.pad(w1, ((0, 0), (0, 8 - w1.shape[1]), (0, 0)))    # Cin 1 -> 8 (zeros)
    w2 = conv_w(p["w_conv2"])
    w3 = conv_w(p["w_conv3"])

    # Fold the NCHW-order flatten of torch.flatten into fc1's weight rows so the
    # kernel consumes the NHWC-flattened conv output directly (free reshape).
    c3 = p["w_conv3"].shape[0]
    h4 = p["w_fc1"].shape[1]
    wfc1 = (p["w_fc1"].reshape(c3, 8, 8, h4).transpose(1, 2, 0, 3)
            .reshape(8 * 8 * c3, h4))

    return dict(
        w1=w1, b1=p["b_conv1"][None, :],
        w2=w2, b2=p["b_conv2"][None, :],
        w3=w3, b3=p["b_conv3"][None, :],
        wfc1=wfc1.astype(jnp.bfloat16),   # fc1 is weight-DMA bound: bf16 halves it
        bfc1=p["b_fc1"][None, :],
        wfc2=p["w_fc2"], bfc2=p["b_fc2"][None, :],
    )


def pallas_forward(x_nchw, kp):
    B = x_nchw.shape[0]
    # NCHW -> NHWC (free: C == 1), zero-pad H/W by 1 and channels 1 -> 8.
    # This is the only runtime data-prep; everything else was folded into weights.
    x = jnp.transpose(x_nchw, (0, 2, 3, 1))
    x = jnp.pad(x, ((0, 0), (1, 1), (1, 1), (0, 8 - x.shape[-1])))
    feats = fused_convs(x, kp["w1"], kp["b1"], kp["w2"], kp["b2"],
                        kp["w3"], kp["b3"])                     # (B, 64, 128)
    feats = feats.reshape(B, -1)                                # (B, 8192), free
    return fc_head(feats, kp["wfc1"], kp["bfc1"], kp["wfc2"], kp["bfc2"])


def reference_forward(x_nchw, p):
    y = x_nchw
    for wk, bk in (("w_conv1", "b_conv1"), ("w_conv2", "b_conv2"), ("w_conv3", "b_conv3")):
        y = lax.conv_general_dilated(y, p[wk], window_strides=(1, 1), padding="SAME",
                                     dimension_numbers=("NCHW", "OIHW", "NCHW"),
                                     precision=lax.Precision.HIGHEST)
        y = jax.nn.relu(y + p[bk][None, :, None, None])
        y = lax.reduce_window(y, -jnp.inf, lax.max, (1, 1, 2, 2), (1, 1, 2, 2), "VALID")
    y = y.reshape(y.shape[0], -1)
    y = jax.nn.relu(jnp.dot(y, p["w_fc1"], precision=lax.Precision.HIGHEST) + p["b_fc1"])
    return jnp.dot(y, p["w_fc2"], precision=lax.Precision.HIGHEST) + p["b_fc2"]


if __name__ == "__main__":
    key = jax.random.PRNGKey(0)
    k_x, k_p = jax.random.split(key)
    params = init_params(k_p)
    kparams = prepare_params(params)        # one-time weight re-layout (incl. bf16 fc1)
    # Input matching the PyTorch module (fc1 expects 8*8*128 after three pools -> 64x64)
    x = jax.random.normal(k_x, (2, 1, 64, 64), jnp.float32)      # NCHW like PyTorch

    fwd = jax.jit(pallas_forward)
    out = jax.block_until_ready(fwd(x, kparams))

    ref = reference_forward(x, params)
    np.testing.assert_allclose(np.asarray(out), np.asarray(ref), rtol=2e-2, atol=2e-2)
    assert out.shape == (2, 15)
    print("KERNEL_OK")
</pallas_src>

<mosaic_0001>
module attributes {stable_mosaic.version = 11 : i64} {
  func.func @_fused_conv_kernel(%arg0: i32, %arg1: memref<1x66x66x8xf32, #tpu.memory_space<vmem>>, %arg2: memref<9x8x32xf32, #tpu.memory_space<vmem>>, %arg3: memref<1x32xf32, #tpu.memory_space<vmem>>, %arg4: memref<9x32x64xf32, #tpu.memory_space<vmem>>, %arg5: memref<1x64xf32, #tpu.memory_space<vmem>>, %arg6: memref<9x64x128xf32, #tpu.memory_space<vmem>>, %arg7: memref<1x128xf32, #tpu.memory_space<vmem>>, %arg8: memref<1x64x128xf32, #tpu.memory_space<vmem>>, %arg9: memref<34x48x32xf32, #tpu.memory_space<vmem>>, %arg10: memref<18x32x64xf32, #tpu.memory_space<vmem>>, %arg11: memref<256x32xf32, #tpu.memory_space<vmem>>, %arg12: memref<4x32x32xf32, #tpu.memory_space<vmem>>, %arg13: memref<256x64xf32, #tpu.memory_space<vmem>>, %arg14: memref<8x16x64xf32, #tpu.memory_space<vmem>>, %arg15: memref<256x128xf32, #tpu.memory_space<vmem>>, %arg16: memref<16x8x128xf32, #tpu.memory_space<vmem>>) attributes {dimension_semantics = [#tpu.dimension_semantics<parallel>], iteration_bounds = array<i64: 2>, scalar_prefetch = 0 : i64, scratch_operands = 8 : i64, tpu.core_type = #tpu.core_type<tc>, window_params = [{transform_indices = @transform_0, window_bounds = array<i64: 1, 66, 66, 8>}, {pipeline_mode = #tpu.pipeline_mode<synchronous>, transform_indices = @transform_1, window_bounds = array<i64: 9, 8, 32>}, {pipeline_mode = #tpu.pipeline_mode<synchronous>, transform_indices = @transform_2, window_bounds = array<i64: 1, 32>}, {pipeline_mode = #tpu.pipeline_mode<synchronous>, transform_indices = @transform_3, window_bounds = array<i64: 9, 32, 64>}, {pipeline_mode = #tpu.pipeline_mode<synchronous>, transform_indices = @transform_4, window_bounds = array<i64: 1, 64>}, {pipeline_mode = #tpu.pipeline_mode<synchronous>, transform_indices = @transform_5, window_bounds = array<i64: 9, 64, 128>}, {pipeline_mode = #tpu.pipeline_mode<synchronous>, transform_indices = @transform_6, window_bounds = array<i64: 1, 128>}, {transform_indices = @transform_7, window_bounds = array<i64: 1, 64, 128>}]} {
    %cst = arith.constant 0.000000e+00 : f32
    %0 = vector.broadcast %cst : f32 to vector<34x48x32xf32>
    %c0 = arith.constant 0 : index
    %c0_0 = arith.constant 0 : index
    %c0_1 = arith.constant 0 : index
    %1 = vector.load %arg9[%c0, %c0_0, %c0_1] : memref<34x48x32xf32, #tpu.memory_space<vmem>>, vector<34x48x32xf32>
    tpu.vector_store %arg9[%c0, %c0_0, %c0_1], %0 {strides = array<i32>} : memref<34x48x32xf32, #tpu.memory_space<vmem>>, vector<34x48x32xf32>,
    %cst_2 = arith.constant 0.000000e+00 : f32
    %2 = vector.broadcast %cst_2 : f32 to vector<18x32x64xf32>
    %c0_3 = arith.constant 0 : index
    %c0_4 = arith.constant 0 : index
    %c0_5 = arith.constant 0 : index
    %3 = vector.load %arg10[%c0_3, %c0_4, %c0_5] : memref<18x32x64xf32, #tpu.memory_space<vmem>>, vector<18x32x64xf32>
    tpu.vector_store %arg10[%c0_3, %c0_4, %c0_5], %2 {strides = array<i32>} : memref<18x32x64xf32, #tpu.memory_space<vmem>>, vector<18x32x64xf32>,
    %c0_i32 = arith.constant 0 : i32
    %c16_i32 = arith.constant 16 : i32
    %4 = arith.addi %c0_i32, %c16_i32 : i32
    %c1_i32 = arith.constant 1 : i32
    scf.for %arg17 = %c0_i32 to %4 step %c1_i32  : i32 {
      %c4_i32_86 = arith.constant 4 : i32
      %79 = arith.muli %arg17, %c4_i32_86 : i32
      %cst_87 = arith.constant 0.000000e+00 : f32
      %80 = vector.broadcast %cst_87 : f32 to vector<256x32xf32>
      %c0_i32_88 = arith.constant 0 : i32
      %81 = arith.addi %79, %c0_i32_88 : i32
      %c0_89 = arith.constant 0 : index
      %82 = arith.index_cast %81 : i32 to index
      %c0_90 = arith.constant 0 : index
      %c0_91 = arith.constant 0 : index
      %83 = vector.load %arg1[%c0_89, %82, %c0_90, %c0_91] : memref<1x66x66x8xf32, #tpu.memory_space<vmem>>, vector<1x4x64x8xf32>
      %84 = vector.shape_cast %83 : vector<1x4x64x8xf32> to vector<4x64x8xf32>
      %85 = vector.shape_cast %84 : vector<4x64x8xf32> to vector<256x8xf32>
      %c0_92 = arith.constant 0 : index
      %c0_93 = arith.constant 0 : index
      %c0_94 = arith.constant 0 : index
      %86 = vector.load %arg2[%c0_92, %c0_93, %c0_94] : memref<9x8x32xf32, #tpu.memory_space<vmem>>, vector<1x8x32xf32>
      %87 = vector.shape_cast %86 : vector<1x8x32xf32> to vector<8x32xf32>
      %cst_95 = arith.constant dense<0.000000e+00> : vector<256x32xf32>
      %88 = tpu.matmul %85, %87, %cst_95 {dimension_numbers = #tpu.dot_dimension_numbers<[1], [0], [0], [1], [0, 0, 1, 1], [], []>} : vector<256x8xf32>, vector<8x32xf32>, vector<256x32xf32> -> vector<256x32xf32>
      %89 = arith.addf %80, %88 : vector<256x32xf32>
      %c0_i32_96 = arith.constant 0 : i32
      %90 = arith.addi %79, %c0_i32_96 : i32
      %c0_97 = arith.constant 0 : index
      %91 = arith.index_cast %90 : i32 to index
      %c1_98 = arith.constant 1 : index
      %c0_99 = arith.constant 0 : index
      %92 = vector.load %arg1[%c0_97, %91, %c1_98, %c0_99] : memref<1x66x66x8xf32, #tpu.memory_space<vmem>>, vector<1x4x64x8xf32>
      %93 = vector.shape_cast %92 : vector<1x4x64x8xf32> to vector<4x64x8xf32>
      %94 = vector.shape_cast %93 : vector<4x64x8xf32> to vector<256x8xf32>
      %c1_100 = arith.constant 1 : index
      %c0_101 = arith.constant 0 : index
      %c0_102 = arith.constant 0 : index
      %95 = vector.load %arg2[%c1_100, %c0_101, %c0_102] : memref<9x8x32xf32, #tpu.memory_space<vmem>>, vector<1x8x32xf32>
      %96 = vector.shape_cast %95 : vector<1x8x32xf32> to vector<8x32xf32>
      %cst_103 = arith.constant dense<0.000000e+00> : vector<256x32xf32>
      %97 = tpu.matmul %94, %96, %cst_103 {dimension_numbers = #tpu.dot_dimension_numbers<[1], [0], [0], [1], [0, 0, 1, 1], [], []>} : vector<256x8xf32>, vector<8x32xf32>, vector<256x32xf32> -> vector<256x32xf32>
      %98 = arith.addf %89, %97 : vector<256x32xf32>
      %c0_i32_104 = arith.constant 0 : i32
      %99 = arith.addi %79, %c0_i32_104 : i32
      %c0_105 = arith.constant 0 : index
      %100 = arith.index_cast %99 : i32 to index
      %c2_106 = arith.constant 2 : index
      %c0_107 = arith.constant 0 : index
      %101 = vector.load %arg1[%c0_105, %100, %c2_106, %c0_107] : memref<1x66x66x8xf32, #tpu.memory_space<vmem>>, vector<1x4x64x8xf32>
      %102 = vector.shape_cast %101 : vector<1x4x64x8xf32> to vector<4x64x8xf32>
      %103 = vector.shape_cast %102 : vector<4x64x8xf32> to vector<256x8xf32>
      %c2_108 = arith.constant 2 : index
      %c0_109 = arith.constant 0 : index
      %c0_110 = arith.constant 0 : index
      %104 = vector.load %arg2[%c2_108, %c0_109, %c0_110] : memref<9x8x32xf32, #tpu.memory_space<vmem>>, vector<1x8x32xf32>
      %105 = vector.shape_cast %104 : vector<1x8x32xf32> to vector<8x32xf32>
      %cst_111 = arith.constant dense<0.000000e+00> : vector<256x32xf32>
      %106 = tpu.matmul %103, %105, %cst_111 {dimension_numbers = #tpu.dot_dimension_numbers<[1], [0], [0], [1], [0, 0, 1, 1], [], []>} : vector<256x8xf32>, vector<8x32xf32>, vector<256x32xf32> -> vector<256x32xf32>
      %107 = arith.addf %98, %106 : vector<256x32xf32>
      %c1_i32_112 = arith.constant 1 : i32
      %108 = arith.addi %79, %c1_i32_112 : i32
      %c0_113 = arith.constant 0 : index
      %109 = arith.index_cast %108 : i32 to index
      %c0_114 = arith.constant 0 : index
      %c0_115 = arith.constant 0 : index
      %110 = vector.load %arg1[%c0_113, %109, %c0_114, %c0_115] : memref<1x66x66x8xf32, #tpu.memory_space<vmem>>, vector<1x4x64x8xf32>
      %111 = vector.shape_cast %110 : vector<1x4x64x8xf32> to vector<4x64x8xf32>
      %112 = vector.shape_cast %111 : vector<4x64x8xf32> to vector<256x8xf32>
      %c3_116 = arith.constant 3 : index
      %c0_117 = arith.constant 0 : index
      %c0_118 = arith.constant 0 : index
      %113 = vector.load %arg2[%c3_116, %c0_117, %c0_118] : memref<9x8x32xf32, #tpu.memory_space<vmem>>, vector<1x8x32xf32>
      %114 = vector.shape_cast %113 : vector<1x8x32xf32> to vector<8x32xf32>
      %cst_119 = arith.constant dense<0.000000e+00> : vector<256x32xf32>
      %115 = tpu.matmul %112, %114, %cst_119 {dimension_numbers = #tpu.dot_dimension_numbers<[1], [0], [0], [1], [0, 0, 1, 1], [], []>} : vector<256x8xf32>, vector<8x32xf32>, vector<256x32xf32> -> vector<256x32xf32>
      %116 = arith.addf %107, %115 : vector<256x32xf32>
      %c1_i32_120 = arith.constant 1 : i32
      %117 = arith.addi %79, %c1_i32_120 : i32
      %c0_121 = arith.constant 0 : index
      %118 = arith.index_cast %117 : i32 to index
      %c1_122 = arith.constant 1 : index
      %c0_123 = arith.constant 0 : index
      %119 = vector.load %arg1[%c0_121, %118, %c1_122, %c0_123] : memref<1x66x66x8xf32, #tpu.memory_space<vmem>>, vector<1x4x64x8xf32>
      %120 = vector.shape_cast %119 : vector<1x4x64x8xf32> to vector<4x64x8xf32>
      %121 = vector.shape_cast %120 : vector<4x64x8xf32> to vector<256x8xf32>
      %c4_124 = arith.constant 4 : index
      %c0_125 = arith.constant 0 : index
      %c0_126 = arith.constant 0 : index
      %122 = vector.load %arg2[%c4_124, %c0_125, %c0_126] : memref<9x8x32xf32, #tpu.memory_space<vmem>>, vector<1x8x32xf32>
      %123 = vector.shape_cast %122 : vector<1x8x32xf32> to vector<8x32xf32>
      %cst_127 = arith.constant dense<0.000000e+00> : vector<256x32xf32>
      %124 = tpu.matmul %121, %123, %cst_127 {dimension_numbers = #tpu.dot_dimension_numbers<[1], [0], [0], [1], [0, 0, 1, 1], [], []>} : vector<256x8xf32>, vector<8x32xf32>, vector<256x32xf32> -> vector<256x32xf32>
      %125 = arith.addf %116, %124 : vector<256x32xf32>
      %c1_i32_128 = arith.constant 1 : i32
      %126 = arith.addi %79, %c1_i32_128 : i32
      %c0_129 = arith.constant 0 : index
      %127 = arith.index_cast %126 : i32 to index
      %c2_130 = arith.constant 2 : index
      %c0_131 = arith.constant 0 : index
      %128 = vector.load %arg1[%c0_129, %127, %c2_130, %c0_131] : memref<1x66x66x8xf32, #tpu.memory_space<vmem>>, vector<1x4x64x8xf32>
      %129 = vector.shape_cast %128 : vector<1x4x64x8xf32> to vector<4x64x8xf32>
      %130 = vector.shape_cast %129 : vector<4x64x8xf32> to vector<256x8xf32>
      %c5_132 = arith.constant 5 : index
      %c0_133 = arith.constant 0 : index
      %c0_134 = arith.constant 0 : index
      %131 = vector.load %arg2[%c5_132, %c0_133, %c0_134] : memref<9x8x32xf32, #tpu.memory_space<vmem>>, vector<1x8x32xf32>
      %132 = vector.shape_cast %131 : vector<1x8x32xf32> to vector<8x32xf32>
      %cst_135 = arith.constant dense<0.000000e+00> : vector<256x32xf32>
      %133 = tpu.matmul %130, %132, %cst_135 {dimension_numbers = #tpu.dot_dimension_numbers<[1], [0], [0], [1], [0, 0, 1, 1], [], []>} : vector<256x8xf32>, vector<8x32xf32>, vector<256x32xf32> -> vector<256x32xf32>
      %134 = arith.addf %125, %133 : vector<256x32xf32>
      %c2_i32 = arith.constant 2 : i32
      %135 = arith.addi %79, %c2_i32 : i32
      %c0_136 = arith.constant 0 : index
      %136 = arith.index_cast %135 : i32 to index
      %c0_137 = arith.constant 0 : index
      %c0_138 = arith.constant 0 : index
      %137 = vector.load %arg1[%c0_136, %136, %c0_137, %c0_138] : memref<1x66x66x8xf32, #tpu.memory_space<vmem>>, vector<1x4x64x8xf32>
      %138 = vector.shape_cast %137 : vector<1x4x64x8xf32> to vector<4x64x8xf32>
      %139 = vector.shape_cast %138 : vector<4x64x8xf32> to vector<256x8xf32>
      %c6_139 = arith.constant 6 : index
      %c0_140 = arith.constant 0 : index
      %c0_141 = arith.constant 0 : index
      %140 = vector.load %arg2[%c6_139, %c0_140, %c0_141] : memref<9x8x32xf32, #tpu.memory_space<vmem>>, vector<1x8x32xf32>
      %141 = vector.shape_cast %140 : vector<1x8x32xf32> to vector<8x32xf32>
      %cst_142 = arith.constant dense<0.000000e+00> : vector<256x32xf32>
      %142 = tpu.matmul %139, %141, %cst_142 {dimension_numbers = #tpu.dot_dimension_numbers<[1], [0], [0], [1], [0, 0, 1, 1], [], []>} : vector<256x8xf32>, vector<8x32xf32>, vector<256x32xf32> -> vector<256x32xf32>
      %143 = arith.addf %134, %142 : vector<256x32xf32>
      %c2_i32_143 = arith.constant 2 : i32
      %144 = arith.addi %79, %c2_i32_143 : i32
      %c0_144 = arith.constant 0 : index
      %145 = arith.index_cast %144 : i32 to index
      %c1_145 = arith.constant 1 : index
      %c0_146 = arith.constant 0 : index
      %146 = vector.load %arg1[%c0_144, %145, %c1_145, %c0_146] : memref<1x66x66x8xf32, #tpu.memory_space<vmem>>, vector<1x4x64x8xf32>
      %147 = vector.shape_cast %146 : vector<1x4x64x8xf32> to vector<4x64x8xf32>
      %148 = vector.shape_cast %147 : vector<4x64x8xf32> to vector<256x8xf32>
      %c7_147 = arith.constant 7 : index
      %c0_148 = arith.constant 0 : index
      %c0_149 = arith.constant 0 : index
      %149 = vector.load %arg2[%c7_147, %c0_148, %c0_149] : memref<9x8x32xf32, #tpu.memory_space<vmem>>, vector<1x8x32xf32>
      %150 = vector.shape_cast %149 : vector<1x8x32xf32> to vector<8x32xf32>
      %cst_150 = arith.constant dense<0.000000e+00> : vector<256x32xf32>
      %151 = tpu.matmul %148, %150, %cst_150 {dimension_numbers = #tpu.dot_dimension_numbers<[1], [0], [0], [1], [0, 0, 1, 1], [], []>} : vector<256x8xf32>, vector<8x32xf32>, vector<256x32xf32> -> vector<256x32xf32>
      %152 = arith.addf %143, %151 : vector<256x32xf32>
      %c2_i32_151 = arith.constant 2 : i32
      %153 = arith.addi %79, %c2_i32_151 : i32
      %c0_152 = arith.constant 0 : index
      %154 = arith.index_cast %153 : i32 to index
      %c2_153 = arith.constant 2 : index
      %c0_154 = arith.constant 0 : index
      %155 = vector.load %arg1[%c0_152, %154, %c2_153, %c0_154] : memref<1x66x66x8xf32, #tpu.memory_space<vmem>>, vector<1x4x64x8xf32>
      %156 = vector.shape_cast %155 : vector<1x4x64x8xf32> to vector<4x64x8xf32>
      %157 = vector.shape_cast %156 : vector<4x64x8xf32> to vector<256x8xf32>
      %c8_155 = arith.constant 8 : index
      %c0_156 = arith.constant 0 : index
      %c0_157 = arith.constant 0 : index
      %158 = vector.load %arg2[%c8_155, %c0_156, %c0_157] : memref<9x8x32xf32, #tpu.memory_space<vmem>>, vector<1x8x32xf32>
      %159 = vector.shape_cast %158 : vector<1x8x32xf32> to vector<8x32xf32>
      %cst_158 = arith.constant dense<0.000000e+00> : vector<256x32xf32>
      %160 = tpu.matmul %157, %159, %cst_158 {dimension_numbers = #tpu.dot_dimension_numbers<[1], [0], [0], [1], [0, 0, 1, 1], [], []>} : vector<256x8xf32>, vector<8x32xf32>, vector<256x32xf32> -> vector<256x32xf32>
      %161 = arith.addf %152, %160 : vector<256x32xf32>
      %c0_159 = arith.constant 0 : index
      %c0_160 = arith.constant 0 : index
      %162 = vector.load %arg3[%c0_159, %c0_160] : memref<1x32xf32, #tpu.memory_space<vmem>>, vector<1x32xf32>
      %163 = vector.broadcast %162 : vector<1x32xf32> to vector<256x32xf32>
      %164 = arith.addf %161, %163 : vector<256x32xf32>
      %cst_161 = arith.constant 0.000000e+00 : f32
      %165 = vector.broadcast %cst_161 : f32 to vector<256x32xf32>
      %166 = arith.maximumf %164, %165 : vector<256x32xf32>
      %c0_162 = arith.constant 0 : index
      %c0_163 = arith.constant 0 : index
      %167 = vector.load %arg11[%c0_162, %c0_163] : memref<256x32xf32, #tpu.memory_space<vmem>>, vector<256x32xf32>
      tpu.vector_store %arg11[%c0_162, %c0_163], %166 {strides = array<i32>} : memref<256x32xf32, #tpu.memory_space<vmem>>, vector<256x32xf32>,
      %c0_164 = arith.constant 0 : index
      %c0_165 = arith.constant 0 : index
      %168 = tpu.strided_load %arg11[%c0_164, %c0_165] {strides = array<i32: 2, 1>} : memref<256x32xf32, #tpu.memory_space<vmem>>, vector<128x32xf32>
      %c1_166 = arith.constant 1 : index
      %c0_167 = arith.constant 0 : index
      %169 = tpu.strided_load %arg11[%c1_166, %c0_167] {strides = array<i32: 2, 1>} : memref<256x32xf32, #tpu.memory_space<vmem>>, vector<128x32xf32>
      %170 = arith.maximumf %168, %169 : vector<128x32xf32>
      %171 = vector.shape_cast %170 : vector<128x32xf32> to vector<4x32x32xf32>
      %c0_168 = arith.constant 0 : index
      %c0_169 = arith.constant 0 : index
      %c0_170 = arith.constant 0 : index
      %172 = vector.load %arg12[%c0_168, %c0_169, %c0_170] : memref<4x32x32xf32, #tpu.memory_space<vmem>>, vector<4x32x32xf32>
      tpu.vector_store %arg12[%c0_168, %c0_169, %c0_170], %171 {strides = array<i32>} : memref<4x32x32xf32, #tpu.memory_space<vmem>>, vector<4x32x32xf32>,
      %c0_171 = arith.constant 0 : index
      %c0_172 = arith.constant 0 : index
      %c0_173 = arith.constant 0 : index
      %173 = tpu.strided_load %arg12[%c0_171, %c0_172, %c0_173] {strides = array<i32: 2, 1, 1>} : memref<4x32x32xf32, #tpu.memory_space<vmem>>, vector<2x32x32xf32>
      %c1_174 = arith.constant 1 : index
      %c0_175 = arith.constant 0 : index
      %c0_176 = arith.constant 0 : index
      %174 = tpu.strided_load %arg12[%c1_174, %c0_175, %c0_176] {strides = array<i32: 2, 1, 1>} : memref<4x32x32xf32, #tpu.memory_space<vmem>>, vector<2x32x32xf32>
      %175 = arith.maximumf %173, %174 : vector<2x32x32xf32>
      %c2_i32_177 = arith.constant 2 : i32
      %176 = arith.muli %arg17, %c2_i32_177 : i32
      %c1_i32_178 = arith.constant 1 : i32
      %177 = arith.addi %c1_i32_178, %176 : i32
      %178 = arith.index_cast %177 : i32 to index
      %c8_179 = arith.constant 8 : index
      %c0_180 = arith.constant 0 : index
      %179 = vector.load %arg9[%178, %c8_179, %c0_180] : memref<34x48x32xf32, #tpu.memory_space<vmem>>, vector<2x32x32xf32>
      tpu.vector_store %arg9[%178, %c8_179, %c0_180], %175 {strides = array<i32>} : memref<34x48x32xf32, #tpu.memory_space<vmem>>, vector<2x32x32xf32>,
    }
    %c16_i32_6 = arith.constant 16 : i32
    %c0_i32_7 = arith.constant 0 : i32
    %c4_i32 = arith.constant 4 : i32
    %5 = arith.addi %c0_i32_7, %c4_i32 : i32
    %c1_i32_8 = arith.constant 1 : i32
    scf.for %arg17 = %c0_i32_7 to %5 step %c1_i32_8  : i32 {
      %c8_i32 = arith.constant 8 : i32
      %79 = arith.muli %arg17, %c8_i32 : i32
      %cst_86 = arith.constant 0.000000e+00 : f32
      %80 = vector.broadcast %cst_86 : f32 to vector<256x64xf32>
      %c0_i32_87 = arith.constant 0 : i32
      %81 = arith.addi %79, %c0_i32_87 : i32
      %82 = arith.index_cast %81 : i32 to index
      %c7_88 = arith.constant 7 : index
      %c0_89 = arith.constant 0 : index
      %83 = vector.load %arg9[%82, %c7_88, %c0_89] : memref<34x48x32xf32, #tpu.memory_space<vmem>>, vector<8x32x32xf32>
      %84 = vector.shape_cast %83 : vector<8x32x32xf32> to vector<256x32xf32>
      %c0_90 = arith.constant 0 : index
      %c0_91 = arith.constant 0 : index
      %c0_92 = arith.constant 0 : index
      %85 = vector.load %arg4[%c0_90, %c0_91, %c0_92] : memref<9x32x64xf32, #tpu.memory_space<vmem>>, vector<1x32x64xf32>
      %86 = vector.shape_cast %85 : vector<1x32x64xf32> to vector<32x64xf32>
      %cst_93 = arith.constant dense<0.000000e+00> : vector<256x64xf32>
      %87 = tpu.matmul %84, %86, %cst_93 {dimension_numbers = #tpu.dot_dimension_numbers<[1], [0], [0], [1], [0, 0, 1, 1], [], []>} : vector<256x32xf32>, vector<32x64xf32>, vector<256x64xf32> -> vector<256x64xf32>
      %88 = arith.addf %80, %87 : vector<256x64xf32>
      %c0_i32_94 = arith.constant 0 : i32
      %89 = arith.addi %79, %c0_i32_94 : i32
      %90 = arith.index_cast %89 : i32 to index
      %c8_95 = arith.constant 8 : index
      %c0_96 = arith.constant 0 : index
      %91 = vector.load %arg9[%90, %c8_95, %c0_96] : memref<34x48x32xf32, #tpu.memory_space<vmem>>, vector<8x32x32xf32>
      %92 = vector.shape_cast %91 : vector<8x32x32xf32> to vector<256x32xf32>
      %c1_97 = arith.constant 1 : index
      %c0_98 = arith.constant 0 : index
      %c0_99 = arith.constant 0 : index
      %93 = vector.load %arg4[%c1_97, %c0_98, %c0_99] : memref<9x32x64xf32, #tpu.memory_space<vmem>>, vector<1x32x64xf32>
      %94 = vector.shape_cast %93 : vector<1x32x64xf32> to vector<32x64xf32>
      %cst_100 = arith.constant dense<0.000000e+00> : vector<256x64xf32>
      %95 = tpu.matmul %92, %94, %cst_100 {dimension_numbers = #tpu.dot_dimension_numbers<[1], [0], [0], [1], [0, 0, 1, 1], [], []>} : vector<256x32xf32>, vector<32x64xf32>, vector<256x64xf32> -> vector<256x64xf32>
      %96 = arith.addf %88, %95 : vector<256x64xf32>
      %c0_i32_101 = arith.constant 0 : i32
      %97 = arith.addi %79, %c0_i32_101 : i32
      %98 = arith.index_cast %97 : i32 to index
      %c9_102 = arith.constant 9 : index
      %c0_103 = arith.constant 0 : index
      %99 = vector.load %arg9[%98, %c9_102, %c0_103] : memref<34x48x32xf32, #tpu.memory_space<vmem>>, vector<8x32x32xf32>
      %100 = vector.shape_cast %99 : vector<8x32x32xf32> to vector<256x32xf32>
      %c2_104 = arith.constant 2 : index
      %c0_105 = arith.constant 0 : index
      %c0_106 = arith.constant 0 : index
      %101 = vector.load %arg4[%c2_104, %c0_105, %c0_106] : memref<9x32x64xf32, #tpu.memory_space<vmem>>, vector<1x32x64xf32>
      %102 = vector.shape_cast %101 : vector<1x32x64xf32> to vector<32x64xf32>
      %cst_107 = arith.constant dense<0.000000e+00> : vector<256x64xf32>
      %103 = tpu.matmul %100, %102, %cst_107 {dimension_numbers = #tpu.dot_dimension_numbers<[1], [0], [0], [1], [0, 0, 1, 1], [], []>} : vector<256x32xf32>, vector<32x64xf32>, vector<256x64xf32> -> vector<256x64xf32>
      %104 = arith.addf %96, %103 : vector<256x64xf32>
      %c1_i32_108 = arith.constant 1 : i32
      %105 = arith.addi %79, %c1_i32_108 : i32
      %106 = arith.index_cast %105 : i32 to index
      %c7_109 = arith.constant 7 : index
      %c0_110 = arith.constant 0 : index
      %107 = vector.load %arg9[%106, %c7_109, %c0_110] : memref<34x48x32xf32, #tpu.memory_space<vmem>>, vector<8x32x32xf32>
      %108 = vector.shape_cast %107 : vector<8x32x32xf32> to vector<256x32xf32>
      %c3_111 = arith.constant 3 : index
      %c0_112 = arith.constant 0 : index
      %c0_113 = arith.constant 0 : index
      %109 = vector.load %arg4[%c3_111, %c0_112, %c0_113] : memref<9x32x64xf32, #tpu.memory_space<vmem>>, vector<1x32x64xf32>
      %110 = vector.shape_cast %109 : vector<1x32x64xf32> to vector<32x64xf32>
      %cst_114 = arith.constant dense<0.000000e+00> : vector<256x64xf32>
      %111 = tpu.matmul %108, %110, %cst_114 {dimension_numbers = #tpu.dot_dimension_numbers<[1], [0], [0], [1], [0, 0, 1, 1], [], []>} : vector<256x32xf32>, vector<32x64xf32>, vector<256x64xf32> -> vector<256x64xf32>
      %112 = arith.addf %104, %111 : vector<256x64xf32>
      %c1_i32_115 = arith.constant 1 : i32
      %113 = arith.addi %79, %c1_i32_115 : i32
      %114 = arith.index_cast %113 : i32 to index
      %c8_116 = arith.constant 8 : index
      %c0_117 = arith.constant 0 : index
      %115 = vector.load %arg9[%114, %c8_116, %c0_117] : memref<34x48x32xf32, #tpu.memory_space<vmem>>, vector<8x32x32xf32>
      %116 = vector.shape_cast %115 : vector<8x32x32xf32> to vector<256x32xf32>
      %c4_118 = arith.constant 4 : index
      %c0_119 = arith.constant 0 : index
      %c0_120 = arith.constant 0 : index
      %117 = vector.load %arg4[%c4_118, %c0_119, %c0_120] : memref<9x32x64xf32, #tpu.memory_space<vmem>>, vector<1x32x64xf32>
      %118 = vector.shape_cast %117 : vector<1x32x64xf32> to vector<32x64xf32>
      %cst_121 = arith.constant dense<0.000000e+00> : vector<256x64xf32>
      %119 = tpu.matmul %116, %118, %cst_121 {dimension_numbers = #tpu.dot_dimension_numbers<[1], [0], [0], [1], [0, 0, 1, 1], [], []>} : vector<256x32xf32>, vector<32x64xf32>, vector<256x64xf32> -> vector<256x64xf32>
      %120 = arith.addf %112, %119 : vector<256x64xf32>
      %c1_i32_122 = arith.constant 1 : i32
      %121 = arith.addi %79, %c1_i32_122 : i32
      %122 = arith.index_cast %121 : i32 to index
      %c9_123 = arith.constant 9 : index
      %c0_124 = arith.constant 0 : index
      %123 = vector.load %arg9[%122, %c9_123, %c0_124] : memref<34x48x32xf32, #tpu.memory_space<vmem>>, vector<8x32x32xf32>
      %124 = vector.shape_cast %123 : vector<8x32x32xf32> to vector<256x32xf32>
      %c5_125 = arith.constant 5 : index
      %c0_126 = arith.constant 0 : index
      %c0_127 = arith.constant 0 : index
      %125 = vector.load %arg4[%c5_125, %c0_126, %c0_127] : memref<9x32x64xf32, #tpu.memory_space<vmem>>, vector<1x32x64xf32>
      %126 = vector.shape_cast %125 : vector<1x32x64xf32> to vector<32x64xf32>
      %cst_128 = arith.constant dense<0.000000e+00> : vector<256x64xf32>
      %127 = tpu.matmul %124, %126, %cst_128 {dimension_numbers = #tpu.dot_dimension_numbers<[1], [0], [0], [1], [0, 0, 1, 1], [], []>} : vector<256x32xf32>, vector<32x64xf32>, vector<256x64xf32> -> vector<256x64xf32>
      %128 = arith.addf %120, %127 : vector<256x64xf32>
      %c2_i32 = arith.constant 2 : i32
      %129 = arith.addi %79, %c2_i32 : i32
      %130 = arith.index_cast %129 : i32 to index
      %c7_129 = arith.constant 7 : index
      %c0_130 = arith.constant 0 : index
      %131 = vector.load %arg9[%130, %c7_129, %c0_130] : memref<34x48x32xf32, #tpu.memory_space<vmem>>, vector<8x32x32xf32>
      %132 = vector.shape_cast %131 : vector<8x32x32xf32> to vector<256x32xf32>
      %c6_131 = arith.constant 6 : index
      %c0_132 = arith.constant 0 : index
      %c0_133 = arith.constant 0 : index
      %133 = vector.load %arg4[%c6_131, %c0_132, %c0_133] : memref<9x32x64xf32, #tpu.memory_space<vmem>>, vector<1x32x64xf32>
      %134 = vector.shape_cast %133 : vector<1x32x64xf32> to vector<32x64xf32>
      %cst_134 = arith.constant dense<0.000000e+00> : vector<256x64xf32>
      %135 = tpu.matmul %132, %134, %cst_134 {dimension_numbers = #tpu.dot_dimension_numbers<[1], [0], [0], [1], [0, 0, 1, 1], [], []>} : vector<256x32xf32>, vector<32x64xf32>, vector<256x64xf32> -> vector<256x64xf32>
      %136 = arith.addf %128, %135 : vector<256x64xf32>
      %c2_i32_135 = arith.constant 2 : i32
      %137 = arith.addi %79, %c2_i32_135 : i32
      %138 = arith.index_cast %137 : i32 to index
      %c8_136 = arith.constant 8 : index
      %c0_137 = arith.constant 0 : index
      %139 = vector.load %arg9[%138, %c8_136, %c0_137] : memref<34x48x32xf32, #tpu.memory_space<vmem>>, vector<8x32x32xf32>
      %140 = vector.shape_cast %139 : vector<8x32x32xf32> to vector<256x32xf32>
      %c7_138 = arith.constant 7 : index
      %c0_139 = arith.constant 0 : index
      %c0_140 = arith.constant 0 : index
      %141 = vector.load %arg4[%c7_138, %c0_139, %c0_140] : memref<9x32x64xf32, #tpu.memory_space<vmem>>, vector<1x32x64xf32>
      %142 = vector.shape_cast %141 : vector<1x32x64xf32> to vector<32x64xf32>
      %cst_141 = arith.constant dense<0.000000e+00> : vector<256x64xf32>
      %143 = tpu.matmul %140, %142, %cst_141 {dimension_numbers = #tpu.dot_dimension_numbers<[1], [0], [0], [1], [0, 0, 1, 1], [], []>} : vector<256x32xf32>, vector<32x64xf32>, vector<256x64xf32> -> vector<256x64xf32>
      %144 = arith.addf %136, %143 : vector<256x64xf32>
      %c2_i32_142 = arith.constant 2 : i32
      %145 = arith.addi %79, %c2_i32_142 : i32
      %146 = arith.index_cast %145 : i32 to index
      %c9_143 = arith.constant 9 : index
      %c0_144 = arith.constant 0 : index
      %147 = vector.load %arg9[%146, %c9_143, %c0_144] : memref<34x48x32xf32, #tpu.memory_space<vmem>>, vector<8x32x32xf32>
      %148 = vector.shape_cast %147 : vector<8x32x32xf32> to vector<256x32xf32>
      %c8_145 = arith.constant 8 : index
      %c0_146 = arith.constant 0 : index
      %c0_147 = arith.constant 0 : index
      %149 = vector.load %arg4[%c8_145, %c0_146, %c0_147] : memref<9x32x64xf32, #tpu.memory_space<vmem>>, vector<1x32x64xf32>
      %150 = vector.shape_cast %149 : vector<1x32x64xf32> to vector<32x64xf32>
      %cst_148 = arith.constant dense<0.000000e+00> : vector<256x64xf32>
      %151 = tpu.matmul %148, %150, %cst_148 {dimension_numbers = #tpu.dot_dimension_numbers<[1], [0], [0], [1], [0, 0, 1, 1], [], []>} : vector<256x32xf32>, vector<32x64xf32>, vector<256x64xf32> -> vector<256x64xf32>
      %152 = arith.addf %144, %151 : vector<256x64xf32>
      %c0_149 = arith.constant 0 : index
      %c0_150 = arith.constant 0 : index
      %153 = vector.load %arg5[%c0_149, %c0_150] : memref<1x64xf32, #tpu.memory_space<vmem>>, vector<1x64xf32>
      %154 = vector.broadcast %153 : vector<1x64xf32> to vector<256x64xf32>
      %155 = arith.addf %152, %154 : vector<256x64xf32>
      %cst_151 = arith.constant 0.000000e+00 : f32
      %156 = vector.broadcast %cst_151 : f32 to vector<256x64xf32>
      %157 = arith.maximumf %155, %156 : vector<256x64xf32>
      %c0_152 = arith.constant 0 : index
      %c0_153 = arith.constant 0 : index
      %158 = vector.load %arg13[%c0_152, %c0_153] : memref<256x64xf32, #tpu.memory_space<vmem>>, vector<256x64xf32>
      tpu.vector_store %arg13[%c0_152, %c0_153], %157 {strides = array<i32>} : memref<256x64xf32, #tpu.memory_space<vmem>>, vector<256x64xf32>,
      %c0_154 = arith.constant 0 : index
      %c0_155 = arith.constant 0 : index
      %159 = tpu.strided_load %arg13[%c0_154, %c0_155] {strides = array<i32: 2, 1>} : memref<256x64xf32, #tpu.memory_space<vmem>>, vector<128x64xf32>
      %c1_156 = arith.constant 1 : index
      %c0_157 = arith.constant 0 : index
      %160 = tpu.strided_load %arg13[%c1_156, %c0_157] {strides = array<i32: 2, 1>} : memref<256x64xf32, #tpu.memory_space<vmem>>, vector<128x64xf32>
      %161 = arith.maximumf %159, %160 : vector<128x64xf32>
      %162 = vector.shape_cast %161 : vector<128x64xf32> to vector<8x16x64xf32>
      %c0_158 = arith.constant 0 : index
      %c0_159 = arith.constant 0 : index
      %c0_160 = arith.constant 0 : index
      %163 = vector.load %arg14[%c0_158, %c0_159, %c0_160] : memref<8x16x64xf32, #tpu.memory_space<vmem>>, vector<8x16x64xf32>
      tpu.vector_store %arg14[%c0_158, %c0_159, %c0_160], %162 {strides = array<i32>} : memref<8x16x64xf32, #tpu.memory_space<vmem>>, vector<8x16x64xf32>,
      %c0_161 = arith.constant 0 : index
      %c0_162 = arith.constant 0 : index
      %c0_163 = arith.constant 0 : index
      %164 = tpu.strided_load %arg14[%c0_161, %c0_162, %c0_163] {strides = array<i32: 2, 1, 1>} : memref<8x16x64xf32, #tpu.memory_space<vmem>>, vector<4x16x64xf32>
      %c1_164 = arith.constant 1 : index
      %c0_165 = arith.constant 0 : index
      %c0_166 = arith.constant 0 : index
      %165 = tpu.strided_load %arg14[%c1_164, %c0_165, %c0_166] {strides = array<i32: 2, 1, 1>} : memref<8x16x64xf32, #tpu.memory_space<vmem>>, vector<4x16x64xf32>
      %166 = arith.maximumf %164, %165 : vector<4x16x64xf32>
      %c4_i32_167 = arith.constant 4 : i32
      %167 = arith.muli %arg17, %c4_i32_167 : i32
      %c1_i32_168 = arith.constant 1 : i32
      %168 = arith.addi %c1_i32_168, %167 : i32
      %169 = arith.index_cast %168 : i32 to index
      %c8_169 = arith.constant 8 : index
      %c0_170 = arith.constant 0 : index
      %170 = vector.load %arg10[%169, %c8_169, %c0_170] : memref<18x32x64xf32, #tpu.memory_space<vmem>>, vector<4x16x64xf32>
      tpu.vector_store %arg10[%169, %c8_169, %c0_170], %166 {strides = array<i32>} : memref<18x32x64xf32, #tpu.memory_space<vmem>>, vector<4x16x64xf32>,
    }
    %c4_i32_9 = arith.constant 4 : i32
    %cst_10 = arith.constant 0.000000e+00 : f32
    %6 = vector.broadcast %cst_10 : f32 to vector<256x128xf32>
    %c0_11 = arith.constant 0 : index
    %c7 = arith.constant 7 : index
    %c0_12 = arith.constant 0 : index
    %7 = vector.load %arg10[%c0_11, %c7, %c0_12] : memref<18x32x64xf32, #tpu.memory_space<vmem>>, vector<16x16x64xf32>
    %8 = vector.shape_cast %7 : vector<16x16x64xf32> to vector<256x64xf32>
    %c0_13 = arith.constant 0 : index
    %c0_14 = arith.constant 0 : index
    %c0_15 = arith.constant 0 : index
    %9 = vector.load %arg6[%c0_13, %c0_14, %c0_15] : memref<9x64x128xf32, #tpu.memory_space<vmem>>, vector<1x64x128xf32>
    %10 = vector.shape_cast %9 : vector<1x64x128xf32> to vector<64x128xf32>
    %cst_16 = arith.constant dense<0.000000e+00> : vector<256x128xf32>
    %11 = tpu.matmul %8, %10, %cst_16 {dimension_numbers = #tpu.dot_dimension_numbers<[1], [0], [0], [1], [0, 0, 1, 1], [], []>} : vector<256x64xf32>, vector<64x128xf32>, vector<256x128xf32> -> vector<256x128xf32>
    %12 = arith.addf %6, %11 : vector<256x128xf32>
    %c0_17 = arith.constant 0 : index
    %c8 = arith.constant 8 : index
    %c0_18 = arith.constant 0 : index
    %13 = vector.load %arg10[%c0_17, %c8, %c0_18] : memref<18x32x64xf32, #tpu.memory_space<vmem>>, vector<16x16x64xf32>
    %14 = vector.shape_cast %13 : vector<16x16x64xf32> to vector<256x64xf32>
    %c1 = arith.constant 1 : index
    %c0_19 = arith.constant 0 : index
    %c0_20 = arith.constant 0 : index
    %15 = vector.load %arg6[%c1, %c0_19, %c0_20] : memref<9x64x128xf32, #tpu.memory_space<vmem>>, vector<1x64x128xf32>
    %16 = vector.shape_cast %15 : vector<1x64x128xf32> to vector<64x128xf32>
    %cst_21 = arith.constant dense<0.000000e+00> : vector<256x128xf32>
    %17 = tpu.matmul %14, %16, %cst_21 {dimension_numbers = #tpu.dot_dimension_numbers<[1], [0], [0], [1], [0, 0, 1, 1], [], []>} : vector<256x64xf32>, vector<64x128xf32>, vector<256x128xf32> -> vector<256x128xf32>
    %18 = arith.addf %12, %17 : vector<256x128xf32>
    %c0_22 = arith.constant 0 : index
    %c9 = arith.constant 9 : index
    %c0_23 = arith.constant 0 : index
    %19 = vector.load %arg10[%c0_22, %c9, %c0_23] : memref<18x32x64xf32, #tpu.memory_space<vmem>>, vector<16x16x64xf32>
    %20 = vector.shape_cast %19 : vector<16x16x64xf32> to vector<256x64xf32>
    %c2 = arith.constant 2 : index
    %c0_24 = arith.constant 0 : index
    %c0_25 = arith.constant 0 : index
    %21 = vector.load %arg6[%c2, %c0_24, %c0_25] : memref<9x64x128xf32, #tpu.memory_space<vmem>>, vector<1x64x128xf32>
    %22 = vector.shape_cast %21 : vector<1x64x128xf32> to vector<64x128xf32>
    %cst_26 = arith.constant dense<0.000000e+00> : vector<256x128xf32>
    %23 = tpu.matmul %20, %22, %cst_26 {dimension_numbers = #tpu.dot_dimension_numbers<[1], [0], [0], [1], [0, 0, 1, 1], [], []>} : vector<256x64xf32>, vector<64x128xf32>, vector<256x128xf32> -> vector<256x128xf32>
    %24 = arith.addf %18, %23 : vector<256x128xf32>
    %c1_27 = arith.constant 1 : index
    %c7_28 = arith.constant 7 : index
    %c0_29 = arith.constant 0 : index
    %25 = vector.load %arg10[%c1_27, %c7_28, %c0_29] : memref<18x32x64xf32, #tpu.memory_space<vmem>>, vector<16x16x64xf32>
    %26 = vector.shape_cast %25 : vector<16x16x64xf32> to vector<256x64xf32>
    %c3 = arith.constant 3 : index
    %c0_30 = arith.constant 0 : index
    %c0_31 = arith.constant 0 : index
    %27 = vector.load %arg6[%c3, %c0_30, %c0_31] : memref<9x64x128xf32, #tpu.memory_space<vmem>>, vector<1x64x128xf32>
    %28 = vector.shape_cast %27 : vector<1x64x128xf32> to vector<64x128xf32>
    %cst_32 = arith.constant dense<0.000000e+00> : vector<256x128xf32>
    %29 = tpu.matmul %26, %28, %cst_32 {dimension_numbers = #tpu.dot_dimension_numbers<[1], [0], [0], [1], [0, 0, 1, 1], [], []>} : vector<256x64xf32>, vector<64x128xf32>, vector<256x128xf32> -> vector<256x128xf32>
    %30 = arith.addf %24, %29 : vector<256x128xf32>
    %c1_33 = arith.constant 1 : index
    %c8_34 = arith.constant 8 : index
    %c0_35 = arith.constant 0 : index
    %31 = vector.load %arg10[%c1_33, %c8_34, %c0_35] : memref<18x32x64xf32, #tpu.memory_space<vmem>>, vector<16x16x64xf32>
    %32 = vector.shape_cast %31 : vector<16x16x64xf32> to vector<256x64xf32>
    %c4 = arith.constant 4 : index
    %c0_36 = arith.constant 0 : index
    %c0_37 = arith.constant 0 : index
    %33 = vector.load %arg6[%c4, %c0_36, %c0_37] : memref<9x64x128xf32, #tpu.memory_space<vmem>>, vector<1x64x128xf32>
    %34 = vector.shape_cast %33 : vector<1x64x128xf32> to vector<64x128xf32>
    %cst_38 = arith.constant dense<0.000000e+00> : vector<256x128xf32>
    %35 = tpu.matmul %32, %34, %cst_38 {dimension_numbers = #tpu.dot_dimension_numbers<[1], [0], [0], [1], [0, 0, 1, 1], [], []>} : vector<256x64xf32>, vector<64x128xf32>, vector<256x128xf32> -> vector<256x128xf32>
    %36 = arith.addf %30, %35 : vector<256x128xf32>
    %c1_39 = arith.constant 1 : index
    %c9_40 = arith.constant 9 : index
    %c0_41 = arith.constant 0 : index
    %37 = vector.load %arg10[%c1_39, %c9_40, %c0_41] : memref<18x32x64xf32, #tpu.memory_space<vmem>>, vector<16x16x64xf32>
    %38 = vector.shape_cast %37 : vector<16x16x64xf32> to vector<256x64xf32>
    %c5 = arith.constant 5 : index
    %c0_42 = arith.constant 0 : index
    %c0_43 = arith.constant 0 : index
    %39 = vector.load %arg6[%c5, %c0_42, %c0_43] : memref<9x64x128xf32, #tpu.memory_space<vmem>>, vector<1x64x128xf32>
    %40 = vector.shape_cast %39 : vector<1x64x128xf32> to vector<64x128xf32>
    %cst_44 = arith.constant dense<0.000000e+00> : vector<256x128xf32>
    %41 = tpu.matmul %38, %40, %cst_44 {dimension_numbers = #tpu.dot_dimension_numbers<[1], [0], [0], [1], [0, 0, 1, 1], [], []>} : vector<256x64xf32>, vector<64x128xf32>, vector<256x128xf32> -> vector<256x128xf32>
    %42 = arith.addf %36, %41 : vector<256x128xf32>
    %c2_45 = arith.constant 2 : index
    %c7_46 = arith.constant 7 : index
    %c0_47 = arith.constant 0 : index
    %43 = vector.load %arg10[%c2_45, %c7_46, %c0_47] : memref<18x32x64xf32, #tpu.memory_space<vmem>>, vector<16x16x64xf32>
    %44 = vector.shape_cast %43 : vector<16x16x64xf32> to vector<256x64xf32>
    %c6 = arith.constant 6 : index
    %c0_48 = arith.constant 0 : index
    %c0_49 = arith.constant 0 : index
    %45 = vector.load %arg6[%c6, %c0_48, %c0_49] : memref<9x64x128xf32, #tpu.memory_space<vmem>>, vector<1x64x128xf32>
    %46 = vector.shape_cast %45 : vector<1x64x128xf32> to vector<64x128xf32>
    %cst_50 = arith.constant dense<0.000000e+00> : vector<256x128xf32>
    %47 = tpu.matmul %44, %46, %cst_50 {dimension_numbers = #tpu.dot_dimension_numbers<[1], [0], [0], [1], [0, 0, 1, 1], [], []>} : vector<256x64xf32>, vector<64x128xf32>, vector<256x128xf32> -> vector<256x128xf32>
    %48 = arith.addf %42, %47 : vector<256x128xf32>
    %c2_51 = arith.constant 2 : index
    %c8_52 = arith.constant 8 : index
    %c0_53 = arith.constant 0 : index
    %49 = vector.load %arg10[%c2_51, %c8_52, %c0_53] : memref<18x32x64xf32, #tpu.memory_space<vmem>>, vector<16x16x64xf32>
    %50 = vector.shape_cast %49 : vector<16x16x64xf32> to vector<256x64xf32>
    %c7_54 = arith.constant 7 : index
    %c0_55 = arith.constant 0 : index
    %c0_56 = arith.constant 0 : index
    %51 = vector.load %arg6[%c7_54, %c0_55, %c0_56] : memref<9x64x128xf32, #tpu.memory_space<vmem>>, vector<1x64x128xf32>
    %52 = vector.shape_cast %51 : vector<1x64x128xf32> to vector<64x128xf32>
    %cst_57 = arith.constant dense<0.000000e+00> : vector<256x128xf32>
    %53 = tpu.matmul %50, %52, %cst_57 {dimension_numbers = #tpu.dot_dimension_numbers<[1], [0], [0], [1], [0, 0, 1, 1], [], []>} : vector<256x64xf32>, vector<64x128xf32>, vector<256x128xf32> -> vector<256x128xf32>
    %54 = arith.addf %48, %53 : vector<256x128xf32>
    %c2_58 = arith.constant 2 : index
    %c9_59 = arith.constant 9 : index
    %c0_60 = arith.constant 0 : index
    %55 = vector.load %arg10[%c2_58, %c9_59, %c0_60] : memref<18x32x64xf32, #tpu.memory_space<vmem>>, vector<16x16x64xf32>
    %56 = vector.shape_cast %55 : vector<16x16x64xf32> to vector<256x64xf32>
    %c8_61 = arith.constant 8 : index
    %c0_62 = arith.constant 0 : index
    %c0_63 = arith.constant 0 : index
    %57 = vector.load %arg6[%c8_61, %c0_62, %c0_63] : memref<9x64x128xf32, #tpu.memory_space<vmem>>, vector<1x64x128xf32>
    %58 = vector.shape_cast %57 : vector<1x64x128xf32> to vector<64x128xf32>
    %cst_64 = arith.constant dense<0.000000e+00> : vector<256x128xf32>
    %59 = tpu.matmul %56, %58, %cst_64 {dimension_numbers = #tpu.dot_dimension_numbers<[1], [0], [0], [1], [0, 0, 1, 1], [], []>} : vector<256x64xf32>, vector<64x128xf32>, vector<256x128xf32> -> vector<256x128xf32>
    %60 = arith.addf %54, %59 : vector<256x128xf32>
    %c0_65 = arith.constant 0 : index
    %c0_66 = arith.constant 0 : index
    %61 = vector.load %arg7[%c0_65, %c0_66] : memref<1x128xf32, #tpu.memory_space<vmem>>, vector<1x128xf32>
    %62 = vector.broadcast %61 : vector<1x128xf32> to vector<256x128xf32>
    %63 = arith.addf %60, %62 : vector<256x128xf32>
    %cst_67 = arith.constant 0.000000e+00 : f32
    %64 = vector.broadcast %cst_67 : f32 to vector<256x128xf32>
    %65 = arith.maximumf %63, %64 : vector<256x128xf32>
    %c0_68 = arith.constant 0 : index
    %c0_69 = arith.constant 0 : index
    %66 = vector.load %arg15[%c0_68, %c0_69] : memref<256x128xf32, #tpu.memory_space<vmem>>, vector<256x128xf32>
    tpu.vector_store %arg15[%c0_68, %c0_69], %65 {strides = array<i32>} : memref<256x128xf32, #tpu.memory_space<vmem>>, vector<256x128xf32>,
    %c0_70 = arith.constant 0 : index
    %c0_71 = arith.constant 0 : index
    %67 = tpu.strided_load %arg15[%c0_70, %c0_71] {strides = array<i32: 2, 1>} : memref<256x128xf32, #tpu.memory_space<vmem>>, vector<128x128xf32>
    %c1_72 = arith.constant 1 : index
    %c0_73 = arith.constant 0 : index
    %68 = tpu.strided_load %arg15[%c1_72, %c0_73] {strides = array<i32: 2, 1>} : memref<256x128xf32, #tpu.memory_space<vmem>>, vector<128x128xf32>
    %69 = arith.maximumf %67, %68 : vector<128x128xf32>
    %70 = vector.shape_cast %69 : vector<128x128xf32> to vector<16x8x128xf32>
    %c0_74 = arith.constant 0 : index
    %c0_75 = arith.constant 0 : index
    %c0_76 = arith.constant 0 : index
    %71 = vector.load %arg16[%c0_74, %c0_75, %c0_76] : memref<16x8x128xf32, #tpu.memory_space<vmem>>, vector<16x8x128xf32>
    tpu.vector_store %arg16[%c0_74, %c0_75, %c0_76], %70 {strides = array<i32>} : memref<16x8x128xf32, #tpu.memory_space<vmem>>, vector<16x8x128xf32>,
    %c0_77 = arith.constant 0 : index
    %c0_78 = arith.constant 0 : index
    %c0_79 = arith.constant 0 : index
    %72 = tpu.strided_load %arg16[%c0_77, %c0_78, %c0_79] {strides = array<i32: 2, 1, 1>} : memref<16x8x128xf32, #tpu.memory_space<vmem>>, vector<8x8x128xf32>
    %c1_80 = arith.constant 1 : index
    %c0_81 = arith.constant 0 : index
    %c0_82 = arith.constant 0 : index
    %73 = tpu.strided_load %arg16[%c1_80, %c0_81, %c0_82] {strides = array<i32: 2, 1, 1>} : memref<16x8x128xf32, #tpu.memory_space<vmem>>, vector<8x8x128xf32>
    %74 = arith.maximumf %72, %73 : vector<8x8x128xf32>
    %75 = vector.shape_cast %74 : vector<8x8x128xf32> to vector<64x128xf32>
    %c0_83 = arith.constant 0 : index
    %c0_84 = arith.constant 0 : index
    %c0_85 = arith.constant 0 : index
    %76 = vector.load %arg8[%c0_83, %c0_84, %c0_85] : memref<1x64x128xf32, #tpu.memory_space<vmem>>, vector<1x64x128xf32>
    %77 = vector.shape_cast %76 : vector<1x64x128xf32> to vector<64x128xf32>
    %78 = vector.shape_cast %75 : vector<64x128xf32> to vector<1x64x128xf32>
    tpu.vector_store %arg8[%c0_83, %c0_84, %c0_85], %78 {strides = array<i32>} : memref<1x64x128xf32, #tpu.memory_space<vmem>>, vector<1x64x128xf32>,
    return
  }
  func.func @transform_0(%arg0: i32) -> (i32, i32, i32, i32) {
    %c0_i32 = arith.constant 0 : i32
    %c0_i32_0 = arith.constant 0 : i32
    %c0_i32_1 = arith.constant 0 : i32
    %c0_i32_2 = arith.constant 0 : i32
    return %arg0, %c0_i32, %c0_i32_0, %c0_i32_1 : i32, i32, i32, i32
  }
  func.func @transform_1(%arg0: i32) -> (i32, i32, i32) {
    %c0_i32 = arith.constant 0 : i32
    %c0_i32_0 = arith.constant 0 : i32
    %c0_i32_1 = arith.constant 0 : i32
    %c0_i32_2 = arith.constant 0 : i32
    return %c0_i32, %c0_i32_0, %c0_i32_1 : i32, i32, i32
  }
  func.func @transform_2(%arg0: i32) -> (i32, i32) {
    %c0_i32 = arith.constant 0 : i32
    %c0_i32_0 = arith.constant 0 : i32
    %c0_i32_1 = arith.constant 0 : i32
    return %c0_i32, %c0_i32_0 : i32, i32
  }
  func.func @transform_3(%arg0: i32) -> (i32, i32, i32) {
    %c0_i32 = arith.constant 0 : i32
    %c0_i32_0 = arith.constant 0 : i32
    %c0_i32_1 = arith.constant 0 : i32
    %c0_i32_2 = arith.constant 0 : i32
    return %c0_i32, %c0_i32_0, %c0_i32_1 : i32, i32, i32
  }
  func.func @transform_4(%arg0: i32) -> (i32, i32) {
    %c0_i32 = arith.constant 0 : i32
    %c0_i32_0 = arith.constant 0 : i32
    %c0_i32_1 = arith.constant 0 : i32
    return %c0_i32, %c0_i32_0 : i32, i32
  }
  func.func @transform_5(%arg0: i32) -> (i32, i32, i32) {
    %c0_i32 = arith.constant 0 : i32
    %c0_i32_0 = arith.constant 0 : i32
    %c0_i32_1 = arith.constant 0 : i32
    %c0_i32_2 = arith.constant 0 : i32
    return %c0_i32, %c0_i32_0, %c0_i32_1 : i32, i32, i32
  }
  func.func @transform_6(%arg0: i32) -> (i32, i32) {
    %c0_i32 = arith.constant 0 : i32
    %c0_i32_0 = arith.constant 0 : i32
    %c0_i32_1 = arith.constant 0 : i32
    return %c0_i32, %c0_i32_0 : i32, i32
  }
  func.func @transform_7(%arg0: i32) -> (i32, i32, i32) {
    %c0_i32 = arith.constant 0 : i32
    %c0_i32_0 = arith.constant 0 : i32
    %c0_i32_1 = arith.constant 0 : i32
    return %arg0, %c0_i32, %c0_i32_0 : i32, i32, i32
  }
}

module attributes {stable_mosaic.version = 11 : i64} {
  func.func @_fc_head_kernel(%arg0: i32, %arg1: memref<2x8192xf32, #tpu.memory_space<vmem>>, %arg2: memref<8192x128xbf16, #tpu.memory_space<vmem>>, %arg3: memref<1x128xf32, #tpu.memory_space<vmem>>, %arg4: memref<128x15xf32, #tpu.memory_space<vmem>>, %arg5: memref<1x15xf32, #tpu.memory_space<vmem>>, %arg6: memref<2x15xf32, #tpu.memory_space<vmem>>) attributes {dimension_semantics = [#tpu.dimension_semantics<arbitrary>], iteration_bounds = array<i64: 1>, scalar_prefetch = 0 : i64, scratch_operands = 0 : i64, tpu.core_type = #tpu.core_type<tc>, window_params = [{pipeline_mode = #tpu.pipeline_mode<synchronous>, transform_indices = @transform_0, window_bounds = array<i64: 2, 8192>}, {pipeline_mode = #tpu.pipeline_mode<synchronous>, transform_indices = @transform_1, window_bounds = array<i64: 8192, 128>}, {pipeline_mode = #tpu.pipeline_mode<synchronous>, transform_indices = @transform_2, window_bounds = array<i64: 1, 128>}, {pipeline_mode = #tpu.pipeline_mode<synchronous>, transform_indices = @transform_3, window_bounds = array<i64: 128, 15>}, {pipeline_mode = #tpu.pipeline_mode<synchronous>, transform_indices = @transform_4, window_bounds = array<i64: 1, 15>}, {pipeline_mode = #tpu.pipeline_mode<synchronous>, transform_indices = @transform_5, window_bounds = array<i64: 2, 15>}]} {
    %c0 = arith.constant 0 : index
    %c0_0 = arith.constant 0 : index
    %0 = vector.load %arg1[%c0, %c0_0] : memref<2x8192xf32, #tpu.memory_space<vmem>>, vector<2x8192xf32>
    %1 = arith.truncf %0 : vector<2x8192xf32> to vector<2x8192xbf16>
    %c0_1 = arith.constant 0 : index
    %c0_2 = arith.constant 0 : index
    %2 = vector.load %arg2[%c0_1, %c0_2] : memref<8192x128xbf16, #tpu.memory_space<vmem>>, vector<8192x128xbf16>
    %cst = arith.constant dense<0.000000e+00> : vector<2x128xf32>
    %3 = tpu.matmul %1, %2, %cst {dimension_numbers = #tpu.dot_dimension_numbers<[1], [0], [0], [1], [0, 0, 1, 1], [], []>} : vector<2x8192xbf16>, vector<8192x128xbf16>, vector<2x128xf32> -> vector<2x128xf32>
    %c0_3 = arith.constant 0 : index
    %c0_4 = arith.constant 0 : index
    %4 = vector.load %arg3[%c0_3, %c0_4] : memref<1x128xf32, #tpu.memory_space<vmem>>, vector<1x128xf32>
    %5 = vector.broadcast %4 : vector<1x128xf32> to vector<2x128xf32>
    %6 = arith.addf %3, %5 : vector<2x128xf32>
    %cst_5 = arith.constant 0.000000e+00 : f32
    %7 = vector.broadcast %cst_5 : f32 to vector<2x128xf32>
    %8 = arith.maximumf %6, %7 : vector<2x128xf32>
    %c0_6 = arith.constant 0 : index
    %c0_7 = arith.constant 0 : index
    %9 = vector.load %arg4[%c0_6, %c0_7] : memref<128x15xf32, #tpu.memory_space<vmem>>, vector<128x15xf32>
    %cst_8 = arith.constant dense<0.000000e+00> : vector<2x15xf32>
    %10 = tpu.matmul %8, %9, %cst_8 {dimension_numbers = #tpu.dot_dimension_numbers<[1], [0], [0], [1], [0, 0, 1, 1], [], []>} : vector<2x128xf32>, vector<128x15xf32>, vector<2x15xf32> -> vector<2x15xf32>
    %c0_9 = arith.constant 0 : index
    %c0_10 = arith.constant 0 : index
    %11 = vector.load %arg5[%c0_9, %c0_10] : memref<1x15xf32, #tpu.memory_space<vmem>>, vector<1x15xf32>
    %12 = vector.broadcast %11 : vector<1x15xf32> to vector<2x15xf32>
    %13 = arith.addf %10, %12 : vector<2x15xf32>
    %c0_11 = arith.constant 0 : index
    %c0_12 = arith.constant 0 : index
    %14 = vector.load %arg6[%c0_11, %c0_12] : memref<2x15xf32, #tpu.memory_space<vmem>>, vector<2x15xf32>
    tpu.vector_store %arg6[%c0_11, %c0_12], %13 {strides = array<i32>} : memref<2x15xf32, #tpu.memory_space<vmem>>, vector<2x15xf32>,
    return
  }
  func.func @transform_0(%arg0: i32) -> (i32, i32) {
    %c0_i32 = arith.constant 0 : i32
    %c0_i32_0 = arith.constant 0 : i32
    %c0_i32_1 = arith.constant 0 : i32
    return %c0_i32, %c0_i32_0 : i32, i32
  }
  func.func @transform_1(%arg0: i32) -> (i32, i32) {
    %c0_i32 = arith.constant 0 : i32
    %c0_i32_0 = arith.constant 0 : i32
    %c0_i32_1 = arith.constant 0 : i32
    return %c0_i32, %c0_i32_0 : i32, i32
  }
  func.func @transform_2(%arg0: i32) -> (i32, i32) {
    %c0_i32 = arith.constant 0 : i32
    %c0_i32_0 = arith.constant 0 : i32
    %c0_i32_1 = arith.constant 0 : i32
    return %c0_i32, %c0_i32_0 : i32, i32
  }
  func.func @transform_3(%arg0: i32) -> (i32, i32) {
    %c0_i32 = arith.constant 0 : i32
    %c0_i32_0 = arith.constant 0 : i32
    %c0_i32_1 = arith.constant 0 : i32
    return %c0_i32, %c0_i32_0 : i32, i32
  }
  func.func @transform_4(%arg0: i32) -> (i32, i32) {
    %c0_i32 = arith.constant 0 : i32
    %c0_i32_0 = arith.constant 0 : i32
    %c0_i32_1 = arith.constant 0 : i32
    return %c0_i32, %c0_i32_0 : i32, i32
  }
  func.func @transform_5(%arg0: i32) -> (i32, i32) {
    %c0_i32 = arith.constant 0 : i32
    %c0_i32_0 = arith.constant 0 : i32
    %c0_i32_1 = arith.constant 0 : i32
    return %c0_i32, %c0_i32_0 : i32, i32
  }
}

</mosaic_0001>

<bundles_post_ra>
// kernel: pallas_forward.3
= control target key start
LH: loop header
LB: loop body
LE: loop exit
PB: predicated region body
PF: predicated region fallthrough
CT: control target
= control target key end

     0   :  { %s9592_s0 = inlined_call_operand.vmem [shape: f32[2,8192], index: 0, kind: input, shape index: {}]   ;;  %s9593_s1 = inlined_call_operand.vmem [shape: bf16[8192,128], index: 1, kind: input, shape index: {}]   ;;  %s9594_s2 = inlined_call_operand.vmem [shape: f32[1,128], index: 2, kind: input, shape index: {}]   ;;  %s9595_s3 = inlined_call_operand.vmem [shape: f32[128,15], index: 3, kind: input, shape index: {}]   ;;  %s9596_s4 = inlined_call_operand.vmem [shape: f32[1,15], index: 4, kind: input, shape index: {}]   ;;  %s9597_s5 = inlined_call_operand.hbm [shape: f32[2,15], index: 5, kind: output, shape index: {}]  }
   0x1   :  { %v7308_v0 = vld [vmem:[%s9593_s1 + $0x38] sm:$0xff]  ;;  %v7307_v4 = vld [vmem:[%s9593_s1 + $0x30] sm:$0xff]  ;;  %v7306_v8 = vld [vmem:[%s9593_s1 + $0x28] sm:$0xff] }
   0x2   :  { %v7316_v1 = vld [vmem:[%s9593_s1 + $0x78] sm:$0xff]  ;;  %4362 = vmatpush.bf16.msra.mxu0 %v7308_v0  ;;  %v7315_v5 = vld [vmem:[%s9593_s1 + $0x70] sm:$0xff]  ;;  %v7314_v9 = vld [vmem:[%s9593_s1 + $0x68] sm:$0xff] }
   0x3   :  { %v7324_v2 = vld [vmem:[%s9593_s1 + $0xb8] sm:$0xff]  ;;  %4375 = vmatpush.bf16.msra.mxu1 %v7316_v1  ;;  %v7323_v6 = vld [vmem:[%s9593_s1 + $0xb0] sm:$0xff]  ;;  %v7322_v10 = vld [vmem:[%s9593_s1 + $0xa8] sm:$0xff] }
   0x4   :  { %v7332_v3 = vld [vmem:[%s9593_s1 + $0xf8] sm:$0xff]  ;;  %4388 = vmatpush.bf16.msra.mxu2 %v7324_v2  ;;  %v7331_v7 = vld [vmem:[%s9593_s1 + $0xf0] sm:$0xff]  ;;  %v7330_v11 = vld [vmem:[%s9593_s1 + $0xe8] sm:$0xff] }
   0x5   :  { %4401 = vmatpush.bf16.msra.mxu3 %v7332_v3  ;;  %v7305_v12 = vld [vmem:[%s9593_s1 + $0x20] sm:$0xff]  ;;  %v7304_v16 = vld [vmem:[%s9593_s1 + $0x18] sm:$0xff]  ;;  %v7303_v20 = vld [vmem:[%s9593_s1 + $0x10] sm:$0xff] }
   0x6   :  { %4363 = vmatpush.bf16.msra.mxu0 %v7307_v4  ;;  %v7313_v13 = vld [vmem:[%s9593_s1 + $0x60] sm:$0xff]  ;;  %v7312_v17 = vld [vmem:[%s9593_s1 + $0x58] sm:$0xff]  ;;  %v7311_v21 = vld [vmem:[%s9593_s1 + $0x50] sm:$0xff] }
   0x7   :  { %4376 = vmatpush.bf16.msra.mxu1 %v7315_v5  ;;  %v7321_v14 = vld [vmem:[%s9593_s1 + $0xa0] sm:$0xff]  ;;  %v7320_v18 = vld [vmem:[%s9593_s1 + $0x98] sm:$0xff]  ;;  %v7319_v23 = vld [vmem:[%s9593_s1 + $0x90] sm:$0xff] }
   0x8   :  { %4389 = vmatpush.bf16.msra.mxu2 %v7323_v6  ;;  %v7329_v15 = vld [vmem:[%s9593_s1 + $0xe0] sm:$0xff]  ;;  %v7328_v19 = vld [vmem:[%s9593_s1 + $0xd8] sm:$0xff]  ;;  %v7327_v24 = vld [vmem:[%s9593_s1 + $0xd0] sm:$0xff] }
   0x9   :  { %4402 = vmatpush.bf16.msra.mxu3 %v7331_v7  ;;  %v21_v22 = vld [vmem:[%s9592_s0] sm:$0xff] }
   0xa   :  { %4364 = vmatpush.bf16.msra.mxu0 %v7306_v8  ;;  %53 = vst [vmem:[#allocation1] ss:$4 sm:$0xff] %v21_v22 }
   0xb   :  { %4377 = vmatpush.bf16.msra.mxu1 %v7314_v9 }
   0xc   :  { %4390 = vmatpush.bf16.msra.mxu2 %v7322_v10 }
   0xd   :  { %4403 = vmatpush.bf16.msra.mxu3 %v7330_v11 }
   0xe   :  { %4365 = vmatpush.bf16.msra.mxu0 %v7305_v12 }
   0xf   :  { %4378 = vmatpush.bf16.msra.mxu1 %v7313_v13 }
  0x10   :  { %4391 = vmatpush.bf16.msra.mxu2 %v7321_v14 }
  0x11   :  { %4404 = vmatpush.bf16.msra.mxu3 %v7329_v15 }
  0x12   :  { %4366 = vmatpush.bf16.msra.mxu0 %v7304_v16 }
  0x13   :  { %4379 = vmatpush.bf16.msra.mxu1 %v7312_v17 }
  0x14   :  { %4392 = vmatpush.bf16.msra.mxu2 %v7320_v18 }
  0x15   :  { %4405 = vmatpush.bf16.msra.mxu3 %v7328_v19 }
  0x16   :  { %10 = vsyncpa [#allocation3], 0  ;;  %4367 = vmatpush.bf16.msra.mxu0 %v7303_v20  ;;  %v7302_v25 = vld [vmem:[%s9593_s1 + $0x8] sm:$0xff]  ;;  %v7301_v29 = vld [vmem:[%s9593_s1] sm:$0xff]  ;;  %s7842_s25 = smov [#allocation2]   ;;  %s5244_s29 = sshll.u32 %s9597_s5, 4  ;;  %s5245_s29 = int_to_ptr.hbm [resolvable:$true] %s5244_s29 }
  0x17   :  { %4380 = vmatpush.bf16.msra.mxu1 %v7311_v21  ;;  %v7310_v26 = vld [vmem:[%s9593_s1 + $0x48] sm:$0xff]  ;;  %v7309_v30 = vld [vmem:[%s9593_s1 + $0x40] sm:$0xff]  ;;  %v58_v32 = vld.sshfl [vmem:[#allocation1 + $0x10] sm:$0xff pattern:$0x73625140]  ;;  %s5242_s26 = sshll.u32 %s7842_s25, 4  ;;  %s5243_s26 = int_to_ptr.vmem [resolvable:$true] %s5242_s26 }
  0x18   :  { %4393 = vmatpush.bf16.msra.mxu2 %v7319_v23  ;;  %v7318_v27 = vld [vmem:[%s9593_s1 + $0x88] sm:$0xff]  ;;  %v7317_v31 = vld [vmem:[%s9593_s1 + $0x80] sm:$0xff]  ;;  %v23_v35 = vld [vmem:[%s9592_s0 + $0x10] sm:$0xff]  ;;  %v200_v43 = vpack.c.bf16 %v58_v32, %v58_v32  ;;  %vm5235_vm0 = vcmask 115712  }
  0x19   :  { %4406 = vmatpush.bf16.msra.mxu3 %v7327_v24  ;;  %v7326_v28 = vld [vmem:[%s9593_s1 + $0xc8] sm:$0xff]  ;;  %v7325_v33 = vld [vmem:[%s9593_s1 + $0xc0] sm:$0xff]  ;;  %v59_v36 = vld.sshfl [vmem:[#allocation1 + $0x18] sm:$0xff pattern:$0x73625140] }
  0x1a   :  { %4368 = vmatpush.bf16.msra.mxu0 %v7302_v25  ;;  %v56_v34 = vld.sshfl [vmem:[#allocation1] sm:$0xff pattern:$0x73625140]  ;;  %v57_v37 = vld.sshfl [vmem:[#allocation1 + $0x8] sm:$0xff pattern:$0x73625140]  ;;  %v201_v45 = vpack.c.bf16 %v59_v36, %v59_v36 }
  0x1b   :  { %4381 = vmatpush.bf16.msra.mxu1 %v7310_v26  ;;  %v7340_v38 = vld [vmem:[%s9593_s1 + $0x138] sm:$0xff]  ;;  %64 = vst [vmem:[#allocation1] ss:$4 sm:$0xff] %v23_v35  ;;  %v22_v42 = vld [vmem:[%s9592_s0 + $0x8] sm:$0xff]  ;;  %v198_v44 = vpack.c.bf16 %v56_v34, %v56_v34  ;;  %v199_v46 = vpack.c.bf16 %v57_v37, %v57_v37  ;;  %v7339_v47 = vld [vmem:[%s9593_s1 + $0x130] sm:$0xff] }
  0x1c   :  { %4394 = vmatpush.bf16.msra.mxu2 %v7318_v27  ;;  %v7348_v39 = vld [vmem:[%s9593_s1 + $0x178] sm:$0xff]  ;;  %55 = vst [vmem:[#allocation1 + $0x20] ss:$4 sm:$0xff] %v22_v42  ;;  %v7347_v48 = vld [vmem:[%s9593_s1 + $0x170] sm:$0xff]  ;;  %v7338_v51 = vld [vmem:[%s9593_s1 + $0x128] sm:$0xff] }
  0x1d   :  { %4407 = vmatpush.bf16.msra.mxu3 %v7326_v28  ;;  %v7356_v40 = vld [vmem:[%s9593_s1 + $0x1b8] sm:$0xff]  ;;  %v7355_v49 = vld [vmem:[%s9593_s1 + $0x1b0] sm:$0xff]  ;;  %v7346_v52 = vld [vmem:[%s9593_s1 + $0x168] sm:$0xff] }
  0x1e   :  { %v7364_v41 = vld [vmem:[%s9593_s1 + $0x1f8] sm:$0xff]  ;;  %4369 = vmatpush.bf16.msra.mxu0 %v7301_v29  ;;  %v7363_v50 = vld [vmem:[%s9593_s1 + $0x1f0] sm:$0xff]  ;;  %v7354_v53 = vld [vmem:[%s9593_s1 + $0x1a8] sm:$0xff] }
  0x1f   :  { %4382 = vmatpush.bf16.msra.mxu1 %v7309_v30  ;;  %v7362_v54 = vld [vmem:[%s9593_s1 + $0x1e8] sm:$0xff]  ;;  %v7337_v55 = vld [vmem:[%s9593_s1 + $0x120] sm:$0xff]  ;;  %v24_v59 = vld [vmem:[%s9592_s0 + $0x18] sm:$0xff] }
  0x20   :  { %4395 = vmatpush.bf16.msra.mxu2 %v7317_v31  ;;  %v7345_v57 = vld [vmem:[%s9593_s1 + $0x160] sm:$0xff]  ;;  %v7336_v0 = vld [vmem:[%s9593_s1 + $0x118] sm:$0xff]  ;;  %v7335_v4 = vld [vmem:[%s9593_s1 + $0x110] sm:$0xff] }
  0x21   :  { %4408 = vmatpush.bf16.msra.mxu3 %v7325_v33  ;;  %4370 = vmatmul.bf16.vlgmr.msra.gmra.mxu0 %v198_v44  ;;  %v7353_v62 = vld [vmem:[%s9593_s1 + $0x1a0] sm:$0xff]  ;;  %v7344_v1 = vld [vmem:[%s9593_s1 + $0x158] sm:$0xff]  ;;  %v7343_v5 = vld [vmem:[%s9593_s1 + $0x150] sm:$0xff] }
  0x22   :  { %4414 = vmatpush.bf16.msrb.mxu0 %v7340_v38  ;;  %4383 = vmatmul.bf16.vlgmr.msra.gmra.mxu1 %v199_v46  ;;  %v7361_v63 = vld [vmem:[%s9593_s1 + $0x1e0] sm:$0xff]  ;;  %v7352_v2 = vld [vmem:[%s9593_s1 + $0x198] sm:$0xff]  ;;  %v7351_v6 = vld [vmem:[%s9593_s1 + $0x190] sm:$0xff] }
  0x23   :  { %4427 = vmatpush.bf16.msrb.mxu1 %v7348_v39  ;;  %4396 = vmatmul.bf16.vlgmr.msra.gmra.mxu2 %v200_v43  ;;  %v8017_v56 = vld.sshfl [vmem:[#allocation1 + $0x30] sm:$0xff pattern:$0x73625140]  ;;  %v8022_v58 = vld.sshfl [vmem:[#allocation1 + $0x20] sm:$0xff pattern:$0x73625140] }
  0x24   :  { %4440 = vmatpush.bf16.msrb.mxu2 %v7356_v40  ;;  %4409 = vmatmul.bf16.vlgmr.msra.gmra.mxu3 %v201_v45  ;;  %v8027_v60 = vld.sshfl [vmem:[#allocation1 + $0x38] sm:$0xff pattern:$0x73625140]  ;;  %v8029_v61 = vld.sshfl [vmem:[#allocation1 + $0x28] sm:$0xff pattern:$0x73625140]  ;;  %v204_v21 = vpack.c.bf16 %v8017_v56, %v8017_v56  ;;  %v202_v22 = vpack.c.bf16 %v8022_v58, %v8022_v58 }
  0x25   :  { %4453 = vmatpush.bf16.msrb.mxu3 %v7364_v41  ;;  %65 = vst [vmem:[#allocation1 + $0x20] ss:$4 sm:$0xff] %v24_v59  ;;  %v7360_v3 = vld [vmem:[%s9593_s1 + $0x1d8] sm:$0xff]  ;;  %v7359_v7 = vld [vmem:[%s9593_s1 + $0x1d0] sm:$0xff]  ;;  %v7334_v8 = vld [vmem:[%s9593_s1 + $0x108] sm:$0xff]  ;;  %v205_v25 = vpack.c.bf16 %v8027_v60, %v8027_v60  ;;  %v203_v26 = vpack.c.bf16 %v8029_v61, %v8029_v61 }
  0x26   :  { %4415 = vmatpush.bf16.msrb.mxu0 %v7339_v47  ;;  %v7342_v9 = vld [vmem:[%s9593_s1 + $0x148] sm:$0xff]  ;;  %v7333_v12 = vld [vmem:[%s9593_s1 + $0x100] sm:$0xff]  ;;  %v7372_v16 = vld [vmem:[%s9593_s1 + $0x238] sm:$0xff] }
  0x27   :  { %4428 = vmatpush.bf16.msrb.mxu1 %v7347_v48  ;;  %v7350_v10 = vld [vmem:[%s9593_s1 + $0x188] sm:$0xff]  ;;  %v7341_v13 = vld [vmem:[%s9593_s1 + $0x140] sm:$0xff]  ;;  %v7380_v17 = vld [vmem:[%s9593_s1 + $0x278] sm:$0xff] }
  0x28   :  { %4441 = vmatpush.bf16.msrb.mxu2 %v7355_v49  ;;  %v7358_v11 = vld [vmem:[%s9593_s1 + $0x1c8] sm:$0xff]  ;;  %v7349_v14 = vld [vmem:[%s9593_s1 + $0x180] sm:$0xff]  ;;  %v7388_v18 = vld [vmem:[%s9593_s1 + $0x2b8] sm:$0xff] }
  0x29   :  { %4454 = vmatpush.bf16.msrb.mxu3 %v7363_v50  ;;  %v7357_v15 = vld [vmem:[%s9593_s1 + $0x1c0] sm:$0xff]  ;;  %v7396_v19 = vld [vmem:[%s9593_s1 + $0x2f8] sm:$0xff]  ;;  %v7371_v20 = vld [vmem:[%s9593_s1 + $0x230] sm:$0xff] }
  0x2a   :  { %4416 = vmatpush.bf16.msrb.mxu0 %v7338_v51  ;;  %v7379_v23 = vld [vmem:[%s9593_s1 + $0x270] sm:$0xff]  ;;  %v8114_v27 = vld.sshfl [vmem:[#allocation1] sm:$0xff pattern:$0x73625140]  ;;  %v7370_v33 = vld [vmem:[%s9593_s1 + $0x228] sm:$0xff] }
  0x2b   :  { %4429 = vmatpush.bf16.msrb.mxu1 %v7346_v52  ;;  %v7387_v24 = vld [vmem:[%s9593_s1 + $0x2b0] sm:$0xff]  ;;  %v8118_v29 = vld.sshfl [vmem:[#allocation1 + $0x8] sm:$0xff pattern:$0x73625140]  ;;  %v25_v31 = vld [vmem:[%s9592_s0 + $0x20] sm:$0xff]  ;;  %v206_v61 = vpack.c.bf16 %v8114_v27, %v8114_v27 }
  0x2c   :  { %4442 = vmatpush.bf16.msrb.mxu2 %v7354_v53  ;;  %v8116_v28 = vld.sshfl [vmem:[#allocation1 + $0x10] sm:$0xff pattern:$0x73625140]  ;;  %v8126_v32 = vld.sshfl [vmem:[#allocation1 + $0x18] sm:$0xff pattern:$0x73625140] }
  0x2d   :  { %4455 = vmatpush.bf16.msrb.mxu3 %v7362_v54  ;;  %v7395_v30 = vld [vmem:[%s9593_s1 + $0x2f0] sm:$0xff]  ;;  %74 = vst [vmem:[#allocation1] ss:$4 sm:$0xff] %v25_v31  ;;  %v7378_v34 = vld [vmem:[%s9593_s1 + $0x268] sm:$0xff]  ;;  %v7369_v37 = vld [vmem:[%s9593_s1 + $0x220] sm:$0xff] }
  0x2e   :  { %4417 = vmatpush.bf16.msrb.mxu0 %v7337_v55  ;;  %v7386_v35 = vld [vmem:[%s9593_s1 + $0x2a8] sm:$0xff]  ;;  %v7377_v38 = vld [vmem:[%s9593_s1 + $0x260] sm:$0xff]  ;;  %v7368_v41 = vld [vmem:[%s9593_s1 + $0x218] sm:$0xff] }
  0x2f   :  { %4430 = vmatpush.bf16.msrb.mxu1 %v7345_v57  ;;  %v7394_v36 = vld [vmem:[%s9593_s1 + $0x2e8] sm:$0xff]  ;;  %v7385_v39 = vld [vmem:[%s9593_s1 + $0x2a0] sm:$0xff]  ;;  %v7376_v42 = vld [vmem:[%s9593_s1 + $0x258] sm:$0xff] }
  0x30   :  { %4443 = vmatpush.bf16.msrb.mxu2 %v7353_v62  ;;  %v7393_v40 = vld [vmem:[%s9593_s1 + $0x2e0] sm:$0xff]  ;;  %v7384_v43 = vld [vmem:[%s9593_s1 + $0x298] sm:$0xff]  ;;  %v7367_v45 = vld [vmem:[%s9593_s1 + $0x210] sm:$0xff]  ;;  %v208_v62 = vpack.c.bf16 %v8116_v28, %v8116_v28 }
  0x31   :  { %4456 = vmatpush.bf16.msrb.mxu3 %v7361_v63  ;;  %v7392_v44 = vld [vmem:[%s9593_s1 + $0x2d8] sm:$0xff]  ;;  %v7375_v46 = vld [vmem:[%s9593_s1 + $0x250] sm:$0xff]  ;;  %v7366_v49 = vld [vmem:[%s9593_s1 + $0x208] sm:$0xff] }
  0x32   :  { %4418 = vmatpush.bf16.msrb.mxu0 %v7336_v0  ;;  %v7383_v47 = vld [vmem:[%s9593_s1 + $0x290] sm:$0xff]  ;;  %v7374_v50 = vld [vmem:[%s9593_s1 + $0x248] sm:$0xff]  ;;  %v7365_v53 = vld [vmem:[%s9593_s1 + $0x200] sm:$0xff]  ;;  %v207_v0 = vpack.c.bf16 %v8118_v29, %v8118_v29 }
  0x33   :  { %4431 = vmatpush.bf16.msrb.mxu1 %v7344_v1  ;;  %v7391_v48 = vld [vmem:[%s9593_s1 + $0x2d0] sm:$0xff]  ;;  %v7382_v51 = vld [vmem:[%s9593_s1 + $0x288] sm:$0xff]  ;;  %v7373_v54 = vld [vmem:[%s9593_s1 + $0x240] sm:$0xff]  ;;  %v209_v1 = vpack.c.bf16 %v8126_v32, %v8126_v32 }
  0x34   :  { %4444 = vmatpush.bf16.msrb.mxu2 %v7352_v2  ;;  %v7390_v52 = vld [vmem:[%s9593_s1 + $0x2c8] sm:$0xff]  ;;  %v7381_v55 = vld [vmem:[%s9593_s1 + $0x280] sm:$0xff]  ;;  %v7404_v57 = vld [vmem:[%s9593_s1 + $0x338] sm:$0xff] }
  0x35   :  { %4457 = vmatpush.bf16.msrb.mxu3 %v7360_v3  ;;  %v7389_v56 = vld [vmem:[%s9593_s1 + $0x2c0] sm:$0xff]  ;;  %v7412_v58 = vld [vmem:[%s9593_s1 + $0x378] sm:$0xff]  ;;  %v7403_v63 = vld [vmem:[%s9593_s1 + $0x330] sm:$0xff] }
  0x36   :  { %4419 = vmatpush.bf16.msrb.mxu0 %v7335_v4  ;;  %v7420_v59 = vld [vmem:[%s9593_s1 + $0x3b8] sm:$0xff]  ;;  %v7411_v2 = vld [vmem:[%s9593_s1 + $0x370] sm:$0xff]  ;;  %v8229_v4 = vld.sshfl [vmem:[#allocation1 + $0x20] sm:$0xff pattern:$0x73625140] }
  0x37   :  { %4432 = vmatpush.bf16.msrb.mxu1 %v7343_v5  ;;  %v7428_v60 = vld [vmem:[%s9593_s1 + $0x3f8] sm:$0xff]  ;;  %v7419_v3 = vld [vmem:[%s9593_s1 + $0x3b0] sm:$0xff]  ;;  %v7406_v27 = vld [vmem:[%s9593_s1 + $0x348] sm:$0xff] }
  0x38   :  { %4445 = vmatpush.bf16.msrb.mxu2 %v7351_v6  ;;  %v8231_v5 = vld.sshfl [vmem:[#allocation1 + $0x30] sm:$0xff pattern:$0x73625140]  ;;  %v8233_v6 = vld.sshfl [vmem:[#allocation1 + $0x28] sm:$0xff pattern:$0x73625140] }
  0x39   :  { %4458 = vmatpush.bf16.msrb.mxu3 %v7359_v7  ;;  %v7427_v7 = vld [vmem:[%s9593_s1 + $0x3f0] sm:$0xff]  ;;  %v7414_v28 = vld [vmem:[%s9593_s1 + $0x388] sm:$0xff]  ;;  %v7405_v31 = vld [vmem:[%s9593_s1 + $0x340] sm:$0xff] }
  0x3a   :  { %4420 = vmatpush.bf16.msrb.mxu0 %v7334_v8  ;;  %v26_v8 = vld [vmem:[%s9592_s0 + $0x28] sm:$0xff]  ;;  %v7413_v32 = vld [vmem:[%s9593_s1 + $0x380] sm:$0xff] }
  0x3b   :  { %4433 = vmatpush.bf16.msrb.mxu1 %v7342_v9  ;;  %v8241_v9 = vld.sshfl [vmem:[#allocation1 + $0x38] sm:$0xff pattern:$0x73625140]  ;;  %v7422_v29 = vld [vmem:[%s9593_s1 + $0x3c8] sm:$0xff] }
  0x3c   :  { %4446 = vmatpush.bf16.msrb.mxu2 %v7350_v10  ;;  %75 = vst [vmem:[#allocation1 + $0x20] ss:$4 sm:$0xff] %v26_v8  ;;  %v7402_v10 = vld [vmem:[%s9593_s1 + $0x328] sm:$0xff]  ;;  %v76_v8 = vld.sshfl [vmem:[#allocation1] sm:$0xff pattern:$0x73625140] }
  0x3d   :  { %4459 = vmatpush.bf16.msrb.mxu3 %v7358_v11  ;;  %v7410_v11 = vld [vmem:[%s9593_s1 + $0x368] sm:$0xff] }
  0x3e   :  { %4421 = vmatpush.bf16.msrb.mxu0 %v7333_v12  ;;  %v7418_v12 = vld [vmem:[%s9593_s1 + $0x3a8] sm:$0xff] }
  0x3f   :  { %4434 = vmatpush.bf16.msrb.mxu1 %v7341_v13  ;;  %v7426_v13 = vld [vmem:[%s9593_s1 + $0x3e8] sm:$0xff] }
  0x40   :  { %4447 = vmatpush.bf16.msrb.mxu2 %v7349_v14  ;;  %v7401_v14 = vld [vmem:[%s9593_s1 + $0x320] sm:$0xff] }
  0x41   :  { %4460 = vmatpush.bf16.msrb.mxu3 %v7357_v15  ;;  %4422 = vmatmul.bf16.vlgmr.msrb.gmra.mxu0 %v202_v22  ;;  %v7409_v15 = vld [vmem:[%s9593_s1 + $0x360] sm:$0xff]  ;;  %v7399_v22 = vld [vmem:[%s9593_s1 + $0x310] sm:$0xff] }
  0x42   :  { %4466 = vmatpush.bf16.msra.mxu0 %v7372_v16  ;;  %4435 = vmatmul.bf16.vlgmr.msrb.gmra.mxu1 %v203_v26  ;;  %v7417_v16 = vld [vmem:[%s9593_s1 + $0x3a0] sm:$0xff]  ;;  %v7398_v26 = vld [vmem:[%s9593_s1 + $0x308] sm:$0xff] }
  0x43   :  { %4479 = vmatpush.bf16.msra.mxu1 %v7380_v17  ;;  %4448 = vmatmul.bf16.vlgmr.msrb.gmra.mxu2 %v204_v21  ;;  %v7425_v17 = vld [vmem:[%s9593_s1 + $0x3e0] sm:$0xff]  ;;  %v7424_v21 = vld [vmem:[%s9593_s1 + $0x3d8] sm:$0xff] }
  0x44   :  { %4492 = vmatpush.bf16.msra.mxu2 %v7388_v18  ;;  %4461 = vmatmul.bf16.vlgmr.msrb.gmra.mxu3 %v205_v25  ;;  %v7400_v18 = vld [vmem:[%s9593_s1 + $0x318] sm:$0xff]  ;;  %v7423_v25 = vld [vmem:[%s9593_s1 + $0x3d0] sm:$0xff] }
  0x45   :  { %4505 = vmatpush.bf16.msra.mxu3 %v7396_v19  ;;  %v7408_v19 = vld [vmem:[%s9593_s1 + $0x358] sm:$0xff] }
  0x46   :  { %4467 = vmatpush.bf16.msra.mxu0 %v7371_v20  ;;  %v7416_v20 = vld [vmem:[%s9593_s1 + $0x398] sm:$0xff] }
  0x47   :  { %4480 = vmatpush.bf16.msra.mxu1 %v7379_v23  ;;  %v7407_v23 = vld [vmem:[%s9593_s1 + $0x350] sm:$0xff] }
  0x48   :  { %4493 = vmatpush.bf16.msra.mxu2 %v7387_v24  ;;  %v7415_v24 = vld [vmem:[%s9593_s1 + $0x390] sm:$0xff] }
  0x49   :  { %4506 = vmatpush.bf16.msra.mxu3 %v7395_v30  ;;  %v7397_v30 = vld [vmem:[%s9593_s1 + $0x300] sm:$0xff] }
  0x4a   :  { %4468 = vmatpush.bf16.msra.mxu0 %v7370_v33  ;;  %v7421_v33 = vld [vmem:[%s9593_s1 + $0x3c0] sm:$0xff] }
  0x4b   :  { %4481 = vmatpush.bf16.msra.mxu1 %v7378_v34  ;;  %v7436_v34 = vld [vmem:[%s9593_s1 + $0x438] sm:$0xff] }
  0x4c   :  { %4494 = vmatpush.bf16.msra.mxu2 %v7386_v35  ;;  %v7444_v35 = vld [vmem:[%s9593_s1 + $0x478] sm:$0xff] }
  0x4d   :  { %4507 = vmatpush.bf16.msra.mxu3 %v7394_v36  ;;  %v7452_v36 = vld [vmem:[%s9593_s1 + $0x4b8] sm:$0xff] }
  0x4e   :  { %4469 = vmatpush.bf16.msra.mxu0 %v7369_v37  ;;  %v7460_v37 = vld [vmem:[%s9593_s1 + $0x4f8] sm:$0xff] }
  0x4f   :  { %4482 = vmatpush.bf16.msra.mxu1 %v7377_v38  ;;  %v210_v38 = vpack.c.bf16 %v8229_v4, %v8229_v4  ;;  %v7445_v4 = vld [vmem:[%s9593_s1 + $0x480] sm:$0xff] }
  0x50   :  { %4495 = vmatpush.bf16.msra.mxu2 %v7385_v39  ;;  %v212_v39 = vpack.c.bf16 %v8231_v5, %v8231_v5  ;;  %v7453_v5 = vld [vmem:[%s9593_s1 + $0x4c0] sm:$0xff] }
  0x51   :  { %4508 = vmatpush.bf16.msra.mxu3 %v7393_v40  ;;  %v211_v40 = vpack.c.bf16 %v8233_v6, %v8233_v6  ;;  %v7468_v6 = vld [vmem:[%s9593_s1 + $0x538] sm:$0xff] }
  0x52   :  { %4470 = vmatpush.bf16.msra.mxu0 %v7368_v41  ;;  %v213_v41 = vpack.c.bf16 %v8241_v9, %v8241_v9  ;;  %v78_v9 = vld.sshfl [vmem:[#allocation1 + $0x10] sm:$0xff pattern:$0x73625140] }
  0x53   :  { %4483 = vmatpush.bf16.msra.mxu1 %v7376_v42  ;;  %v7435_v42 = vld [vmem:[%s9593_s1 + $0x430] sm:$0xff] }
  0x54   :  { %4496 = vmatpush.bf16.msra.mxu2 %v7384_v43  ;;  %v7443_v43 = vld [vmem:[%s9593_s1 + $0x470] sm:$0xff] }
  0x55   :  { %4509 = vmatpush.bf16.msra.mxu3 %v7392_v44  ;;  %v7451_v44 = vld [vmem:[%s9593_s1 + $0x4b0] sm:$0xff] }
  0x56   :  { %4471 = vmatpush.bf16.msra.mxu0 %v7367_v45  ;;  %v7459_v45 = vld [vmem:[%s9593_s1 + $0x4f0] sm:$0xff] }
  0x57   :  { %4484 = vmatpush.bf16.msra.mxu1 %v7375_v46  ;;  %v7434_v46 = vld [vmem:[%s9593_s1 + $0x428] sm:$0xff] }
  0x58   :  { %4497 = vmatpush.bf16.msra.mxu2 %v7383_v47  ;;  %v7442_v47 = vld [vmem:[%s9593_s1 + $0x468] sm:$0xff] }
  0x59   :  { %4510 = vmatpush.bf16.msra.mxu3 %v7391_v48  ;;  %v7450_v48 = vld [vmem:[%s9593_s1 + $0x4a8] sm:$0xff] }
  0x5a   :  { %4472 = vmatpush.bf16.msra.mxu0 %v7366_v49  ;;  %v7458_v49 = vld [vmem:[%s9593_s1 + $0x4e8] sm:$0xff] }
  0x5b   :  { %4485 = vmatpush.bf16.msra.mxu1 %v7374_v50  ;;  %v7433_v50 = vld [vmem:[%s9593_s1 + $0x420] sm:$0xff] }
  0x5c   :  { %4498 = vmatpush.bf16.msra.mxu2 %v7382_v51  ;;  %v7441_v51 = vld [vmem:[%s9593_s1 + $0x460] sm:$0xff] }
  0x5d   :  { %4511 = vmatpush.bf16.msra.mxu3 %v7390_v52  ;;  %v7449_v52 = vld [vmem:[%s9593_s1 + $0x4a0] sm:$0xff] }
  0x5e   :  { %4473 = vmatpush.bf16.msra.mxu0 %v7365_v53  ;;  %v7457_v53 = vld [vmem:[%s9593_s1 + $0x4e0] sm:$0xff] }
  0x5f   :  { %4486 = vmatpush.bf16.msra.mxu1 %v7373_v54  ;;  %v7432_v54 = vld [vmem:[%s9593_s1 + $0x418] sm:$0xff] }
  0x60   :  { %4499 = vmatpush.bf16.msra.mxu2 %v7381_v55  ;;  %v7440_v55 = vld [vmem:[%s9593_s1 + $0x458] sm:$0xff] }
  0x61   :  { %4512 = vmatpush.bf16.msra.mxu3 %v7389_v56  ;;  %4474 = vmatmul.bf16.vlgmr.msra.gmra.mxu0 %v206_v61  ;;  %v7448_v56 = vld [vmem:[%s9593_s1 + $0x498] sm:$0xff]  ;;  %v7455_v61 = vld [vmem:[%s9593_s1 + $0x4d0] sm:$0xff] }
  0x62   :  { %4518 = vmatpush.bf16.msrb.mxu0 %v7404_v57  ;;  %4487 = vmatmul.bf16.vlgmr.msra.gmra.mxu1 %v207_v0  ;;  %v7456_v57 = vld [vmem:[%s9593_s1 + $0x4d8] sm:$0xff]  ;;  %v7446_v0 = vld [vmem:[%s9593_s1 + $0x488] sm:$0xff] }
  0x63   :  { %4531 = vmatpush.bf16.msrb.mxu1 %v7412_v58  ;;  %4500 = vmatmul.bf16.vlgmr.msra.gmra.mxu2 %v208_v62  ;;  %v7431_v58 = vld [vmem:[%s9593_s1 + $0x410] sm:$0xff]  ;;  %v7430_v62 = vld [vmem:[%s9593_s1 + $0x408] sm:$0xff] }
  0x64   :  { %4544 = vmatpush.bf16.msrb.mxu2 %v7420_v59  ;;  %4513 = vmatmul.bf16.vlgmr.msra.gmra.mxu3 %v209_v1  ;;  %v7439_v59 = vld [vmem:[%s9593_s1 + $0x450] sm:$0xff]  ;;  %v7454_v1 = vld [vmem:[%s9593_s1 + $0x4c8] sm:$0xff] }
  0x65   :  { %4557 = vmatpush.bf16.msrb.mxu3 %v7428_v60  ;;  %v7447_v60 = vld [vmem:[%s9593_s1 + $0x490] sm:$0xff] }
  0x66   :  { %4519 = vmatpush.bf16.msrb.mxu0 %v7403_v63  ;;  %v7438_v63 = vld [vmem:[%s9593_s1 + $0x448] sm:$0xff] }
  0x67   :  { %4532 = vmatpush.bf16.msrb.mxu1 %v7411_v2  ;;  %v7429_v2 = vld [vmem:[%s9593_s1 + $0x400] sm:$0xff] }
  0x68   :  { %4545 = vmatpush.bf16.msrb.mxu2 %v7419_v3  ;;  %v7437_v3 = vld [vmem:[%s9593_s1 + $0x440] sm:$0xff] }
  0x69   :  { %4558 = vmatpush.bf16.msrb.mxu3 %v7427_v7  ;;  %v7476_v7 = vld [vmem:[%s9593_s1 + $0x578] sm:$0xff] }
  0x6a   :  { %4520 = vmatpush.bf16.msrb.mxu0 %v7402_v10  ;;  %v77_v10 = vld.sshfl [vmem:[#allocation1 + $0x8] sm:$0xff pattern:$0x73625140] }
  0x6b   :  { %4533 = vmatpush.bf16.msrb.mxu1 %v7410_v11  ;;  %v79_v11 = vld.sshfl [vmem:[#allocation1 + $0x18] sm:$0xff pattern:$0x73625140] }
  0x6c   :  { %4546 = vmatpush.bf16.msrb.mxu2 %v7418_v12  ;;  %v7484_v12 = vld [vmem:[%s9593_s1 + $0x5b8] sm:$0xff] }
  0x6d   :  { %4559 = vmatpush.bf16.msrb.mxu3 %v7426_v13  ;;  %v7492_v13 = vld [vmem:[%s9593_s1 + $0x5f8] sm:$0xff] }
  0x6e   :  { %4521 = vmatpush.bf16.msrb.mxu0 %v7401_v14  ;;  %v214_v14 = vpack.c.bf16 %v76_v8, %v76_v8  ;;  %v7499_v8 = vld [vmem:[%s9593_s1 + $0x630] sm:$0xff] }
  0x6f   :  { %4534 = vmatpush.bf16.msrb.mxu1 %v7409_v15  ;;  %v216_v15 = vpack.c.bf16 %v78_v9, %v78_v9  ;;  %v7507_v9 = vld [vmem:[%s9593_s1 + $0x670] sm:$0xff] }
  0x70   :  { %4547 = vmatpush.bf16.msrb.mxu2 %v7417_v16  ;;  %v215_v16 = vpack.c.bf16 %v77_v10, %v77_v10  ;;  %v7515_v10 = vld [vmem:[%s9593_s1 + $0x6b0] sm:$0xff] }
  0x71   :  { %4560 = vmatpush.bf16.msrb.mxu3 %v7425_v17  ;;  %v217_v17 = vpack.c.bf16 %v79_v11, %v79_v11  ;;  %v7523_v11 = vld [vmem:[%s9593_s1 + $0x6f0] sm:$0xff] }
  0x72   :  { %4522 = vmatpush.bf16.msrb.mxu0 %v7400_v18  ;;  %v7467_v18 = vld [vmem:[%s9593_s1 + $0x530] sm:$0xff] }
  0x73   :  { %4535 = vmatpush.bf16.msrb.mxu1 %v7408_v19  ;;  %v7475_v19 = vld [vmem:[%s9593_s1 + $0x570] sm:$0xff] }
  0x74   :  { %4548 = vmatpush.bf16.msrb.mxu2 %v7416_v20  ;;  %v7483_v20 = vld [vmem:[%s9593_s1 + $0x5b0] sm:$0xff] }
  0x75   :  { %4561 = vmatpush.bf16.msrb.mxu3 %v7424_v21  ;;  %v7491_v21 = vld [vmem:[%s9593_s1 + $0x5f0] sm:$0xff] }
  0x76   :  { %4523 = vmatpush.bf16.msrb.mxu0 %v7399_v22  ;;  %v7466_v22 = vld [vmem:[%s9593_s1 + $0x528] sm:$0xff] }
  0x77   :  { %4536 = vmatpush.bf16.msrb.mxu1 %v7407_v23  ;;  %v7474_v23 = vld [vmem:[%s9593_s1 + $0x568] sm:$0xff] }
  0x78   :  { %4549 = vmatpush.bf16.msrb.mxu2 %v7415_v24  ;;  %v7814_v24 = vld [vmem:[%s9594_s2] ss:$0 sm:$0xff] }
  0x79   :  { %4562 = vmatpush.bf16.msrb.mxu3 %v7423_v25  ;;  %v7482_v25 = vld [vmem:[%s9593_s1 + $0x5a8] sm:$0xff] }
  0x7a   :  { %4524 = vmatpush.bf16.msrb.mxu0 %v7398_v26  ;;  %v7490_v26 = vld [vmem:[%s9593_s1 + $0x5e8] sm:$0xff] }
  0x7b   :  { %4537 = vmatpush.bf16.msrb.mxu1 %v7406_v27 }
  0x7c   :  { %4550 = vmatpush.bf16.msrb.mxu2 %v7414_v28  ;;  %v7465_v28 = vld [vmem:[%s9593_s1 + $0x520] sm:$0xff] }
  0x7d   :  { %4563 = vmatpush.bf16.msrb.mxu3 %v7422_v29  ;;  %v7473_v29 = vld [vmem:[%s9593_s1 + $0x560] sm:$0xff] }
  0x7e   :  { %4525 = vmatpush.bf16.msrb.mxu0 %v7397_v30 }
  0x7f   :  { %4538 = vmatpush.bf16.msrb.mxu1 %v7405_v31 }
  0x80   :  { %4551 = vmatpush.bf16.msrb.mxu2 %v7413_v32  ;;  %v7481_v32 = vld [vmem:[%s9593_s1 + $0x5a0] sm:$0xff] }
  0x81   :  { %4564 = vmatpush.bf16.msrb.mxu3 %v7421_v33  ;;  %4526 = vmatmul.bf16.vlgmr.msrb.gmra.mxu0 %v210_v38  ;;  %v7489_v33 = vld [vmem:[%s9593_s1 + $0x5e0] sm:$0xff]  ;;  %v7488_v38 = vld [vmem:[%s9593_s1 + $0x5d8] sm:$0xff] }
  0x82   :  { %4570 = vmatpush.bf16.msra.mxu0 %v7436_v34  ;;  %4539 = vmatmul.bf16.vlgmr.msrb.gmra.mxu1 %v211_v40 }
  0x83   :  { %4583 = vmatpush.bf16.msra.mxu1 %v7444_v35  ;;  %4552 = vmatmul.bf16.vlgmr.msrb.gmra.mxu2 %v212_v39  ;;  %v7464_v35 = vld [vmem:[%s9593_s1 + $0x518] sm:$0xff] }
  0x84   :  { %4596 = vmatpush.bf16.msra.mxu2 %v7452_v36  ;;  %4565 = vmatmul.bf16.vlgmr.msrb.gmra.mxu3 %v213_v41  ;;  %v7472_v36 = vld [vmem:[%s9593_s1 + $0x558] sm:$0xff] }
  0x85   :  { %4609 = vmatpush.bf16.msra.mxu3 %v7460_v37  ;;  %v7480_v37 = vld [vmem:[%s9593_s1 + $0x598] sm:$0xff] }
  0x86   :  { %4571 = vmatpush.bf16.msra.mxu0 %v7435_v42 }
  0x87   :  { %4584 = vmatpush.bf16.msra.mxu1 %v7443_v43  ;;  %v7463_v43 = vld [vmem:[%s9593_s1 + $0x510] sm:$0xff] }
  0x88   :  { %4597 = vmatpush.bf16.msra.mxu2 %v7451_v44  ;;  %v7471_v44 = vld [vmem:[%s9593_s1 + $0x550] sm:$0xff] }
  0x89   :  { %4610 = vmatpush.bf16.msra.mxu3 %v7459_v45 }
  0x8a   :  { %4572 = vmatpush.bf16.msra.mxu0 %v7434_v46 }
  0x8b   :  { %4585 = vmatpush.bf16.msra.mxu1 %v7442_v47  ;;  %v7479_v47 = vld [vmem:[%s9593_s1 + $0x590] sm:$0xff] }
  0x8c   :  { %4598 = vmatpush.bf16.msra.mxu2 %v7450_v48  ;;  %v7487_v48 = vld [vmem:[%s9593_s1 + $0x5d0] sm:$0xff] }
  0x8d   :  { %4611 = vmatpush.bf16.msra.mxu3 %v7458_v49  ;;  %v7462_v49 = vld [vmem:[%s9593_s1 + $0x508] sm:$0xff] }
  0x8e   :  { %4573 = vmatpush.bf16.msra.mxu0 %v7433_v50  ;;  %v7470_v50 = vld [vmem:[%s9593_s1 + $0x548] sm:$0xff] }
  0x8f   :  { %4586 = vmatpush.bf16.msra.mxu1 %v7441_v51  ;;  %v27_v51 = vld [vmem:[%s9592_s0 + $0x30] sm:$0xff] }
  0x90   :  { %4599 = vmatpush.bf16.msra.mxu2 %v7449_v52  ;;  %v7478_v52 = vld [vmem:[%s9593_s1 + $0x588] sm:$0xff]  ;;  %84 = vst [vmem:[#allocation1] ss:$4 sm:$0xff] %v27_v51 }
  0x91   :  { %4612 = vmatpush.bf16.msra.mxu3 %v7457_v53  ;;  %v7486_v53 = vld [vmem:[%s9593_s1 + $0x5c8] sm:$0xff] }
  0x92   :  { %4574 = vmatpush.bf16.msra.mxu0 %v7432_v54 }
  0x93   :  { %4587 = vmatpush.bf16.msra.mxu1 %v7440_v55 }
  0x94   :  { %4600 = vmatpush.bf16.msra.mxu2 %v7448_v56  ;;  %v7461_v56 = vld [vmem:[%s9593_s1 + $0x500] sm:$0xff] }
  0x95   :  { %4613 = vmatpush.bf16.msra.mxu3 %v7456_v57  ;;  %v7469_v57 = vld [vmem:[%s9593_s1 + $0x540] sm:$0xff] }
  0x96   :  { %4575 = vmatpush.bf16.msra.mxu0 %v7431_v58  ;;  %v7477_v58 = vld [vmem:[%s9593_s1 + $0x580] sm:$0xff] }
  0x97   :  { %4588 = vmatpush.bf16.msra.mxu1 %v7439_v59  ;;  %v7485_v59 = vld [vmem:[%s9593_s1 + $0x5c0] sm:$0xff] }
  0x98   :  { %4601 = vmatpush.bf16.msra.mxu2 %v7447_v60  ;;  %v7500_v60 = vld [vmem:[%s9593_s1 + $0x638] sm:$0xff]  ;;  %v86_v51 = vld.sshfl [vmem:[#allocation1] sm:$0xff pattern:$0x73625140] }
  0x99   :  { %4614 = vmatpush.bf16.msra.mxu3 %v7455_v61  ;;  %v7508_v61 = vld [vmem:[%s9593_s1 + $0x678] sm:$0xff] }
  0x9a   :  { %4576 = vmatpush.bf16.msra.mxu0 %v7430_v62  ;;  %v80_v62 = vld.sshfl [vmem:[#allocation1 + $0x20] sm:$0xff pattern:$0x73625140] }
  0x9b   :  { %4589 = vmatpush.bf16.msra.mxu1 %v7438_v63  ;;  %v82_v63 = vld.sshfl [vmem:[#allocation1 + $0x30] sm:$0xff pattern:$0x73625140] }
  0x9c   :  { %4602 = vmatpush.bf16.msra.mxu2 %v7446_v0  ;;  %v81_v0 = vld.sshfl [vmem:[#allocation1 + $0x28] sm:$0xff pattern:$0x73625140] }
  0x9d   :  { %4615 = vmatpush.bf16.msra.mxu3 %v7454_v1  ;;  %v83_v1 = vld.sshfl [vmem:[#allocation1 + $0x38] sm:$0xff pattern:$0x73625140] }
  0x9e   :  { %4577 = vmatpush.bf16.msra.mxu0 %v7429_v2  ;;  %v4371_v27 = vpop.f32.mrf.mxu0  ;;  %v7516_v2 = vld [vmem:[%s9593_s1 + $0x6b8] sm:$0xff] }
  0x9f   :  { %4590 = vmatpush.bf16.msra.mxu1 %v7437_v3  ;;  %v4372_v30 = vadd.f32 %v7814_v24, %v4371_v27  ;;  %v4384_v31 = vpop.f32.mrf.mxu1  ;;  %v7524_v3 = vld [vmem:[%s9593_s1 + $0x6f8] sm:$0xff] }
  0xa0   :  { %4603 = vmatpush.bf16.msra.mxu2 %v7445_v4  ;;  %v218_v4 = vpack.c.bf16 %v80_v62, %v80_v62  ;;  %v7496_v24 = vld [vmem:[%s9593_s1 + $0x618] sm:$0xff]  ;;  %v7539_v62 = vld [vmem:[%s9593_s1 + $0x770] sm:$0xff] }
  0xa1   :  { %4616 = vmatpush.bf16.msra.mxu3 %v7453_v5  ;;  %4578 = vmatmul.bf16.vlgmr.msra.gmra.mxu0 %v214_v14  ;;  %v4385_v34 = vadd.f32 %v4384_v31, %v4372_v30  ;;  %v220_v5 = vpack.c.bf16 %v82_v63, %v82_v63  ;;  %v7514_v14 = vld [vmem:[%s9593_s1 + $0x6a8] sm:$0xff]  ;;  %v7520_v27 = vld [vmem:[%s9593_s1 + $0x6d8] sm:$0xff]  ;;  %v7547_v63 = vld [vmem:[%s9593_s1 + $0x7b0] sm:$0xff] }
  0xa2   :  { %4622 = vmatpush.bf16.msrb.mxu0 %v7468_v6  ;;  %4591 = vmatmul.bf16.vlgmr.msra.gmra.mxu1 %v215_v16  ;;  %v219_v6 = vpack.c.bf16 %v81_v0, %v81_v0  ;;  %v7555_v0 = vld [vmem:[%s9593_s1 + $0x7f0] sm:$0xff] }
  0xa3   :  { %4635 = vmatpush.bf16.msrb.mxu1 %v7476_v7  ;;  %4604 = vmatmul.bf16.vlgmr.msra.gmra.mxu2 %v216_v15  ;;  %v221_v7 = vpack.c.bf16 %v83_v1, %v83_v1  ;;  %v7522_v15 = vld [vmem:[%s9593_s1 + $0x6e8] sm:$0xff] }
  0xa4   :  { %4648 = vmatpush.bf16.msrb.mxu2 %v7484_v12  ;;  %4617 = vmatmul.bf16.vlgmr.msra.gmra.mxu3 %v217_v17  ;;  %v7498_v12 = vld [vmem:[%s9593_s1 + $0x628] sm:$0xff]  ;;  %v7497_v17 = vld [vmem:[%s9593_s1 + $0x620] sm:$0xff] }
  0xa5   :  { %4661 = vmatpush.bf16.msrb.mxu3 %v7492_v13  ;;  %v7506_v13 = vld [vmem:[%s9593_s1 + $0x668] sm:$0xff] }
  0xa6   :  { %4623 = vmatpush.bf16.msrb.mxu0 %v7467_v18  ;;  %v4397_v39 = vpop.f32.mrf.mxu2  ;;  %v4373_v42 = vpop.f32.mrf.mxu0  ;;  %v7505_v18 = vld [vmem:[%s9593_s1 + $0x660] sm:$0xff]  ;;  %v7530_v1 = vld [vmem:[%s9593_s1 + $0x728] sm:$0xff] }
  0xa7   :  { %4636 = vmatpush.bf16.msrb.mxu1 %v7475_v19  ;;  %v4398_v40 = vadd.f32 %v4397_v39, %v4385_v34  ;;  %v4410_v41 = vpop.f32.mrf.mxu3  ;;  %v4386_v46 = vpop.f32.mrf.mxu1  ;;  %v7502_v39 = vld [vmem:[%s9593_s1 + $0x648] sm:$0xff] }
  0xa8   :  { %4649 = vmatpush.bf16.msrb.mxu2 %v7483_v20  ;;  %v7518_v42 = vld [vmem:[%s9593_s1 + $0x6c8] sm:$0xff]  ;;  %v7501_v46 = vld [vmem:[%s9593_s1 + $0x640] sm:$0xff] }
  0xa9   :  { %4662 = vmatpush.bf16.msrb.mxu3 %v7491_v21  ;;  %v8488_v45 = vadd.f32 %v4410_v41, %v4398_v40  ;;  %v7513_v21 = vld [vmem:[%s9593_s1 + $0x6a0] sm:$0xff]  ;;  %v28_v40 = vld [vmem:[%s9592_s0 + $0x38] sm:$0xff]  ;;  %v7510_v41 = vld [vmem:[%s9593_s1 + $0x688] sm:$0xff] }
  0xaa   :  { %4624 = vmatpush.bf16.msrb.mxu0 %v7466_v22  ;;  %v7521_v22 = vld [vmem:[%s9593_s1 + $0x6e0] sm:$0xff]  ;;  %85 = vst [vmem:[#allocation1 + $0x20] ss:$4 sm:$0xff] %v28_v40 }
  0xab   :  { %4637 = vmatpush.bf16.msrb.mxu1 %v7474_v23 }
  0xac   :  { %4650 = vmatpush.bf16.msrb.mxu2 %v7482_v25  ;;  %v7504_v25 = vld [vmem:[%s9593_s1 + $0x658] sm:$0xff] }
  0xad   :  { %4663 = vmatpush.bf16.msrb.mxu3 %v7490_v26  ;;  %v7512_v26 = vld [vmem:[%s9593_s1 + $0x698] sm:$0xff] }
  0xae   :  { %4625 = vmatpush.bf16.msrb.mxu0 %v7465_v28  ;;  %v4399_v54 = vpop.f32.mrf.mxu2 }
  0xaf   :  { %4638 = vmatpush.bf16.msrb.mxu1 %v7473_v29  ;;  %v4412_v55 = vpop.f32.mrf.mxu3  ;;  %v89_v54 = vld.sshfl [vmem:[#allocation1 + $0x18] sm:$0xff pattern:$0x73625140] }
  0xb0   :  { %4651 = vmatpush.bf16.msrb.mxu2 %v7481_v32  ;;  %v7495_v32 = vld [vmem:[%s9593_s1 + $0x610] sm:$0xff]  ;;  %v7548_v55 = vld [vmem:[%s9593_s1 + $0x7b8] sm:$0xff] }
  0xb1   :  { %4664 = vmatpush.bf16.msrb.mxu3 %v7489_v33  ;;  %v7503_v33 = vld [vmem:[%s9593_s1 + $0x650] sm:$0xff]  ;;  %v90_v40 = vld.sshfl [vmem:[#allocation1 + $0x20] sm:$0xff pattern:$0x73625140] }
  0xb2   :  { %4626 = vmatpush.bf16.msrb.mxu0 %v7464_v35 }
  0xb3   :  { %4639 = vmatpush.bf16.msrb.mxu1 %v7472_v36  ;;  %v7511_v36 = vld [vmem:[%s9593_s1 + $0x690] sm:$0xff] }
  0xb4   :  { %4652 = vmatpush.bf16.msrb.mxu2 %v7480_v37  ;;  %v7519_v37 = vld [vmem:[%s9593_s1 + $0x6d0] sm:$0xff] }
  0xb5   :  { %4665 = vmatpush.bf16.msrb.mxu3 %v7488_v38  ;;  %v7494_v38 = vld [vmem:[%s9593_s1 + $0x608] sm:$0xff] }
  0xb6   :  { %4627 = vmatpush.bf16.msrb.mxu0 %v7463_v43 }
  0xb7   :  { %4640 = vmatpush.bf16.msrb.mxu1 %v7471_v44 }
  0xb8   :  { %4653 = vmatpush.bf16.msrb.mxu2 %v7479_v47  ;;  %v7509_v47 = vld [vmem:[%s9593_s1 + $0x680] sm:$0xff] }
  0xb9   :  { %4666 = vmatpush.bf16.msrb.mxu3 %v7487_v48  ;;  %v7517_v48 = vld [vmem:[%s9593_s1 + $0x6c0] sm:$0xff] }
  0xba   :  { %4628 = vmatpush.bf16.msrb.mxu0 %v7462_v49  ;;  %v7532_v49 = vld [vmem:[%s9593_s1 + $0x738] sm:$0xff] }
  0xbb   :  { %4641 = vmatpush.bf16.msrb.mxu1 %v7470_v50  ;;  %v7540_v50 = vld [vmem:[%s9593_s1 + $0x778] sm:$0xff] }
  0xbc   :  { %4654 = vmatpush.bf16.msrb.mxu2 %v7478_v52  ;;  %v88_v52 = vld.sshfl [vmem:[#allocation1 + $0x10] sm:$0xff pattern:$0x73625140] }
  0xbd   :  { %4667 = vmatpush.bf16.msrb.mxu3 %v7486_v53  ;;  %v87_v53 = vld.sshfl [vmem:[#allocation1 + $0x8] sm:$0xff pattern:$0x73625140] }
  0xbe   :  { %4629 = vmatpush.bf16.msrb.mxu0 %v7461_v56  ;;  %v4423_v16 = vpop.f32.mrf.mxu0  ;;  %v7556_v56 = vld [vmem:[%s9593_s1 + $0x7f8] sm:$0xff] }
  0xbf   :  { %4642 = vmatpush.bf16.msrb.mxu1 %v7469_v57  ;;  %v4424_v19 = vadd.f32 %v4423_v16, %v8488_v45  ;;  %v4436_v20 = vpop.f32.mrf.mxu1  ;;  %v7493_v45 = vld [vmem:[%s9593_s1 + $0x600] sm:$0xff]  ;;  %v222_v57 = vpack.c.bf16 %v86_v51, %v86_v51  ;;  %v7552_v16 = vld [vmem:[%s9593_s1 + $0x7d8] sm:$0xff]  ;;  %v7571_v51 = vld [vmem:[%s9593_s1 + $0x870] sm:$0xff] }
  0xc0   :  { %4655 = vmatpush.bf16.msrb.mxu2 %v7477_v58  ;;  %v224_v58 = vpack.c.bf16 %v88_v52, %v88_v52  ;;  %v7579_v52 = vld [vmem:[%s9593_s1 + $0x8b0] sm:$0xff] }
  0xc1   :  { %4668 = vmatpush.bf16.msrb.mxu3 %v7485_v59  ;;  %4630 = vmatmul.bf16.vlgmr.msrb.gmra.mxu0 %v218_v4  ;;  %v4437_v23 = vadd.f32 %v4436_v20, %v4424_v19  ;;  %v223_v59 = vpack.c.bf16 %v87_v53, %v87_v53  ;;  %v7554_v4 = vld [vmem:[%s9593_s1 + $0x7e8] sm:$0xff]  ;;  %v7587_v53 = vld [vmem:[%s9593_s1 + $0x8f0] sm:$0xff] }
  0xc2   :  { %4674 = vmatpush.bf16.msra.mxu0 %v7500_v60  ;;  %4643 = vmatmul.bf16.vlgmr.msrb.gmra.mxu1 %v219_v6  ;;  %v225_v60 = vpack.c.bf16 %v89_v54, %v89_v54  ;;  %v7562_v54 = vld [vmem:[%s9593_s1 + $0x828] sm:$0xff] }
  0xc3   :  { %4687 = vmatpush.bf16.msra.mxu1 %v7508_v61  ;;  %4656 = vmatmul.bf16.vlgmr.msrb.gmra.mxu2 %v220_v5  ;;  %v7531_v61 = vld [vmem:[%s9593_s1 + $0x730] sm:$0xff] }
  0xc4   :  { %4700 = vmatpush.bf16.msra.mxu2 %v7516_v2  ;;  %4669 = vmatmul.bf16.vlgmr.msrb.gmra.mxu3 %v221_v7  ;;  %v7538_v2 = vld [vmem:[%s9593_s1 + $0x768] sm:$0xff]  ;;  %v7529_v7 = vld [vmem:[%s9593_s1 + $0x720] sm:$0xff] }
  0xc5   :  { %4713 = vmatpush.bf16.msra.mxu3 %v7524_v3  ;;  %v7546_v3 = vld [vmem:[%s9593_s1 + $0x7a8] sm:$0xff] }
  0xc6   :  { %4675 = vmatpush.bf16.msra.mxu0 %v7499_v8  ;;  %v4449_v28 = vpop.f32.mrf.mxu2  ;;  %v4425_v31 = vpop.f32.mrf.mxu0  ;;  %v7537_v8 = vld [vmem:[%s9593_s1 + $0x760] sm:$0xff] }
  0xc7   :  { %4688 = vmatpush.bf16.msra.mxu1 %v7507_v9  ;;  %v4450_v29 = vadd.f32 %v4449_v28, %v4437_v23  ;;  %v4462_v30 = vpop.f32.mrf.mxu3  ;;  %v4438_v35 = vpop.f32.mrf.mxu1  ;;  %v7535_v23 = vld [vmem:[%s9593_s1 + $0x750] sm:$0xff]  ;;  %v7534_v28 = vld [vmem:[%s9593_s1 + $0x748] sm:$0xff] }
  0xc8   :  { %4701 = vmatpush.bf16.msra.mxu2 %v7515_v10  ;;  %v7545_v10 = vld [vmem:[%s9593_s1 + $0x7a0] sm:$0xff]  ;;  %v7550_v31 = vld [vmem:[%s9593_s1 + $0x7c8] sm:$0xff] }
  0xc9   :  { %4714 = vmatpush.bf16.msra.mxu3 %v7523_v11  ;;  %v8590_v34 = vadd.f32 %v4462_v30, %v4450_v29  ;;  %v7553_v11 = vld [vmem:[%s9593_s1 + $0x7e0] sm:$0xff]  ;;  %v7542_v30 = vld [vmem:[%s9593_s1 + $0x788] sm:$0xff] }
  0xca   :  { %4676 = vmatpush.bf16.msra.mxu0 %v7498_v12  ;;  %v29_v29 = vld [vmem:[%s9592_s0 + $0x40] sm:$0xff] }
  0xcb   :  { %4689 = vmatpush.bf16.msra.mxu1 %v7506_v13  ;;  %v7528_v13 = vld [vmem:[%s9593_s1 + $0x718] sm:$0xff]  ;;  %94 = vst [vmem:[#allocation1] ss:$4 sm:$0xff] %v29_v29  ;;  %v7533_v35 = vld [vmem:[%s9593_s1 + $0x740] sm:$0xff] }
  0xcc   :  { %4702 = vmatpush.bf16.msra.mxu2 %v7514_v14  ;;  %v7536_v14 = vld [vmem:[%s9593_s1 + $0x758] sm:$0xff] }
  0xcd   :  { %4715 = vmatpush.bf16.msra.mxu3 %v7522_v15  ;;  %v7544_v15 = vld [vmem:[%s9593_s1 + $0x798] sm:$0xff] }
  0xce   :  { %4677 = vmatpush.bf16.msra.mxu0 %v7497_v17  ;;  %v4451_v43 = vpop.f32.mrf.mxu2 }
  0xcf   :  { %4690 = vmatpush.bf16.msra.mxu1 %v7505_v18  ;;  %v4464_v44 = vpop.f32.mrf.mxu3  ;;  %v93_v43 = vld.sshfl [vmem:[#allocation1 + $0x38] sm:$0xff pattern:$0x73625140] }
  0xd0   :  { %4703 = vmatpush.bf16.msra.mxu2 %v7513_v21  ;;  %v7580_v44 = vld [vmem:[%s9593_s1 + $0x8b8] sm:$0xff] }
  0xd1   :  { %4716 = vmatpush.bf16.msra.mxu3 %v7521_v22  ;;  %v7527_v22 = vld [vmem:[%s9593_s1 + $0x710] sm:$0xff] }
  0xd2   :  { %4678 = vmatpush.bf16.msra.mxu0 %v7496_v24  ;;  %v96_v29 = vld.sshfl [vmem:[#allocation1] sm:$0xff pattern:$0x73625140] }
  0xd3   :  { %4691 = vmatpush.bf16.msra.mxu1 %v7504_v25  ;;  %v7543_v25 = vld [vmem:[%s9593_s1 + $0x790] sm:$0xff] }
  0xd4   :  { %4704 = vmatpush.bf16.msra.mxu2 %v7512_v26  ;;  %v7551_v26 = vld [vmem:[%s9593_s1 + $0x7d0] sm:$0xff] }
  0xd5   :  { %4717 = vmatpush.bf16.msra.mxu3 %v7520_v27  ;;  %v7526_v27 = vld [vmem:[%s9593_s1 + $0x708] sm:$0xff] }
  0xd6   :  { %4679 = vmatpush.bf16.msra.mxu0 %v7495_v32 }
  0xd7   :  { %4692 = vmatpush.bf16.msra.mxu1 %v7503_v33 }
  0xd8   :  { %4705 = vmatpush.bf16.msra.mxu2 %v7511_v36  ;;  %v7541_v36 = vld [vmem:[%s9593_s1 + $0x780] sm:$0xff] }
  0xd9   :  { %4718 = vmatpush.bf16.msra.mxu3 %v7519_v37  ;;  %v7549_v37 = vld [vmem:[%s9593_s1 + $0x7c0] sm:$0xff] }
  0xda   :  { %4680 = vmatpush.bf16.msra.mxu0 %v7494_v38  ;;  %v7564_v38 = vld [vmem:[%s9593_s1 + $0x838] sm:$0xff] }
  0xdb   :  { %4693 = vmatpush.bf16.msra.mxu1 %v7502_v39  ;;  %v7572_v39 = vld [vmem:[%s9593_s1 + $0x878] sm:$0xff] }
  0xdc   :  { %4706 = vmatpush.bf16.msra.mxu2 %v7510_v41  ;;  %v92_v41 = vld.sshfl [vmem:[#allocation1 + $0x30] sm:$0xff pattern:$0x73625140] }
  0xdd   :  { %4719 = vmatpush.bf16.msra.mxu3 %v7518_v42  ;;  %v91_v42 = vld.sshfl [vmem:[#allocation1 + $0x28] sm:$0xff pattern:$0x73625140] }
  0xde   :  { %4681 = vmatpush.bf16.msra.mxu0 %v7493_v45  ;;  %v4475_v5 = vpop.f32.mrf.mxu0  ;;  %v7588_v45 = vld [vmem:[%s9593_s1 + $0x8f8] sm:$0xff] }
  0xdf   :  { %4694 = vmatpush.bf16.msra.mxu1 %v7501_v46  ;;  %v4476_v6 = vadd.f32 %v4475_v5, %v8590_v34  ;;  %v4488_v9 = vpop.f32.mrf.mxu1  ;;  %v7525_v34 = vld [vmem:[%s9593_s1 + $0x700] sm:$0xff]  ;;  %v226_v46 = vpack.c.bf16 %v90_v40, %v90_v40  ;;  %v7584_v5 = vld [vmem:[%s9593_s1 + $0x8d8] sm:$0xff]  ;;  %v7603_v40 = vld [vmem:[%s9593_s1 + $0x970] sm:$0xff] }
  0xe0   :  { %4707 = vmatpush.bf16.msra.mxu2 %v7509_v47  ;;  %v228_v47 = vpack.c.bf16 %v92_v41, %v92_v41  ;;  %v7611_v41 = vld [vmem:[%s9593_s1 + $0x9b0] sm:$0xff] }
  0xe1   :  { %4720 = vmatpush.bf16.msra.mxu3 %v7517_v48  ;;  %4682 = vmatmul.bf16.vlgmr.msra.gmra.mxu0 %v222_v57  ;;  %v4489_v12 = vadd.f32 %v4488_v9, %v4476_v6  ;;  %v227_v48 = vpack.c.bf16 %v91_v42, %v91_v42  ;;  %v7586_v57 = vld [vmem:[%s9593_s1 + $0x8e8] sm:$0xff]  ;;  %v7619_v42 = vld [vmem:[%s9593_s1 + $0x9f0] sm:$0xff] }
  0xe2   :  { %4726 = vmatpush.bf16.msrb.mxu0 %v7532_v49  ;;  %4695 = vmatmul.bf16.vlgmr.msra.gmra.mxu1 %v223_v59  ;;  %v229_v49 = vpack.c.bf16 %v93_v43, %v93_v43  ;;  %v7594_v43 = vld [vmem:[%s9593_s1 + $0x928] sm:$0xff] }
  0xe3   :  { %4739 = vmatpush.bf16.msrb.mxu1 %v7540_v50  ;;  %4708 = vmatmul.bf16.vlgmr.msra.gmra.mxu2 %v224_v58  ;;  %v7563_v50 = vld [vmem:[%s9593_s1 + $0x830] sm:$0xff] }
  0xe4   :  { %4752 = vmatpush.bf16.msrb.mxu2 %v7548_v55  ;;  %4721 = vmatmul.bf16.vlgmr.msra.gmra.mxu3 %v225_v60  ;;  %v7570_v55 = vld [vmem:[%s9593_s1 + $0x868] sm:$0xff]  ;;  %v7561_v60 = vld [vmem:[%s9593_s1 + $0x820] sm:$0xff] }
  0xe5   :  { %4765 = vmatpush.bf16.msrb.mxu3 %v7556_v56  ;;  %v7578_v56 = vld [vmem:[%s9593_s1 + $0x8a8] sm:$0xff] }
  0xe6   :  { %4727 = vmatpush.bf16.msrb.mxu0 %v7531_v61  ;;  %v4501_v17 = vpop.f32.mrf.mxu2  ;;  %v4477_v20 = vpop.f32.mrf.mxu0  ;;  %v7569_v61 = vld [vmem:[%s9593_s1 + $0x860] sm:$0xff] }
  0xe7   :  { %4740 = vmatpush.bf16.msrb.mxu1 %v7539_v62  ;;  %v4502_v18 = vadd.f32 %v4501_v17, %v4489_v12  ;;  %v4514_v19 = vpop.f32.mrf.mxu3  ;;  %v4490_v24 = vpop.f32.mrf.mxu1  ;;  %v7567_v12 = vld [vmem:[%s9593_s1 + $0x850] sm:$0xff]  ;;  %v7566_v17 = vld [vmem:[%s9593_s1 + $0x848] sm:$0xff] }
  0xe8   :  { %4753 = vmatpush.bf16.msrb.mxu2 %v7547_v63  ;;  %v7577_v63 = vld [vmem:[%s9593_s1 + $0x8a0] sm:$0xff]  ;;  %v7582_v20 = vld [vmem:[%s9593_s1 + $0x8c8] sm:$0xff] }
  0xe9   :  { %4766 = vmatpush.bf16.msrb.mxu3 %v7555_v0  ;;  %v8686_v21 = vadd.f32 %v4514_v19, %v4502_v18  ;;  %v7585_v0 = vld [vmem:[%s9593_s1 + $0x8e0] sm:$0xff]  ;;  %v30_v18 = vld [vmem:[%s9592_s0 + $0x48] sm:$0xff] }
  0xea   :  { %4728 = vmatpush.bf16.msrb.mxu0 %v7530_v1  ;;  %v7574_v19 = vld [vmem:[%s9593_s1 + $0x888] sm:$0xff]  ;;  %95 = vst [vmem:[#allocation1 + $0x20] ss:$4 sm:$0xff] %v30_v18  ;;  %v7565_v24 = vld [vmem:[%s9593_s1 + $0x840] sm:$0xff] }
  0xeb   :  { %4741 = vmatpush.bf16.msrb.mxu1 %v7538_v2  ;;  %v7560_v2 = vld [vmem:[%s9593_s1 + $0x818] sm:$0xff] }
  0xec   :  { %4754 = vmatpush.bf16.msrb.mxu2 %v7546_v3  ;;  %v7568_v3 = vld [vmem:[%s9593_s1 + $0x858] sm:$0xff] }
  0xed   :  { %4767 = vmatpush.bf16.msrb.mxu3 %v7554_v4  ;;  %v7576_v4 = vld [vmem:[%s9593_s1 + $0x898] sm:$0xff] }
  0xee   :  { %4729 = vmatpush.bf16.msrb.mxu0 %v7529_v7  ;;  %v4503_v32 = vpop.f32.mrf.mxu2 }
  0xef   :  { %4742 = vmatpush.bf16.msrb.mxu1 %v7537_v8  ;;  %v4516_v33 = vpop.f32.mrf.mxu3  ;;  %v99_v32 = vld.sshfl [vmem:[#allocation1 + $0x18] sm:$0xff pattern:$0x73625140] }
  0xf0   :  { %4755 = vmatpush.bf16.msrb.mxu2 %v7545_v10  ;;  %v7612_v33 = vld [vmem:[%s9593_s1 + $0x9b8] sm:$0xff] }
  0xf1   :  { %4768 = vmatpush.bf16.msrb.mxu3 %v7553_v11  ;;  %v7559_v11 = vld [vmem:[%s9593_s1 + $0x810] sm:$0xff]  ;;  %v100_v18 = vld.sshfl [vmem:[#allocation1 + $0x20] sm:$0xff pattern:$0x73625140] }
  0xf2   :  { %4730 = vmatpush.bf16.msrb.mxu0 %v7528_v13 }
  0xf3   :  { %4743 = vmatpush.bf16.msrb.mxu1 %v7536_v14  ;;  %v7575_v14 = vld [vmem:[%s9593_s1 + $0x890] sm:$0xff] }
  0xf4   :  { %4756 = vmatpush.bf16.msrb.mxu2 %v7544_v15  ;;  %v7583_v15 = vld [vmem:[%s9593_s1 + $0x8d0] sm:$0xff] }
  0xf5   :  { %4769 = vmatpush.bf16.msrb.mxu3 %v7552_v16  ;;  %v7558_v16 = vld [vmem:[%s9593_s1 + $0x808] sm:$0xff] }
  0xf6   :  { %4731 = vmatpush.bf16.msrb.mxu0 %v7527_v22 }
  0xf7   :  { %4744 = vmatpush.bf16.msrb.mxu1 %v7535_v23  ;;  %v7557_v23 = vld [vmem:[%s9593_s1 + $0x800] sm:$0xff] }
  0xf8   :  { %4757 = vmatpush.bf16.msrb.mxu2 %v7543_v25  ;;  %v7573_v25 = vld [vmem:[%s9593_s1 + $0x880] sm:$0xff] }
  0xf9   :  { %4770 = vmatpush.bf16.msrb.mxu3 %v7551_v26  ;;  %v7581_v26 = vld [vmem:[%s9593_s1 + $0x8c0] sm:$0xff] }
  0xfa   :  { %4732 = vmatpush.bf16.msrb.mxu0 %v7526_v27  ;;  %v7596_v27 = vld [vmem:[%s9593_s1 + $0x938] sm:$0xff] }
  0xfb   :  { %4745 = vmatpush.bf16.msrb.mxu1 %v7534_v28  ;;  %v7604_v28 = vld [vmem:[%s9593_s1 + $0x978] sm:$0xff] }
  0xfc   :  { %4758 = vmatpush.bf16.msrb.mxu2 %v7542_v30  ;;  %v98_v30 = vld.sshfl [vmem:[#allocation1 + $0x10] sm:$0xff pattern:$0x73625140] }
  0xfd   :  { %4771 = vmatpush.bf16.msrb.mxu3 %v7550_v31  ;;  %v97_v31 = vld.sshfl [vmem:[#allocation1 + $0x8] sm:$0xff pattern:$0x73625140] }
  0xfe   :  { %4733 = vmatpush.bf16.msrb.mxu0 %v7525_v34  ;;  %v4527_v58 = vpop.f32.mrf.mxu0  ;;  %v7620_v34 = vld [vmem:[%s9593_s1 + $0x9f8] sm:$0xff] }
  0xff   :  { %4746 = vmatpush.bf16.msrb.mxu1 %v7533_v35  ;;  %v4528_v59 = vadd.f32 %v4527_v58, %v8686_v21  ;;  %v4540_v62 = vpop.f32.mrf.mxu1  ;;  %v230_v35 = vpack.c.bf16 %v96_v29, %v96_v29  ;;  %v7616_v58 = vld [vmem:[%s9593_s1 + $0x9d8] sm:$0xff]  ;;  %v7635_v29 = vld [vmem:[%s9593_s1 + $0xa70] sm:$0xff] }
 0x100   :  { %4759 = vmatpush.bf16.msrb.mxu2 %v7541_v36  ;;  %v232_v36 = vpack.c.bf16 %v98_v30, %v98_v30  ;;  %v7643_v30 = vld [vmem:[%s9593_s1 + $0xab0] sm:$0xff] }
 0x101   :  { %4772 = vmatpush.bf16.msrb.mxu3 %v7549_v37  ;;  %4734 = vmatmul.bf16.vlgmr.msrb.gmra.mxu0 %v226_v46  ;;  %v4541_v1 = vadd.f32 %v4540_v62, %v4528_v59  ;;  %v231_v37 = vpack.c.bf16 %v97_v31, %v97_v31  ;;  %v7618_v46 = vld [vmem:[%s9593_s1 + $0x9e8] sm:$0xff]  ;;  %v7651_v31 = vld [vmem:[%s9593_s1 + $0xaf0] sm:$0xff] }
 0x102   :  { %4778 = vmatpush.bf16.msra.mxu0 %v7564_v38  ;;  %4747 = vmatmul.bf16.vlgmr.msrb.gmra.mxu1 %v227_v48  ;;  %v233_v38 = vpack.c.bf16 %v99_v32, %v99_v32  ;;  %v7626_v32 = vld [vmem:[%s9593_s1 + $0xa28] sm:$0xff] }
 0x103   :  { %4791 = vmatpush.bf16.msra.mxu1 %v7572_v39  ;;  %4760 = vmatmul.bf16.vlgmr.msrb.gmra.mxu2 %v228_v47  ;;  %v7595_v39 = vld [vmem:[%s9593_s1 + $0x930] sm:$0xff] }
 0x104   :  { %4804 = vmatpush.bf16.msra.mxu2 %v7580_v44  ;;  %4773 = vmatmul.bf16.vlgmr.msrb.gmra.mxu3 %v229_v49  ;;  %v7602_v44 = vld [vmem:[%s9593_s1 + $0x968] sm:$0xff]  ;;  %v7593_v49 = vld [vmem:[%s9593_s1 + $0x920] sm:$0xff] }
 0x105   :  { %4817 = vmatpush.bf16.msra.mxu3 %v7588_v45  ;;  %v7610_v45 = vld [vmem:[%s9593_s1 + $0x9a8] sm:$0xff] }
 0x106   :  { %4779 = vmatpush.bf16.msra.mxu0 %v7563_v50  ;;  %v4553_v6 = vpop.f32.mrf.mxu2  ;;  %v4529_v9 = vpop.f32.mrf.mxu0  ;;  %v7601_v50 = vld [vmem:[%s9593_s1 + $0x960] sm:$0xff] }
 0x107   :  { %4792 = vmatpush.bf16.msra.mxu1 %v7571_v51  ;;  %v4554_v7 = vadd.f32 %v4553_v6, %v4541_v1  ;;  %v4566_v8 = vpop.f32.mrf.mxu3  ;;  %v4542_v13 = vpop.f32.mrf.mxu1  ;;  %v7599_v1 = vld [vmem:[%s9593_s1 + $0x950] sm:$0xff]  ;;  %v7598_v6 = vld [vmem:[%s9593_s1 + $0x948] sm:$0xff] }
 0x108   :  { %4805 = vmatpush.bf16.msra.mxu2 %v7579_v52  ;;  %v7609_v52 = vld [vmem:[%s9593_s1 + $0x9a0] sm:$0xff]  ;;  %v7614_v9 = vld [vmem:[%s9593_s1 + $0x9c8] sm:$0xff] }
 0x109   :  { %4818 = vmatpush.bf16.msra.mxu3 %v7587_v53  ;;  %v8788_v10 = vadd.f32 %v4566_v8, %v4554_v7  ;;  %v7617_v53 = vld [vmem:[%s9593_s1 + $0x9e0] sm:$0xff]  ;;  %v31_v7 = vld [vmem:[%s9592_s0 + $0x50] sm:$0xff]  ;;  %v7606_v8 = vld [vmem:[%s9593_s1 + $0x988] sm:$0xff] }
 0x10a   :  { %4780 = vmatpush.bf16.msra.mxu0 %v7562_v54  ;;  %104 = vst [vmem:[#allocation1] ss:$4 sm:$0xff] %v31_v7  ;;  %v7597_v13 = vld [vmem:[%s9593_s1 + $0x940] sm:$0xff] }
 0x10b   :  { %4793 = vmatpush.bf16.msra.mxu1 %v7570_v55  ;;  %v7592_v55 = vld [vmem:[%s9593_s1 + $0x918] sm:$0xff] }
 0x10c   :  { %4806 = vmatpush.bf16.msra.mxu2 %v7578_v56  ;;  %v7600_v56 = vld [vmem:[%s9593_s1 + $0x958] sm:$0xff] }
 0x10d   :  { %4819 = vmatpush.bf16.msra.mxu3 %v7586_v57  ;;  %v7608_v57 = vld [vmem:[%s9593_s1 + $0x998] sm:$0xff] }
 0x10e   :  { %4781 = vmatpush.bf16.msra.mxu0 %v7561_v60  ;;  %v4555_v21 = vpop.f32.mrf.mxu2 }
 0x10f   :  { %4794 = vmatpush.bf16.msra.mxu1 %v7569_v61  ;;  %v4568_v22 = vpop.f32.mrf.mxu3  ;;  %v103_v21 = vld.sshfl [vmem:[#allocation1 + $0x38] sm:$0xff pattern:$0x73625140] }
 0x110   :  { %4807 = vmatpush.bf16.msra.mxu2 %v7577_v63  ;;  %v7644_v22 = vld [vmem:[%s9593_s1 + $0xab8] sm:$0xff] }
 0x111   :  { %4820 = vmatpush.bf16.msra.mxu3 %v7585_v0  ;;  %v7591_v0 = vld [vmem:[%s9593_s1 + $0x910] sm:$0xff]  ;;  %v106_v7 = vld.sshfl [vmem:[#allocation1] sm:$0xff pattern:$0x73625140] }
 0x112   :  { %4782 = vmatpush.bf16.msra.mxu0 %v7560_v2 }
 0x113   :  { %4795 = vmatpush.bf16.msra.mxu1 %v7568_v3  ;;  %v7607_v3 = vld [vmem:[%s9593_s1 + $0x990] sm:$0xff] }
 0x114   :  { %4808 = vmatpush.bf16.msra.mxu2 %v7576_v4  ;;  %v7615_v4 = vld [vmem:[%s9593_s1 + $0x9d0] sm:$0xff] }
 0x115   :  { %4821 = vmatpush.bf16.msra.mxu3 %v7584_v5  ;;  %v7590_v5 = vld [vmem:[%s9593_s1 + $0x908] sm:$0xff] }
 0x116   :  { %4783 = vmatpush.bf16.msra.mxu0 %v7559_v11 }
 0x117   :  { %4796 = vmatpush.bf16.msra.mxu1 %v7567_v12  ;;  %v7589_v12 = vld [vmem:[%s9593_s1 + $0x900] sm:$0xff] }
 0x118   :  { %4809 = vmatpush.bf16.msra.mxu2 %v7575_v14  ;;  %v7605_v14 = vld [vmem:[%s9593_s1 + $0x980] sm:$0xff] }
 0x119   :  { %4822 = vmatpush.bf16.msra.mxu3 %v7583_v15  ;;  %v7613_v15 = vld [vmem:[%s9593_s1 + $0x9c0] sm:$0xff] }
 0x11a   :  { %4784 = vmatpush.bf16.msra.mxu0 %v7558_v16  ;;  %v7628_v16 = vld [vmem:[%s9593_s1 + $0xa38] sm:$0xff] }
 0x11b   :  { %4797 = vmatpush.bf16.msra.mxu1 %v7566_v17  ;;  %v7636_v17 = vld [vmem:[%s9593_s1 + $0xa78] sm:$0xff] }
 0x11c   :  { %4810 = vmatpush.bf16.msra.mxu2 %v7574_v19  ;;  %v102_v19 = vld.sshfl [vmem:[#allocation1 + $0x30] sm:$0xff pattern:$0x73625140] }
 0x11d   :  { %4823 = vmatpush.bf16.msra.mxu3 %v7582_v20  ;;  %v101_v20 = vld.sshfl [vmem:[#allocation1 + $0x28] sm:$0xff pattern:$0x73625140] }
 0x11e   :  { %4785 = vmatpush.bf16.msra.mxu0 %v7557_v23  ;;  %v4579_v47 = vpop.f32.mrf.mxu0  ;;  %v7652_v23 = vld [vmem:[%s9593_s1 + $0xaf8] sm:$0xff] }
 0x11f   :  { %4798 = vmatpush.bf16.msra.mxu1 %v7565_v24  ;;  %v4580_v48 = vadd.f32 %v4579_v47, %v8788_v10  ;;  %v4592_v51 = vpop.f32.mrf.mxu1  ;;  %v234_v24 = vpack.c.bf16 %v100_v18, %v100_v18  ;;  %v7648_v47 = vld [vmem:[%s9593_s1 + $0xad8] sm:$0xff]  ;;  %v7667_v18 = vld [vmem:[%s9593_s1 + $0xb70] sm:$0xff] }
 0x120   :  { %4811 = vmatpush.bf16.msra.mxu2 %v7573_v25  ;;  %v236_v25 = vpack.c.bf16 %v102_v19, %v102_v19  ;;  %v7675_v19 = vld [vmem:[%s9593_s1 + $0xbb0] sm:$0xff] }
 0x121   :  { %4824 = vmatpush.bf16.msra.mxu3 %v7581_v26  ;;  %4786 = vmatmul.bf16.vlgmr.msra.gmra.mxu0 %v230_v35  ;;  %v4593_v54 = vadd.f32 %v4592_v51, %v4580_v48  ;;  %v235_v26 = vpack.c.bf16 %v101_v20, %v101_v20  ;;  %v7650_v35 = vld [vmem:[%s9593_s1 + $0xae8] sm:$0xff]  ;;  %v7683_v20 = vld [vmem:[%s9593_s1 + $0xbf0] sm:$0xff] }
 0x122   :  { %4830 = vmatpush.bf16.msrb.mxu0 %v7596_v27  ;;  %4799 = vmatmul.bf16.vlgmr.msra.gmra.mxu1 %v231_v37  ;;  %v237_v27 = vpack.c.bf16 %v103_v21, %v103_v21  ;;  %v7658_v21 = vld [vmem:[%s9593_s1 + $0xb28] sm:$0xff] }
 0x123   :  { %4843 = vmatpush.bf16.msrb.mxu1 %v7604_v28  ;;  %4812 = vmatmul.bf16.vlgmr.msra.gmra.mxu2 %v232_v36  ;;  %v7627_v28 = vld [vmem:[%s9593_s1 + $0xa30] sm:$0xff] }
 0x124   :  { %4856 = vmatpush.bf16.msrb.mxu2 %v7612_v33  ;;  %4825 = vmatmul.bf16.vlgmr.msra.gmra.mxu3 %v233_v38  ;;  %v7634_v33 = vld [vmem:[%s9593_s1 + $0xa68] sm:$0xff]  ;;  %v7625_v38 = vld [vmem:[%s9593_s1 + $0xa20] sm:$0xff] }
 0x125   :  { %4869 = vmatpush.bf16.msrb.mxu3 %v7620_v34  ;;  %v7642_v34 = vld [vmem:[%s9593_s1 + $0xaa8] sm:$0xff] }
 0x126   :  { %4831 = vmatpush.bf16.msrb.mxu0 %v7595_v39  ;;  %v4605_v59 = vpop.f32.mrf.mxu2  ;;  %v4581_v62 = vpop.f32.mrf.mxu0  ;;  %v7633_v39 = vld [vmem:[%s9593_s1 + $0xa60] sm:$0xff] }
 0x127   :  { %4844 = vmatpush.bf16.msrb.mxu1 %v7603_v40  ;;  %v4606_v60 = vadd.f32 %v4605_v59, %v4593_v54  ;;  %v4618_v61 = vpop.f32.mrf.mxu3  ;;  %v4594_v2 = vpop.f32.mrf.mxu1  ;;  %v7631_v54 = vld [vmem:[%s9593_s1 + $0xa50] sm:$0xff]  ;;  %v7630_v59 = vld [vmem:[%s9593_s1 + $0xa48] sm:$0xff] }
 0x128   :  { %4857 = vmatpush.bf16.msrb.mxu2 %v7611_v41  ;;  %v7641_v41 = vld [vmem:[%s9593_s1 + $0xaa0] sm:$0xff]  ;;  %v7646_v62 = vld [vmem:[%s9593_s1 + $0xac8] sm:$0xff] }
 0x129   :  { %4870 = vmatpush.bf16.msrb.mxu3 %v7619_v42  ;;  %v8890_v63 = vadd.f32 %v4618_v61, %v4606_v60  ;;  %v7649_v42 = vld [vmem:[%s9593_s1 + $0xae0] sm:$0xff]  ;;  %v32_v60 = vld [vmem:[%s9592_s0 + $0x58] sm:$0xff]  ;;  %v7638_v61 = vld [vmem:[%s9593_s1 + $0xa88] sm:$0xff] }
 0x12a   :  { %4832 = vmatpush.bf16.msrb.mxu0 %v7594_v43  ;;  %105 = vst [vmem:[#allocation1 + $0x20] ss:$4 sm:$0xff] %v32_v60  ;;  %v7629_v2 = vld [vmem:[%s9593_s1 + $0xa40] sm:$0xff] }
 0x12b   :  { %4845 = vmatpush.bf16.msrb.mxu1 %v7602_v44  ;;  %v7624_v44 = vld [vmem:[%s9593_s1 + $0xa18] sm:$0xff] }
 0x12c   :  { %4858 = vmatpush.bf16.msrb.mxu2 %v7610_v45  ;;  %v7632_v45 = vld [vmem:[%s9593_s1 + $0xa58] sm:$0xff] }
 0x12d   :  { %4871 = vmatpush.bf16.msrb.mxu3 %v7618_v46  ;;  %v7640_v46 = vld [vmem:[%s9593_s1 + $0xa98] sm:$0xff] }
 0x12e   :  { %4833 = vmatpush.bf16.msrb.mxu0 %v7593_v49  ;;  %v4607_v10 = vpop.f32.mrf.mxu2 }
 0x12f   :  { %4846 = vmatpush.bf16.msrb.mxu1 %v7601_v50  ;;  %v4620_v11 = vpop.f32.mrf.mxu3  ;;  %v109_v10 = vld.sshfl [vmem:[#allocation1 + $0x18] sm:$0xff pattern:$0x73625140] }
 0x130   :  { %4859 = vmatpush.bf16.msrb.mxu2 %v7609_v52  ;;  %v7676_v11 = vld [vmem:[%s9593_s1 + $0xbb8] sm:$0xff] }
 0x131   :  { %4872 = vmatpush.bf16.msrb.mxu3 %v7617_v53  ;;  %v7623_v53 = vld [vmem:[%s9593_s1 + $0xa10] sm:$0xff]  ;;  %v110_v60 = vld.sshfl [vmem:[#allocation1 + $0x20] sm:$0xff pattern:$0x73625140] }
 0x132   :  { %4834 = vmatpush.bf16.msrb.mxu0 %v7592_v55 }
 0x133   :  { %4847 = vmatpush.bf16.msrb.mxu1 %v7600_v56  ;;  %v7639_v56 = vld [vmem:[%s9593_s1 + $0xa90] sm:$0xff] }
 0x134   :  { %4860 = vmatpush.bf16.msrb.mxu2 %v7608_v57  ;;  %v7647_v57 = vld [vmem:[%s9593_s1 + $0xad0] sm:$0xff] }
 0x135   :  { %4873 = vmatpush.bf16.msrb.mxu3 %v7616_v58  ;;  %v7622_v58 = vld [vmem:[%s9593_s1 + $0xa08] sm:$0xff] }
 0x136   :  { %4835 = vmatpush.bf16.msrb.mxu0 %v7591_v0 }
 0x137   :  { %4848 = vmatpush.bf16.msrb.mxu1 %v7599_v1  ;;  %v7621_v1 = vld [vmem:[%s9593_s1 + $0xa00] sm:$0xff] }
 0x138   :  { %4861 = vmatpush.bf16.msrb.mxu2 %v7607_v3  ;;  %v7637_v3 = vld [vmem:[%s9593_s1 + $0xa80] sm:$0xff] }
 0x139   :  { %4874 = vmatpush.bf16.msrb.mxu3 %v7615_v4  ;;  %v7645_v4 = vld [vmem:[%s9593_s1 + $0xac0] sm:$0xff] }
 0x13a   :  { %4836 = vmatpush.bf16.msrb.mxu0 %v7590_v5  ;;  %v7660_v5 = vld [vmem:[%s9593_s1 + $0xb38] sm:$0xff] }
 0x13b   :  { %4849 = vmatpush.bf16.msrb.mxu1 %v7598_v6  ;;  %v7668_v6 = vld [vmem:[%s9593_s1 + $0xb78] sm:$0xff] }
 0x13c   :  { %4862 = vmatpush.bf16.msrb.mxu2 %v7606_v8  ;;  %v108_v8 = vld.sshfl [vmem:[#allocation1 + $0x10] sm:$0xff pattern:$0x73625140] }
 0x13d   :  { %4875 = vmatpush.bf16.msrb.mxu3 %v7614_v9  ;;  %v107_v9 = vld.sshfl [vmem:[#allocation1 + $0x8] sm:$0xff pattern:$0x73625140] }
 0x13e   :  { %4837 = vmatpush.bf16.msrb.mxu0 %v7589_v12  ;;  %v4631_v36 = vpop.f32.mrf.mxu0  ;;  %v7684_v12 = vld [vmem:[%s9593_s1 + $0xbf8] sm:$0xff] }
 0x13f   :  { %4850 = vmatpush.bf16.msrb.mxu1 %v7597_v13  ;;  %v4632_v37 = vadd.f32 %v4631_v36, %v8890_v63  ;;  %v4644_v40 = vpop.f32.mrf.mxu1  ;;  %v238_v13 = vpack.c.bf16 %v106_v7, %v106_v7  ;;  %v7680_v36 = vld [vmem:[%s9593_s1 + $0xbd8] sm:$0xff]  ;;  %v7699_v7 = vld [vmem:[%s9593_s1 + $0xc70] sm:$0xff] }
 0x140   :  { %4863 = vmatpush.bf16.msrb.mxu2 %v7605_v14  ;;  %v240_v14 = vpack.c.bf16 %v108_v8, %v108_v8  ;;  %v7707_v8 = vld [vmem:[%s9593_s1 + $0xcb0] sm:$0xff] }
 0x141   :  { %4876 = vmatpush.bf16.msrb.mxu3 %v7613_v15  ;;  %4838 = vmatmul.bf16.vlgmr.msrb.gmra.mxu0 %v234_v24  ;;  %v4645_v43 = vadd.f32 %v4644_v40, %v4632_v37  ;;  %v239_v15 = vpack.c.bf16 %v107_v9, %v107_v9  ;;  %v7682_v24 = vld [vmem:[%s9593_s1 + $0xbe8] sm:$0xff]  ;;  %v7715_v9 = vld [vmem:[%s9593_s1 + $0xcf0] sm:$0xff] }
 0x142   :  { %4882 = vmatpush.bf16.msra.mxu0 %v7628_v16  ;;  %4851 = vmatmul.bf16.vlgmr.msrb.gmra.mxu1 %v235_v26  ;;  %v241_v16 = vpack.c.bf16 %v109_v10, %v109_v10  ;;  %v7690_v10 = vld [vmem:[%s9593_s1 + $0xc28] sm:$0xff] }
 0x143   :  { %4895 = vmatpush.bf16.msra.mxu1 %v7636_v17  ;;  %4864 = vmatmul.bf16.vlgmr.msrb.gmra.mxu2 %v236_v25  ;;  %v7659_v17 = vld [vmem:[%s9593_s1 + $0xb30] sm:$0xff] }
 0x144   :  { %4908 = vmatpush.bf16.msra.mxu2 %v7644_v22  ;;  %4877 = vmatmul.bf16.vlgmr.msrb.gmra.mxu3 %v237_v27  ;;  %v7666_v22 = vld [vmem:[%s9593_s1 + $0xb68] sm:$0xff]  ;;  %v7657_v27 = vld [vmem:[%s9593_s1 + $0xb20] sm:$0xff] }
 0x145   :  { %4921 = vmatpush.bf16.msra.mxu3 %v7652_v23  ;;  %v7674_v23 = vld [vmem:[%s9593_s1 + $0xba8] sm:$0xff] }
 0x146   :  { %4883 = vmatpush.bf16.msra.mxu0 %v7627_v28  ;;  %v4657_v48 = vpop.f32.mrf.mxu2  ;;  %v4633_v51 = vpop.f32.mrf.mxu0  ;;  %v7665_v28 = vld [vmem:[%s9593_s1 + $0xb60] sm:$0xff] }
 0x147   :  { %4896 = vmatpush.bf16.msra.mxu1 %v7635_v29  ;;  %v4658_v49 = vadd.f32 %v4657_v48, %v4645_v43  ;;  %v4670_v50 = vpop.f32.mrf.mxu3  ;;  %v4646_v55 = vpop.f32.mrf.mxu1  ;;  %v7663_v43 = vld [vmem:[%s9593_s1 + $0xb50] sm:$0xff]  ;;  %v7662_v48 = vld [vmem:[%s9593_s1 + $0xb48] sm:$0xff] }
 0x148   :  { %4909 = vmatpush.bf16.msra.mxu2 %v7643_v30  ;;  %v7673_v30 = vld [vmem:[%s9593_s1 + $0xba0] sm:$0xff]  ;;  %v7678_v51 = vld [vmem:[%s9593_s1 + $0xbc8] sm:$0xff] }
 0x149   :  { %4922 = vmatpush.bf16.msra.mxu3 %v7651_v31  ;;  %v8992_v52 = vadd.f32 %v4670_v50, %v4658_v49  ;;  %v7681_v31 = vld [vmem:[%s9593_s1 + $0xbe0] sm:$0xff]  ;;  %v7670_v50 = vld [vmem:[%s9593_s1 + $0xb88] sm:$0xff] }
 0x14a   :  { %4884 = vmatpush.bf16.msra.mxu0 %v7626_v32  ;;  %v33_v49 = vld [vmem:[%s9592_s0 + $0x60] sm:$0xff] }
 0x14b   :  { %4897 = vmatpush.bf16.msra.mxu1 %v7634_v33  ;;  %v7656_v33 = vld [vmem:[%s9593_s1 + $0xb18] sm:$0xff]  ;;  %114 = vst [vmem:[#allocation1] ss:$4 sm:$0xff] %v33_v49  ;;  %v7661_v55 = vld [vmem:[%s9593_s1 + $0xb40] sm:$0xff] }
 0x14c   :  { %4910 = vmatpush.bf16.msra.mxu2 %v7642_v34  ;;  %v7664_v34 = vld [vmem:[%s9593_s1 + $0xb58] sm:$0xff] }
 0x14d   :  { %4923 = vmatpush.bf16.msra.mxu3 %v7650_v35  ;;  %v7672_v35 = vld [vmem:[%s9593_s1 + $0xb98] sm:$0xff] }
 0x14e   :  { %4885 = vmatpush.bf16.msra.mxu0 %v7625_v38  ;;  %v4659_v63 = vpop.f32.mrf.mxu2 }
 0x14f   :  { %4898 = vmatpush.bf16.msra.mxu1 %v7633_v39  ;;  %v4672_v0 = vpop.f32.mrf.mxu3  ;;  %v113_v63 = vld.sshfl [vmem:[#allocation1 + $0x38] sm:$0xff pattern:$0x73625140] }
 0x150   :  { %4911 = vmatpush.bf16.msra.mxu2 %v7641_v41  ;;  %v7708_v0 = vld [vmem:[%s9593_s1 + $0xcb8] sm:$0xff] }
 0x151   :  { %4924 = vmatpush.bf16.msra.mxu3 %v7649_v42  ;;  %v7655_v42 = vld [vmem:[%s9593_s1 + $0xb10] sm:$0xff] }
 0x152   :  { %4886 = vmatpush.bf16.msra.mxu0 %v7624_v44  ;;  %v116_v49 = vld.sshfl [vmem:[#allocation1] sm:$0xff pattern:$0x73625140] }
 0x153   :  { %4899 = vmatpush.bf16.msra.mxu1 %v7632_v45  ;;  %v7671_v45 = vld [vmem:[%s9593_s1 + $0xb90] sm:$0xff] }
 0x154   :  { %4912 = vmatpush.bf16.msra.mxu2 %v7640_v46  ;;  %v7679_v46 = vld [vmem:[%s9593_s1 + $0xbd0] sm:$0xff] }
 0x155   :  { %4925 = vmatpush.bf16.msra.mxu3 %v7648_v47  ;;  %v7654_v47 = vld [vmem:[%s9593_s1 + $0xb08] sm:$0xff] }
 0x156   :  { %4887 = vmatpush.bf16.msra.mxu0 %v7623_v53 }
 0x157   :  { %4900 = vmatpush.bf16.msra.mxu1 %v7631_v54  ;;  %v7653_v54 = vld [vmem:[%s9593_s1 + $0xb00] sm:$0xff] }
 0x158   :  { %4913 = vmatpush.bf16.msra.mxu2 %v7639_v56  ;;  %v7669_v56 = vld [vmem:[%s9593_s1 + $0xb80] sm:$0xff] }
 0x159   :  { %4926 = vmatpush.bf16.msra.mxu3 %v7647_v57  ;;  %v7677_v57 = vld [vmem:[%s9593_s1 + $0xbc0] sm:$0xff] }
 0x15a   :  { %4888 = vmatpush.bf16.msra.mxu0 %v7622_v58  ;;  %v7692_v58 = vld [vmem:[%s9593_s1 + $0xc38] sm:$0xff] }
 0x15b   :  { %4901 = vmatpush.bf16.msra.mxu1 %v7630_v59  ;;  %v7700_v59 = vld [vmem:[%s9593_s1 + $0xc78] sm:$0xff] }
 0x15c   :  { %4914 = vmatpush.bf16.msra.mxu2 %v7638_v61  ;;  %v112_v61 = vld.sshfl [vmem:[#allocation1 + $0x30] sm:$0xff pattern:$0x73625140] }
 0x15d   :  { %4927 = vmatpush.bf16.msra.mxu3 %v7646_v62  ;;  %v111_v62 = vld.sshfl [vmem:[#allocation1 + $0x28] sm:$0xff pattern:$0x73625140] }
 0x15e   :  { %4889 = vmatpush.bf16.msra.mxu0 %v7621_v1  ;;  %v4683_v25 = vpop.f32.mrf.mxu0  ;;  %v7716_v1 = vld [vmem:[%s9593_s1 + $0xcf8] sm:$0xff] }
 0x15f   :  { %4902 = vmatpush.bf16.msra.mxu1 %v7629_v2  ;;  %v4684_v26 = vadd.f32 %v4683_v25, %v8992_v52  ;;  %v4696_v29 = vpop.f32.mrf.mxu1  ;;  %v242_v2 = vpack.c.bf16 %v110_v60, %v110_v60  ;;  %v7712_v25 = vld [vmem:[%s9593_s1 + $0xcd8] sm:$0xff]  ;;  %v7731_v60 = vld [vmem:[%s9593_s1 + $0xd70] sm:$0xff] }
 0x160   :  { %4915 = vmatpush.bf16.msra.mxu2 %v7637_v3  ;;  %v244_v3 = vpack.c.bf16 %v112_v61, %v112_v61  ;;  %v7739_v61 = vld [vmem:[%s9593_s1 + $0xdb0] sm:$0xff] }
 0x161   :  { %4928 = vmatpush.bf16.msra.mxu3 %v7645_v4  ;;  %4890 = vmatmul.bf16.vlgmr.msra.gmra.mxu0 %v238_v13  ;;  %v4697_v32 = vadd.f32 %v4696_v29, %v4684_v26  ;;  %v243_v4 = vpack.c.bf16 %v111_v62, %v111_v62  ;;  %v7714_v13 = vld [vmem:[%s9593_s1 + $0xce8] sm:$0xff]  ;;  %v7747_v62 = vld [vmem:[%s9593_s1 + $0xdf0] sm:$0xff] }
 0x162   :  { %4934 = vmatpush.bf16.msrb.mxu0 %v7660_v5  ;;  %4903 = vmatmul.bf16.vlgmr.msra.gmra.mxu1 %v239_v15  ;;  %v245_v5 = vpack.c.bf16 %v113_v63, %v113_v63  ;;  %v7722_v63 = vld [vmem:[%s9593_s1 + $0xd28] sm:$0xff] }
 0x163   :  { %4947 = vmatpush.bf16.msrb.mxu1 %v7668_v6  ;;  %4916 = vmatmul.bf16.vlgmr.msra.gmra.mxu2 %v240_v14  ;;  %v7691_v6 = vld [vmem:[%s9593_s1 + $0xc30] sm:$0xff] }
 0x164   :  { %4960 = vmatpush.bf16.msrb.mxu2 %v7676_v11  ;;  %4929 = vmatmul.bf16.vlgmr.msra.gmra.mxu3 %v241_v16  ;;  %v7698_v11 = vld [vmem:[%s9593_s1 + $0xc68] sm:$0xff]  ;;  %v7689_v16 = vld [vmem:[%s9593_s1 + $0xc20] sm:$0xff] }
 0x165   :  { %4973 = vmatpush.bf16.msrb.mxu3 %v7684_v12  ;;  %v7706_v12 = vld [vmem:[%s9593_s1 + $0xca8] sm:$0xff] }
 0x166   :  { %4935 = vmatpush.bf16.msrb.mxu0 %v7659_v17  ;;  %v4709_v37 = vpop.f32.mrf.mxu2  ;;  %v4685_v40 = vpop.f32.mrf.mxu0  ;;  %v7697_v17 = vld [vmem:[%s9593_s1 + $0xc60] sm:$0xff] }
 0x167   :  { %4948 = vmatpush.bf16.msrb.mxu1 %v7667_v18  ;;  %v4710_v38 = vadd.f32 %v4709_v37, %v4697_v32  ;;  %v4722_v39 = vpop.f32.mrf.mxu3  ;;  %v4698_v44 = vpop.f32.mrf.mxu1  ;;  %v7695_v32 = vld [vmem:[%s9593_s1 + $0xc50] sm:$0xff]  ;;  %v7694_v37 = vld [vmem:[%s9593_s1 + $0xc48] sm:$0xff] }
 0x168   :  { %4961 = vmatpush.bf16.msrb.mxu2 %v7675_v19  ;;  %v7705_v19 = vld [vmem:[%s9593_s1 + $0xca0] sm:$0xff]  ;;  %v7710_v40 = vld [vmem:[%s9593_s1 + $0xcc8] sm:$0xff] }
 0x169   :  { %4974 = vmatpush.bf16.msrb.mxu3 %v7683_v20  ;;  %v9094_v41 = vadd.f32 %v4722_v39, %v4710_v38  ;;  %v7713_v20 = vld [vmem:[%s9593_s1 + $0xce0] sm:$0xff]  ;;  %v34_v38 = vld [vmem:[%s9592_s0 + $0x68] sm:$0xff] }
 0x16a   :  { %4936 = vmatpush.bf16.msrb.mxu0 %v7658_v21  ;;  %v7702_v39 = vld [vmem:[%s9593_s1 + $0xc88] sm:$0xff]  ;;  %115 = vst [vmem:[#allocation1 + $0x20] ss:$4 sm:$0xff] %v34_v38  ;;  %v7693_v44 = vld [vmem:[%s9593_s1 + $0xc40] sm:$0xff] }
 0x16b   :  { %4949 = vmatpush.bf16.msrb.mxu1 %v7666_v22  ;;  %v7688_v22 = vld [vmem:[%s9593_s1 + $0xc18] sm:$0xff] }
 0x16c   :  { %4962 = vmatpush.bf16.msrb.mxu2 %v7674_v23  ;;  %v7696_v23 = vld [vmem:[%s9593_s1 + $0xc58] sm:$0xff] }
 0x16d   :  { %4975 = vmatpush.bf16.msrb.mxu3 %v7682_v24  ;;  %v7704_v24 = vld [vmem:[%s9593_s1 + $0xc98] sm:$0xff] }
 0x16e   :  { %4937 = vmatpush.bf16.msrb.mxu0 %v7657_v27  ;;  %v4711_v52 = vpop.f32.mrf.mxu2 }
 0x16f   :  { %4950 = vmatpush.bf16.msrb.mxu1 %v7665_v28  ;;  %v4724_v53 = vpop.f32.mrf.mxu3  ;;  %v119_v52 = vld.sshfl [vmem:[#allocation1 + $0x18] sm:$0xff pattern:$0x73625140] }
 0x170   :  { %4963 = vmatpush.bf16.msrb.mxu2 %v7673_v30  ;;  %v7740_v53 = vld [vmem:[%s9593_s1 + $0xdb8] sm:$0xff] }
 0x171   :  { %4976 = vmatpush.bf16.msrb.mxu3 %v7681_v31  ;;  %v7687_v31 = vld [vmem:[%s9593_s1 + $0xc10] sm:$0xff]  ;;  %v120_v38 = vld.sshfl [vmem:[#allocation1 + $0x20] sm:$0xff pattern:$0x73625140] }
 0x172   :  { %4938 = vmatpush.bf16.msrb.mxu0 %v7656_v33 }
 0x173   :  { %4951 = vmatpush.bf16.msrb.mxu1 %v7664_v34  ;;  %v7703_v34 = vld [vmem:[%s9593_s1 + $0xc90] sm:$0xff] }
 0x174   :  { %4964 = vmatpush.bf16.msrb.mxu2 %v7672_v35  ;;  %v7711_v35 = vld [vmem:[%s9593_s1 + $0xcd0] sm:$0xff] }
 0x175   :  { %4977 = vmatpush.bf16.msrb.mxu3 %v7680_v36  ;;  %v7686_v36 = vld [vmem:[%s9593_s1 + $0xc08] sm:$0xff] }
 0x176   :  { %4939 = vmatpush.bf16.msrb.mxu0 %v7655_v42 }
 0x177   :  { %4952 = vmatpush.bf16.msrb.mxu1 %v7663_v43  ;;  %v7685_v43 = vld [vmem:[%s9593_s1 + $0xc00] sm:$0xff] }
 0x178   :  { %4965 = vmatpush.bf16.msrb.mxu2 %v7671_v45  ;;  %v7701_v45 = vld [vmem:[%s9593_s1 + $0xc80] sm:$0xff] }
 0x179   :  { %4978 = vmatpush.bf16.msrb.mxu3 %v7679_v46  ;;  %v7709_v46 = vld [vmem:[%s9593_s1 + $0xcc0] sm:$0xff] }
 0x17a   :  { %4940 = vmatpush.bf16.msrb.mxu0 %v7654_v47  ;;  %v7724_v47 = vld [vmem:[%s9593_s1 + $0xd38] sm:$0xff] }
 0x17b   :  { %4953 = vmatpush.bf16.msrb.mxu1 %v7662_v48  ;;  %v7732_v48 = vld [vmem:[%s9593_s1 + $0xd78] sm:$0xff] }
 0x17c   :  { %4966 = vmatpush.bf16.msrb.mxu2 %v7670_v50  ;;  %v118_v50 = vld.sshfl [vmem:[#allocation1 + $0x10] sm:$0xff pattern:$0x73625140] }
 0x17d   :  { %4979 = vmatpush.bf16.msrb.mxu3 %v7678_v51  ;;  %v117_v51 = vld.sshfl [vmem:[#allocation1 + $0x8] sm:$0xff pattern:$0x73625140] }
 0x17e   :  { %4941 = vmatpush.bf16.msrb.mxu0 %v7653_v54  ;;  %v4735_v14 = vpop.f32.mrf.mxu0  ;;  %v7748_v54 = vld [vmem:[%s9593_s1 + $0xdf8] sm:$0xff] }
 0x17f   :  { %4954 = vmatpush.bf16.msrb.mxu1 %v7661_v55  ;;  %v4736_v15 = vadd.f32 %v4735_v14, %v9094_v41  ;;  %v4748_v18 = vpop.f32.mrf.mxu1  ;;  %v246_v55 = vpack.c.bf16 %v116_v49, %v116_v49  ;;  %v7744_v14 = vld [vmem:[%s9593_s1 + $0xdd8] sm:$0xff]  ;;  %v7763_v49 = vld [vmem:[%s9593_s1 + $0xe70] sm:$0xff] }
 0x180   :  { %4967 = vmatpush.bf16.msrb.mxu2 %v7669_v56  ;;  %v248_v56 = vpack.c.bf16 %v118_v50, %v118_v50  ;;  %v7771_v50 = vld [vmem:[%s9593_s1 + $0xeb0] sm:$0xff] }
 0x181   :  { %4980 = vmatpush.bf16.msrb.mxu3 %v7677_v57  ;;  %4942 = vmatmul.bf16.vlgmr.msrb.gmra.mxu0 %v242_v2  ;;  %v4749_v21 = vadd.f32 %v4748_v18, %v4736_v15  ;;  %v247_v57 = vpack.c.bf16 %v117_v51, %v117_v51  ;;  %v7746_v2 = vld [vmem:[%s9593_s1 + $0xde8] sm:$0xff]  ;;  %v7779_v51 = vld [vmem:[%s9593_s1 + $0xef0] sm:$0xff] }
 0x182   :  { %4986 = vmatpush.bf16.msra.mxu0 %v7692_v58  ;;  %4955 = vmatmul.bf16.vlgmr.msrb.gmra.mxu1 %v243_v4  ;;  %v249_v58 = vpack.c.bf16 %v119_v52, %v119_v52  ;;  %v7754_v52 = vld [vmem:[%s9593_s1 + $0xe28] sm:$0xff] }
 0x183   :  { %4999 = vmatpush.bf16.msra.mxu1 %v7700_v59  ;;  %4968 = vmatmul.bf16.vlgmr.msrb.gmra.mxu2 %v244_v3  ;;  %v7723_v59 = vld [vmem:[%s9593_s1 + $0xd30] sm:$0xff] }
 0x184   :  { %5012 = vmatpush.bf16.msra.mxu2 %v7708_v0  ;;  %4981 = vmatmul.bf16.vlgmr.msrb.gmra.mxu3 %v245_v5  ;;  %v7730_v0 = vld [vmem:[%s9593_s1 + $0xd68] sm:$0xff]  ;;  %v7721_v5 = vld [vmem:[%s9593_s1 + $0xd20] sm:$0xff] }
 0x185   :  { %5025 = vmatpush.bf16.msra.mxu3 %v7716_v1  ;;  %v7738_v1 = vld [vmem:[%s9593_s1 + $0xda8] sm:$0xff] }
 0x186   :  { %4987 = vmatpush.bf16.msra.mxu0 %v7691_v6  ;;  %v4761_v26 = vpop.f32.mrf.mxu2  ;;  %v4737_v29 = vpop.f32.mrf.mxu0  ;;  %v7729_v6 = vld [vmem:[%s9593_s1 + $0xd60] sm:$0xff] }
 0x187   :  { %5000 = vmatpush.bf16.msra.mxu1 %v7699_v7  ;;  %v4762_v27 = vadd.f32 %v4761_v26, %v4749_v21  ;;  %v4774_v28 = vpop.f32.mrf.mxu3  ;;  %v4750_v33 = vpop.f32.mrf.mxu1  ;;  %v7727_v21 = vld [vmem:[%s9593_s1 + $0xd50] sm:$0xff]  ;;  %v7726_v26 = vld [vmem:[%s9593_s1 + $0xd48] sm:$0xff] }
 0x188   :  { %5013 = vmatpush.bf16.msra.mxu2 %v7707_v8  ;;  %v7737_v8 = vld [vmem:[%s9593_s1 + $0xda0] sm:$0xff]  ;;  %v7742_v29 = vld [vmem:[%s9593_s1 + $0xdc8] sm:$0xff] }
 0x189   :  { %5026 = vmatpush.bf16.msra.mxu3 %v7715_v9  ;;  %v9196_v30 = vadd.f32 %v4774_v28, %v4762_v27  ;;  %v7745_v9 = vld [vmem:[%s9593_s1 + $0xde0] sm:$0xff]  ;;  %v35_v27 = vld [vmem:[%s9592_s0 + $0x70] sm:$0xff]  ;;  %v7734_v28 = vld [vmem:[%s9593_s1 + $0xd88] sm:$0xff] }
 0x18a   :  { %4988 = vmatpush.bf16.msra.mxu0 %v7690_v10  ;;  %124 = vst [vmem:[#allocation1] ss:$4 sm:$0xff] %v35_v27  ;;  %v7725_v33 = vld [vmem:[%s9593_s1 + $0xd40] sm:$0xff] }
 0x18b   :  { %5001 = vmatpush.bf16.msra.mxu1 %v7698_v11  ;;  %v7720_v11 = vld [vmem:[%s9593_s1 + $0xd18] sm:$0xff] }
 0x18c   :  { %5014 = vmatpush.bf16.msra.mxu2 %v7706_v12  ;;  %v7728_v12 = vld [vmem:[%s9593_s1 + $0xd58] sm:$0xff] }
 0x18d   :  { %5027 = vmatpush.bf16.msra.mxu3 %v7714_v13  ;;  %v7736_v13 = vld [vmem:[%s9593_s1 + $0xd98] sm:$0xff] }
 0x18e   :  { %4989 = vmatpush.bf16.msra.mxu0 %v7689_v16  ;;  %v4763_v41 = vpop.f32.mrf.mxu2 }
 0x18f   :  { %5002 = vmatpush.bf16.msra.mxu1 %v7697_v17  ;;  %v4776_v42 = vpop.f32.mrf.mxu3  ;;  %v123_v41 = vld.sshfl [vmem:[#allocation1 + $0x38] sm:$0xff pattern:$0x73625140] }
 0x190   :  { %5015 = vmatpush.bf16.msra.mxu2 %v7705_v19  ;;  %v7772_v42 = vld [vmem:[%s9593_s1 + $0xeb8] sm:$0xff] }
 0x191   :  { %5028 = vmatpush.bf16.msra.mxu3 %v7713_v20  ;;  %v7719_v20 = vld [vmem:[%s9593_s1 + $0xd10] sm:$0xff]  ;;  %v126_v27 = vld.sshfl [vmem:[#allocation1] sm:$0xff pattern:$0x73625140] }
 0x192   :  { %4990 = vmatpush.bf16.msra.mxu0 %v7688_v22 }
 0x193   :  { %5003 = vmatpush.bf16.msra.mxu1 %v7696_v23  ;;  %v7735_v23 = vld [vmem:[%s9593_s1 + $0xd90] sm:$0xff] }
 0x194   :  { %5016 = vmatpush.bf16.msra.mxu2 %v7704_v24  ;;  %v7743_v24 = vld [vmem:[%s9593_s1 + $0xdd0] sm:$0xff] }
 0x195   :  { %5029 = vmatpush.bf16.msra.mxu3 %v7712_v25  ;;  %v7718_v25 = vld [vmem:[%s9593_s1 + $0xd08] sm:$0xff] }
 0x196   :  { %4991 = vmatpush.bf16.msra.mxu0 %v7687_v31 }
 0x197   :  { %5004 = vmatpush.bf16.msra.mxu1 %v7695_v32  ;;  %v7717_v32 = vld [vmem:[%s9593_s1 + $0xd00] sm:$0xff] }
 0x198   :  { %5017 = vmatpush.bf16.msra.mxu2 %v7703_v34  ;;  %v7733_v34 = vld [vmem:[%s9593_s1 + $0xd80] sm:$0xff] }
 0x199   :  { %5030 = vmatpush.bf16.msra.mxu3 %v7711_v35  ;;  %v7741_v35 = vld [vmem:[%s9593_s1 + $0xdc0] sm:$0xff] }
 0x19a   :  { %4992 = vmatpush.bf16.msra.mxu0 %v7686_v36  ;;  %v7756_v36 = vld [vmem:[%s9593_s1 + $0xe38] sm:$0xff] }
 0x19b   :  { %5005 = vmatpush.bf16.msra.mxu1 %v7694_v37  ;;  %v7764_v37 = vld [vmem:[%s9593_s1 + $0xe78] sm:$0xff] }
 0x19c   :  { %5018 = vmatpush.bf16.msra.mxu2 %v7702_v39  ;;  %v122_v39 = vld.sshfl [vmem:[#allocation1 + $0x30] sm:$0xff pattern:$0x73625140] }
 0x19d   :  { %5031 = vmatpush.bf16.msra.mxu3 %v7710_v40  ;;  %v121_v40 = vld.sshfl [vmem:[#allocation1 + $0x28] sm:$0xff pattern:$0x73625140] }
 0x19e   :  { %4993 = vmatpush.bf16.msra.mxu0 %v7685_v43  ;;  %v4787_v3 = vpop.f32.mrf.mxu0  ;;  %v7780_v43 = vld [vmem:[%s9593_s1 + $0xef8] sm:$0xff] }
 0x19f   :  { %5006 = vmatpush.bf16.msra.mxu1 %v7693_v44  ;;  %v4788_v4 = vadd.f32 %v4787_v3, %v9196_v30  ;;  %v4800_v7 = vpop.f32.mrf.mxu1  ;;  %v250_v44 = vpack.c.bf16 %v120_v38, %v120_v38  ;;  %v7776_v3 = vld [vmem:[%s9593_s1 + $0xed8] sm:$0xff]  ;;  %v7795_v38 = vld [vmem:[%s9593_s1 + $0xf70] sm:$0xff] }
 0x1a0   :  { %5019 = vmatpush.bf16.msra.mxu2 %v7701_v45  ;;  %v252_v45 = vpack.c.bf16 %v122_v39, %v122_v39  ;;  %v7803_v39 = vld [vmem:[%s9593_s1 + $0xfb0] sm:$0xff] }
 0x1a1   :  { %5032 = vmatpush.bf16.msra.mxu3 %v7709_v46  ;;  %4994 = vmatmul.bf16.vlgmr.msra.gmra.mxu0 %v246_v55  ;;  %v4801_v10 = vadd.f32 %v4800_v7, %v4788_v4  ;;  %v251_v46 = vpack.c.bf16 %v121_v40, %v121_v40  ;;  %v7778_v55 = vld [vmem:[%s9593_s1 + $0xee8] sm:$0xff]  ;;  %v7811_v40 = vld [vmem:[%s9593_s1 + $0xff0] sm:$0xff] }
 0x1a2   :  { %5038 = vmatpush.bf16.msrb.mxu0 %v7724_v47  ;;  %5007 = vmatmul.bf16.vlgmr.msra.gmra.mxu1 %v247_v57  ;;  %v253_v47 = vpack.c.bf16 %v123_v41, %v123_v41  ;;  %v7786_v41 = vld [vmem:[%s9593_s1 + $0xf28] sm:$0xff] }
 0x1a3   :  { %5051 = vmatpush.bf16.msrb.mxu1 %v7732_v48  ;;  %5020 = vmatmul.bf16.vlgmr.msra.gmra.mxu2 %v248_v56  ;;  %v7755_v48 = vld [vmem:[%s9593_s1 + $0xe30] sm:$0xff] }
 0x1a4   :  { %5064 = vmatpush.bf16.msrb.mxu2 %v7740_v53  ;;  %5033 = vmatmul.bf16.vlgmr.msra.gmra.mxu3 %v249_v58  ;;  %v7762_v53 = vld [vmem:[%s9593_s1 + $0xe68] sm:$0xff]  ;;  %v7753_v58 = vld [vmem:[%s9593_s1 + $0xe20] sm:$0xff] }
 0x1a5   :  { %5077 = vmatpush.bf16.msrb.mxu3 %v7748_v54  ;;  %v7770_v54 = vld [vmem:[%s9593_s1 + $0xea8] sm:$0xff] }
 0x1a6   :  { %5039 = vmatpush.bf16.msrb.mxu0 %v7723_v59  ;;  %v4813_v15 = vpop.f32.mrf.mxu2  ;;  %v4789_v18 = vpop.f32.mrf.mxu0  ;;  %v7761_v59 = vld [vmem:[%s9593_s1 + $0xe60] sm:$0xff] }
 0x1a7   :  { %5052 = vmatpush.bf16.msrb.mxu1 %v7731_v60  ;;  %v4814_v16 = vadd.f32 %v4813_v15, %v4801_v10  ;;  %v4826_v17 = vpop.f32.mrf.mxu3  ;;  %v4802_v22 = vpop.f32.mrf.mxu1  ;;  %v7759_v10 = vld [vmem:[%s9593_s1 + $0xe50] sm:$0xff]  ;;  %v7750_v15 = vld [vmem:[%s9593_s1 + $0xe08] sm:$0xff] }
 0x1a8   :  { %5065 = vmatpush.bf16.msrb.mxu2 %v7739_v61  ;;  %v7769_v61 = vld [vmem:[%s9593_s1 + $0xea0] sm:$0xff]  ;;  %v7774_v18 = vld [vmem:[%s9593_s1 + $0xec8] sm:$0xff] }
 0x1a9   :  { %5078 = vmatpush.bf16.msrb.mxu3 %v7747_v62  ;;  %v9298_v19 = vadd.f32 %v4826_v17, %v4814_v16  ;;  %v7777_v62 = vld [vmem:[%s9593_s1 + $0xee0] sm:$0xff]  ;;  %v7758_v16 = vld [vmem:[%s9593_s1 + $0xe48] sm:$0xff] }
 0x1aa   :  { %5040 = vmatpush.bf16.msrb.mxu0 %v7722_v63  ;;  %v7766_v17 = vld [vmem:[%s9593_s1 + $0xe88] sm:$0xff]  ;;  %v7757_v22 = vld [vmem:[%s9593_s1 + $0xe40] sm:$0xff] }
 0x1ab   :  { %5053 = vmatpush.bf16.msrb.mxu1 %v7730_v0  ;;  %v7752_v0 = vld [vmem:[%s9593_s1 + $0xe18] sm:$0xff] }
 0x1ac   :  { %5066 = vmatpush.bf16.msrb.mxu2 %v7738_v1  ;;  %v7760_v1 = vld [vmem:[%s9593_s1 + $0xe58] sm:$0xff] }
 0x1ad   :  { %5079 = vmatpush.bf16.msrb.mxu3 %v7746_v2  ;;  %v7768_v2 = vld [vmem:[%s9593_s1 + $0xe98] sm:$0xff] }
 0x1ae   :  { %5041 = vmatpush.bf16.msrb.mxu0 %v7721_v5  ;;  %v4815_v30 = vpop.f32.mrf.mxu2 }
 0x1af   :  { %5054 = vmatpush.bf16.msrb.mxu1 %v7729_v6  ;;  %v4828_v31 = vpop.f32.mrf.mxu3  ;;  %v129_v30 = vld.sshfl [vmem:[#allocation1 + $0x18] sm:$0xff pattern:$0x73625140] }
 0x1b0   :  { %5067 = vmatpush.bf16.msrb.mxu2 %v7737_v8  ;;  %v7804_v31 = vld [vmem:[%s9593_s1 + $0xfb8] sm:$0xff] }
 0x1b1   :  { %5080 = vmatpush.bf16.msrb.mxu3 %v7745_v9  ;;  %v7751_v9 = vld [vmem:[%s9593_s1 + $0xe10] sm:$0xff] }
 0x1b2   :  { %5042 = vmatpush.bf16.msrb.mxu0 %v7720_v11 }
 0x1b3   :  { %5055 = vmatpush.bf16.msrb.mxu1 %v7728_v12  ;;  %v7767_v12 = vld [vmem:[%s9593_s1 + $0xe90] sm:$0xff] }
 0x1b4   :  { %5068 = vmatpush.bf16.msrb.mxu2 %v7736_v13  ;;  %v7775_v13 = vld [vmem:[%s9593_s1 + $0xed0] sm:$0xff] }
 0x1b5   :  { %5081 = vmatpush.bf16.msrb.mxu3 %v7744_v14  ;;  %v36_v14 = vld [vmem:[%s9592_s0 + $0x78] sm:$0xff] }
 0x1b6   :  { %5043 = vmatpush.bf16.msrb.mxu0 %v7719_v20  ;;  %125 = vst [vmem:[#allocation1 + $0x20] ss:$4 sm:$0xff] %v36_v14 }
 0x1b7   :  { %5056 = vmatpush.bf16.msrb.mxu1 %v7727_v21  ;;  %v7749_v21 = vld [vmem:[%s9593_s1 + $0xe00] sm:$0xff] }
 0x1b8   :  { %5069 = vmatpush.bf16.msrb.mxu2 %v7735_v23  ;;  %v7765_v23 = vld [vmem:[%s9593_s1 + $0xe80] sm:$0xff] }
 0x1b9   :  { %5082 = vmatpush.bf16.msrb.mxu3 %v7743_v24  ;;  %v7773_v24 = vld [vmem:[%s9593_s1 + $0xec0] sm:$0xff] }
 0x1ba   :  { %5044 = vmatpush.bf16.msrb.mxu0 %v7718_v25  ;;  %v7788_v25 = vld [vmem:[%s9593_s1 + $0xf38] sm:$0xff] }
 0x1bb   :  { %5057 = vmatpush.bf16.msrb.mxu1 %v7726_v26  ;;  %v7796_v26 = vld [vmem:[%s9593_s1 + $0xf78] sm:$0xff] }
 0x1bc   :  { %5070 = vmatpush.bf16.msrb.mxu2 %v7734_v28  ;;  %v128_v28 = vld.sshfl [vmem:[#allocation1 + $0x10] sm:$0xff pattern:$0x73625140] }
 0x1bd   :  { %5083 = vmatpush.bf16.msrb.mxu3 %v7742_v29  ;;  %v127_v29 = vld.sshfl [vmem:[#allocation1 + $0x8] sm:$0xff pattern:$0x73625140] }
 0x1be   :  { %5045 = vmatpush.bf16.msrb.mxu0 %v7717_v32  ;;  %v4839_v56 = vpop.f32.mrf.mxu0  ;;  %v7812_v32 = vld [vmem:[%s9593_s1 + $0xff8] sm:$0xff]  ;;  %v131_v14 = vld.sshfl [vmem:[#allocation1 + $0x28] sm:$0xff pattern:$0x73625140] }
 0x1bf   :  { %5058 = vmatpush.bf16.msrb.mxu1 %v7725_v33  ;;  %v4840_v57 = vadd.f32 %v4839_v56, %v9298_v19  ;;  %v4852_v60 = vpop.f32.mrf.mxu1  ;;  %v254_v33 = vpack.c.bf16 %v126_v27, %v126_v27  ;;  %v7808_v56 = vld [vmem:[%s9593_s1 + $0xfd8] sm:$0xff] }
 0x1c0   :  { %5071 = vmatpush.bf16.msrb.mxu2 %v7733_v34  ;;  %v256_v34 = vpack.c.bf16 %v128_v28, %v128_v28 }
 0x1c1   :  { %5084 = vmatpush.bf16.msrb.mxu3 %v7741_v35  ;;  %5046 = vmatmul.bf16.vlgmr.msrb.gmra.mxu0 %v250_v44  ;;  %v4853_v63 = vadd.f32 %v4852_v60, %v4840_v57  ;;  %v255_v35 = vpack.c.bf16 %v127_v29, %v127_v29  ;;  %v7810_v44 = vld [vmem:[%s9593_s1 + $0xfe8] sm:$0xff] }
 0x1c2   :  { %5090 = vmatpush.bf16.msra.mxu0 %v7756_v36  ;;  %5059 = vmatmul.bf16.vlgmr.msrb.gmra.mxu1 %v251_v46  ;;  %v257_v36 = vpack.c.bf16 %v129_v30, %v129_v30 }
 0x1c3   :  { %5103 = vmatpush.bf16.msra.mxu1 %v7764_v37  ;;  %5072 = vmatmul.bf16.vlgmr.msrb.gmra.mxu2 %v252_v45  ;;  %v7787_v37 = vld [vmem:[%s9593_s1 + $0xf30] sm:$0xff] }
 0x1c4   :  { %5116 = vmatpush.bf16.msra.mxu2 %v7772_v42  ;;  %5085 = vmatmul.bf16.vlgmr.msrb.gmra.mxu3 %v253_v47  ;;  %v7794_v42 = vld [vmem:[%s9593_s1 + $0xf68] sm:$0xff]  ;;  %v7785_v47 = vld [vmem:[%s9593_s1 + $0xf20] sm:$0xff] }
 0x1c5   :  { %5129 = vmatpush.bf16.msra.mxu3 %v7780_v43  ;;  %v7802_v43 = vld [vmem:[%s9593_s1 + $0xfa8] sm:$0xff] }
 0x1c6   :  { %5091 = vmatpush.bf16.msra.mxu0 %v7755_v48  ;;  %v4865_v4 = vpop.f32.mrf.mxu2  ;;  %v4841_v7 = vpop.f32.mrf.mxu0  ;;  %v7793_v48 = vld [vmem:[%s9593_s1 + $0xf60] sm:$0xff] }
 0x1c7   :  { %5104 = vmatpush.bf16.msra.mxu1 %v7763_v49  ;;  %v4866_v5 = vadd.f32 %v4865_v4, %v4853_v63  ;;  %v4878_v6 = vpop.f32.mrf.mxu3  ;;  %v4854_v11 = vpop.f32.mrf.mxu1  ;;  %v7791_v63 = vld [vmem:[%s9593_s1 + $0xf50] sm:$0xff]  ;;  %v7790_v4 = vld [vmem:[%s9593_s1 + $0xf48] sm:$0xff] }
 0x1c8   :  { %5117 = vmatpush.bf16.msra.mxu2 %v7771_v50  ;;  %v7801_v50 = vld [vmem:[%s9593_s1 + $0xfa0] sm:$0xff] }
 0x1c9   :  { %5130 = vmatpush.bf16.msra.mxu3 %v7779_v51  ;;  %v9400_v8 = vadd.f32 %v4878_v6, %v4866_v5  ;;  %v7809_v51 = vld [vmem:[%s9593_s1 + $0xfe0] sm:$0xff]  ;;  %v7798_v5 = vld [vmem:[%s9593_s1 + $0xf88] sm:$0xff] }
 0x1ca   :  { %5092 = vmatpush.bf16.msra.mxu0 %v7754_v52  ;;  %v7806_v6 = vld [vmem:[%s9593_s1 + $0xfc8] sm:$0xff]  ;;  %v7797_v11 = vld [vmem:[%s9593_s1 + $0xf80] sm:$0xff] }
 0x1cb   :  { %5105 = vmatpush.bf16.msra.mxu1 %v7762_v53  ;;  %v7784_v53 = vld [vmem:[%s9593_s1 + $0xf18] sm:$0xff] }
 0x1cc   :  { %5118 = vmatpush.bf16.msra.mxu2 %v7770_v54  ;;  %v7792_v54 = vld [vmem:[%s9593_s1 + $0xf58] sm:$0xff] }
 0x1cd   :  { %5131 = vmatpush.bf16.msra.mxu3 %v7778_v55  ;;  %v7800_v55 = vld [vmem:[%s9593_s1 + $0xf98] sm:$0xff] }
 0x1ce   :  { %5093 = vmatpush.bf16.msra.mxu0 %v7753_v58  ;;  %v4867_v19 = vpop.f32.mrf.mxu2 }
 0x1cf   :  { %5106 = vmatpush.bf16.msra.mxu1 %v7761_v59  ;;  %v4880_v20 = vpop.f32.mrf.mxu3 }
 0x1d0   :  { %5119 = vmatpush.bf16.msra.mxu2 %v7769_v61 }
 0x1d1   :  { %5132 = vmatpush.bf16.msra.mxu3 %v7777_v62  ;;  %v7783_v62 = vld [vmem:[%s9593_s1 + $0xf10] sm:$0xff] }
 0x1d2   :  { %5094 = vmatpush.bf16.msra.mxu0 %v7752_v0 }
 0x1d3   :  { %5107 = vmatpush.bf16.msra.mxu1 %v7760_v1  ;;  %v7799_v1 = vld [vmem:[%s9593_s1 + $0xf90] sm:$0xff] }
 0x1d4   :  { %5120 = vmatpush.bf16.msra.mxu2 %v7768_v2  ;;  %v7807_v2 = vld [vmem:[%s9593_s1 + $0xfd0] sm:$0xff] }
 0x1d5   :  { %5133 = vmatpush.bf16.msra.mxu3 %v7776_v3  ;;  %v7782_v3 = vld [vmem:[%s9593_s1 + $0xf08] sm:$0xff] }
 0x1d6   :  { %5095 = vmatpush.bf16.msra.mxu0 %v7751_v9 }
 0x1d7   :  { %5108 = vmatpush.bf16.msra.mxu1 %v7759_v10  ;;  %v7789_v10 = vld [vmem:[%s9593_s1 + $0xf40] sm:$0xff] }
 0x1d8   :  { %5121 = vmatpush.bf16.msra.mxu2 %v7767_v12  ;;  %v7805_v12 = vld [vmem:[%s9593_s1 + $0xfc0] sm:$0xff] }
 0x1d9   :  { %5134 = vmatpush.bf16.msra.mxu3 %v7775_v13  ;;  %v130_v13 = vld.sshfl [vmem:[#allocation1 + $0x20] sm:$0xff pattern:$0x73625140] }
 0x1da   :  { %5096 = vmatpush.bf16.msra.mxu0 %v7750_v15  ;;  %v132_v15 = vld.sshfl [vmem:[#allocation1 + $0x30] sm:$0xff pattern:$0x73625140] }
 0x1db   :  { %5109 = vmatpush.bf16.msra.mxu1 %v7758_v16  ;;  %v133_v16 = vld.sshfl [vmem:[#allocation1 + $0x38] sm:$0xff pattern:$0x73625140]  ;;  %v260_v19 = vpack.c.bf16 %v132_v15, %v132_v15 }
 0x1dc   :  { %5122 = vmatpush.bf16.msra.mxu2 %v7766_v17  ;;  %v258_v17 = vpack.c.bf16 %v130_v13, %v130_v13  ;;  %v261_v20 = vpack.c.bf16 %v133_v16, %v133_v16 }
 0x1dd   :  { %5135 = vmatpush.bf16.msra.mxu3 %v7774_v18  ;;  %v259_v18 = vpack.c.bf16 %v131_v14, %v131_v14 }
 0x1de   :  { %5097 = vmatpush.bf16.msra.mxu0 %v7749_v21  ;;  %v4891_v45 = vpop.f32.mrf.mxu0 }
 0x1df   :  { %5110 = vmatpush.bf16.msra.mxu1 %v7757_v22  ;;  %v4892_v46 = vadd.f32 %v4891_v45, %v9400_v8  ;;  %v4904_v49 = vpop.f32.mrf.mxu1  ;;  %v7781_v8 = vld [vmem:[%s9593_s1 + $0xf00] sm:$0xff] }
 0x1e0   :  { %5123 = vmatpush.bf16.msra.mxu2 %v7765_v23 }
 0x1e1   :  { %5136 = vmatpush.bf16.msra.mxu3 %v7773_v24  ;;  %5098 = vmatmul.bf16.vlgmr.msra.gmra.mxu0 %v254_v33  ;;  %v4905_v52 = vadd.f32 %v4904_v49, %v4892_v46  ;;  %v5210_v49 = vld [vmem:[%s9595_s3 + $0x78] sm:$0xff] }
 0x1e2   :  { %5142 = vmatpush.bf16.msrb.mxu0 %v7788_v25  ;;  %5111 = vmatmul.bf16.vlgmr.msra.gmra.mxu1 %v255_v35 }
 0x1e3   :  { %5155 = vmatpush.bf16.msrb.mxu1 %v7796_v26  ;;  %5124 = vmatmul.bf16.vlgmr.msra.gmra.mxu2 %v256_v34 }
 0x1e4   :  { %5168 = vmatpush.bf16.msrb.mxu2 %v7804_v31  ;;  %5137 = vmatmul.bf16.vlgmr.msra.gmra.mxu3 %v257_v36 }
 0x1e5   :  { %5181 = vmatpush.bf16.msrb.mxu3 %v7812_v32 }
 0x1e6   :  { %5143 = vmatpush.bf16.msrb.mxu0 %v7787_v37  ;;  %v4917_v57 = vpop.f32.mrf.mxu2  ;;  %v4893_v60 = vpop.f32.mrf.mxu0 }
 0x1e7   :  { %5156 = vmatpush.bf16.msrb.mxu1 %v7795_v38  ;;  %v4918_v58 = vadd.f32 %v4917_v57, %v4905_v52  ;;  %v4930_v59 = vpop.f32.mrf.mxu3  ;;  %v4906_v0 = vpop.f32.mrf.mxu1  ;;  %v5203_v60 = vld [vmem:[%s9595_s3 + $0x40] sm:$0xff] }
 0x1e8   :  { %5169 = vmatpush.bf16.msrb.mxu2 %v7803_v39 }
 0x1e9   :  { %5182 = vmatpush.bf16.msrb.mxu3 %v7811_v40  ;;  %v4931_v61 = vadd.f32 %v4930_v59, %v4918_v58  ;;  %v5205_v58 = vld [vmem:[%s9595_s3 + $0x50] sm:$0xff]  ;;  %v5204_v59 = vld [vmem:[%s9595_s3 + $0x48] sm:$0xff] }
 0x1ea   :  { %5144 = vmatpush.bf16.msrb.mxu0 %v7786_v41 }
 0x1eb   :  { %5157 = vmatpush.bf16.msrb.mxu1 %v7794_v42 }
 0x1ec   :  { %5170 = vmatpush.bf16.msrb.mxu2 %v7802_v43 }
 0x1ed   :  { %5183 = vmatpush.bf16.msrb.mxu3 %v7810_v44 }
 0x1ee   :  { %5145 = vmatpush.bf16.msrb.mxu0 %v7785_v47  ;;  %v4919_v7 = vpop.f32.mrf.mxu2 }
 0x1ef   :  { %5158 = vmatpush.bf16.msrb.mxu1 %v7793_v48  ;;  %v4932_v9 = vpop.f32.mrf.mxu3 }
 0x1f0   :  { %5171 = vmatpush.bf16.msrb.mxu2 %v7801_v50  ;;  %v5209_v50 = vld [vmem:[%s9595_s3 + $0x70] sm:$0xff] }
 0x1f1   :  { %5184 = vmatpush.bf16.msrb.mxu3 %v7809_v51 }
 0x1f2   :  { %5146 = vmatpush.bf16.msrb.mxu0 %v7784_v53  ;;  %v5208_v53 = vld [vmem:[%s9595_s3 + $0x68] sm:$0xff] }
 0x1f3   :  { %5159 = vmatpush.bf16.msrb.mxu1 %v7792_v54  ;;  %v5207_v54 = vld [vmem:[%s9595_s3 + $0x60] sm:$0xff] }
 0x1f4   :  { %5172 = vmatpush.bf16.msrb.mxu2 %v7800_v55  ;;  %v5206_v55 = vld [vmem:[%s9595_s3 + $0x58] sm:$0xff] }
 0x1f5   :  { %5185 = vmatpush.bf16.msrb.mxu3 %v7808_v56 }
 0x1f6   :  { %5147 = vmatpush.bf16.msrb.mxu0 %v7783_v62  ;;  %v5201_v62 = vld [vmem:[%s9595_s3 + $0x30] sm:$0xff] }
 0x1f7   :  { %5160 = vmatpush.bf16.msrb.mxu1 %v7791_v63  ;;  %v5200_v63 = vld [vmem:[%s9595_s3 + $0x28] sm:$0xff] }
 0x1f8   :  { %5173 = vmatpush.bf16.msrb.mxu2 %v7799_v1  ;;  %v5199_v1 = vld [vmem:[%s9595_s3 + $0x20] sm:$0xff] }
 0x1f9   :  { %5186 = vmatpush.bf16.msrb.mxu3 %v7807_v2 }
 0x1fa   :  { %5148 = vmatpush.bf16.msrb.mxu0 %v7782_v3  ;;  %v5198_v3 = vld [vmem:[%s9595_s3 + $0x18] sm:$0xff] }
 0x1fb   :  { %5161 = vmatpush.bf16.msrb.mxu1 %v7790_v4  ;;  %v5197_v4 = vld [vmem:[%s9595_s3 + $0x10] sm:$0xff] }
 0x1fc   :  { %5174 = vmatpush.bf16.msrb.mxu2 %v7798_v5 }
 0x1fd   :  { %5187 = vmatpush.bf16.msrb.mxu3 %v7806_v6 }
 0x1fe   :  { %5149 = vmatpush.bf16.msrb.mxu0 %v7781_v8  ;;  %v4943_v21 = vpop.f32.mrf.mxu0  ;;  %v5196_v8 = vld [vmem:[%s9595_s3 + $0x8] sm:$0xff] }
 0x1ff   :  { %5162 = vmatpush.bf16.msrb.mxu1 %v7789_v10  ;;  %v4944_v22 = vadd.f32 %v4943_v21, %v4931_v61  ;;  %v4956_v23 = vpop.f32.mrf.mxu1  ;;  %v5202_v61 = vld [vmem:[%s9595_s3 + $0x38] sm:$0xff] }
 0x200   :  { %5175 = vmatpush.bf16.msrb.mxu2 %v7797_v11  ;;  %v5195_v11 = vld [vmem:[%s9595_s3] sm:$0xff] }
 0x201   :  { %5188 = vmatpush.bf16.msrb.mxu3 %v7805_v12  ;;  %5150 = vmatmul.bf16.vlgmr.msrb.gmra.mxu0 %v258_v17  ;;  %v4957_v24 = vadd.f32 %v4956_v23, %v4944_v22 }
 0x202   :  { %5163 = vmatmul.bf16.vlgmr.msrb.gmra.mxu1 %v259_v18  ;;  %5215 = vmatpush.msra.mxu0 %v5210_v49 }
 0x203   :  { %5176 = vmatmul.bf16.vlgmr.msrb.gmra.mxu2 %v260_v19 }
 0x204   :  { %5189 = vmatmul.bf16.vlgmr.msrb.gmra.mxu3 %v261_v20  ;;  %5216 = vmatpush.msra.mxu0 %v5209_v50 }
 0x206   :  { %v4969_v25 = vpop.f32.mrf.mxu2  ;;  %v4945_v28 = vpop.f32.mrf.mxu0  ;;  %5217 = vmatpush.msra.mxu0 %v5208_v53 }
 0x207   :  { %v4970_v26 = vadd.f32 %v4969_v25, %v4957_v24  ;;  %v4982_v27 = vpop.f32.mrf.mxu3  ;;  %v4958_v30 = vpop.f32.mrf.mxu1 }
 0x208   :  { %5218 = vmatpush.msra.mxu0 %v5207_v54 }
 0x209   :  { %v4983_v29 = vadd.f32 %v4982_v27, %v4970_v26 }
 0x20a   :  { %5219 = vmatpush.msra.mxu0 %v5206_v55 }
 0x20c   :  { %5220 = vmatpush.msra.mxu0 %v5205_v58 }
 0x20e   :  { %v4971_v31 = vpop.f32.mrf.mxu2  ;;  %5221 = vmatpush.msra.mxu0 %v5204_v59 }
 0x20f   :  { %v4984_v32 = vpop.f32.mrf.mxu3 }
 0x210   :  { %5222 = vmatpush.msra.mxu0 %v5203_v60 }
 0x212   :  { %5223 = vmatpush.msra.mxu0 %v5202_v61 }
 0x214   :  { %5224 = vmatpush.msra.mxu0 %v5201_v62 }
 0x216   :  { %5225 = vmatpush.msra.mxu0 %v5200_v63 }
 0x218   :  { %5226 = vmatpush.msra.mxu0 %v5199_v1 }
 0x21a   :  { %5227 = vmatpush.msra.mxu0 %v5198_v3 }
 0x21c   :  { %5228 = vmatpush.msra.mxu0 %v5197_v4 }
 0x21e   :  { %v4995_v33 = vpop.f32.mrf.mxu0  ;;  %5229 = vmatpush.msra.mxu0 %v5196_v8 }
 0x21f   :  { %v4996_v34 = vadd.f32 %v4995_v33, %v4983_v29  ;;  %v5008_v35 = vpop.f32.mrf.mxu1 }
 0x220   :  { %5230 = vmatpush.msra.mxu0 %v5195_v11 }
 0x221   :  { %v5009_v36 = vadd.f32 %v5008_v35, %v4996_v34  ;;  %v7815_v34 = vld [vmem:[%s9596_s4] ss:$0 sm:$0xff] }
 0x226   :  { %v5021_v37 = vpop.f32.mrf.mxu2  ;;  %v4997_v40 = vpop.f32.mrf.mxu0 }
 0x227   :  { %v5022_v38 = vadd.f32 %v5021_v37, %v5009_v36  ;;  %v5034_v39 = vpop.f32.mrf.mxu3  ;;  %v5010_v42 = vpop.f32.mrf.mxu1 }
 0x229   :  { %v5035_v41 = vadd.f32 %v5034_v39, %v5022_v38 }
 0x22e   :  { %v5023_v43 = vpop.f32.mrf.mxu2 }
 0x22f   :  { %v5036_v44 = vpop.f32.mrf.mxu3 }
 0x23e   :  { %v5047_v45 = vpop.f32.mrf.mxu0 }
 0x23f   :  { %v5060_v46 = vpop.f32.mrf.mxu1  ;;  %v5048_v6 = vadd.f32 %v5047_v45, %v5035_v41 }
 0x241   :  { %v5061_v12 = vadd.f32 %v5060_v46, %v5048_v6 }
 0x246   :  { %v5073_v47 = vpop.f32.mrf.mxu2  ;;  %v5049_v51 = vpop.f32.mrf.mxu0 }
 0x247   :  { %v5086_v48 = vpop.f32.mrf.mxu3  ;;  %v5062_v52 = vpop.f32.mrf.mxu1  ;;  %v5074_v13 = vadd.f32 %v5073_v47, %v5061_v12 }
 0x249   :  { %v5087_v16 = vadd.f32 %v5086_v48, %v5074_v13 }
 0x24e   :  { %v5075_v56 = vpop.f32.mrf.mxu2 }
 0x24f   :  { %v5088_v57 = vpop.f32.mrf.mxu3 }
 0x25e   :  { %v5099_v0 = vpop.f32.mrf.mxu0 }
 0x25f   :  { %v5112_v2 = vpop.f32.mrf.mxu1  ;;  %v5100_v17 = vadd.f32 %v5099_v0, %v5087_v16 }
 0x261   :  { %v5113_v18 = vadd.f32 %v5112_v2, %v5100_v17 }
 0x266   :  { %v5125_v5 = vpop.f32.mrf.mxu2  ;;  %v5101_v9 = vpop.f32.mrf.mxu0 }
 0x267   :  { %v5138_v7 = vpop.f32.mrf.mxu3  ;;  %v5114_v10 = vpop.f32.mrf.mxu1  ;;  %v5126_v19 = vadd.f32 %v5125_v5, %v5113_v18 }
 0x269   :  { %v5139_v20 = vadd.f32 %v5138_v7, %v5126_v19 }
 0x26e   :  { %v5127_v14 = vpop.f32.mrf.mxu2 }
 0x26f   :  { %v5140_v15 = vpop.f32.mrf.mxu3 }
 0x27e   :  { %v5151_v21 = vpop.f32.mrf.mxu0 }
 0x27f   :  { %v5164_v22 = vpop.f32.mrf.mxu1  ;;  %v5152_v23 = vadd.f32 %v5151_v21, %v5139_v20 }
 0x281   :  { %v5165_v24 = vadd.f32 %v5164_v22, %v5152_v23 }
 0x286   :  { %v5177_v25 = vpop.f32.mrf.mxu2  ;;  %v5153_v28 = vpop.f32.mrf.mxu0 }
 0x287   :  { %v5190_v26 = vpop.f32.mrf.mxu3  ;;  %v5178_v27 = vadd.f32 %v5177_v25, %v5165_v24  ;;  %v5166_v29 = vpop.f32.mrf.mxu1 }
 0x289   :  { %v5191_v30 = vadd.f32 %v5190_v26, %v5178_v27 }
 0x28b   :  { %v5194_v31 = vmax.f32 %v5191_v30, 0.0 }
 0x28d   :  { %5231 = vmatmul.f32.vlgmr.msra.gmra.mxu0 %v5194_v31 }
 0x28e   :  { %v5179_v32 = vpop.f32.mrf.mxu2 }
 0x28f   :  { %v5192_v33 = vpop.f32.mrf.mxu3 }
 0x30a   :  { %v5232_v35 = vpop.f32.mrf.mxu0 }
 0x30b   :  { %v5233_v36 = vadd.f32 %v7815_v34, %v5232_v35 }
 0x30d   :  { %5236 = vst.msk [vmem:[#allocation2] sm:$0x3] %vm5235_vm0, %v5233_v36 }
 0x30e   :  { %5247 = dma.vmem_to_hbm [thread:$0]  %s5243_s26, 32, %s5245_s29, [#allocation3]  }
 0x30f   :  { %7840 = dma.done.wait [#allocation3], 32  }
 0x310   :  { %7841 = vsyncadd [#allocation3], 4294967264 }
 0x311   :  { %5252 = vsyncpa [#allocation3], 1 }

// kernel: pallas_forward.2
= control target key start
LH: loop header
LB: loop body
LE: loop exit
PB: predicated region body
PF: predicated region fallthrough
CT: control target
= control target key end

     0   :  { %s10225_s24 = smov 0   ;;  %s14304_s0 = inlined_call_operand.vmem [shape: f32[2,66,66,8], index: 0, kind: input, shape index: {}]   ;;  %s14305_s1 = inlined_call_operand.vmem [shape: f32[9,8,32], index: 1, kind: input, shape index: {}]   ;;  %s14306_s2 = inlined_call_operand.vmem [shape: f32[1,32], index: 2, kind: input, shape index: {}]   ;;  %s14307_s3 = inlined_call_operand.vmem [shape: f32[9,32,64], index: 3, kind: input, shape index: {}]   ;;  %s14308_s4 = inlined_call_operand.vmem [shape: f32[1,64], index: 4, kind: input, shape index: {}]   ;;  %s14309_s5 = inlined_call_operand.vmem [shape: f32[9,64,128], index: 5, kind: input, shape index: {}]   ;;  %s14310_s6 = inlined_call_operand.vmem [shape: f32[1,128], index: 6, kind: input, shape index: {}]   ;;  %s14311_s7 = inlined_call_operand.vmem [shape: f32[2,64,128], index: 7, kind: output, shape index: {}]  }
   0x1 LB: > { %s8695_s25 = sadd.s32 4294967295, %s10174_s24   ;;  %p8699_p0 = scmp.ge.s32.totalorder %s10174_s24, 1  ;;  %s10174_s24 = sphi %s10225_s24, %s17_s24  }
   0x2   : > { %p237_p1 = scmp.lt.s32.totalorder %s10174_s24, 3 }
   0x4   : > { %p238_p2 = pnand %p8699_p0, %p237_p1 }
   0x6   : > { %241 = sbr.rel (%p238_p2) target bundleno = 2494 (0x9be), region = 48 }
   0xb   : > { %p269_p3 = scmp.lt.s32.totalorder %s8695_s25, 1  ;;  %vm279_vm0 = vcmask 261120   ;;  %v10184_v0 = vmov 0.0   ;;  %vm484_vm1 = vcmask 523264   ;;  %s10795_s11 = smov 0  }
   0xc   : > { %280 = vst.msk [vmem:[#allocation2] sm:$0xff] %vm279_vm0, %v10184_v0 }
   0xd   : > { %s14588_s25 = smov (!%p269_p3, %s8695_s25), 1  ;;  %281 = vst.msk [vmem:[#allocation2 + $0x8] sm:$0xff] %vm279_vm0, %v10184_v0 }
   0xe   : > { %282 = vst.msk [vmem:[#allocation2 + $0x10] sm:$0xff] %vm279_vm0, %v10184_v0  ;;  %s10130_s26 = smul.u32 4752, %s14588_s25  ;;  %s10089_s27 = sshll.u32 %s14588_s25, 6 }
   0xf   : > { %283 = vst.msk [vmem:[#allocation2 + $0x18] sm:$0xff] %vm279_vm0, %v10184_v0  ;;  %s10244_s30 = scalar_lea.vmem %s14311_s7, %s10089_s27 }
  0x10   : > { %284 = vst.msk [vmem:[#allocation2 + $0x20] sm:$0xff] %vm279_vm0, %v10184_v0  ;;  %s10251_s10 = scalar_lea.vmem %s14304_s0, %s10130_s26 }
  0x11   : > { %285 = vst.msk [vmem:[#allocation2 + $0x28] sm:$0xff] %vm279_vm0, %v10184_v0 }
  0x12   : > { %286 = vst.msk [vmem:[#allocation2 + $0x30] sm:$0xff] %vm279_vm0, %v10184_v0 }
  0x13   : > { %287 = vst.msk [vmem:[#allocation2 + $0x38] sm:$0xff] %vm279_vm0, %v10184_v0 }
  0x14   : > { %288 = vst.msk [vmem:[#allocation2 + $0x40] sm:$0xff] %vm279_vm0, %v10184_v0 }
  0x15   : > { %289 = vst.msk [vmem:[#allocation2 + $0x48] sm:$0xff] %vm279_vm0, %v10184_v0 }
  0x16   : > { %290 = vst.msk [vmem:[#allocation2 + $0x50] sm:$0xff] %vm279_vm0, %v10184_v0 }
  0x17   : > { %291 = vst.msk [vmem:[#allocation2 + $0x58] sm:$0xff] %vm279_vm0, %v10184_v0 }
  0x18   : > { %292 = vst.msk [vmem:[#allocation2 + $0x60] sm:$0xff] %vm279_vm0, %v10184_v0 }
  0x19   : > { %293 = vst.msk [vmem:[#allocation2 + $0x68] sm:$0xff] %vm279_vm0, %v10184_v0 }
  0x1a   : > { %294 = vst.msk [vmem:[#allocation2 + $0x70] sm:$0xff] %vm279_vm0, %v10184_v0 }
  0x1b   : > { %295 = vst.msk [vmem:[#allocation2 + $0x78] sm:$0xff] %vm279_vm0, %v10184_v0 }
  0x1c   : > { %296 = vst.msk [vmem:[#allocation2 + $0x80] sm:$0xff] %vm279_vm0, %v10184_v0 }
  0x1d   : > { %297 = vst.msk [vmem:[#allocation2 + $0x88] sm:$0xff] %vm279_vm0, %v10184_v0 }
  0x1e   : > { %298 = vst.msk [vmem:[#allocation2 + $0x90] sm:$0xff] %vm279_vm0, %v10184_v0 }
  0x1f   : > { %299 = vst.msk [vmem:[#allocation2 + $0x98] sm:$0xff] %vm279_vm0, %v10184_v0 }
  0x20   : > { %300 = vst.msk [vmem:[#allocation2 + $0xa0] sm:$0xff] %vm279_vm0, %v10184_v0 }
  0x21   : > { %301 = vst.msk [vmem:[#allocation2 + $0xa8] sm:$0xff] %vm279_vm0, %v10184_v0 }
  0x22   : > { %302 = vst.msk [vmem:[#allocation2 + $0xb0] sm:$0xff] %vm279_vm0, %v10184_v0 }
  0x23   : > { %303 = vst.msk [vmem:[#allocation2 + $0xb8] sm:$0xff] %vm279_vm0, %v10184_v0 }
  0x24   : > { %304 = vst.msk [vmem:[#allocation2 + $0xc0] sm:$0xff] %vm279_vm0, %v10184_v0 }
  0x25   : > { %305 = vst.msk [vmem:[#allocation2 + $0xc8] sm:$0xff] %vm279_vm0, %v10184_v0 }
  0x26   : > { %306 = vst.msk [vmem:[#allocation2 + $0xd0] sm:$0xff] %vm279_vm0, %v10184_v0 }
  0x27   : > { %307 = vst.msk [vmem:[#allocation2 + $0xd8] sm:$0xff] %vm279_vm0, %v10184_v0 }
  0x28   : > { %308 = vst.msk [vmem:[#allocation2 + $0xe0] sm:$0xff] %vm279_vm0, %v10184_v0 }
  0x29   : > { %309 = vst.msk [vmem:[#allocation2 + $0xe8] sm:$0xff] %vm279_vm0, %v10184_v0 }
  0x2a   : > { %310 = vst.msk [vmem:[#allocation2 + $0xf0] sm:$0xff] %vm279_vm0, %v10184_v0 }
  0x2b   : > { %311 = vst.msk [vmem:[#allocation2 + $0xf8] sm:$0xff] %vm279_vm0, %v10184_v0 }
  0x2c   : > { %312 = vst.msk [vmem:[#allocation2 + $0x100] sm:$0xff] %vm279_vm0, %v10184_v0 }
  0x2d   : > { %313 = vst.msk [vmem:[#allocation2 + $0x108] sm:$0xff] %vm279_vm0, %v10184_v0 }
  0x2e   : > { %314 = vst.msk [vmem:[#allocation2 + $0x110] sm:$0xff] %vm279_vm0, %v10184_v0 }
  0x2f   : > { %315 = vst.msk [vmem:[#allocation2 + $0x118] sm:$0xff] %vm279_vm0, %v10184_v0 }
  0x30   : > { %316 = vst.msk [vmem:[#allocation2 + $0x120] sm:$0xff] %vm279_vm0, %v10184_v0 }
  0x31   : > { %317 = vst.msk [vmem:[#allocation2 + $0x128] sm:$0xff] %vm279_vm0, %v10184_v0 }
  0x32   : > { %318 = vst.msk [vmem:[#allocation2 + $0x130] sm:$0xff] %vm279_vm0, %v10184_v0 }
  0x33   : > { %319 = vst.msk [vmem:[#allocation2 + $0x138] sm:$0xff] %vm279_vm0, %v10184_v0 }
  0x34   : > { %320 = vst.msk [vmem:[#allocation2 + $0x140] sm:$0xff] %vm279_vm0, %v10184_v0 }
  0x35   : > { %321 = vst.msk [vmem:[#allocation2 + $0x148] sm:$0xff] %vm279_vm0, %v10184_v0 }
  0x36   : > { %322 = vst.msk [vmem:[#allocation2 + $0x150] sm:$0xff] %vm279_vm0, %v10184_v0 }
  0x37   : > { %323 = vst.msk [vmem:[#allocation2 + $0x158] sm:$0xff] %vm279_vm0, %v10184_v0 }
  0x38   : > { %324 = vst.msk [vmem:[#allocation2 + $0x160] sm:$0xff] %vm279_vm0, %v10184_v0 }
  0x39   : > { %325 = vst.msk [vmem:[#allocation2 + $0x168] sm:$0xff] %vm279_vm0, %v10184_v0 }
  0x3a   : > { %326 = vst.msk [vmem:[#allocation2 + $0x170] sm:$0xff] %vm279_vm0, %v10184_v0 }
  0x3b   : > { %327 = vst.msk [vmem:[#allocation2 + $0x178] sm:$0xff] %vm279_vm0, %v10184_v0 }
  0x3c   : > { %328 = vst.msk [vmem:[#allocation2 + $0x180] sm:$0xff] %vm279_vm0, %v10184_v0 }
  0x3d   : > { %329 = vst.msk [vmem:[#allocation2 + $0x188] sm:$0xff] %vm279_vm0, %v10184_v0 }
  0x3e   : > { %330 = vst.msk [vmem:[#allocation2 + $0x190] sm:$0xff] %vm279_vm0, %v10184_v0 }
  0x3f   : > { %331 = vst.msk [vmem:[#allocation2 + $0x198] sm:$0xff] %vm279_vm0, %v10184_v0 }
  0x40   : > { %332 = vst.msk [vmem:[#allocation2 + $0x1a0] sm:$0xff] %vm279_vm0, %v10184_v0 }
  0x41   : > { %333 = vst.msk [vmem:[#allocation2 + $0x1a8] sm:$0xff] %vm279_vm0, %v10184_v0 }
  0x42   : > { %334 = vst.msk [vmem:[#allocation2 + $0x1b0] sm:$0xff] %vm279_vm0, %v10184_v0 }
  0x43   : > { %335 = vst.msk [vmem:[#allocation2 + $0x1b8] sm:$0xff] %vm279_vm0, %v10184_v0 }
  0x44   : > { %336 = vst.msk [vmem:[#allocation2 + $0x1c0] sm:$0xff] %vm279_vm0, %v10184_v0 }
  0x45   : > { %337 = vst.msk [vmem:[#allocation2 + $0x1c8] sm:$0xff] %vm279_vm0, %v10184_v0 }
  0x46   : > { %338 = vst.msk [vmem:[#allocation2 + $0x1d0] sm:$0xff] %vm279_vm0, %v10184_v0 }
  0x47   : > { %339 = vst.msk [vmem:[#allocation2 + $0x1d8] sm:$0xff] %vm279_vm0, %v10184_v0 }
  0x48   : > { %340 = vst.msk [vmem:[#allocation2 + $0x1e0] sm:$0xff] %vm279_vm0, %v10184_v0 }
  0x49   : > { %341 = vst.msk [vmem:[#allocation2 + $0x1e8] sm:$0xff] %vm279_vm0, %v10184_v0 }
  0x4a   : > { %342 = vst.msk [vmem:[#allocation2 + $0x1f0] sm:$0xff] %vm279_vm0, %v10184_v0 }
  0x4b   : > { %343 = vst.msk [vmem:[#allocation2 + $0x1f8] sm:$0xff] %vm279_vm0, %v10184_v0 }
  0x4c   : > { %344 = vst.msk [vmem:[#allocation2 + $0x200] sm:$0xff] %vm279_vm0, %v10184_v0 }
  0x4d   : > { %345 = vst.msk [vmem:[#allocation2 + $0x208] sm:$0xff] %vm279_vm0, %v10184_v0 }
  0x4e   : > { %346 = vst.msk [vmem:[#allocation2 + $0x210] sm:$0xff] %vm279_vm0, %v10184_v0 }
  0x4f   : > { %347 = vst.msk [vmem:[#allocation2 + $0x218] sm:$0xff] %vm279_vm0, %v10184_v0 }
  0x50   : > { %348 = vst.msk [vmem:[#allocation2 + $0x220] sm:$0xff] %vm279_vm0, %v10184_v0 }
  0x51   : > { %349 = vst.msk [vmem:[#allocation2 + $0x228] sm:$0xff] %vm279_vm0, %v10184_v0 }
  0x52   : > { %350 = vst.msk [vmem:[#allocation2 + $0x230] sm:$0xff] %vm279_vm0, %v10184_v0 }
  0x53   : > { %351 = vst.msk [vmem:[#allocation2 + $0x238] sm:$0xff] %vm279_vm0, %v10184_v0 }
  0x54   : > { %352 = vst.msk [vmem:[#allocation2 + $0x240] sm:$0xff] %vm279_vm0, %v10184_v0 }
  0x55   : > { %353 = vst.msk [vmem:[#allocation2 + $0x248] sm:$0xff] %vm279_vm0, %v10184_v0 }
  0x56   : > { %354 = vst.msk [vmem:[#allocation2 + $0x250] sm:$0xff] %vm279_vm0, %v10184_v0 }
  0x57   : > { %355 = vst.msk [vmem:[#allocation2 + $0x258] sm:$0xff] %vm279_vm0, %v10184_v0 }
  0x58   : > { %356 = vst.msk [vmem:[#allocation2 + $0x260] sm:$0xff] %vm279_vm0, %v10184_v0 }
  0x59   : > { %357 = vst.msk [vmem:[#allocation2 + $0x268] sm:$0xff] %vm279_vm0, %v10184_v0 }
  0x5a   : > { %358 = vst.msk [vmem:[#allocation2 + $0x270] sm:$0xff] %vm279_vm0, %v10184_v0 }
  0x5b   : > { %359 = vst.msk [vmem:[#allocation2 + $0x278] sm:$0xff] %vm279_vm0, %v10184_v0 }
  0x5c   : > { %360 = vst.msk [vmem:[#allocation2 + $0x280] sm:$0xff] %vm279_vm0, %v10184_v0 }
  0x5d   : > { %361 = vst.msk [vmem:[#allocation2 + $0x288] sm:$0xff] %vm279_vm0, %v10184_v0 }
  0x5e   : > { %362 = vst.msk [vmem:[#allocation2 + $0x290] sm:$0xff] %vm279_vm0, %v10184_v0 }
  0x5f   : > { %363 = vst.msk [vmem:[#allocation2 + $0x298] sm:$0xff] %vm279_vm0, %v10184_v0 }
  0x60   : > { %364 = vst.msk [vmem:[#allocation2 + $0x2a0] sm:$0xff] %vm279_vm0, %v10184_v0 }
  0x61   : > { %365 = vst.msk [vmem:[#allocation2 + $0x2a8] sm:$0xff] %vm279_vm0, %v10184_v0 }
  0x62   : > { %366 = vst.msk [vmem:[#allocation2 + $0x2b0] sm:$0xff] %vm279_vm0, %v10184_v0 }
  0x63   : > { %367 = vst.msk [vmem:[#allocation2 + $0x2b8] sm:$0xff] %vm279_vm0, %v10184_v0 }
  0x64   : > { %368 = vst.msk [vmem:[#allocation2 + $0x2c0] sm:$0xff] %vm279_vm0, %v10184_v0 }
  0x65   : > { %369 = vst.msk [vmem:[#allocation2 + $0x2c8] sm:$0xff] %vm279_vm0, %v10184_v0 }
  0x66   : > { %370 = vst.msk [vmem:[#allocation2 + $0x2d0] sm:$0xff] %vm279_vm0, %v10184_v0 }
  0x67   : > { %371 = vst.msk [vmem:[#allocation2 + $0x2d8] sm:$0xff] %vm279_vm0, %v10184_v0 }
  0x68   : > { %372 = vst.msk [vmem:[#allocation2 + $0x2e0] sm:$0xff] %vm279_vm0, %v10184_v0 }
  0x69   : > { %373 = vst.msk [vmem:[#allocation2 + $0x2e8] sm:$0xff] %vm279_vm0, %v10184_v0 }
  0x6a   : > { %374 = vst.msk [vmem:[#allocation2 + $0x2f0] sm:$0xff] %vm279_vm0, %v10184_v0 }
  0x6b   : > { %375 = vst.msk [vmem:[#allocation2 + $0x2f8] sm:$0xff] %vm279_vm0, %v10184_v0 }
  0x6c   : > { %376 = vst.msk [vmem:[#allocation2 + $0x300] sm:$0xff] %vm279_vm0, %v10184_v0 }
  0x6d   : > { %377 = vst.msk [vmem:[#allocation2 + $0x308] sm:$0xff] %vm279_vm0, %v10184_v0 }
  0x6e   : > { %378 = vst.msk [vmem:[#allocation2 + $0x310] sm:$0xff] %vm279_vm0, %v10184_v0 }
  0x6f   : > { %379 = vst.msk [vmem:[#allocation2 + $0x318] sm:$0xff] %vm279_vm0, %v10184_v0 }
  0x70   : > { %380 = vst.msk [vmem:[#allocation2 + $0x320] sm:$0xff] %vm279_vm0, %v10184_v0 }
  0x71   : > { %381 = vst.msk [vmem:[#allocation2 + $0x328] sm:$0xff] %vm279_vm0, %v10184_v0 }
  0x72   : > { %382 = vst.msk [vmem:[#allocation2 + $0x330] sm:$0xff] %vm279_vm0, %v10184_v0 }
  0x73   : > { %383 = vst.msk [vmem:[#allocation2 + $0x338] sm:$0xff] %vm279_vm0, %v10184_v0 }
  0x74   : > { %384 = vst.msk [vmem:[#allocation2 + $0x340] sm:$0xff] %vm279_vm0, %v10184_v0 }
  0x75   : > { %385 = vst.msk [vmem:[#allocation2 + $0x348] sm:$0xff] %vm279_vm0, %v10184_v0 }
  0x76   : > { %386 = vst.msk [vmem:[#allocation2 + $0x350] sm:$0xff] %vm279_vm0, %v10184_v0 }
  0x77   : > { %387 = vst.msk [vmem:[#allocation2 + $0x358] sm:$0xff] %vm279_vm0, %v10184_v0 }
  0x78   : > { %388 = vst.msk [vmem:[#allocation2 + $0x360] sm:$0xff] %vm279_vm0, %v10184_v0 }
  0x79   : > { %389 = vst.msk [vmem:[#allocation2 + $0x368] sm:$0xff] %vm279_vm0, %v10184_v0 }
  0x7a   : > { %390 = vst.msk [vmem:[#allocation2 + $0x370] sm:$0xff] %vm279_vm0, %v10184_v0 }
  0x7b   : > { %391 = vst.msk [vmem:[#allocation2 + $0x378] sm:$0xff] %vm279_vm0, %v10184_v0 }
  0x7c   : > { %392 = vst.msk [vmem:[#allocation2 + $0x380] sm:$0xff] %vm279_vm0, %v10184_v0 }
  0x7d   : > { %393 = vst.msk [vmem:[#allocation2 + $0x388] sm:$0xff] %vm279_vm0, %v10184_v0 }
  0x7e   : > { %394 = vst.msk [vmem:[#allocation2 + $0x390] sm:$0xff] %vm279_vm0, %v10184_v0 }
  0x7f   : > { %395 = vst.msk [vmem:[#allocation2 + $0x398] sm:$0xff] %vm279_vm0, %v10184_v0 }
  0x80   : > { %396 = vst.msk [vmem:[#allocation2 + $0x3a0] sm:$0xff] %vm279_vm0, %v10184_v0 }
  0x81   : > { %397 = vst.msk [vmem:[#allocation2 + $0x3a8] sm:$0xff] %vm279_vm0, %v10184_v0 }
  0x82   : > { %398 = vst.msk [vmem:[#allocation2 + $0x3b0] sm:$0xff] %vm279_vm0, %v10184_v0 }
  0x83   : > { %399 = vst.msk [vmem:[#allocation2 + $0x3b8] sm:$0xff] %vm279_vm0, %v10184_v0 }
  0x84   : > { %400 = vst.msk [vmem:[#allocation2 + $0x3c0] sm:$0xff] %vm279_vm0, %v10184_v0 }
  0x85   : > { %401 = vst.msk [vmem:[#allocation2 + $0x3c8] sm:$0xff] %vm279_vm0, %v10184_v0 }
  0x86   : > { %402 = vst.msk [vmem:[#allocation2 + $0x3d0] sm:$0xff] %vm279_vm0, %v10184_v0 }
  0x87   : > { %403 = vst.msk [vmem:[#allocation2 + $0x3d8] sm:$0xff] %vm279_vm0, %v10184_v0 }
  0x88   : > { %404 = vst.msk [vmem:[#allocation2 + $0x3e0] sm:$0xff] %vm279_vm0, %v10184_v0 }
  0x89   : > { %405 = vst.msk [vmem:[#allocation2 + $0x3e8] sm:$0xff] %vm279_vm0, %v10184_v0 }
  0x8a   : > { %406 = vst.msk [vmem:[#allocation2 + $0x3f0] sm:$0xff] %vm279_vm0, %v10184_v0 }
  0x8b   : > { %407 = vst.msk [vmem:[#allocation2 + $0x3f8] sm:$0xff] %vm279_vm0, %v10184_v0 }
  0x8c   : > { %408 = vst.msk [vmem:[#allocation2 + $0x400] sm:$0xff] %vm279_vm0, %v10184_v0 }
  0x8d   : > { %409 = vst.msk [vmem:[#allocation2 + $0x408] sm:$0xff] %vm279_vm0, %v10184_v0 }
  0x8e   : > { %410 = vst.msk [vmem:[#allocation2 + $0x410] sm:$0xff] %vm279_vm0, %v10184_v0 }
  0x8f   : > { %411 = vst.msk [vmem:[#allocation2 + $0x418] sm:$0xff] %vm279_vm0, %v10184_v0 }
  0x90   : > { %412 = vst.msk [vmem:[#allocation2 + $0x420] sm:$0xff] %vm279_vm0, %v10184_v0 }
  0x91   : > { %413 = vst.msk [vmem:[#allocation2 + $0x428] sm:$0xff] %vm279_vm0, %v10184_v0 }
  0x92   : > { %414 = vst.msk [vmem:[#allocation2 + $0x430] sm:$0xff] %vm279_vm0, %v10184_v0 }
  0x93   : > { %415 = vst.msk [vmem:[#allocation2 + $0x438] sm:$0xff] %vm279_vm0, %v10184_v0 }
  0x94   : > { %416 = vst.msk [vmem:[#allocation2 + $0x440] sm:$0xff] %vm279_vm0, %v10184_v0 }
  0x95   : > { %417 = vst.msk [vmem:[#allocation2 + $0x448] sm:$0xff] %vm279_vm0, %v10184_v0 }
  0x96   : > { %418 = vst.msk [vmem:[#allocation2 + $0x450] sm:$0xff] %vm279_vm0, %v10184_v0 }
  0x97   : > { %419 = vst.msk [vmem:[#allocation2 + $0x458] sm:$0xff] %vm279_vm0, %v10184_v0 }
  0x98   : > { %420 = vst.msk [vmem:[#allocation2 + $0x460] sm:$0xff] %vm279_vm0, %v10184_v0 }
  0x99   : > { %421 = vst.msk [vmem:[#allocation2 + $0x468] sm:$0xff] %vm279_vm0, %v10184_v0 }
  0x9a   : > { %422 = vst.msk [vmem:[#allocation2 + $0x470] sm:$0xff] %vm279_vm0, %v10184_v0 }
  0x9b   : > { %423 = vst.msk [vmem:[#allocation2 + $0x478] sm:$0xff] %vm279_vm0, %v10184_v0 }
  0x9c   : > { %424 = vst.msk [vmem:[#allocation2 + $0x480] sm:$0xff] %vm279_vm0, %v10184_v0 }
  0x9d   : > { %425 = vst.msk [vmem:[#allocation2 + $0x488] sm:$0xff] %vm279_vm0, %v10184_v0 }
  0x9e   : > { %426 = vst.msk [vmem:[#allocation2 + $0x490] sm:$0xff] %vm279_vm0, %v10184_v0 }
  0x9f   : > { %427 = vst.msk [vmem:[#allocation2 + $0x498] sm:$0xff] %vm279_vm0, %v10184_v0 }
  0xa0   : > { %428 = vst.msk [vmem:[#allocation2 + $0x4a0] sm:$0xff] %vm279_vm0, %v10184_v0 }
  0xa1   : > { %429 = vst.msk [vmem:[#allocation2 + $0x4a8] sm:$0xff] %vm279_vm0, %v10184_v0 }
  0xa2   : > { %430 = vst.msk [vmem:[#allocation2 + $0x4b0] sm:$0xff] %vm279_vm0, %v10184_v0 }
  0xa3   : > { %431 = vst.msk [vmem:[#allocation2 + $0x4b8] sm:$0xff] %vm279_vm0, %v10184_v0 }
  0xa4   : > { %432 = vst.msk [vmem:[#allocation2 + $0x4c0] sm:$0xff] %vm279_vm0, %v10184_v0 }
  0xa5   : > { %433 = vst.msk [vmem:[#allocation2 + $0x4c8] sm:$0xff] %vm279_vm0, %v10184_v0 }
  0xa6   : > { %434 = vst.msk [vmem:[#allocation2 + $0x4d0] sm:$0xff] %vm279_vm0, %v10184_v0 }
  0xa7   : > { %435 = vst.msk [vmem:[#allocation2 + $0x4d8] sm:$0xff] %vm279_vm0, %v10184_v0 }
  0xa8   : > { %436 = vst.msk [vmem:[#allocation2 + $0x4e0] sm:$0xff] %vm279_vm0, %v10184_v0 }
  0xa9   : > { %437 = vst.msk [vmem:[#allocation2 + $0x4e8] sm:$0xff] %vm279_vm0, %v10184_v0 }
  0xaa   : > { %438 = vst.msk [vmem:[#allocation2 + $0x4f0] sm:$0xff] %vm279_vm0, %v10184_v0 }
  0xab   : > { %439 = vst.msk [vmem:[#allocation2 + $0x4f8] sm:$0xff] %vm279_vm0, %v10184_v0 }
  0xac   : > { %440 = vst.msk [vmem:[#allocation2 + $0x500] sm:$0xff] %vm279_vm0, %v10184_v0 }
  0xad   : > { %441 = vst.msk [vmem:[#allocation2 + $0x508] sm:$0xff] %vm279_vm0, %v10184_v0 }
  0xae   : > { %442 = vst.msk [vmem:[#allocation2 + $0x510] sm:$0xff] %vm279_vm0, %v10184_v0 }
  0xaf   : > { %443 = vst.msk [vmem:[#allocation2 + $0x518] sm:$0xff] %vm279_vm0, %v10184_v0 }
  0xb0   : > { %444 = vst.msk [vmem:[#allocation2 + $0x520] sm:$0xff] %vm279_vm0, %v10184_v0 }
  0xb1   : > { %445 = vst.msk [vmem:[#allocation2 + $0x528] sm:$0xff] %vm279_vm0, %v10184_v0 }
  0xb2   : > { %446 = vst.msk [vmem:[#allocation2 + $0x530] sm:$0xff] %vm279_vm0, %v10184_v0 }
  0xb3   : > { %447 = vst.msk [vmem:[#allocation2 + $0x538] sm:$0xff] %vm279_vm0, %v10184_v0 }
  0xb4   : > { %448 = vst.msk [vmem:[#allocation2 + $0x540] sm:$0xff] %vm279_vm0, %v10184_v0 }
  0xb5   : > { %449 = vst.msk [vmem:[#allocation2 + $0x548] sm:$0xff] %vm279_vm0, %v10184_v0 }
  0xb6   : > { %450 = vst.msk [vmem:[#allocation2 + $0x550] sm:$0xff] %vm279_vm0, %v10184_v0 }
  0xb7   : > { %451 = vst.msk [vmem:[#allocation2 + $0x558] sm:$0xff] %vm279_vm0, %v10184_v0 }
  0xb8   : > { %452 = vst.msk [vmem:[#allocation2 + $0x560] sm:$0xff] %vm279_vm0, %v10184_v0 }
  0xb9   : > { %453 = vst.msk [vmem:[#allocation2 + $0x568] sm:$0xff] %vm279_vm0, %v10184_v0 }
  0xba   : > { %454 = vst.msk [vmem:[#allocation2 + $0x570] sm:$0xff] %vm279_vm0, %v10184_v0 }
  0xbb   : > { %455 = vst.msk [vmem:[#allocation2 + $0x578] sm:$0xff] %vm279_vm0, %v10184_v0 }
  0xbc   : > { %456 = vst.msk [vmem:[#allocation2 + $0x580] sm:$0xff] %vm279_vm0, %v10184_v0 }
  0xbd   : > { %457 = vst.msk [vmem:[#allocation2 + $0x588] sm:$0xff] %vm279_vm0, %v10184_v0 }
  0xbe   : > { %458 = vst.msk [vmem:[#allocation2 + $0x590] sm:$0xff] %vm279_vm0, %v10184_v0 }
  0xbf   : > { %459 = vst.msk [vmem:[#allocation2 + $0x598] sm:$0xff] %vm279_vm0, %v10184_v0 }
  0xc0   : > { %460 = vst.msk [vmem:[#allocation2 + $0x5a0] sm:$0xff] %vm279_vm0, %v10184_v0 }
  0xc1   : > { %461 = vst.msk [vmem:[#allocation2 + $0x5a8] sm:$0xff] %vm279_vm0, %v10184_v0 }
  0xc2   : > { %462 = vst.msk [vmem:[#allocation2 + $0x5b0] sm:$0xff] %vm279_vm0, %v10184_v0 }
  0xc3   : > { %463 = vst.msk [vmem:[#allocation2 + $0x5b8] sm:$0xff] %vm279_vm0, %v10184_v0 }
  0xc4   : > { %464 = vst.msk [vmem:[#allocation2 + $0x5c0] sm:$0xff] %vm279_vm0, %v10184_v0 }
  0xc5   : > { %465 = vst.msk [vmem:[#allocation2 + $0x5c8] sm:$0xff] %vm279_vm0, %v10184_v0 }
  0xc6   : > { %466 = vst.msk [vmem:[#allocation2 + $0x5d0] sm:$0xff] %vm279_vm0, %v10184_v0 }
  0xc7   : > { %467 = vst.msk [vmem:[#allocation2 + $0x5d8] sm:$0xff] %vm279_vm0, %v10184_v0 }
  0xc8   : > { %468 = vst.msk [vmem:[#allocation2 + $0x5e0] sm:$0xff] %vm279_vm0, %v10184_v0 }
  0xc9   : > { %469 = vst.msk [vmem:[#allocation2 + $0x5e8] sm:$0xff] %vm279_vm0, %v10184_v0 }
  0xca   : > { %470 = vst.msk [vmem:[#allocation2 + $0x5f0] sm:$0xff] %vm279_vm0, %v10184_v0 }
  0xcb   : > { %471 = vst.msk [vmem:[#allocation2 + $0x5f8] sm:$0xff] %vm279_vm0, %v10184_v0 }
  0xcc   : > { %472 = vst.msk [vmem:[#allocation2 + $0x600] sm:$0xff] %vm279_vm0, %v10184_v0 }
  0xcd   : > { %473 = vst.msk [vmem:[#allocation2 + $0x608] sm:$0xff] %vm279_vm0, %v10184_v0 }
  0xce   : > { %474 = vst.msk [vmem:[#allocation2 + $0x610] sm:$0xff] %vm279_vm0, %v10184_v0 }
  0xcf   : > { %475 = vst.msk [vmem:[#allocation2 + $0x618] sm:$0xff] %vm279_vm0, %v10184_v0 }
  0xd0   : > { %476 = vst.msk [vmem:[#allocation2 + $0x620] sm:$0xff] %vm279_vm0, %v10184_v0 }
  0xd1   : > { %477 = vst.msk [vmem:[#allocation2 + $0x628] sm:$0xff] %vm279_vm0, %v10184_v0 }
  0xd2   : > { %478 = vst.msk [vmem:[#allocation2 + $0x630] sm:$0xff] %vm279_vm0, %v10184_v0 }
  0xd3   : > { %479 = vst.msk [vmem:[#allocation2 + $0x638] sm:$0xff] %vm279_vm0, %v10184_v0 }
  0xd4   : > { %480 = vst.msk [vmem:[#allocation2 + $0x640] sm:$0xff] %vm279_vm0, %v10184_v0 }
  0xd5   : > { %481 = vst.msk [vmem:[#allocation2 + $0x648] sm:$0xff] %vm279_vm0, %v10184_v0 }
  0xd6   : > { %482 = vst.msk [vmem:[#allocation2 + $0x650] sm:$0xff] %vm279_vm0, %v10184_v0 }
  0xd7   : > { %483 = vst.msk [vmem:[#allocation2 + $0x658] sm:$0xff] %vm279_vm0, %v10184_v0 }
  0xd8   : > { %485 = vst.msk [vmem:[#allocation3] sm:$0xff] %vm484_vm1, %v10184_v0 }
  0xd9   : > { %486 = vst.msk [vmem:[#allocation3 + $0x8] sm:$0xff] %vm484_vm1, %v10184_v0 }
  0xda   : > { %487 = vst.msk [vmem:[#allocation3 + $0x10] sm:$0xff] %vm484_vm1, %v10184_v0 }
  0xdb   : > { %488 = vst.msk [vmem:[#allocation3 + $0x18] sm:$0xff] %vm484_vm1, %v10184_v0 }
  0xdc   : > { %489 = vst.msk [vmem:[#allocation3 + $0x20] sm:$0xff] %vm484_vm1, %v10184_v0 }
  0xdd   : > { %490 = vst.msk [vmem:[#allocation3 + $0x28] sm:$0xff] %vm484_vm1, %v10184_v0 }
  0xde   : > { %491 = vst.msk [vmem:[#allocation3 + $0x30] sm:$0xff] %vm484_vm1, %v10184_v0 }
  0xdf   : > { %492 = vst.msk [vmem:[#allocation3 + $0x38] sm:$0xff] %vm484_vm1, %v10184_v0 }
  0xe0   : > { %493 = vst.msk [vmem:[#allocation3 + $0x40] sm:$0xff] %vm484_vm1, %v10184_v0 }
  0xe1   : > { %494 = vst.msk [vmem:[#allocation3 + $0x48] sm:$0xff] %vm484_vm1, %v10184_v0 }
  0xe2   : > { %495 = vst.msk [vmem:[#allocation3 + $0x50] sm:$0xff] %vm484_vm1, %v10184_v0 }
  0xe3   : > { %496 = vst.msk [vmem:[#allocation3 + $0x58] sm:$0xff] %vm484_vm1, %v10184_v0 }
  0xe4   : > { %497 = vst.msk [vmem:[#allocation3 + $0x60] sm:$0xff] %vm484_vm1, %v10184_v0 }
  0xe5   : > { %498 = vst.msk [vmem:[#allocation3 + $0x68] sm:$0xff] %vm484_vm1, %v10184_v0 }
  0xe6   : > { %499 = vst.msk [vmem:[#allocation3 + $0x70] sm:$0xff] %vm484_vm1, %v10184_v0 }
  0xe7   : > { %500 = vst.msk [vmem:[#allocation3 + $0x78] sm:$0xff] %vm484_vm1, %v10184_v0 }
  0xe8   : > { %501 = vst.msk [vmem:[#allocation3 + $0x80] sm:$0xff] %vm484_vm1, %v10184_v0 }
  0xe9   : > { %502 = vst.msk [vmem:[#allocation3 + $0x88] sm:$0xff] %vm484_vm1, %v10184_v0 }
  0xea   : > { %503 = vst.msk [vmem:[#allocation3 + $0x90] sm:$0xff] %vm484_vm1, %v10184_v0 }
  0xeb   : > { %504 = vst.msk [vmem:[#allocation3 + $0x98] sm:$0xff] %vm484_vm1, %v10184_v0 }
  0xec   : > { %505 = vst.msk [vmem:[#allocation3 + $0xa0] sm:$0xff] %vm484_vm1, %v10184_v0 }
  0xed   : > { %506 = vst.msk [vmem:[#allocation3 + $0xa8] sm:$0xff] %vm484_vm1, %v10184_v0 }
  0xee   : > { %507 = vst.msk [vmem:[#allocation3 + $0xb0] sm:$0xff] %vm484_vm1, %v10184_v0 }
  0xef   : > { %508 = vst.msk [vmem:[#allocation3 + $0xb8] sm:$0xff] %vm484_vm1, %v10184_v0 }
  0xf0   : > { %509 = vst.msk [vmem:[#allocation3 + $0xc0] sm:$0xff] %vm484_vm1, %v10184_v0 }
  0xf1   : > { %510 = vst.msk [vmem:[#allocation3 + $0xc8] sm:$0xff] %vm484_vm1, %v10184_v0 }
  0xf2   : > { %511 = vst.msk [vmem:[#allocation3 + $0xd0] sm:$0xff] %vm484_vm1, %v10184_v0 }
  0xf3   : > { %512 = vst.msk [vmem:[#allocation3 + $0xd8] sm:$0xff] %vm484_vm1, %v10184_v0 }
  0xf4   : > { %513 = vst.msk [vmem:[#allocation3 + $0xe0] sm:$0xff] %vm484_vm1, %v10184_v0 }
  0xf5   : > { %514 = vst.msk [vmem:[#allocation3 + $0xe8] sm:$0xff] %vm484_vm1, %v10184_v0 }
  0xf6   : > { %515 = vst.msk [vmem:[#allocation3 + $0xf0] sm:$0xff] %vm484_vm1, %v10184_v0 }
  0xf7   : > { %516 = vst.msk [vmem:[#allocation3 + $0xf8] sm:$0xff] %vm484_vm1, %v10184_v0 }
  0xf8   : > { %517 = vst.msk [vmem:[#allocation3 + $0x100] sm:$0xff] %vm484_vm1, %v10184_v0 }
  0xf9   : > { %518 = vst.msk [vmem:[#allocation3 + $0x108] sm:$0xff] %vm484_vm1, %v10184_v0 }
  0xfa   : > { %519 = vst.msk [vmem:[#allocation3 + $0x110] sm:$0xff] %vm484_vm1, %v10184_v0 }
  0xfb   : > { %520 = vst.msk [vmem:[#allocation3 + $0x118] sm:$0xff] %vm484_vm1, %v10184_v0 }
  0xfc   : > { %521 = vst.msk [vmem:[#allocation3 + $0x120] sm:$0xff] %vm484_vm1, %v10184_v0 }
  0xfd   : > { %522 = vst.msk [vmem:[#allocation3 + $0x128] sm:$0xff] %vm484_vm1, %v10184_v0 }
  0xfe   : > { %523 = vst.msk [vmem:[#allocation3 + $0x130] sm:$0xff] %vm484_vm1, %v10184_v0 }
  0xff   : > { %524 = vst.msk [vmem:[#allocation3 + $0x138] sm:$0xff] %vm484_vm1, %v10184_v0 }
 0x100   : > { %525 = vst.msk [vmem:[#allocation3 + $0x140] sm:$0xff] %vm484_vm1, %v10184_v0 }
 0x101   : > { %526 = vst.msk [vmem:[#allocation3 + $0x148] sm:$0xff] %vm484_vm1, %v10184_v0 }
 0x102   : > { %527 = vst.msk [vmem:[#allocation3 + $0x150] sm:$0xff] %vm484_vm1, %v10184_v0 }
 0x103   : > { %528 = vst.msk [vmem:[#allocation3 + $0x158] sm:$0xff] %vm484_vm1, %v10184_v0 }
 0x104   : > { %529 = vst.msk [vmem:[#allocation3 + $0x160] sm:$0xff] %vm484_vm1, %v10184_v0 }
 0x105   : > { %530 = vst.msk [vmem:[#allocation3 + $0x168] sm:$0xff] %vm484_vm1, %v10184_v0 }
 0x106   : > { %531 = vst.msk [vmem:[#allocation3 + $0x170] sm:$0xff] %vm484_vm1, %v10184_v0 }
 0x107   : > { %532 = vst.msk [vmem:[#allocation3 + $0x178] sm:$0xff] %vm484_vm1, %v10184_v0 }
 0x108   : > { %533 = vst.msk [vmem:[#allocation3 + $0x180] sm:$0xff] %vm484_vm1, %v10184_v0 }
 0x109   : > { %534 = vst.msk [vmem:[#allocation3 + $0x188] sm:$0xff] %vm484_vm1, %v10184_v0 }
 0x10a   : > { %535 = vst.msk [vmem:[#allocation3 + $0x190] sm:$0xff] %vm484_vm1, %v10184_v0 }
 0x10b   : > { %536 = vst.msk [vmem:[#allocation3 + $0x198] sm:$0xff] %vm484_vm1, %v10184_v0 }
 0x10c   : > { %537 = vst.msk [vmem:[#allocation3 + $0x1a0] sm:$0xff] %vm484_vm1, %v10184_v0 }
 0x10d   : > { %538 = vst.msk [vmem:[#allocation3 + $0x1a8] sm:$0xff] %vm484_vm1, %v10184_v0 }
 0x10e   : > { %539 = vst.msk [vmem:[#allocation3 + $0x1b0] sm:$0xff] %vm484_vm1, %v10184_v0 }
 0x10f   : > { %540 = vst.msk [vmem:[#allocation3 + $0x1b8] sm:$0xff] %vm484_vm1, %v10184_v0 }
 0x110   : > { %541 = vst.msk [vmem:[#allocation3 + $0x1c0] sm:$0xff] %vm484_vm1, %v10184_v0 }
 0x111   : > { %542 = vst.msk [vmem:[#allocation3 + $0x1c8] sm:$0xff] %vm484_vm1, %v10184_v0 }
 0x112   : > { %543 = vst.msk [vmem:[#allocation3 + $0x1d0] sm:$0xff] %vm484_vm1, %v10184_v0 }
 0x113   : > { %544 = vst.msk [vmem:[#allocation3 + $0x1d8] sm:$0xff] %vm484_vm1, %v10184_v0 }
 0x114   : > { %545 = vst.msk [vmem:[#allocation3 + $0x1e0] sm:$0xff] %vm484_vm1, %v10184_v0 }
 0x115   : > { %546 = vst.msk [vmem:[#allocation3 + $0x1e8] sm:$0xff] %vm484_vm1, %v10184_v0 }
 0x116   : > { %547 = vst.msk [vmem:[#allocation3 + $0x1f0] sm:$0xff] %vm484_vm1, %v10184_v0 }
 0x117   : > { %548 = vst.msk [vmem:[#allocation3 + $0x1f8] sm:$0xff] %vm484_vm1, %v10184_v0 }
 0x118   : > { %549 = vst.msk [vmem:[#allocation3 + $0x200] sm:$0xff] %vm484_vm1, %v10184_v0 }
 0x119   : > { %550 = vst.msk [vmem:[#allocation3 + $0x208] sm:$0xff] %vm484_vm1, %v10184_v0 }
 0x11a   : > { %551 = vst.msk [vmem:[#allocation3 + $0x210] sm:$0xff] %vm484_vm1, %v10184_v0 }
 0x11b   : > { %552 = vst.msk [vmem:[#allocation3 + $0x218] sm:$0xff] %vm484_vm1, %v10184_v0 }
 0x11c   : > { %553 = vst.msk [vmem:[#allocation3 + $0x220] sm:$0xff] %vm484_vm1, %v10184_v0 }
 0x11d   : > { %554 = vst.msk [vmem:[#allocation3 + $0x228] sm:$0xff] %vm484_vm1, %v10184_v0 }
 0x11e   : > { %555 = vst.msk [vmem:[#allocation3 + $0x230] sm:$0xff] %vm484_vm1, %v10184_v0 }
 0x11f   : > { %556 = vst.msk [vmem:[#allocation3 + $0x238] sm:$0xff] %vm484_vm1, %v10184_v0 }
 0x120 LB: >> { %v8705_v1 = vld [vmem:[%s14305_s1 + $0x8] sm:$0xff]  ;;  %v8770_v2 = vld [vmem:[%s14305_s1 + $0x10] sm:$0xff]  ;;  %v8837_v3 = vld [vmem:[%s14305_s1 + $0x18] sm:$0xff]  ;;  %s8704_s20 = smul.u32 288, %s10178_s11  ;;  %vm633_vm2 = vcmask 64512   ;;  %s10178_s11 = sphi %s10795_s11, %s562_s11  }
 0x121   : >> { %10091 = vmatpush.msra.mxu1 %v8705_v1  ;;  %10092 = vmatpush.msra.mxu2 %v8705_v1  ;;  %v598_v4 = vld [vmem:[%s14305_s1] sm:$0xff]  ;;  %v9034_v26 = vld [vmem:[%s14305_s1 + $0x30] sm:$0xff]  ;;  %v9099_v27 = vld [vmem:[%s14305_s1 + $0x38] sm:$0xff]  ;;  %s9198_s15 = smul.u32 96, %s10178_s11  ;;  %s562_s11 = sadd.s32 1, %s10178_s11  }
 0x122   : >> { %10093 = vmatpush.msra.mxu3 %v8705_v1  ;;  %v8902_v5 = vld [vmem:[%s14305_s1 + $0x20] sm:$0xff]  ;;  %s10817_s23 = scalar_lea.vmem %s10251_s10, %s8704_s20  ;;  %745 = vmatpush.msra.mxu0 %v8705_v1  ;;  %v8967_v28 = vld [vmem:[%s14305_s1 + $0x28] sm:$0xff]  ;;  %p559_p4 = scmp.ge.s32.totalorder %s562_s11, 16  }
 0x123   : >> { %1197 = vmatpush.msrb.mxu2 %v8770_v2  ;;  %954 = vmatpush.msrb.mxu1 %v598_v4  ;;  %v10820_v6 = vld [vmem:[%s10817_s23 + $0x49] sm:$0xff]  ;;  %v10823_v7 = vld [vmem:[%s10817_s23 + $0x91] sm:$0xff]  ;;  %v10826_v8 = vld [vmem:[%s10817_s23 + $0xd9] sm:$0xff]  ;;  %s11879_s16 = scalar_lea.vmem [#allocation2], %s9198_s15  ;;  %s11988_s19 = smov (%p559_p4), 0  }
 0x124   : >> { %1475 = vmatpush.msrb.mxu3 %v8837_v3  ;;  %1750 = vmatpush.msrb.mxu0 %v8902_v5  ;;  %v599_v9 = vld [vmem:[%s10817_s23 + $0x1] sm:$0xff]  ;;  %v10837_v10 = vld [vmem:[%s10817_s23 + $0x51] sm:$0xff]  ;;  %v10840_v11 = vld [vmem:[%s10817_s23 + $0x99] sm:$0xff] }
 0x125   : >> { %8714 = vmatmul.msk.f32.vlgmr.msra.gmra.mxu1 %vm633_vm2, %v10820_v6  ;;  %8722 = vmatmul.msk.f32.vlgmr.msra.gmra.mxu2 %vm633_vm2, %v10823_v7  ;;  %v10843_v12 = vld [vmem:[%s10817_s23 + $0xe1] sm:$0xff]  ;;  %v600_v13 = vld [vmem:[%s10817_s23 + $0x9] sm:$0xff]  ;;  %v10854_v14 = vld [vmem:[%s10817_s23 + $0x59] sm:$0xff] }
 0x126   : >> { %8730 = vmatmul.msk.f32.vlgmr.msra.gmra.mxu3 %vm633_vm2, %v10826_v8  ;;  %8706 = vmatmul.msk.f32.vlgmr.msra.gmra.mxu0 %vm633_vm2, %v599_v9  ;;  %v10857_v15 = vld [vmem:[%s10817_s23 + $0xa1] sm:$0xff]  ;;  %v10860_v16 = vld [vmem:[%s10817_s23 + $0xe9] sm:$0xff]  ;;  %v601_v17 = vld [vmem:[%s10817_s23 + $0x11] sm:$0xff] }
 0x127   : >> { %v10871_v18 = vld [vmem:[%s10817_s23 + $0x61] sm:$0xff]  ;;  %v10874_v19 = vld [vmem:[%s10817_s23 + $0xa9] sm:$0xff]  ;;  %v10877_v20 = vld [vmem:[%s10817_s23 + $0xf1] sm:$0xff]  ;;  %2303 = vmatpush.msra.mxu2 %v9034_v26  ;;  %2578 = vmatpush.msra.mxu3 %v9099_v27 }
 0x128   : >> { %v602_v21 = vld [vmem:[%s10817_s23 + $0x19] sm:$0xff]  ;;  %v10888_v22 = vld [vmem:[%s10817_s23 + $0x69] sm:$0xff]  ;;  %v10891_v23 = vld [vmem:[%s10817_s23 + $0xb1] sm:$0xff]  ;;  %2025 = vmatpush.msra.mxu1 %v8967_v28 }
 0x129   : >> { %v10894_v24 = vld [vmem:[%s10817_s23 + $0xf9] sm:$0xff]  ;;  %v603_v25 = vld [vmem:[%s10817_s23 + $0x21] sm:$0xff]  ;;  %v10914_v29 = vld [vmem:[%s10817_s23 + $0x71] sm:$0xff] }
 0x12a   : >> { %v10917_v30 = vld [vmem:[%s10817_s23 + $0xb9] sm:$0xff]  ;;  %v10920_v31 = vld [vmem:[%s10817_s23 + $0x101] sm:$0xff]  ;;  %v604_v32 = vld [vmem:[%s10817_s23 + $0x29] sm:$0xff] }
 0x12b   : >> { %v9164_v33 = vld [vmem:[%s14305_s1 + $0x40] sm:$0xff]  ;;  %v10940_v36 = vld [vmem:[%s10817_s23 + $0x109] sm:$0xff]  ;;  %v605_v37 = vld [vmem:[%s10817_s23 + $0x31] sm:$0xff] }
 0x12c   : >> { %2853 = vmatpush.msra.mxu0 %v9164_v33  ;;  %v10934_v34 = vld [vmem:[%s10817_s23 + $0x79] sm:$0xff]  ;;  %v10937_v35 = vld [vmem:[%s10817_s23 + $0xc1] sm:$0xff]  ;;  %v10954_v39 = vld [vmem:[%s10817_s23 + $0xc9] sm:$0xff] }
 0x12d   : >> { %8715 = vmatmul.msk.f32.gmra.mxu1 %vm633_vm2, %v10837_v10  ;;  %8723 = vmatmul.msk.f32.gmra.mxu2 %vm633_vm2, %v10840_v11  ;;  %v10951_v38 = vld [vmem:[%s10817_s23 + $0x81] sm:$0xff]  ;;  %v10957_v40 = vld [vmem:[%s10817_s23 + $0x111] sm:$0xff]  ;;  %v606_v41 = vld [vmem:[%s10817_s23 + $0x39] sm:$0xff] }
 0x12e   : >> { %8731 = vmatmul.msk.f32.gmra.mxu3 %vm633_vm2, %v10843_v12  ;;  %8707 = vmatmul.msk.f32.gmra.mxu0 %vm633_vm2, %v600_v13  ;;  %v566_v42 = vld [vmem:[%s10817_s23] sm:$0xff]  ;;  %v8805_v44 = vld [vmem:[%s10817_s23 + $0x48] sm:$0xff]  ;;  %v8806_v47 = vld [vmem:[%s10817_s23 + $0x50] sm:$0xff] }
 0x12f   : >> { %v1052_v43 = vld [vmem:[%s10817_s23 + $0x2] sm:$0xff]  ;;  %v1053_v46 = vld [vmem:[%s10817_s23 + $0xa] sm:$0xff]  ;;  %v1054_v49 = vld [vmem:[%s10817_s23 + $0x12] sm:$0xff] }
 0x130   : >> { %v567_v45 = vld [vmem:[%s10817_s23 + $0x8] sm:$0xff]  ;;  %v568_v48 = vld [vmem:[%s10817_s23 + $0x10] sm:$0xff]  ;;  %v10986_v50 = vld [vmem:[%s10817_s23 + $0x58] sm:$0xff] }
 0x131   : >> { %v569_v51 = vld [vmem:[%s10817_s23 + $0x18] sm:$0xff]  ;;  %v10997_v53 = vld [vmem:[%s10817_s23 + $0x60] sm:$0xff]  ;;  %v11008_v56 = vld [vmem:[%s10817_s23 + $0x68] sm:$0xff] }
 0x132   : >> { %v1055_v52 = vld [vmem:[%s10817_s23 + $0x1a] sm:$0xff]  ;;  %v1056_v55 = vld [vmem:[%s10817_s23 + $0x22] sm:$0xff]  ;;  %v1057_v58 = vld [vmem:[%s10817_s23 + $0x2a] sm:$0xff] }
 0x133   : >> { %v570_v54 = vld [vmem:[%s10817_s23 + $0x20] sm:$0xff]  ;;  %v571_v57 = vld [vmem:[%s10817_s23 + $0x28] sm:$0xff]  ;;  %v11019_v59 = vld [vmem:[%s10817_s23 + $0x70] sm:$0xff] }
 0x134   : >> { %v572_v60 = vld [vmem:[%s10817_s23 + $0x30] sm:$0xff]  ;;  %v11030_v62 = vld [vmem:[%s10817_s23 + $0x78] sm:$0xff]  ;;  %v11041_v1 = vld [vmem:[%s10817_s23 + $0x80] sm:$0xff] }
 0x135   : >> { %8716 = vmatmul.msk.f32.gmra.mxu1 %vm633_vm2, %v10854_v14  ;;  %8724 = vmatmul.msk.f32.gmra.mxu2 %vm633_vm2, %v10857_v15  ;;  %v1058_v61 = vld [vmem:[%s10817_s23 + $0x32] sm:$0xff]  ;;  %v1059_v0 = vld [vmem:[%s10817_s23 + $0x3a] sm:$0xff]  ;;  %v11052_v3 = vld [vmem:[%s10817_s23 + $0x4a] sm:$0xff] }
 0x136   : >> { %8732 = vmatmul.msk.f32.gmra.mxu3 %vm633_vm2, %v10860_v16  ;;  %8708 = vmatmul.msk.f32.gmra.mxu0 %vm633_vm2, %v601_v17  ;;  %v573_v63 = vld [vmem:[%s10817_s23 + $0x38] sm:$0xff]  ;;  %v11055_v4 = vld [vmem:[%s10817_s23 + $0x90] sm:$0xff]  ;;  %v11097_v26 = vld [vmem:[%s10817_s23 + $0xa0] sm:$0xff] }
 0x137   : >> { %v11073_v13 = vld [vmem:[%s10817_s23 + $0x52] sm:$0xff]  ;;  %v11116_v33 = vld [vmem:[%s10817_s23 + $0x62] sm:$0xff] }
 0x13d   : >> { %8717 = vmatmul.msk.f32.gmra.mxu1 %vm633_vm2, %v10871_v18  ;;  %8725 = vmatmul.msk.f32.gmra.mxu2 %vm633_vm2, %v10874_v19 }
 0x13e   : >> { %8733 = vmatmul.msk.f32.gmra.mxu3 %vm633_vm2, %v10877_v20  ;;  %8709 = vmatmul.msk.f32.gmra.mxu0 %vm633_vm2, %v602_v21 }
 0x145   : >> { %8718 = vmatmul.msk.f32.gmra.mxu1 %vm633_vm2, %v10888_v22  ;;  %8726 = vmatmul.msk.f32.gmra.mxu2 %vm633_vm2, %v10891_v23 }
 0x146   : >> { %8734 = vmatmul.msk.f32.gmra.mxu3 %vm633_vm2, %v10894_v24  ;;  %8710 = vmatmul.msk.f32.gmra.mxu0 %vm633_vm2, %v603_v25  ;;  %v11094_v25 = vld [vmem:[%s10817_s23 + $0x5a] sm:$0xff] }
 0x14d   : >> { %8719 = vmatmul.msk.f32.gmra.mxu1 %vm633_vm2, %v10914_v29  ;;  %8727 = vmatmul.msk.f32.gmra.mxu2 %vm633_vm2, %v10917_v30 }
 0x14e   : >> { %8735 = vmatmul.msk.f32.gmra.mxu3 %vm633_vm2, %v10920_v31  ;;  %8711 = vmatmul.msk.f32.gmra.mxu0 %vm633_vm2, %v604_v32 }
 0x155   : >> { %8720 = vmatmul.msk.f32.gmra.mxu1 %vm633_vm2, %v10934_v34  ;;  %8728 = vmatmul.msk.f32.gmra.mxu2 %vm633_vm2, %v10937_v35 }
 0x156   : >> { %8736 = vmatmul.msk.f32.gmra.mxu3 %vm633_vm2, %v10940_v36  ;;  %8712 = vmatmul.msk.f32.gmra.mxu0 %vm633_vm2, %v605_v37 }
 0x15d   : >> { %8721 = vmatmul.msk.f32.gmra.mxu1 %vm633_vm2, %v10951_v38  ;;  %8729 = vmatmul.msk.f32.gmra.mxu2 %vm633_vm2, %v10954_v39 }
 0x15e   : >> { %8737 = vmatmul.msk.f32.gmra.mxu3 %vm633_vm2, %v10957_v40  ;;  %8713 = vmatmul.msk.f32.gmra.mxu0 %vm633_vm2, %v606_v41 }
 0x165   : >> { %8738 = vmatmul.msk.f32.vlgmr.msrb.gmra.mxu1 %vm633_vm2, %v566_v42  ;;  %8771 = vmatmul.msk.f32.vlgmr.msrb.gmra.mxu2 %vm633_vm2, %v1052_v43  ;;  %v11138_v43 = vld [vmem:[%s10817_s23 + $0x6a] sm:$0xff] }
 0x166   : >> { %8838 = vmatmul.msk.f32.vlgmr.msrb.gmra.mxu3 %vm633_vm2, %v8805_v44  ;;  %8903 = vmatmul.msk.f32.vlgmr.msrb.gmra.mxu0 %vm633_vm2, %v10820_v6 }
 0x16d   : >> { %8739 = vmatmul.msk.f32.gmra.mxu1 %vm633_vm2, %v567_v45  ;;  %8772 = vmatmul.msk.f32.gmra.mxu2 %vm633_vm2, %v1053_v46 }
 0x16e   : >> { %8839 = vmatmul.msk.f32.gmra.mxu3 %vm633_vm2, %v8806_v47  ;;  %8904 = vmatmul.msk.f32.gmra.mxu0 %vm633_vm2, %v10837_v10 }
 0x175   : >> { %8740 = vmatmul.msk.f32.gmra.mxu1 %vm633_vm2, %v568_v48  ;;  %8773 = vmatmul.msk.f32.gmra.mxu2 %vm633_vm2, %v1054_v49  ;;  %v11160_v48 = vld [vmem:[%s10817_s23 + $0x72] sm:$0xff] }
 0x176   : >> { %8840 = vmatmul.msk.f32.gmra.mxu3 %vm633_vm2, %v10986_v50  ;;  %8905 = vmatmul.msk.f32.gmra.mxu0 %vm633_vm2, %v10854_v14  ;;  %v11076_v14 = vld [vmem:[%s10817_s23 + $0x98] sm:$0xff] }
 0x177   : >> { %v11163_v49 = vld [vmem:[%s10817_s23 + $0xb8] sm:$0xff] }
 0x17d   : >> { %8741 = vmatmul.msk.f32.gmra.mxu1 %vm633_vm2, %v569_v51  ;;  %8774 = vmatmul.msk.f32.gmra.mxu2 %vm633_vm2, %v1055_v52 }
 0x17e   : >> { %8841 = vmatmul.msk.f32.gmra.mxu3 %vm633_vm2, %v10997_v53  ;;  %8906 = vmatmul.msk.f32.gmra.mxu0 %vm633_vm2, %v10871_v18 }
 0x185   : >> { %8742 = vmatmul.msk.f32.gmra.mxu1 %vm633_vm2, %v570_v54  ;;  %8775 = vmatmul.msk.f32.gmra.mxu2 %vm633_vm2, %v1056_v55  ;;  %v11185_v54 = vld [vmem:[%s10817_s23 + $0xc0] sm:$0xff] }
 0x186   : >> { %8842 = vmatmul.msk.f32.gmra.mxu3 %vm633_vm2, %v11008_v56  ;;  %8907 = vmatmul.msk.f32.gmra.mxu0 %vm633_vm2, %v10888_v22 }
 0x18d   : >> { %8743 = vmatmul.msk.f32.gmra.mxu1 %vm633_vm2, %v571_v57  ;;  %8776 = vmatmul.msk.f32.gmra.mxu2 %vm633_vm2, %v1057_v58  ;;  %v11204_v58 = vld [vmem:[%s10817_s23 + $0x82] sm:$0xff] }
 0x18e   : >> { %8843 = vmatmul.msk.f32.gmra.mxu3 %vm633_vm2, %v11019_v59  ;;  %8908 = vmatmul.msk.f32.gmra.mxu0 %vm633_vm2, %v10914_v29 }
 0x195   : >> { %8744 = vmatmul.msk.f32.gmra.mxu1 %vm633_vm2, %v572_v60  ;;  %8777 = vmatmul.msk.f32.gmra.mxu2 %vm633_vm2, %v1058_v61 }
 0x196   : >> { %8844 = vmatmul.msk.f32.gmra.mxu3 %vm633_vm2, %v11030_v62  ;;  %8909 = vmatmul.msk.f32.gmra.mxu0 %vm633_vm2, %v10934_v34  ;;  %v11119_v34 = vld [vmem:[%s10817_s23 + $0xa8] sm:$0xff] }
 0x19d   : >> { %8745 = vmatmul.msk.f32.gmra.mxu1 %vm633_vm2, %v573_v63  ;;  %8778 = vmatmul.msk.f32.gmra.mxu2 %vm633_vm2, %v1059_v0  ;;  %v11224_v63 = vld [vmem:[%s10817_s23 + $0x92] sm:$0xff] }
 0x19e   : >> { %8845 = vmatmul.msk.f32.gmra.mxu3 %vm633_vm2, %v11041_v1  ;;  %8910 = vmatmul.msk.f32.gmra.mxu0 %vm633_vm2, %v10951_v38  ;;  %v11227_v0 = vld [vmem:[%s10817_s23 + $0xd8] sm:$0xff] }
 0x1a2   : >> { %v11049_v2 = vpop.f32.mrf.mxu1 }
 0x1a3   : >> { %v11057_v5 = vpop.f32.mrf.mxu0 }
 0x1a5   : >> { %8746 = vmatmul.msk.f32.gmra.mxu1 %vm633_vm2, %v8805_v44  ;;  %8779 = vmatmul.msk.f32.gmra.mxu2 %vm633_vm2, %v11052_v3  ;;  %v11141_v44 = vld [vmem:[%s10817_s23 + $0xb0] sm:$0xff] }
 0x1a6   : >> { %8846 = vmatmul.msk.f32.gmra.mxu3 %vm633_vm2, %v11055_v4  ;;  %8911 = vmatmul.msk.f32.gmra.mxu0 %vm633_vm2, %v10823_v7 }
 0x1a8   : >> { %v11066_v6 = vpop.f32.mrf.mxu2 }
 0x1a9   : >> { %v11068_v9 = vpop.f32.mrf.mxu3 }
 0x1aa   : >> { %14369 = vst [vmem:[#allocation10_spill] sm:$0xff] %v11068_v9  ;;  %v11070_v10 = vpop.f32.mrf.mxu1 }
 0x1ab   : >> { %v11078_v17 = vpop.f32.mrf.mxu0 }
 0x1ad   : >> { %8747 = vmatmul.msk.f32.gmra.mxu1 %vm633_vm2, %v8806_v47  ;;  %8780 = vmatmul.msk.f32.gmra.mxu2 %vm633_vm2, %v11073_v13 }
 0x1ae   : >> { %8847 = vmatmul.msk.f32.gmra.mxu3 %vm633_vm2, %v11076_v14  ;;  %8912 = vmatmul.msk.f32.gmra.mxu0 %vm633_vm2, %v10840_v11 }
 0x1b0   : >> { %v11087_v18 = vpop.f32.mrf.mxu2 }
 0x1b1   : >> { %v11089_v21 = vpop.f32.mrf.mxu3 }
 0x1b2   : >> { %14370 = vst [vmem:[#allocation11_spill] sm:$0xff] %v11089_v21  ;;  %v11091_v22 = vpop.f32.mrf.mxu1  ;;  %v11242_v21 = vld [vmem:[%s10817_s23 + $0xe0] sm:$0xff] }
 0x1b3   : >> { %v11099_v27 = vpop.f32.mrf.mxu0 }
 0x1b5   : >> { %8748 = vmatmul.msk.f32.gmra.mxu1 %vm633_vm2, %v10986_v50  ;;  %8781 = vmatmul.msk.f32.gmra.mxu2 %vm633_vm2, %v11094_v25 }
 0x1b6   : >> { %8848 = vmatmul.msk.f32.gmra.mxu3 %vm633_vm2, %v11097_v26  ;;  %8913 = vmatmul.msk.f32.gmra.mxu0 %vm633_vm2, %v10857_v15 }
 0x1b8   : >> { %v11109_v28 = vpop.f32.mrf.mxu2 }
 0x1b9   : >> { %v11111_v29 = vpop.f32.mrf.mxu3 }
 0x1ba   : >> { %14371 = vst [vmem:[#allocation12_spill] sm:$0xff] %v11111_v29  ;;  %v11113_v32 = vpop.f32.mrf.mxu1 }
 0x1bb   : >> { %v11121_v37 = vpop.f32.mrf.mxu0 }
 0x1bd   : >> { %8749 = vmatmul.msk.f32.gmra.mxu1 %vm633_vm2, %v10997_v53  ;;  %8782 = vmatmul.msk.f32.gmra.mxu2 %vm633_vm2, %v11116_v33  ;;  %v11182_v53 = vld [vmem:[%s10817_s23 + $0x7a] sm:$0xff] }
 0x1be   : >> { %8849 = vmatmul.msk.f32.gmra.mxu3 %vm633_vm2, %v11119_v34  ;;  %8914 = vmatmul.msk.f32.gmra.mxu0 %vm633_vm2, %v10874_v19 }
 0x1c0   : >> { %v11131_v38 = vpop.f32.mrf.mxu2 }
 0x1c1   : >> { %v11133_v41 = vpop.f32.mrf.mxu3 }
 0x1c2   : >> { %14372 = vst [vmem:[#allocation13_spill] sm:$0xff] %v11133_v41  ;;  %v11135_v42 = vpop.f32.mrf.mxu1  ;;  %v11239_v41 = vld [vmem:[%s10817_s23 + $0x9a] sm:$0xff] }
 0x1c3   : >> { %v11143_v45 = vpop.f32.mrf.mxu0 }
 0x1c5   : >> { %8750 = vmatmul.msk.f32.gmra.mxu1 %vm633_vm2, %v11008_v56  ;;  %8783 = vmatmul.msk.f32.gmra.mxu2 %vm633_vm2, %v11138_v43 }
 0x1c6   : >> { %8850 = vmatmul.msk.f32.gmra.mxu3 %vm633_vm2, %v11141_v44  ;;  %8915 = vmatmul.msk.f32.gmra.mxu0 %vm633_vm2, %v10891_v23 }
 0x1c8   : >> { %v11153_v19 = vpop.f32.mrf.mxu2 }
 0x1c9   : >> { %v11155_v46 = vpop.f32.mrf.mxu3 }
 0x1ca   : >> { %14373 = vst [vmem:[#allocation14_spill] sm:$0xff] %v11155_v46  ;;  %v11157_v47 = vpop.f32.mrf.mxu1 }
 0x1cb   : >> { %v11165_v50 = vpop.f32.mrf.mxu0 }
 0x1cd   : >> { %8751 = vmatmul.msk.f32.gmra.mxu1 %vm633_vm2, %v11019_v59  ;;  %8784 = vmatmul.msk.f32.gmra.mxu2 %vm633_vm2, %v11160_v48  ;;  %v11207_v59 = vld [vmem:[%s10817_s23 + $0xc8] sm:$0xff] }
 0x1ce   : >> { %8851 = vmatmul.msk.f32.gmra.mxu3 %vm633_vm2, %v11163_v49  ;;  %8916 = vmatmul.msk.f32.gmra.mxu0 %vm633_vm2, %v10917_v30 }
 0x1d0   : >> { %v11175_v23 = vpop.f32.mrf.mxu2 }
 0x1d1   : >> { %v11177_v51 = vpop.f32.mrf.mxu3 }
 0x1d2   : >> { %14374 = vst [vmem:[#allocation15_spill] sm:$0xff] %v11177_v51  ;;  %v11179_v52 = vpop.f32.mrf.mxu1 }
 0x1d3   : >> { %v11187_v55 = vpop.f32.mrf.mxu0 }
 0x1d5   : >> { %8752 = vmatmul.msk.f32.gmra.mxu1 %vm633_vm2, %v11030_v62  ;;  %8785 = vmatmul.msk.f32.gmra.mxu2 %vm633_vm2, %v11182_v53 }
 0x1d6   : >> { %8852 = vmatmul.msk.f32.gmra.mxu3 %vm633_vm2, %v11185_v54  ;;  %8917 = vmatmul.msk.f32.gmra.mxu0 %vm633_vm2, %v10937_v35 }
 0x1d8   : >> { %v11197_v30 = vpop.f32.mrf.mxu2 }
 0x1d9   : >> { %v11199_v56 = vpop.f32.mrf.mxu3 }
 0x1da   : >> { %14375 = vst [vmem:[#allocation16_spill] sm:$0xff] %v11199_v56  ;;  %v11201_v57 = vpop.f32.mrf.mxu1 }
 0x1db   : >> { %v11209_v60 = vpop.f32.mrf.mxu0 }
 0x1dd   : >> { %8753 = vmatmul.msk.f32.gmra.mxu1 %vm633_vm2, %v11041_v1  ;;  %8786 = vmatmul.msk.f32.gmra.mxu2 %vm633_vm2, %v11204_v58 }
 0x1de   : >> { %8853 = vmatmul.msk.f32.gmra.mxu3 %vm633_vm2, %v11207_v59  ;;  %8918 = vmatmul.msk.f32.gmra.mxu0 %vm633_vm2, %v10954_v39 }
 0x1e0   : >> { %v11219_v35 = vpop.f32.mrf.mxu2 }
 0x1e1   : >> { %14376 = vst [vmem:[#allocation17_spill] sm:$0xff] %v11219_v35  ;;  %v11221_v61 = vpop.f32.mrf.mxu3 }
 0x1e2   : >> { %14377 = vst [vmem:[#allocation18_spill] sm:$0xff] %v11221_v61  ;;  %v956_v62 = vpop.f32.mrf.mxu1 }
 0x1e3   : >> { %v1752_v1 = vpop.f32.mrf.mxu0  ;;  %v957_v39 = vadd.f32 %v956_v62, %v11057_v5 }
 0x1e5   : >> { %8754 = vmatmul.msk.f32.gmra.mxu1 %vm633_vm2, %v11055_v4  ;;  %8787 = vmatmul.msk.f32.gmra.mxu2 %vm633_vm2, %v11224_v63 }
 0x1e6   : >> { %8854 = vmatmul.msk.f32.gmra.mxu3 %vm633_vm2, %v11227_v0  ;;  %8919 = vmatmul.msk.f32.gmra.mxu0 %vm633_vm2, %v10826_v8 }
 0x1e8   : >> { %v1199_v61 = vpop.f32.mrf.mxu2 }
 0x1e9   : >> { %v1295_v56 = vadd.f32 %v1199_v61, %v957_v39  ;;  %v1477_v51 = vpop.f32.mrf.mxu3  ;;  %v11256_v61 = vld [vmem:[%s10817_s23 + $0xa2] sm:$0xff] }
 0x1ea   : >> { %v959_v46 = vpop.f32.mrf.mxu1 }
 0x1eb   : >> { %v1573_v29 = vadd.f32 %v1477_v51, %v1295_v56  ;;  %v1755_v9 = vpop.f32.mrf.mxu0  ;;  %v960_v8 = vadd.f32 %v959_v46, %v11078_v17 }
 0x1ed   : >> { %v11244_v35 = vadd.f32 %v1752_v1, %v1573_v29  ;;  %8755 = vmatmul.msk.f32.gmra.mxu1 %vm633_vm2, %v11076_v14  ;;  %8788 = vmatmul.msk.f32.gmra.mxu2 %vm633_vm2, %v11239_v41  ;;  %v11259_v1 = vld [vmem:[%s10817_s23 + $0xe8] sm:$0xff] }
 0x1ee   : >> { %8855 = vmatmul.msk.f32.gmra.mxu3 %vm633_vm2, %v11242_v21  ;;  %8920 = vmatmul.msk.f32.gmra.mxu0 %vm633_vm2, %v10843_v12 }
 0x1ef   : >> { %14378 = vst [vmem:[#allocation19_spill] sm:$0xff] %v11244_v35 }
 0x1f0   : >> { %v1202_v5 = vpop.f32.mrf.mxu2 }
 0x1f1   : >> { %v1296_v51 = vadd.f32 %v1202_v5, %v960_v8  ;;  %v1480_v56 = vpop.f32.mrf.mxu3  ;;  %v11273_v5 = vld [vmem:[%s10817_s23 + $0xaa] sm:$0xff] }
 0x1f2   : >> { %v962_v29 = vpop.f32.mrf.mxu1 }
 0x1f3   : >> { %v1574_v62 = vadd.f32 %v1480_v56, %v1296_v51  ;;  %v1758_v39 = vpop.f32.mrf.mxu0  ;;  %v963_v12 = vadd.f32 %v962_v29, %v11099_v27  ;;  %v11276_v56 = vld [vmem:[%s10817_s23 + $0xf0] sm:$0xff] }
 0x1f5   : >> { %v11261_v35 = vadd.f32 %v1755_v9, %v1574_v62  ;;  %8756 = vmatmul.msk.f32.gmra.mxu1 %vm633_vm2, %v11097_v26  ;;  %8789 = vmatmul.msk.f32.gmra.mxu2 %vm633_vm2, %v11256_v61 }
 0x1f6   : >> { %8856 = vmatmul.msk.f32.gmra.mxu3 %vm633_vm2, %v11259_v1  ;;  %8921 = vmatmul.msk.f32.gmra.mxu0 %vm633_vm2, %v10860_v16 }
 0x1f7   : >> { %14379 = vst [vmem:[#allocation20_spill] sm:$0xff] %v11261_v35 }
 0x1f8   : >> { %v1205_v17 = vpop.f32.mrf.mxu2 }
 0x1f9   : >> { %v1297_v46 = vadd.f32 %v1205_v17, %v963_v12  ;;  %v1483_v8 = vpop.f32.mrf.mxu3  ;;  %v11290_v17 = vld [vmem:[%s10817_s23 + $0xb2] sm:$0xff] }
 0x1fa   : >> { %v965_v9 = vpop.f32.mrf.mxu1 }
 0x1fb   : >> { %v1575_v51 = vadd.f32 %v1483_v8, %v1297_v46  ;;  %v1761_v62 = vpop.f32.mrf.mxu0  ;;  %v966_v16 = vadd.f32 %v965_v9, %v11121_v37  ;;  %v11293_v8 = vld [vmem:[%s10817_s23 + $0xf8] sm:$0xff] }
 0x1fd   : >> { %v11278_v35 = vadd.f32 %v1758_v39, %v1575_v51  ;;  %8757 = vmatmul.msk.f32.gmra.mxu1 %vm633_vm2, %v11119_v34  ;;  %8790 = vmatmul.msk.f32.gmra.mxu2 %vm633_vm2, %v11273_v5 }
 0x1fe   : >> { %8857 = vmatmul.msk.f32.gmra.mxu3 %vm633_vm2, %v11276_v56  ;;  %8922 = vmatmul.msk.f32.gmra.mxu0 %vm633_vm2, %v10877_v20 }
 0x1ff   : >> { %14380 = vst [vmem:[#allocation21_spill] sm:$0xff] %v11278_v35 }
 0x200   : >> { %v1208_v27 = vpop.f32.mrf.mxu2 }
 0x201   : >> { %v1298_v29 = vadd.f32 %v1208_v27, %v966_v16  ;;  %v1486_v12 = vpop.f32.mrf.mxu3  ;;  %v11307_v27 = vld [vmem:[%s10817_s23 + $0xba] sm:$0xff] }
 0x202   : >> { %v968_v39 = vpop.f32.mrf.mxu1 }
 0x203   : >> { %v1576_v46 = vadd.f32 %v1486_v12, %v1298_v29  ;;  %v1764_v51 = vpop.f32.mrf.mxu0  ;;  %v969_v20 = vadd.f32 %v968_v39, %v11143_v45  ;;  %v11310_v12 = vld [vmem:[%s10817_s23 + $0x100] sm:$0xff] }
 0x205   : >> { %v11295_v35 = vadd.f32 %v1761_v62, %v1576_v46  ;;  %8758 = vmatmul.msk.f32.gmra.mxu1 %vm633_vm2, %v11141_v44  ;;  %8791 = vmatmul.msk.f32.gmra.mxu2 %vm633_vm2, %v11290_v17 }
 0x206   : >> { %8858 = vmatmul.msk.f32.gmra.mxu3 %vm633_vm2, %v11293_v8  ;;  %8923 = vmatmul.msk.f32.gmra.mxu0 %vm633_vm2, %v10894_v24 }
 0x207   : >> { %14381 = vst [vmem:[#allocation22_spill] sm:$0xff] %v11295_v35 }
 0x208   : >> { %v1211_v37 = vpop.f32.mrf.mxu2 }
 0x209   : >> { %v1299_v9 = vadd.f32 %v1211_v37, %v969_v20  ;;  %v1489_v16 = vpop.f32.mrf.mxu3  ;;  %v11324_v37 = vld [vmem:[%s10817_s23 + $0xc2] sm:$0xff] }
 0x20a   : >> { %v971_v62 = vpop.f32.mrf.mxu1 }
 0x20b   : >> { %v1577_v29 = vadd.f32 %v1489_v16, %v1299_v9  ;;  %v1767_v46 = vpop.f32.mrf.mxu0  ;;  %v972_v24 = vadd.f32 %v971_v62, %v11165_v50  ;;  %v11327_v16 = vld [vmem:[%s10817_s23 + $0x108] sm:$0xff] }
 0x20d   : >> { %v11312_v35 = vadd.f32 %v1764_v51, %v1577_v29  ;;  %8759 = vmatmul.msk.f32.gmra.mxu1 %vm633_vm2, %v11163_v49  ;;  %8792 = vmatmul.msk.f32.gmra.mxu2 %vm633_vm2, %v11307_v27 }
 0x20e   : >> { %8859 = vmatmul.msk.f32.gmra.mxu3 %vm633_vm2, %v11310_v12  ;;  %8924 = vmatmul.msk.f32.gmra.mxu0 %vm633_vm2, %v10920_v31 }
 0x20f   : >> { %14382 = vst [vmem:[#allocation23_spill] sm:$0xff] %v11312_v35 }
 0x210   : >> { %v1214_v45 = vpop.f32.mrf.mxu2 }
 0x211   : >> { %v1300_v39 = vadd.f32 %v1214_v45, %v972_v24  ;;  %v1492_v20 = vpop.f32.mrf.mxu3  ;;  %v11341_v45 = vld [vmem:[%s10817_s23 + $0xca] sm:$0xff] }
 0x212   : >> { %v974_v51 = vpop.f32.mrf.mxu1  ;;  %14384 = vst [vmem:[#allocation25_spill] sm:$0xff] %v11341_v45 }
 0x213   : >> { %v1578_v9 = vadd.f32 %v1492_v20, %v1300_v39  ;;  %v1770_v29 = vpop.f32.mrf.mxu0  ;;  %v975_v31 = vadd.f32 %v974_v51, %v11187_v55  ;;  %v11344_v20 = vld [vmem:[%s10817_s23 + $0x110] sm:$0xff] }
 0x215   : >> { %v11329_v35 = vadd.f32 %v1767_v46, %v1578_v9  ;;  %8760 = vmatmul.msk.f32.gmra.mxu1 %vm633_vm2, %v11185_v54  ;;  %8793 = vmatmul.msk.f32.gmra.mxu2 %vm633_vm2, %v11324_v37 }
 0x216   : >> { %8860 = vmatmul.msk.f32.gmra.mxu3 %vm633_vm2, %v11327_v16  ;;  %8925 = vmatmul.msk.f32.gmra.mxu0 %vm633_vm2, %v10940_v36 }
 0x217   : >> { %14383 = vst [vmem:[#allocation24_spill] sm:$0xff] %v11329_v35 }
 0x218   : >> { %v1217_v50 = vpop.f32.mrf.mxu2 }
 0x219   : >> { %v1301_v62 = vadd.f32 %v1217_v50, %v975_v31  ;;  %v1495_v24 = vpop.f32.mrf.mxu3 }
 0x21a   : >> { %v977_v46 = vpop.f32.mrf.mxu1 }
 0x21b   : >> { %v1579_v39 = vadd.f32 %v1495_v24, %v1301_v62  ;;  %v1773_v9 = vpop.f32.mrf.mxu0  ;;  %v978_v36 = vadd.f32 %v977_v46, %v11209_v60  ;;  %v11361_v24 = vld [vmem:[%s10817_s23 + $0x120] sm:$0xff] }
 0x21c   : >> { %14386 = vst [vmem:[#allocation27_spill] sm:$0xff] %v11361_v24 }
 0x21d   : >> { %v11346_v35 = vadd.f32 %v1770_v29, %v1579_v39  ;;  %8761 = vmatmul.msk.f32.gmra.mxu1 %vm633_vm2, %v11207_v59  ;;  %8794 = vmatmul.msk.f32.gmra.mxu2 %vm633_vm2, %v11341_v45  ;;  %v11358_v29 = vld [vmem:[%s10817_s23 + $0xda] sm:$0xff] }
 0x21e   : >> { %8861 = vmatmul.msk.f32.gmra.mxu3 %vm633_vm2, %v11344_v20  ;;  %8926 = vmatmul.msk.f32.gmra.mxu0 %vm633_vm2, %v10957_v40 }
 0x21f   : >> { %14385 = vst [vmem:[#allocation26_spill] sm:$0xff] %v11346_v35  ;;  %v11364_v35 = vld [vmem:[%s10817_s23 + $0x121] sm:$0xff] }
 0x220   : >> { %v1220_v55 = vpop.f32.mrf.mxu2  ;;  %14387 = vst [vmem:[#allocation28_spill] sm:$0xff] %v11364_v35 }
 0x221   : >> { %v1302_v51 = vadd.f32 %v1220_v55, %v978_v36  ;;  %v1498_v31 = vpop.f32.mrf.mxu3 }
 0x222   : >> { %v980_v50 = vpop.f32.mrf.mxu1 }
 0x223   : >> { %v1580_v62 = vadd.f32 %v1498_v31, %v1302_v51  ;;  %v1776_v39 = vpop.f32.mrf.mxu0  ;;  %v981_v40 = vadd.f32 %v980_v50, %v11049_v2  ;;  %v11381_v31 = vld [vmem:[%s10817_s23 + $0x128] sm:$0xff] }
 0x224   : >> { %14389 = vst [vmem:[#allocation30_spill] sm:$0xff] %v11381_v31 }
 0x225   : >> { %v11366_v45 = vadd.f32 %v1773_v9, %v1580_v62  ;;  %8762 = vmatmul.msk.f32.gmra.mxu1 %vm633_vm2, %v11227_v0  ;;  %8795 = vmatmul.msk.f32.gmra.mxu2 %vm633_vm2, %v11358_v29  ;;  %v11378_v9 = vld [vmem:[%s10817_s23 + $0xe2] sm:$0xff] }
 0x226   : >> { %8862 = vmatmul.msk.f32.gmra.mxu3 %vm633_vm2, %v11361_v24  ;;  %8927 = vmatmul.msk.f32.gmra.mxu0 %vm633_vm2, %v11364_v35  ;;  %v11404_v35 = vld [vmem:[%s10817_s23 + $0x131] sm:$0xff] }
 0x227   : >> { %14388 = vst [vmem:[#allocation29_spill] sm:$0xff] %v11366_v45  ;;  %v11384_v45 = vld [vmem:[%s10817_s23 + $0x129] sm:$0xff] }
 0x228   : >> { %v1223_v60 = vpop.f32.mrf.mxu2  ;;  %14390 = vst [vmem:[#allocation31_spill] sm:$0xff] %v11384_v45 }
 0x229   : >> { %v1303_v46 = vadd.f32 %v1223_v60, %v981_v40  ;;  %v1501_v36 = vpop.f32.mrf.mxu3  ;;  %14393 = vst [vmem:[#allocation34_spill] sm:$0xff] %v11404_v35 }
 0x22a   : >> { %v983_v55 = vpop.f32.mrf.mxu1 }
 0x22b   : >> { %v1581_v51 = vadd.f32 %v1501_v36, %v1303_v46  ;;  %v1779_v62 = vpop.f32.mrf.mxu0  ;;  %v984_v2 = vadd.f32 %v983_v55, %v11070_v10 }
 0x22d   : >> { %v11386_v24 = vadd.f32 %v1776_v39, %v1581_v51  ;;  %8763 = vmatmul.msk.f32.gmra.mxu1 %vm633_vm2, %v11242_v21  ;;  %8796 = vmatmul.msk.f32.gmra.mxu2 %vm633_vm2, %v11378_v9  ;;  %v11398_v39 = vld [vmem:[%s10817_s23 + $0xea] sm:$0xff] }
 0x22e   : >> { %8863 = vmatmul.msk.f32.gmra.mxu3 %vm633_vm2, %v11381_v31  ;;  %8928 = vmatmul.msk.f32.gmra.mxu0 %vm633_vm2, %v11384_v45  ;;  %v11401_v51 = vld [vmem:[%s10817_s23 + $0x130] sm:$0xff]  ;;  %v11424_v45 = vld [vmem:[%s10817_s23 + $0x139] sm:$0xff] }
 0x22f   : >> { %14391 = vst [vmem:[#allocation32_spill] sm:$0xff] %v11386_v24 }
 0x230   : >> { %v1226_v50 = vpop.f32.mrf.mxu2  ;;  %14392 = vst [vmem:[#allocation33_spill] sm:$0xff] %v11401_v51 }
 0x231   : >> { %v1304_v40 = vadd.f32 %v1226_v50, %v984_v2  ;;  %v1504_v60 = vpop.f32.mrf.mxu3  ;;  %14396 = vst [vmem:[#allocation37_spill] sm:$0xff] %v11424_v45 }
 0x232   : >> { %v986_v46 = vpop.f32.mrf.mxu1 }
 0x233   : >> { %v1582_v36 = vadd.f32 %v1504_v60, %v1304_v40  ;;  %v1782_v24 = vpop.f32.mrf.mxu0  ;;  %v987_v10 = vadd.f32 %v986_v46, %v11091_v22 }
 0x235   : >> { %v11406_v31 = vadd.f32 %v1779_v62, %v1582_v36  ;;  %8764 = vmatmul.msk.f32.gmra.mxu1 %vm633_vm2, %v11259_v1  ;;  %8797 = vmatmul.msk.f32.gmra.mxu2 %vm633_vm2, %v11398_v39  ;;  %v11418_v62 = vld [vmem:[%s10817_s23 + $0xf2] sm:$0xff] }
 0x236   : >> { %8864 = vmatmul.msk.f32.gmra.mxu3 %vm633_vm2, %v11401_v51  ;;  %8929 = vmatmul.msk.f32.gmra.mxu0 %vm633_vm2, %v11404_v35  ;;  %v11421_v36 = vld [vmem:[%s10817_s23 + $0x138] sm:$0xff]  ;;  %v11444_v35 = vld [vmem:[%s10817_s23 + $0x141] sm:$0xff] }
 0x237   : >> { %14394 = vst [vmem:[#allocation35_spill] sm:$0xff] %v11406_v31 }
 0x238   : >> { %v1229_v55 = vpop.f32.mrf.mxu2  ;;  %14395 = vst [vmem:[#allocation36_spill] sm:$0xff] %v11421_v36 }
 0x239   : >> { %v1305_v2 = vadd.f32 %v1229_v55, %v987_v10  ;;  %v1507_v50 = vpop.f32.mrf.mxu3  ;;  %14399 = vst [vmem:[#allocation40_spill] sm:$0xff] %v11444_v35 }
 0x23a   : >> { %v989_v40 = vpop.f32.mrf.mxu1 }
 0x23b   : >> { %v1583_v60 = vadd.f32 %v1507_v50, %v1305_v2  ;;  %v1785_v31 = vpop.f32.mrf.mxu0  ;;  %v990_v22 = vadd.f32 %v989_v40, %v11113_v32 }
 0x23d   : >> { %v11426_v51 = vadd.f32 %v1782_v24, %v1583_v60  ;;  %8765 = vmatmul.msk.f32.gmra.mxu1 %vm633_vm2, %v11276_v56  ;;  %8798 = vmatmul.msk.f32.gmra.mxu2 %vm633_vm2, %v11418_v62  ;;  %v11438_v24 = vld [vmem:[%s10817_s23 + $0xfa] sm:$0xff] }
 0x23e   : >> { %8865 = vmatmul.msk.f32.gmra.mxu3 %vm633_vm2, %v11421_v36  ;;  %8930 = vmatmul.msk.f32.gmra.mxu0 %vm633_vm2, %v11424_v45  ;;  %v11441_v60 = vld [vmem:[%s10817_s23 + $0x140] sm:$0xff]  ;;  %v11464_v45 = vld [vmem:[%s10817_s23 + $0x149] sm:$0xff] }
 0x23f   : >> { %14397 = vst [vmem:[#allocation38_spill] sm:$0xff] %v11426_v51 }
 0x240   : >> { %v1232_v46 = vpop.f32.mrf.mxu2  ;;  %14398 = vst [vmem:[#allocation39_spill] sm:$0xff] %v11441_v60 }
 0x241   : >> { %v1306_v10 = vadd.f32 %v1232_v46, %v990_v22  ;;  %v1510_v55 = vpop.f32.mrf.mxu3  ;;  %14402 = vst [vmem:[#allocation43_spill] sm:$0xff] %v11464_v45 }
 0x242   : >> { %v992_v2 = vpop.f32.mrf.mxu1 }
 0x243   : >> { %v1584_v50 = vadd.f32 %v1510_v55, %v1306_v10  ;;  %v1788_v51 = vpop.f32.mrf.mxu0  ;;  %v993_v32 = vadd.f32 %v992_v2, %v11135_v42 }
 0x245   : >> { %v11446_v36 = vadd.f32 %v1785_v31, %v1584_v50  ;;  %8766 = vmatmul.msk.f32.gmra.mxu1 %vm633_vm2, %v11293_v8  ;;  %8799 = vmatmul.msk.f32.gmra.mxu2 %vm633_vm2, %v11438_v24  ;;  %v11458_v31 = vld [vmem:[%s10817_s23 + $0x102] sm:$0xff] }
 0x246   : >> { %8866 = vmatmul.msk.f32.gmra.mxu3 %vm633_vm2, %v11441_v60  ;;  %8931 = vmatmul.msk.f32.gmra.mxu0 %vm633_vm2, %v11444_v35  ;;  %v11461_v50 = vld [vmem:[%s10817_s23 + $0x148] sm:$0xff]  ;;  %v11484_v35 = vld [vmem:[%s10817_s23 + $0x151] sm:$0xff] }
 0x247   : >> { %14400 = vst [vmem:[#allocation41_spill] sm:$0xff] %v11446_v36 }
 0x248   : >> { %v1235_v40 = vpop.f32.mrf.mxu2  ;;  %14401 = vst [vmem:[#allocation42_spill] sm:$0xff] %v11461_v50 }
 0x249   : >> { %v1307_v22 = vadd.f32 %v1235_v40, %v993_v32  ;;  %v1513_v46 = vpop.f32.mrf.mxu3 }
 0x24a   : >> { %v995_v10 = vpop.f32.mrf.mxu1 }
 0x24b   : >> { %v1585_v55 = vadd.f32 %v1513_v46, %v1307_v22  ;;  %v1791_v36 = vpop.f32.mrf.mxu0  ;;  %v996_v42 = vadd.f32 %v995_v10, %v11157_v47 }
 0x24d   : >> { %v11466_v60 = vadd.f32 %v1788_v51, %v1585_v55  ;;  %8767 = vmatmul.msk.f32.gmra.mxu1 %vm633_vm2, %v11310_v12  ;;  %8800 = vmatmul.msk.f32.gmra.mxu2 %vm633_vm2, %v11458_v31  ;;  %v11478_v51 = vld [vmem:[%s10817_s23 + $0x10a] sm:$0xff] }
 0x24e   : >> { %8867 = vmatmul.msk.f32.gmra.mxu3 %vm633_vm2, %v11461_v50  ;;  %8932 = vmatmul.msk.f32.gmra.mxu0 %vm633_vm2, %v11464_v45  ;;  %14404 = vst [vmem:[#allocation45_spill] sm:$0xff] %v11478_v51  ;;  %v11481_v55 = vld [vmem:[%s10817_s23 + $0x150] sm:$0xff]  ;;  %v11504_v45 = vld [vmem:[%s10817_s23 + $0x159] sm:$0xff] }
 0x24f   : >> { %14403 = vst [vmem:[#allocation44_spill] sm:$0xff] %v11466_v60 }
 0x250   : >> { %v1238_v2 = vpop.f32.mrf.mxu2 }
 0x251   : >> { %v1308_v32 = vadd.f32 %v1238_v2, %v996_v42  ;;  %v1516_v40 = vpop.f32.mrf.mxu3 }
 0x252   : >> { %v998_v22 = vpop.f32.mrf.mxu1 }
 0x253   : >> { %v1586_v46 = vadd.f32 %v1516_v40, %v1308_v32  ;;  %v1794_v60 = vpop.f32.mrf.mxu0  ;;  %v999_v47 = vadd.f32 %v998_v22, %v11179_v52 }
 0x255   : >> { %v11486_v50 = vadd.f32 %v1791_v36, %v1586_v46  ;;  %8768 = vmatmul.msk.f32.gmra.mxu1 %vm633_vm2, %v11327_v16  ;;  %8801 = vmatmul.msk.f32.gmra.mxu2 %vm633_vm2, %v11478_v51  ;;  %v11498_v36 = vld [vmem:[%s10817_s23 + $0x112] sm:$0xff] }
 0x256   : >> { %8868 = vmatmul.msk.f32.gmra.mxu3 %vm633_vm2, %v11481_v55  ;;  %8933 = vmatmul.msk.f32.gmra.mxu0 %vm633_vm2, %v11484_v35  ;;  %v11501_v46 = vld [vmem:[%s10817_s23 + $0x158] sm:$0xff] }
 0x257   : >> { %14405 = vst [vmem:[#allocation46_spill] sm:$0xff] %v11486_v50 }
 0x258   : >> { %v1241_v10 = vpop.f32.mrf.mxu2 }
 0x259   : >> { %v1309_v42 = vadd.f32 %v1241_v10, %v999_v47  ;;  %v1519_v2 = vpop.f32.mrf.mxu3 }
 0x25a   : >> { %v1001_v32 = vpop.f32.mrf.mxu1 }
 0x25b   : >> { %v1587_v40 = vadd.f32 %v1519_v2, %v1309_v42  ;;  %v1797_v50 = vpop.f32.mrf.mxu0  ;;  %v1002_v52 = vadd.f32 %v1001_v32, %v11201_v57 }
 0x25d   : >> { %v11506_v51 = vadd.f32 %v1794_v60, %v1587_v40  ;;  %8769 = vmatmul.msk.f32.gmra.mxu1 %vm633_vm2, %v11344_v20  ;;  %8802 = vmatmul.msk.f32.gmra.mxu2 %vm633_vm2, %v11498_v36 }
 0x25e   : >> { %8869 = vmatmul.msk.f32.gmra.mxu3 %vm633_vm2, %v11501_v46  ;;  %8934 = vmatmul.msk.f32.gmra.mxu0 %vm633_vm2, %v11504_v45 }
 0x260   : >> { %v1244_v22 = vpop.f32.mrf.mxu2 }
 0x261   : >> { %v1310_v47 = vadd.f32 %v1244_v22, %v1002_v52  ;;  %v1522_v10 = vpop.f32.mrf.mxu3 }
 0x262   : >> { %v1004_v42 = vpop.f32.mrf.mxu1 }
 0x263   : >> { %v1588_v60 = vadd.f32 %v1522_v10, %v1310_v47  ;;  %v1800_v2 = vpop.f32.mrf.mxu0  ;;  %v1005_v57 = vadd.f32 %v1004_v42, %v11066_v6 }
 0x265   : >> { %v11517_v40 = vadd.f32 %v1797_v50, %v1588_v60  ;;  %8968 = vmatmul.msk.f32.vlgmr.msra.gmra.mxu1 %vm633_vm2, %v11052_v3  ;;  %9035 = vmatmul.msk.f32.vlgmr.msra.gmra.mxu2 %vm633_vm2, %v11055_v4 }
 0x266   : >> { %9100 = vmatmul.msk.f32.vlgmr.msra.gmra.mxu3 %vm633_vm2, %v10823_v7  ;;  %9165 = vmatmul.msk.f32.vlgmr.msra.gmra.mxu0 %vm633_vm2, %v11224_v63 }
 0x268   : >> { %v1247_v32 = vpop.f32.mrf.mxu2 }
 0x269   : >> { %v1311_v52 = vadd.f32 %v1247_v32, %v1005_v57  ;;  %v1525_v22 = vpop.f32.mrf.mxu3 }
 0x26a   : >> { %v1007_v47 = vpop.f32.mrf.mxu1 }
 0x26b   : >> { %v1589_v50 = vadd.f32 %v1525_v22, %v1311_v52  ;;  %v1803_v10 = vpop.f32.mrf.mxu0  ;;  %v1008_v7 = vadd.f32 %v1007_v47, %v11087_v18  ;;  %v9070_v47 = vld [vmem:[%s10817_s23 + $0xa9] sm:$0xff] }
 0x26d   : >> { %v11528_v60 = vadd.f32 %v1800_v2, %v1589_v50  ;;  %8969 = vmatmul.msk.f32.gmra.mxu1 %vm633_vm2, %v11073_v13  ;;  %9036 = vmatmul.msk.f32.gmra.mxu2 %vm633_vm2, %v11076_v14 }
 0x26e   : >> { %9101 = vmatmul.msk.f32.gmra.mxu3 %vm633_vm2, %v10840_v11  ;;  %9166 = vmatmul.msk.f32.gmra.mxu0 %vm633_vm2, %v11239_v41 }
 0x270   : >> { %v1250_v3 = vpop.f32.mrf.mxu2 }
 0x271   : >> { %v1312_v4 = vadd.f32 %v1250_v3, %v1008_v7  ;;  %v1528_v6 = vpop.f32.mrf.mxu3 }
 0x272   : >> { %v1010_v42 = vpop.f32.mrf.mxu1 }
 0x273   : >> { %v1590_v2 = vadd.f32 %v1528_v6, %v1312_v4  ;;  %v1806_v57 = vpop.f32.mrf.mxu0  ;;  %v1011_v11 = vadd.f32 %v1010_v42, %v11109_v28  ;;  %v9071_v4 = vld [vmem:[%s10817_s23 + $0xb1] sm:$0xff] }
 0x275   : >> { %v11539_v32 = vadd.f32 %v1803_v10, %v1590_v2  ;;  %8970 = vmatmul.msk.f32.gmra.mxu1 %vm633_vm2, %v11094_v25  ;;  %9037 = vmatmul.msk.f32.gmra.mxu2 %vm633_vm2, %v11097_v26 }
 0x276   : >> { %9102 = vmatmul.msk.f32.gmra.mxu3 %vm633_vm2, %v10857_v15  ;;  %9167 = vmatmul.msk.f32.gmra.mxu0 %vm633_vm2, %v11256_v61 }
 0x278   : >> { %v1253_v13 = vpop.f32.mrf.mxu2 }
 0x279   : >> { %v1313_v14 = vadd.f32 %v1253_v13, %v1011_v11  ;;  %v1531_v18 = vpop.f32.mrf.mxu3  ;;  %v9072_v13 = vld [vmem:[%s10817_s23 + $0xb9] sm:$0xff] }
 0x27a   : >> { %v1013_v52 = vpop.f32.mrf.mxu1 }
 0x27b   : >> { %v1591_v22 = vadd.f32 %v1531_v18, %v1313_v14  ;;  %v1809_v50 = vpop.f32.mrf.mxu0  ;;  %v1014_v15 = vadd.f32 %v1013_v52, %v11131_v38 }
 0x27d   : >> { %v11551_v25 = vadd.f32 %v1806_v57, %v1591_v22  ;;  %8971 = vmatmul.msk.f32.gmra.mxu1 %vm633_vm2, %v11116_v33  ;;  %9038 = vmatmul.msk.f32.gmra.mxu2 %vm633_vm2, %v11119_v34 }
 0x27e   : >> { %9103 = vmatmul.msk.f32.gmra.mxu3 %vm633_vm2, %v9070_v47  ;;  %9168 = vmatmul.msk.f32.gmra.mxu0 %vm633_vm2, %v11273_v5 }
 0x280   : >> { %v1256_v26 = vpop.f32.mrf.mxu2 }
 0x281   : >> { %v1314_v28 = vadd.f32 %v1256_v26, %v1014_v15  ;;  %v1534_v10 = vpop.f32.mrf.mxu3 }
 0x282   : >> { %v1016_v7 = vpop.f32.mrf.mxu1 }
 0x283   : >> { %v1592_v3 = vadd.f32 %v1534_v10, %v1314_v28  ;;  %v1812_v6 = vpop.f32.mrf.mxu0  ;;  %v1017_v33 = vadd.f32 %v1016_v7, %v11153_v19 }
 0x285   : >> { %v11562_v42 = vadd.f32 %v1809_v50, %v1592_v3  ;;  %8972 = vmatmul.msk.f32.gmra.mxu1 %vm633_vm2, %v11138_v43  ;;  %9039 = vmatmul.msk.f32.gmra.mxu2 %vm633_vm2, %v11141_v44  ;;  %v9073_v50 = vld [vmem:[%s10817_s23 + $0xc1] sm:$0xff]  ;;  %v9074_v3 = vld [vmem:[%s10817_s23 + $0xc9] sm:$0xff] }
 0x286   : >> { %9104 = vmatmul.msk.f32.gmra.mxu3 %vm633_vm2, %v9071_v4  ;;  %9169 = vmatmul.msk.f32.gmra.mxu0 %vm633_vm2, %v11290_v17 }
 0x288   : >> { %v1259_v34 = vpop.f32.mrf.mxu2 }
 0x289   : >> { %v1315_v38 = vadd.f32 %v1259_v34, %v1017_v33  ;;  %v1537_v2 = vpop.f32.mrf.mxu3 }
 0x28a   : >> { %v1019_v57 = vpop.f32.mrf.mxu1 }
 0x28b   : >> { %v1593_v11 = vadd.f32 %v1537_v2, %v1315_v38  ;;  %v1815_v14 = vpop.f32.mrf.mxu0  ;;  %v1020_v43 = vadd.f32 %v1019_v57, %v11175_v23 }
 0x28d   : >> { %v11573_v18 = vadd.f32 %v1812_v6, %v1593_v11  ;;  %8973 = vmatmul.msk.f32.gmra.mxu1 %vm633_vm2, %v11160_v48  ;;  %9040 = vmatmul.msk.f32.gmra.mxu2 %vm633_vm2, %v11163_v49  ;;  %v9075_v11 = vld [vmem:[%s10817_s23 + $0xd9] sm:$0xff] }
 0x28e   : >> { %9105 = vmatmul.msk.f32.gmra.mxu3 %vm633_vm2, %v9072_v13  ;;  %9170 = vmatmul.msk.f32.gmra.mxu0 %vm633_vm2, %v11307_v27 }
 0x290   : >> { %v1262_v44 = vpop.f32.mrf.mxu2 }
 0x291   : >> { %v1316_v19 = vadd.f32 %v1262_v44, %v1020_v43  ;;  %v1540_v52 = vpop.f32.mrf.mxu3 }
 0x292   : >> { %v1022_v22 = vpop.f32.mrf.mxu1 }
 0x293   : >> { %v1594_v47 = vadd.f32 %v1540_v52, %v1316_v19  ;;  %v1818_v15 = vpop.f32.mrf.mxu0  ;;  %v1023_v48 = vadd.f32 %v1022_v22, %v11197_v30 }
 0x295   : >> { %v11584_v26 = vadd.f32 %v1815_v14, %v1594_v47  ;;  %8974 = vmatmul.msk.f32.gmra.mxu1 %vm633_vm2, %v11182_v53  ;;  %9041 = vmatmul.msk.f32.gmra.mxu2 %vm633_vm2, %v11185_v54  ;;  %v14406_v53 = vld [vmem:[#allocation25_spill] sm:$0xff] }
 0x296   : >> { %9106 = vmatmul.msk.f32.gmra.mxu3 %vm633_vm2, %v9073_v50  ;;  %9171 = vmatmul.msk.f32.gmra.mxu0 %vm633_vm2, %v11324_v37  ;;  %v14407_v54 = vld [vmem:[#allocation17_spill] sm:$0xff] }
 0x297   : >> { %v9076_v47 = vld [vmem:[%s10817_s23 + $0xe1] sm:$0xff] }
 0x298   : >> { %v1265_v49 = vpop.f32.mrf.mxu2 }
 0x299   : >> { %v1317_v23 = vadd.f32 %v1265_v49, %v1023_v48  ;;  %v1543_v28 = vpop.f32.mrf.mxu3 }
 0x29a   : >> { %v1025_v10 = vpop.f32.mrf.mxu1 }
 0x29b   : >> { %v1595_v7 = vadd.f32 %v1543_v28, %v1317_v23  ;;  %v1821_v4 = vpop.f32.mrf.mxu0  ;;  %v1026_v30 = vadd.f32 %v1025_v10, %v14407_v54 }
 0x29d   : >> { %v11595_v6 = vadd.f32 %v1818_v15, %v1595_v7  ;;  %8975 = vmatmul.msk.f32.gmra.mxu1 %vm633_vm2, %v11204_v58  ;;  %9042 = vmatmul.msk.f32.gmra.mxu2 %vm633_vm2, %v11207_v59  ;;  %v14408_v58 = vld [vmem:[#allocation10_spill] sm:$0xff] }
 0x29e   : >> { %9107 = vmatmul.msk.f32.gmra.mxu3 %vm633_vm2, %v9074_v3  ;;  %9172 = vmatmul.msk.f32.gmra.mxu0 %vm633_vm2, %v14406_v53  ;;  %v9077_v7 = vld [vmem:[%s10817_s23 + $0xe9] sm:$0xff] }
 0x2a0   : >> { %v1268_v33 = vpop.f32.mrf.mxu2 }
 0x2a1   : >> { %v1318_v34 = vadd.f32 %v1268_v33, %v1026_v30  ;;  %v1546_v38 = vpop.f32.mrf.mxu3 }
 0x2a2   : >> { %v1028_v2 = vpop.f32.mrf.mxu1 }
 0x2a3   : >> { %v1596_v57 = vadd.f32 %v1546_v38, %v1318_v34  ;;  %v1824_v13 = vpop.f32.mrf.mxu0  ;;  %v1029_v59 = vadd.f32 %v1028_v2, %v14408_v58  ;;  %v9078_v2 = vld [vmem:[%s10817_s23 + $0xf1] sm:$0xff] }
 0x2a5   : >> { %v11606_v14 = vadd.f32 %v1821_v4, %v1596_v57  ;;  %8976 = vmatmul.msk.f32.gmra.mxu1 %vm633_vm2, %v11224_v63  ;;  %9043 = vmatmul.msk.f32.gmra.mxu2 %vm633_vm2, %v11227_v0  ;;  %v14409_v63 = vld [vmem:[#allocation11_spill] sm:$0xff] }
 0x2a6   : >> { %9108 = vmatmul.msk.f32.gmra.mxu3 %vm633_vm2, %v9075_v11  ;;  %9173 = vmatmul.msk.f32.gmra.mxu0 %vm633_vm2, %v11358_v29 }
 0x2a8   : >> { %v1271_v43 = vpop.f32.mrf.mxu2 }
 0x2a9   : >> { %v1319_v44 = vadd.f32 %v1271_v43, %v1029_v59  ;;  %v1549_v19 = vpop.f32.mrf.mxu3 }
 0x2aa   : >> { %v1031_v52 = vpop.f32.mrf.mxu1 }
 0x2ab   : >> { %v1597_v22 = vadd.f32 %v1549_v19, %v1319_v44  ;;  %v1827_v50 = vpop.f32.mrf.mxu0  ;;  %v1032_v0 = vadd.f32 %v1031_v52, %v14409_v63  ;;  %v9079_v19 = vld [vmem:[%s10817_s23 + $0xf9] sm:$0xff] }
 0x2ad   : >> { %v11617_v15 = vadd.f32 %v1824_v13, %v1597_v22  ;;  %8977 = vmatmul.msk.f32.gmra.mxu1 %vm633_vm2, %v11239_v41  ;;  %9044 = vmatmul.msk.f32.gmra.mxu2 %vm633_vm2, %v11242_v21  ;;  %v14410_v21 = vld [vmem:[#allocation12_spill] sm:$0xff] }
 0x2ae   : >> { %9109 = vmatmul.msk.f32.gmra.mxu3 %vm633_vm2, %v9076_v47  ;;  %9174 = vmatmul.msk.f32.gmra.mxu0 %vm633_vm2, %v11378_v9 }
 0x2b0   : >> { %v1274_v48 = vpop.f32.mrf.mxu2 }
 0x2b1   : >> { %v1320_v49 = vadd.f32 %v1274_v48, %v1032_v0  ;;  %v1552_v23 = vpop.f32.mrf.mxu3 }
 0x2b2   : >> { %v1034_v28 = vpop.f32.mrf.mxu1 }
 0x2b3   : >> { %v1598_v10 = vadd.f32 %v1552_v23, %v1320_v49  ;;  %v1830_v3 = vpop.f32.mrf.mxu0  ;;  %v1035_v41 = vadd.f32 %v1034_v28, %v14410_v21  ;;  %v9080_v49 = vld [vmem:[%s10817_s23 + $0x101] sm:$0xff] }
 0x2b5   : >> { %v11628_v4 = vadd.f32 %v1827_v50, %v1598_v10  ;;  %8978 = vmatmul.msk.f32.gmra.mxu1 %vm633_vm2, %v11256_v61  ;;  %9045 = vmatmul.msk.f32.gmra.mxu2 %vm633_vm2, %v11259_v1  ;;  %v14411_v61 = vld [vmem:[#allocation13_spill] sm:$0xff] }
 0x2b6   : >> { %9110 = vmatmul.msk.f32.gmra.mxu3 %vm633_vm2, %v9077_v7  ;;  %9175 = vmatmul.msk.f32.gmra.mxu0 %vm633_vm2, %v11398_v39 }
 0x2b8   : >> { %v1277_v54 = vpop.f32.mrf.mxu2 }
 0x2b9   : >> { %v1321_v30 = vadd.f32 %v1277_v54, %v1035_v41  ;;  %v1555_v33 = vpop.f32.mrf.mxu3  ;;  %v9081_v54 = vld [vmem:[%s10817_s23 + $0x109] sm:$0xff] }
 0x2ba   : >> { %v1037_v34 = vpop.f32.mrf.mxu1 }
 0x2bb   : >> { %v1599_v38 = vadd.f32 %v1555_v33, %v1321_v30  ;;  %v1833_v57 = vpop.f32.mrf.mxu0  ;;  %v1038_v1 = vadd.f32 %v1037_v34, %v14411_v61 }
 0x2bd   : >> { %v11639_v11 = vadd.f32 %v1830_v3, %v1599_v38  ;;  %8979 = vmatmul.msk.f32.gmra.mxu1 %vm633_vm2, %v11273_v5  ;;  %9046 = vmatmul.msk.f32.gmra.mxu2 %vm633_vm2, %v11276_v56  ;;  %v14412_v5 = vld [vmem:[#allocation14_spill] sm:$0xff] }
 0x2be   : >> { %9111 = vmatmul.msk.f32.gmra.mxu3 %vm633_vm2, %v9078_v2  ;;  %9176 = vmatmul.msk.f32.gmra.mxu0 %vm633_vm2, %v11418_v62 }
 0x2c0   : >> { %v1280_v13 = vpop.f32.mrf.mxu2 }
 0x2c1   : >> { %v1322_v58 = vadd.f32 %v1280_v13, %v1038_v1  ;;  %v1558_v59 = vpop.f32.mrf.mxu3  ;;  %v9082_v13 = vld [vmem:[%s10817_s23 + $0x111] sm:$0xff] }
 0x2c2   : >> { %v1040_v43 = vpop.f32.mrf.mxu1 }
 0x2c3   : >> { %v1600_v44 = vadd.f32 %v1558_v59, %v1322_v58  ;;  %v1836_v52 = vpop.f32.mrf.mxu0  ;;  %v1041_v56 = vadd.f32 %v1040_v43, %v14412_v5 }
 0x2c5   : >> { %v11650_v22 = vadd.f32 %v1833_v57, %v1600_v44  ;;  %8980 = vmatmul.msk.f32.gmra.mxu1 %vm633_vm2, %v11290_v17  ;;  %9047 = vmatmul.msk.f32.gmra.mxu2 %vm633_vm2, %v11293_v8  ;;  %v14413_v17 = vld [vmem:[#allocation15_spill] sm:$0xff] }
 0x2c6   : >> { %9112 = vmatmul.msk.f32.gmra.mxu3 %vm633_vm2, %v9079_v19  ;;  %9177 = vmatmul.msk.f32.gmra.mxu0 %vm633_vm2, %v11438_v24 }
 0x2c8   : >> { %v1283_v47 = vpop.f32.mrf.mxu2 }
 0x2c9   : >> { %v1323_v50 = vadd.f32 %v1283_v47, %v1041_v56  ;;  %v1561_v63 = vpop.f32.mrf.mxu3  ;;  %v11694_v47 = vld [vmem:[%s10817_s23 + $0x122] sm:$0xff] }
 0x2ca   : >> { %v1043_v0 = vpop.f32.mrf.mxu1 }
 0x2cb   : >> { %v1601_v48 = vadd.f32 %v1561_v63, %v1323_v50  ;;  %v1839_v23 = vpop.f32.mrf.mxu0  ;;  %v1044_v8 = vadd.f32 %v1043_v0, %v14413_v17  ;;  %v14418_v50 = vld [vmem:[#allocation28_spill] sm:$0xff]  ;;  %v14419_v63 = vld [vmem:[#allocation19_spill] sm:$0xff] }
 0x2cd   : >> { %v11661_v28 = vadd.f32 %v1836_v52, %v1601_v48  ;;  %8981 = vmatmul.msk.f32.gmra.mxu1 %vm633_vm2, %v11307_v27  ;;  %9048 = vmatmul.msk.f32.gmra.mxu2 %vm633_vm2, %v11310_v12  ;;  %v14414_v27 = vld [vmem:[#allocation45_spill] sm:$0xff]  ;;  %v14415_v12 = vld [vmem:[#allocation16_spill] sm:$0xff] }
 0x2ce   : >> { %9113 = vmatmul.msk.f32.gmra.mxu3 %vm633_vm2, %v9080_v49  ;;  %9178 = vmatmul.msk.f32.gmra.mxu0 %vm633_vm2, %v11458_v31 }
 0x2d0   : >> { %v1286_v10 = vpop.f32.mrf.mxu2 }
 0x2d1   : >> { %v1324_v7 = vadd.f32 %v1286_v10, %v1044_v8  ;;  %v1564_v3 = vpop.f32.mrf.mxu3 }
 0x2d2   : >> { %v1046_v21 = vpop.f32.mrf.mxu1 }
 0x2d3   : >> { %v1602_v41 = vadd.f32 %v1564_v3, %v1324_v7  ;;  %v1842_v30 = vpop.f32.mrf.mxu0  ;;  %v1047_v34 = vadd.f32 %v1046_v21, %v14415_v12  ;;  %v11713_v7 = vld [vmem:[%s10817_s23 + $0x12a] sm:$0xff] }
 0x2d4   : >> { %v14420_v21 = vld [vmem:[#allocation30_spill] sm:$0xff] }
 0x2d5   : >> { %v11672_v33 = vadd.f32 %v1839_v23, %v1602_v41  ;;  %8982 = vmatmul.msk.f32.gmra.mxu1 %vm633_vm2, %v11324_v37  ;;  %9049 = vmatmul.msk.f32.gmra.mxu2 %vm633_vm2, %v11327_v16  ;;  %v14416_v37 = vld [vmem:[#allocation18_spill] sm:$0xff]  ;;  %v14421_v41 = vld [vmem:[#allocation31_spill] sm:$0xff] }
 0x2d6   : >> { %9114 = vmatmul.msk.f32.gmra.mxu3 %vm633_vm2, %v9081_v54  ;;  %9179 = vmatmul.msk.f32.gmra.mxu0 %vm633_vm2, %v14414_v27  ;;  %v14422_v54 = vld [vmem:[#allocation20_spill] sm:$0xff] }
 0x2d8   : >> { %v1289_v38 = vpop.f32.mrf.mxu2 }
 0x2d9   : >> { %v1325_v2 = vadd.f32 %v1289_v38, %v1047_v34  ;;  %v1567_v57 = vpop.f32.mrf.mxu3 }
 0x2da   : >> { %v1049_v61 = vpop.f32.mrf.mxu1 }
 0x2db   : >> { %v1603_v1 = vadd.f32 %v1567_v57, %v1325_v2  ;;  %v1845_v58 = vpop.f32.mrf.mxu0  ;;  %v1050_v16 = vadd.f32 %v1049_v61, %v14416_v37  ;;  %v14423_v37 = vld [vmem:[#allocation33_spill] sm:$0xff] }
 0x2dd   : >> { %v11683_v59 = vadd.f32 %v1842_v30, %v1603_v1  ;;  %8983 = vmatmul.msk.f32.gmra.mxu1 %vm633_vm2, %v14406_v53  ;;  %9050 = vmatmul.msk.f32.gmra.mxu2 %vm633_vm2, %v11344_v20  ;;  %v14417_v20 = vld [vmem:[#allocation27_spill] sm:$0xff] }
 0x2de   : >> { %9115 = vmatmul.msk.f32.gmra.mxu3 %vm633_vm2, %v9082_v13  ;;  %9180 = vmatmul.msk.f32.gmra.mxu0 %vm633_vm2, %v11498_v36  ;;  %v11727_v13 = vld [vmem:[%s10817_s23 + $0x132] sm:$0xff] }
 0x2e0   : >> { %v1292_v43 = vpop.f32.mrf.mxu2 }
 0x2e1   : >> { %v1326_v44 = vadd.f32 %v1292_v43, %v1050_v16  ;;  %v1570_v19 = vpop.f32.mrf.mxu3  ;;  %v14424_v16 = vld [vmem:[#allocation34_spill] sm:$0xff]  ;;  %v14425_v43 = vld [vmem:[#allocation21_spill] sm:$0xff] }
 0x2e2   : >> { %v2027_v52 = vpop.f32.mrf.mxu1 }
 0x2e3   : >> { %v1604_v5 = vadd.f32 %v1570_v19, %v1326_v44  ;;  %v2855_v56 = vpop.f32.mrf.mxu0  ;;  %v2123_v0 = vadd.f32 %v2027_v52, %v14419_v63 }
 0x2e5   : >> { %v11696_v53 = vadd.f32 %v1845_v58, %v1604_v5  ;;  %8984 = vmatmul.msk.f32.gmra.mxu1 %vm633_vm2, %v11358_v29  ;;  %9051 = vmatmul.msk.f32.gmra.mxu2 %vm633_vm2, %v14417_v20  ;;  %v11710_v29 = vld [vmem:[%s14306_s2] ss:$0 sm:$0xff] }
 0x2e6   : >> { %9116 = vmatmul.msk.f32.gmra.mxu3 %vm633_vm2, %v14418_v50  ;;  %9181 = vmatmul.msk.f32.gmra.mxu0 %vm633_vm2, %v11694_v47 }
 0x2e8   : >> { %v2305_v48 = vpop.f32.mrf.mxu2 }
 0x2e9   : >> { %v2401_v49 = vadd.f32 %v2305_v48, %v2123_v0  ;;  %v2580_v23 = vpop.f32.mrf.mxu3  ;;  %v11741_v0 = vld [vmem:[%s10817_s23 + $0x13a] sm:$0xff] }
 0x2ea   : >> { %v2030_v17 = vpop.f32.mrf.mxu1 }
 0x2eb   : >> { %v2676_v8 = vadd.f32 %v2580_v23, %v2401_v49  ;;  %v2858_v10 = vpop.f32.mrf.mxu0  ;;  %v2124_v30 = vadd.f32 %v2030_v17, %v14422_v54  ;;  %v14426_v49 = vld [vmem:[#allocation36_spill] sm:$0xff]  ;;  %v14427_v23 = vld [vmem:[#allocation37_spill] sm:$0xff]  ;;  %v14428_v17 = vld [vmem:[#allocation22_spill] sm:$0xff] }
 0x2ed   : >> { %v2951_v3 = vadd.f32 %v2855_v56, %v2676_v8  ;;  %8985 = vmatmul.msk.f32.gmra.mxu1 %vm633_vm2, %v11378_v9  ;;  %9052 = vmatmul.msk.f32.gmra.mxu2 %vm633_vm2, %v14420_v21 }
 0x2ee   : >> { %9117 = vmatmul.msk.f32.gmra.mxu3 %vm633_vm2, %v14421_v41  ;;  %9182 = vmatmul.msk.f32.gmra.mxu0 %vm633_vm2, %v11713_v7 }
 0x2ef   : >> { %v2987_v12 = vadd.f32 %v11710_v29, %v2951_v3 }
 0x2f0   : >> { %v2308_v34 = vpop.f32.mrf.mxu2 }
 0x2f1   : >> { %v3019_v38 = vmax.f32 %v2987_v12, 0.0  ;;  %v2402_v2 = vadd.f32 %v2308_v34, %v2124_v30  ;;  %v2583_v57 = vpop.f32.mrf.mxu3 }
 0x2f2   : >> { %v2033_v61 = vpop.f32.mrf.mxu1 }
 0x2f3   : >> { %3051 = vst.msk [vmem:[#allocation4] sm:$0xff] %vm279_vm0, %v3019_v38  ;;  %v2677_v9 = vadd.f32 %v2583_v57, %v2402_v2  ;;  %v2861_v1 = vpop.f32.mrf.mxu0  ;;  %v2125_v44 = vadd.f32 %v2033_v61, %v14425_v43  ;;  %v11755_v57 = vld [vmem:[%s10817_s23 + $0x142] sm:$0xff] }
 0x2f5   : >> { %v2952_v58 = vadd.f32 %v2858_v10, %v2677_v9  ;;  %8986 = vmatmul.msk.f32.gmra.mxu1 %vm633_vm2, %v11398_v39  ;;  %9053 = vmatmul.msk.f32.gmra.mxu2 %vm633_vm2, %v14423_v37  ;;  %v14429_v9 = vld [vmem:[#allocation39_spill] sm:$0xff] }
 0x2f6   : >> { %9118 = vmatmul.msk.f32.gmra.mxu3 %vm633_vm2, %v14424_v16  ;;  %9183 = vmatmul.msk.f32.gmra.mxu0 %vm633_vm2, %v11727_v13 }
 0x2f7   : >> { %v2988_v19 = vadd.f32 %v11710_v29, %v2952_v58  ;;  %v14431_v58 = vld [vmem:[#allocation23_spill] sm:$0xff] }
 0x2f8   : >> { %v2311_v52 = vpop.f32.mrf.mxu2 }
 0x2f9   : >> { %v3020_v5 = vmax.f32 %v2988_v19, 0.0  ;;  %v2403_v56 = vadd.f32 %v2311_v52, %v2125_v44  ;;  %v2586_v20 = vpop.f32.mrf.mxu3 }
 0x2fa   : >> { %v2036_v50 = vpop.f32.mrf.mxu1 }
 0x2fb   : >> { %3052 = vst.msk [vmem:[#allocation4 + $0x8] sm:$0xff] %vm279_vm0, %v3020_v5  ;;  %v2678_v39 = vadd.f32 %v2586_v20, %v2403_v56  ;;  %v2864_v63 = vpop.f32.mrf.mxu0  ;;  %v2126_v8 = vadd.f32 %v2036_v50, %v14428_v17  ;;  %v11770_v20 = vld [vmem:[%s10817_s23 + $0x14a] sm:$0xff] }
 0x2fd   : >> { %v2953_v48 = vadd.f32 %v2861_v1, %v2678_v39  ;;  %8987 = vmatmul.msk.f32.gmra.mxu1 %vm633_vm2, %v11418_v62  ;;  %9054 = vmatmul.msk.f32.gmra.mxu2 %vm633_vm2, %v14426_v49  ;;  %v14430_v1 = vld [vmem:[#allocation40_spill] sm:$0xff]  ;;  %v14432_v39 = vld [vmem:[#allocation42_spill] sm:$0xff] }
 0x2fe   : >> { %9119 = vmatmul.msk.f32.gmra.mxu3 %vm633_vm2, %v14427_v23  ;;  %9184 = vmatmul.msk.f32.gmra.mxu0 %vm633_vm2, %v11741_v0 }
 0x2ff   : >> { %v2989_v10 = vadd.f32 %v11710_v29, %v2953_v48  ;;  %v14434_v48 = vld [vmem:[#allocation24_spill] sm:$0xff] }
 0x300   : >> { %v2314_v3 = vpop.f32.mrf.mxu2 }
 0x301   : >> { %v3021_v21 = vmax.f32 %v2989_v10, 0.0  ;;  %v2404_v41 = vadd.f32 %v2314_v3, %v2126_v8  ;;  %v2589_v54 = vpop.f32.mrf.mxu3 }
 0x302   : >> { %v3083_v30 = vld [vmem:[#allocation4] ss:$2 sm:$0xff]  ;;  %v3115_v62 = vld [vmem:[#allocation4 + $0x1] ss:$2 sm:$0xff]  ;;  %v2039_v12 = vpop.f32.mrf.mxu1 }
 0x303   : >> { %v3146_v34 = vmax.f32 %v3083_v30, %v3115_v62  ;;  %3053 = vst.msk [vmem:[#allocation4 + $0x10] sm:$0xff] %vm279_vm0, %v3021_v21  ;;  %v2679_v38 = vadd.f32 %v2589_v54, %v2404_v41  ;;  %v2867_v2 = vpop.f32.mrf.mxu0  ;;  %v2127_v37 = vadd.f32 %v2039_v12, %v14431_v58  ;;  %v11784_v12 = vld [vmem:[%s10817_s23 + $0x152] sm:$0xff] }
 0x305   : >> { %3162 = vst.msk [vmem:[#allocation5] sm:$0xff] %vm279_vm0, %v3146_v34  ;;  %v2954_v61 = vadd.f32 %v2864_v63, %v2679_v38  ;;  %8988 = vmatmul.msk.f32.gmra.mxu1 %vm633_vm2, %v11438_v24  ;;  %9055 = vmatmul.msk.f32.gmra.mxu2 %vm633_vm2, %v14429_v9  ;;  %v14433_v63 = vld [vmem:[#allocation43_spill] sm:$0xff]  ;;  %v14435_v38 = vld [vmem:[#allocation26_spill] sm:$0xff] }
 0x306   : >> { %9120 = vmatmul.msk.f32.gmra.mxu3 %vm633_vm2, %v14430_v1  ;;  %9185 = vmatmul.msk.f32.gmra.mxu0 %vm633_vm2, %v11755_v57 }
 0x307   : >> { %v2990_v16 = vadd.f32 %v11710_v29, %v2954_v61 }
 0x308   : >> { %v2317_v43 = vpop.f32.mrf.mxu2 }
 0x309   : >> { %v3022_v44 = vmax.f32 %v2990_v16, 0.0  ;;  %v2405_v19 = vadd.f32 %v2317_v43, %v2127_v37  ;;  %v2592_v52 = vpop.f32.mrf.mxu3 }
 0x30a   : >> { %v2042_v5 = vpop.f32.mrf.mxu1 }
 0x30b   : >> { %3054 = vst.msk [vmem:[#allocation4 + $0x18] sm:$0xff] %vm279_vm0, %v3022_v44  ;;  %v2680_v24 = vadd.f32 %v2592_v52, %v2405_v19  ;;  %v2870_v56 = vpop.f32.mrf.mxu0  ;;  %v2128_v49 = vadd.f32 %v2042_v5, %v14434_v48  ;;  %v14436_v44 = vld [vmem:[#allocation29_spill] sm:$0xff] }
 0x30d   : >> { %v2955_v50 = vadd.f32 %v2867_v2, %v2680_v24  ;;  %8989 = vmatmul.msk.f32.gmra.mxu1 %vm633_vm2, %v11458_v31  ;;  %9056 = vmatmul.msk.f32.gmra.mxu2 %vm633_vm2, %v14432_v39 }
 0x30e   : >> { %9121 = vmatmul.msk.f32.gmra.mxu3 %vm633_vm2, %v14433_v63  ;;  %9186 = vmatmul.msk.f32.gmra.mxu0 %vm633_vm2, %v11770_v20 }
 0x30f   : >> { %v2991_v23 = vadd.f32 %v11710_v29, %v2955_v50 }
 0x310   : >> { %v2320_v17 = vpop.f32.mrf.mxu2 }
 0x311   : >> { %v3023_v8 = vmax.f32 %v2991_v23, 0.0  ;;  %v2406_v10 = vadd.f32 %v2320_v17, %v2128_v49  ;;  %v2595_v3 = vpop.f32.mrf.mxu3  ;;  %v9091_v49 = vld [vmem:[%s10817_s23 + $0x169] sm:$0xff] }
 0x312   : >> { %v3085_v21 = vld [vmem:[#allocation4 + $0x10] ss:$2 sm:$0xff]  ;;  %v3117_v31 = vld [vmem:[#allocation4 + $0x11] ss:$2 sm:$0xff]  ;;  %v2045_v41 = vpop.f32.mrf.mxu1 }
 0x313   : >> { %v3147_v54 = vmax.f32 %v3085_v21, %v3117_v31  ;;  %3055 = vst.msk [vmem:[#allocation4 + $0x20] sm:$0xff] %vm279_vm0, %v3023_v8  ;;  %v2681_v30 = vadd.f32 %v2595_v3, %v2406_v10  ;;  %v2873_v62 = vpop.f32.mrf.mxu0  ;;  %v2129_v2 = vadd.f32 %v2045_v41, %v14435_v38  ;;  %v9156_v17 = vld [vmem:[%s10817_s23 + $0x16a] sm:$0xff]  ;;  %v14437_v10 = vld [vmem:[#allocation32_spill] sm:$0xff] }
 0x314   : >> { %v9092_v38 = vld [vmem:[%s10817_s23 + $0x171] sm:$0xff] }
 0x315   : >> { %3163 = vst.msk [vmem:[#allocation5 + $0x8] sm:$0xff] %vm279_vm0, %v3147_v54  ;;  %v2956_v34 = vadd.f32 %v2870_v56, %v2681_v30  ;;  %8990 = vmatmul.msk.f32.gmra.mxu1 %vm633_vm2, %v14414_v27  ;;  %9057 = vmatmul.msk.f32.gmra.mxu2 %vm633_vm2, %v11481_v55  ;;  %v11799_v55 = vld [vmem:[%s10817_s23 + $0x15a] sm:$0xff] }
 0x316   : >> { %9122 = vmatmul.msk.f32.gmra.mxu3 %vm633_vm2, %v11484_v35  ;;  %9187 = vmatmul.msk.f32.gmra.mxu0 %vm633_vm2, %v11784_v12 }
 0x317   : >> { %v2992_v61 = vadd.f32 %v11710_v29, %v2956_v34  ;;  %v9027_v34 = vld [vmem:[%s10817_s23 + $0x170] sm:$0xff] }
 0x318   : >> { %v2323_v9 = vpop.f32.mrf.mxu2 }
 0x319   : >> { %v3024_v1 = vmax.f32 %v2992_v61, 0.0  ;;  %v2407_v58 = vadd.f32 %v2323_v9, %v2129_v2  ;;  %v2598_v37 = vpop.f32.mrf.mxu3  ;;  %v9157_v61 = vld [vmem:[%s10817_s23 + $0x172] sm:$0xff] }
 0x31a   : >> { %v2048_v16 = vpop.f32.mrf.mxu1 }
 0x31b   : >> { %3056 = vst.msk [vmem:[#allocation4 + $0x28] sm:$0xff] %vm279_vm0, %v3024_v1  ;;  %v2682_v27 = vadd.f32 %v2598_v37, %v2407_v58  ;;  %v2876_v43 = vpop.f32.mrf.mxu0  ;;  %v2130_v19 = vadd.f32 %v2048_v16, %v14436_v44  ;;  %v14438_v1 = vld [vmem:[#allocation35_spill] sm:$0xff] }
 0x31d   : >> { %v2957_v35 = vadd.f32 %v2873_v62, %v2682_v27  ;;  %8991 = vmatmul.msk.f32.gmra.mxu1 %vm633_vm2, %v11498_v36  ;;  %9058 = vmatmul.msk.f32.gmra.mxu2 %vm633_vm2, %v11501_v46  ;;  %v9026_v46 = vld [vmem:[%s10817_s23 + $0x168] sm:$0xff] }
 0x31e   : >> { %9123 = vmatmul.msk.f32.gmra.mxu3 %vm633_vm2, %v11504_v45  ;;  %9188 = vmatmul.msk.f32.gmra.mxu0 %vm633_vm2, %v11799_v55 }
 0x31f   : >> { %v2993_v52 = vadd.f32 %v11710_v29, %v2957_v35 }
 0x320   : >> { %v2326_v5 = vpop.f32.mrf.mxu2 }
 0x321   : >> { %v3025_v24 = vmax.f32 %v2993_v52, 0.0  ;;  %v2408_v56 = vadd.f32 %v2326_v5, %v2130_v19  ;;  %v2601_v50 = vpop.f32.mrf.mxu3 }
 0x322   : >> { %v3087_v36 = vld [vmem:[#allocation4 + $0x20] ss:$2 sm:$0xff]  ;;  %v3119_v39 = vld [vmem:[#allocation4 + $0x21] ss:$2 sm:$0xff]  ;;  %v2051_v63 = vpop.f32.mrf.mxu1 }
 0x323   : >> { %v3148_v48 = vmax.f32 %v3087_v36, %v3119_v39  ;;  %3057 = vst.msk [vmem:[#allocation4 + $0x30] sm:$0xff] %vm279_vm0, %v3025_v24  ;;  %v2683_v45 = vadd.f32 %v2601_v50, %v2408_v56  ;;  %v2879_v23 = vpop.f32.mrf.mxu0  ;;  %v2131_v3 = vadd.f32 %v2051_v63, %v14437_v10  ;;  %v9093_v56 = vld [vmem:[%s10817_s23 + $0x179] sm:$0xff]  ;;  %v14439_v63 = vld [vmem:[#allocation38_spill] sm:$0xff] }
 0x324   : >> { %v9158_v36 = vld [vmem:[%s10817_s23 + $0x17a] sm:$0xff] }
 0x325   : >> { %3164 = vst.msk [vmem:[#allocation5 + $0x10] sm:$0xff] %vm279_vm0, %v3148_v48  ;;  %v2958_v8 = vadd.f32 %v2876_v43, %v2683_v45  ;;  %8992 = vmatmul.msk.f32.gmra.mxu1 %vm633_vm2, %v11694_v47  ;;  %9059 = vmatmul.msk.f32.gmra.mxu2 %vm633_vm2, %v9026_v46  ;;  %v9029_v10 = vld [vmem:[%s10817_s23 + $0x180] sm:$0xff] }
 0x326   : >> { %9124 = vmatmul.msk.f32.gmra.mxu3 %vm633_vm2, %v9091_v49  ;;  %9189 = vmatmul.msk.f32.gmra.mxu0 %vm633_vm2, %v9156_v17 }
 0x327   : >> { %v2994_v21 = vadd.f32 %v11710_v29, %v2958_v8 }
 0x328   : >> { %v2329_v31 = vpop.f32.mrf.mxu2 }
 0x329   : >> { %v3026_v41 = vmax.f32 %v2994_v21, 0.0  ;;  %v2409_v54 = vadd.f32 %v2329_v31, %v2131_v3  ;;  %v2604_v30 = vpop.f32.mrf.mxu3  ;;  %v9094_v3 = vld [vmem:[%s10817_s23 + $0x181] sm:$0xff] }
 0x32a   : >> { %v2054_v62 = vpop.f32.mrf.mxu1  ;;  %v9159_v31 = vld [vmem:[%s10817_s23 + $0x182] sm:$0xff] }
 0x32b   : >> { %3058 = vst.msk [vmem:[#allocation4 + $0x38] sm:$0xff] %vm279_vm0, %v3026_v41  ;;  %v2684_v47 = vadd.f32 %v2604_v30, %v2409_v54  ;;  %v2882_v2 = vpop.f32.mrf.mxu0  ;;  %v2132_v58 = vadd.f32 %v2054_v62, %v14438_v1  ;;  %v14440_v54 = vld [vmem:[#allocation41_spill] sm:$0xff] }
 0x32d   : >> { %v2959_v9 = vadd.f32 %v2879_v23, %v2684_v47  ;;  %8993 = vmatmul.msk.f32.gmra.mxu1 %vm633_vm2, %v11713_v7  ;;  %9060 = vmatmul.msk.f32.gmra.mxu2 %vm633_vm2, %v9027_v34  ;;  %v9028_v7 = vld [vmem:[%s10817_s23 + $0x178] sm:$0xff] }
 0x32e   : >> { %9125 = vmatmul.msk.f32.gmra.mxu3 %vm633_vm2, %v9092_v38  ;;  %9190 = vmatmul.msk.f32.gmra.mxu0 %vm633_vm2, %v9157_v61 }
 0x32f   : >> { %v2995_v37 = vadd.f32 %v11710_v29, %v2959_v9 }
 0x330   : >> { %v2332_v16 = vpop.f32.mrf.mxu2 }
 0x331   : >> { %v3027_v27 = vmax.f32 %v2995_v37, 0.0  ;;  %v2410_v43 = vadd.f32 %v2332_v16, %v2132_v58  ;;  %v2607_v35 = vpop.f32.mrf.mxu3  ;;  %v9095_v16 = vld [vmem:[%s10817_s23 + $0x189] sm:$0xff] }
 0x332   : >> { %v3089_v44 = vld [vmem:[#allocation4 + $0x30] ss:$2 sm:$0xff]  ;;  %v3121_v19 = vld [vmem:[#allocation4 + $0x31] ss:$2 sm:$0xff]  ;;  %v2057_v52 = vpop.f32.mrf.mxu1 }
 0x333   : >> { %v3149_v5 = vmax.f32 %v3089_v44, %v3121_v19  ;;  %3059 = vst.msk [vmem:[#allocation4 + $0x40] sm:$0xff] %vm279_vm0, %v3027_v27  ;;  %v2685_v24 = vadd.f32 %v2607_v35, %v2410_v43  ;;  %v2885_v50 = vpop.f32.mrf.mxu0  ;;  %v2133_v46 = vadd.f32 %v2057_v52, %v14439_v63  ;;  %v9160_v43 = vld [vmem:[%s10817_s23 + $0x18a] sm:$0xff]  ;;  %v14441_v44 = vld [vmem:[#allocation44_spill] sm:$0xff] }
 0x335   : >> { %3165 = vst.msk [vmem:[#allocation5 + $0x18] sm:$0xff] %vm279_vm0, %v3149_v5  ;;  %v2960_v39 = vadd.f32 %v2882_v2, %v2685_v24  ;;  %8994 = vmatmul.msk.f32.gmra.mxu1 %vm633_vm2, %v11727_v13  ;;  %9061 = vmatmul.msk.f32.gmra.mxu2 %vm633_vm2, %v9028_v7 }
 0x336   : >> { %9126 = vmatmul.msk.f32.gmra.mxu3 %vm633_vm2, %v9093_v56  ;;  %9191 = vmatmul.msk.f32.gmra.mxu0 %vm633_vm2, %v9158_v36  ;;  %v9031_v36 = vld [vmem:[%s10817_s23 + $0x190] sm:$0xff] }
 0x337   : >> { %v2996_v48 = vadd.f32 %v11710_v29, %v2960_v39  ;;  %v9096_v39 = vld [vmem:[%s10817_s23 + $0x191] sm:$0xff] }
 0x338   : >> { %v2335_v45 = vpop.f32.mrf.mxu2 }
 0x339   : >> { %v3028_v49 = vmax.f32 %v2996_v48, 0.0  ;;  %v2411_v23 = vadd.f32 %v2335_v45, %v2133_v46  ;;  %v2610_v17 = vpop.f32.mrf.mxu3  ;;  %v9161_v46 = vld [vmem:[%s10817_s23 + $0x192] sm:$0xff]  ;;  %v3178_v48 = vld [vmem:[#allocation5] sm:$0xff] }
 0x33a   : >> { %v2060_v8 = vpop.f32.mrf.mxu1 }
 0x33b   : >> { %3060 = vst.msk [vmem:[#allocation4 + $0x48] sm:$0xff] %vm279_vm0, %v3028_v49  ;;  %v2686_v13 = vadd.f32 %v2610_v17, %v2411_v23  ;;  %v2888_v21 = vpop.f32.mrf.mxu0  ;;  %v2134_v30 = vadd.f32 %v2060_v8, %v14440_v54  ;;  %v14442_v17 = vld [vmem:[#allocation46_spill] sm:$0xff] }
 0x33d   : >> { %v2961_v41 = vadd.f32 %v2885_v50, %v2686_v13  ;;  %8995 = vmatmul.msk.f32.gmra.mxu1 %vm633_vm2, %v11741_v0  ;;  %9062 = vmatmul.msk.f32.gmra.mxu2 %vm633_vm2, %v9029_v10  ;;  %v9030_v0 = vld [vmem:[%s10817_s23 + $0x188] sm:$0xff] }
 0x33e   : >> { %9127 = vmatmul.msk.f32.gmra.mxu3 %vm633_vm2, %v9094_v3  ;;  %9192 = vmatmul.msk.f32.gmra.mxu0 %vm633_vm2, %v9159_v31 }
 0x33f   : >> { %v2997_v62 = vadd.f32 %v11710_v29, %v2961_v41 }
 0x340   : >> { %v2338_v34 = vpop.f32.mrf.mxu2 }
 0x341   : >> { %v3029_v47 = vmax.f32 %v2997_v62, 0.0  ;;  %v2412_v38 = vadd.f32 %v2338_v34, %v2134_v30  ;;  %v2613_v2 = vpop.f32.mrf.mxu3  ;;  %v9032_v30 = vld [vmem:[%s10817_s23 + $0x198] sm:$0xff] }
 0x342   : >> { %v3091_v61 = vld [vmem:[#allocation4 + $0x40] ss:$2 sm:$0xff]  ;;  %v3123_v9 = vld [vmem:[#allocation4 + $0x41] ss:$2 sm:$0xff]  ;;  %v2063_v1 = vpop.f32.mrf.mxu1 }
 0x343   : >> { %v3150_v58 = vmax.f32 %v3091_v61, %v3123_v9  ;;  %3061 = vst.msk [vmem:[#allocation4 + $0x50] sm:$0xff] %vm279_vm0, %v3029_v47  ;;  %v2687_v37 = vadd.f32 %v2613_v2, %v2412_v38  ;;  %v2891_v27 = vpop.f32.mrf.mxu0  ;;  %v2135_v19 = vadd.f32 %v2063_v1, %v14441_v44  ;;  %v9097_v47 = vld [vmem:[%s10817_s23 + $0x199] sm:$0xff] }
 0x344   : >> { %v9162_v2 = vld [vmem:[%s10817_s23 + $0x19a] sm:$0xff] }
 0x345   : >> { %3166 = vst.msk [vmem:[#allocation5 + $0x20] sm:$0xff] %vm279_vm0, %v3150_v58  ;;  %v2962_v35 = vadd.f32 %v2888_v21, %v2687_v37  ;;  %8996 = vmatmul.msk.f32.gmra.mxu1 %vm633_vm2, %v11755_v57  ;;  %9063 = vmatmul.msk.f32.gmra.mxu2 %vm633_vm2, %v9030_v0 }
 0x346   : >> { %9128 = vmatmul.msk.f32.gmra.mxu3 %vm633_vm2, %v9095_v16  ;;  %9193 = vmatmul.msk.f32.gmra.mxu0 %vm633_vm2, %v9160_v43  ;;  %v9033_v43 = vld [vmem:[%s10817_s23 + $0x1a0] sm:$0xff] }
 0x347   : >> { %v2998_v52 = vadd.f32 %v11710_v29, %v2962_v35  ;;  %v9098_v35 = vld [vmem:[%s10817_s23 + $0x1a1] sm:$0xff] }
 0x348   : >> { %v2341_v7 = vpop.f32.mrf.mxu2 }
 0x349   : >> { %v3030_v5 = vmax.f32 %v2998_v52, 0.0  ;;  %v2413_v24 = vadd.f32 %v2341_v7, %v2135_v19  ;;  %v2616_v56 = vpop.f32.mrf.mxu3  ;;  %v9163_v19 = vld [vmem:[%s10817_s23 + $0x1a2] sm:$0xff] }
 0x34a   : >> { %v2066_v50 = vpop.f32.mrf.mxu1  ;;  %v3179_v52 = vld [vmem:[#allocation5 + $0x8] sm:$0xff] }
 0x34b   : >> { %3062 = vst.msk [vmem:[#allocation4 + $0x58] sm:$0xff] %vm279_vm0, %v3030_v5  ;;  %v2688_v57 = vadd.f32 %v2616_v56, %v2413_v24  ;;  %v2894_v63 = vpop.f32.mrf.mxu0  ;;  %v2136_v8 = vadd.f32 %v2066_v50, %v14442_v17 }
 0x34c   : >> { %v3187_v45 = vld [vmem:[#allocation5 + $0x20] sm:$0xff] }
 0x34d   : >> { %v3195_v49 = vmax.f32 %v3178_v48, %v3187_v45  ;;  %v2963_v23 = vadd.f32 %v2891_v27, %v2688_v57  ;;  %8997 = vmatmul.msk.f32.gmra.mxu1 %vm633_vm2, %v11770_v20  ;;  %9064 = vmatmul.msk.f32.gmra.mxu2 %vm633_vm2, %v9031_v36 }
 0x34e   : >> { %9129 = vmatmul.msk.f32.gmra.mxu3 %vm633_vm2, %v9096_v39  ;;  %9194 = vmatmul.msk.f32.gmra.mxu0 %vm633_vm2, %v9161_v46 }
 0x34f   : >> { %9199 = vst.msk [vmem:[%s11879_s16 + $0x38] sm:$0xff] %vm279_vm0, %v3195_v49  ;;  %v2999_v10 = vadd.f32 %v11710_v29, %v2963_v23 }
 0x350   : >> { %v2344_v13 = vpop.f32.mrf.mxu2 }
 0x351   : >> { %v3031_v3 = vmax.f32 %v2999_v10, 0.0  ;;  %v2414_v20 = vadd.f32 %v2344_v13, %v2136_v8  ;;  %v2619_v21 = vpop.f32.mrf.mxu3 }
 0x352   : >> { %v3093_v31 = vld [vmem:[#allocation4 + $0x50] ss:$2 sm:$0xff]  ;;  %v3125_v41 = vld [vmem:[#allocation4 + $0x51] ss:$2 sm:$0xff]  ;;  %v2069_v54 = vpop.f32.mrf.mxu1 }
 0x353   : >> { %v3151_v62 = vmax.f32 %v3093_v31, %v3125_v41  ;;  %3063 = vst.msk [vmem:[#allocation4 + $0x60] sm:$0xff] %vm279_vm0, %v3031_v3  ;;  %v2689_v34 = vadd.f32 %v2619_v21, %v2414_v20  ;;  %v2897_v38 = vpop.f32.mrf.mxu0  ;;  %v2137_v9 = vadd.f32 %v2069_v54, %v11506_v51  ;;  %v3180_v41 = vld [vmem:[#allocation5 + $0x10] sm:$0xff] }
 0x355   : >> { %3167 = vst.msk [vmem:[#allocation5 + $0x28] sm:$0xff] %vm279_vm0, %v3151_v62  ;;  %v2964_v61 = vadd.f32 %v2894_v63, %v2689_v34  ;;  %8998 = vmatmul.msk.f32.gmra.mxu1 %vm633_vm2, %v11784_v12  ;;  %9065 = vmatmul.msk.f32.gmra.mxu2 %vm633_vm2, %v9032_v30 }
 0x356   : >> { %9130 = vmatmul.msk.f32.gmra.mxu3 %vm633_vm2, %v9097_v47  ;;  %9195 = vmatmul.msk.f32.gmra.mxu0 %vm633_vm2, %v9162_v2 }
 0x357   : >> { %v3000_v1 = vadd.f32 %v11710_v29, %v2964_v61 }
 0x358   : >> { %v2347_v0 = vpop.f32.mrf.mxu2 }
 0x359   : >> { %v3032_v58 = vmax.f32 %v3000_v1, 0.0  ;;  %v2415_v37 = vadd.f32 %v2347_v0, %v2137_v9  ;;  %v2622_v16 = vpop.f32.mrf.mxu3 }
 0x35a   : >> { %v2072_v27 = vpop.f32.mrf.mxu1 }
 0x35b   : >> { %3064 = vst.msk [vmem:[#allocation4 + $0x68] sm:$0xff] %vm279_vm0, %v3032_v58  ;;  %v2690_v12 = vadd.f32 %v2622_v16, %v2415_v37  ;;  %v2900_v44 = vpop.f32.mrf.mxu0  ;;  %v2138_v51 = vadd.f32 %v2072_v27, %v11517_v40 }
 0x35c   : >> { %v3188_v7 = vld [vmem:[#allocation5 + $0x28] sm:$0xff] }
 0x35d   : >> { %v3196_v5 = vmax.f32 %v3179_v52, %v3188_v7  ;;  %v2965_v24 = vadd.f32 %v2897_v38, %v2690_v12  ;;  %8999 = vmatmul.msk.f32.gmra.mxu1 %vm633_vm2, %v11799_v55  ;;  %9066 = vmatmul.msk.f32.gmra.mxu2 %vm633_vm2, %v9033_v43 }
 0x35e   : >> { %9131 = vmatmul.msk.f32.gmra.mxu3 %vm633_vm2, %v9098_v35  ;;  %9196 = vmatmul.msk.f32.gmra.mxu0 %vm633_vm2, %v9163_v19 }
 0x35f   : >> { %9200 = vst.msk [vmem:[%s11879_s16 + $0x40] sm:$0xff] %vm279_vm0, %v3196_v5  ;;  %v3001_v56 = vadd.f32 %v11710_v29, %v2965_v24  ;;  %v3181_v24 = vld [vmem:[#allocation5 + $0x18] sm:$0xff] }
 0x360   : >> { %v2350_v50 = vpop.f32.mrf.mxu2 }
 0x361   : >> { %v3033_v36 = vmax.f32 %v3001_v56, 0.0  ;;  %v2416_v57 = vadd.f32 %v2350_v50, %v2138_v51  ;;  %v2625_v39 = vpop.f32.mrf.mxu3 }
 0x362   : >> { %v3095_v63 = vld [vmem:[#allocation4 + $0x60] ss:$2 sm:$0xff]  ;;  %v3127_v46 = vld [vmem:[#allocation4 + $0x61] ss:$2 sm:$0xff]  ;;  %v2075_v48 = vpop.f32.mrf.mxu1 }
 0x363   : >> { %v3152_v55 = vmax.f32 %v3095_v63, %v3127_v46  ;;  %3065 = vst.msk [vmem:[#allocation4 + $0x70] sm:$0xff] %vm279_vm0, %v3033_v36  ;;  %v2691_v45 = vadd.f32 %v2625_v39, %v2416_v57  ;;  %v2903_v49 = vpop.f32.mrf.mxu0  ;;  %v2139_v40 = vadd.f32 %v2075_v48, %v11528_v60 }
 0x365   : >> { %3168 = vst.msk [vmem:[#allocation5 + $0x30] sm:$0xff] %vm279_vm0, %v3152_v55  ;;  %v2966_v23 = vadd.f32 %v2900_v44, %v2691_v45 }
 0x367   : >> { %v3002_v17 = vadd.f32 %v11710_v29, %v2966_v23 }
 0x368   : >> { %v2353_v8 = vpop.f32.mrf.mxu2 }
 0x369   : >> { %v3034_v10 = vmax.f32 %v3002_v17, 0.0  ;;  %v2417_v13 = vadd.f32 %v2353_v8, %v2139_v40  ;;  %v2628_v3 = vpop.f32.mrf.mxu3 }
 0x36a   : >> { %v2078_v20 = vpop.f32.mrf.mxu1 }
 0x36b   : >> { %3066 = vst.msk [vmem:[#allocation4 + $0x78] sm:$0xff] %vm279_vm0, %v3034_v10  ;;  %v2692_v21 = vadd.f32 %v2628_v3, %v2417_v13  ;;  %v2906_v31 = vpop.f32.mrf.mxu0  ;;  %v2140_v34 = vadd.f32 %v2078_v20, %v11539_v32 }
 0x36c   : >> { %v3189_v54 = vld [vmem:[#allocation5 + $0x30] sm:$0xff] }
 0x36d   : >> { %v3197_v30 = vmax.f32 %v3180_v41, %v3189_v54  ;;  %v2967_v62 = vadd.f32 %v2903_v49, %v2692_v21 }
 0x36f   : >> { %9201 = vst.msk [vmem:[%s11879_s16 + $0x48] sm:$0xff] %vm279_vm0, %v3197_v30  ;;  %v3003_v60 = vadd.f32 %v11710_v29, %v2967_v62 }
 0x370   : >> { %v2356_v47 = vpop.f32.mrf.mxu2 }
 0x371   : >> { %v3035_v38 = vmax.f32 %v3003_v60, 0.0  ;;  %v2418_v2 = vadd.f32 %v2356_v47, %v2140_v34  ;;  %v2631_v61 = vpop.f32.mrf.mxu3 }
 0x372   : >> { %v3097_v9 = vld [vmem:[#allocation4 + $0x70] ss:$2 sm:$0xff]  ;;  %v3129_v1 = vld [vmem:[#allocation4 + $0x71] ss:$2 sm:$0xff]  ;;  %v2081_v0 = vpop.f32.mrf.mxu1 }
 0x373   : >> { %v3153_v58 = vmax.f32 %v3097_v9, %v3129_v1  ;;  %3067 = vst.msk [vmem:[#allocation4 + $0x80] sm:$0xff] %vm279_vm0, %v3035_v38  ;;  %v2693_v37 = vadd.f32 %v2631_v61, %v2418_v2  ;;  %v2909_v16 = vpop.f32.mrf.mxu0  ;;  %v2141_v32 = vadd.f32 %v2081_v0, %v11551_v25 }
 0x375   : >> { %3169 = vst.msk [vmem:[#allocation5 + $0x38] sm:$0xff] %vm279_vm0, %v3153_v58  ;;  %v2968_v27 = vadd.f32 %v2906_v31, %v2693_v37 }
 0x377   : >> { %v3004_v43 = vadd.f32 %v11710_v29, %v2968_v27 }
 0x378   : >> { %v2359_v12 = vpop.f32.mrf.mxu2 }
 0x379   : >> { %v3036_v35 = vmax.f32 %v3004_v43, 0.0  ;;  %v2419_v44 = vadd.f32 %v2359_v12, %v2141_v32  ;;  %v2634_v19 = vpop.f32.mrf.mxu3 }
 0x37a   : >> { %v2084_v52 = vpop.f32.mrf.mxu1 }
 0x37b   : >> { %3068 = vst.msk [vmem:[#allocation4 + $0x88] sm:$0xff] %vm279_vm0, %v3036_v35  ;;  %v2694_v7 = vadd.f32 %v2634_v19, %v2419_v44  ;;  %v2912_v5 = vpop.f32.mrf.mxu0  ;;  %v2142_v36 = vadd.f32 %v2084_v52, %v11562_v42 }
 0x37c   : >> { %v3190_v51 = vld [vmem:[#allocation5 + $0x38] sm:$0xff] }
 0x37d   : >> { %v3198_v56 = vmax.f32 %v3181_v24, %v3190_v51  ;;  %v2969_v50 = vadd.f32 %v2909_v16, %v2694_v7 }
 0x37f   : >> { %9202 = vst.msk [vmem:[%s11879_s16 + $0x50] sm:$0xff] %vm279_vm0, %v3198_v56  ;;  %v3005_v25 = vadd.f32 %v11710_v29, %v2969_v50 }
 0x380   : >> { %v2362_v57 = vpop.f32.mrf.mxu2 }
 0x381   : >> { %v3037_v39 = vmax.f32 %v3005_v25, 0.0  ;;  %v2420_v63 = vadd.f32 %v2362_v57, %v2142_v36  ;;  %v2637_v46 = vpop.f32.mrf.mxu3 }
 0x382   : >> { %v3099_v48 = vld [vmem:[#allocation4 + $0x80] ss:$2 sm:$0xff]  ;;  %v3131_v55 = vld [vmem:[#allocation4 + $0x81] ss:$2 sm:$0xff]  ;;  %v2087_v45 = vpop.f32.mrf.mxu1 }
 0x383   : >> { %v3154_v49 = vmax.f32 %v3099_v48, %v3131_v55  ;;  %3069 = vst.msk [vmem:[#allocation4 + $0x90] sm:$0xff] %vm279_vm0, %v3037_v39  ;;  %v2695_v23 = vadd.f32 %v2637_v46, %v2420_v63  ;;  %v2915_v40 = vpop.f32.mrf.mxu0  ;;  %v2143_v8 = vadd.f32 %v2087_v45, %v11573_v18 }
 0x385   : >> { %3170 = vst.msk [vmem:[#allocation5 + $0x40] sm:$0xff] %vm279_vm0, %v3154_v49  ;;  %v2970_v17 = vadd.f32 %v2912_v5, %v2695_v23 }
 0x387   : >> { %v3006_v42 = vadd.f32 %v11710_v29, %v2970_v17 }
 0x388   : >> { %v2365_v10 = vpop.f32.mrf.mxu2 }
 0x389   : >> { %v3038_v13 = vmax.f32 %v3006_v42, 0.0  ;;  %v2421_v3 = vadd.f32 %v2365_v10, %v2143_v8  ;;  %v2640_v20 = vpop.f32.mrf.mxu3 }
 0x38a   : >> { %v2090_v21 = vpop.f32.mrf.mxu1 }
 0x38b   : >> { %3070 = vst.msk [vmem:[#allocation4 + $0x98] sm:$0xff] %vm279_vm0, %v3038_v13  ;;  %v2696_v31 = vadd.f32 %v2640_v20, %v2421_v3  ;;  %v2918_v41 = vpop.f32.mrf.mxu0  ;;  %v2144_v30 = vadd.f32 %v2090_v21, %v11584_v26 }
 0x38d   : >> { %v2971_v54 = vadd.f32 %v2915_v40, %v2696_v31 }
 0x38f   : >> { %v3007_v62 = vadd.f32 %v11710_v29, %v2971_v54 }
 0x390   : >> { %v2368_v34 = vpop.f32.mrf.mxu2 }
 0x391   : >> { %v3039_v60 = vmax.f32 %v3007_v62, 0.0  ;;  %v2422_v47 = vadd.f32 %v2368_v34, %v2144_v30  ;;  %v2643_v18 = vpop.f32.mrf.mxu3 }
 0x392   : >> { %v3101_v38 = vld [vmem:[#allocation4 + $0x90] ss:$2 sm:$0xff]  ;;  %v3133_v2 = vld [vmem:[#allocation4 + $0x91] ss:$2 sm:$0xff]  ;;  %v2093_v61 = vpop.f32.mrf.mxu1 }
 0x393   : >> { %v3155_v9 = vmax.f32 %v3101_v38, %v3133_v2  ;;  %3071 = vst.msk [vmem:[#allocation4 + $0xa0] sm:$0xff] %vm279_vm0, %v3039_v60  ;;  %v2697_v1 = vadd.f32 %v2643_v18, %v2422_v47  ;;  %v2921_v0 = vpop.f32.mrf.mxu0  ;;  %v2145_v37 = vadd.f32 %v2093_v61, %v11595_v6 }
 0x395   : >> { %3171 = vst.msk [vmem:[#allocation5 + $0x48] sm:$0xff] %vm279_vm0, %v3155_v9  ;;  %v2972_v58 = vadd.f32 %v2918_v41, %v2697_v1 }
 0x397   : >> { %v3008_v26 = vadd.f32 %v11710_v29, %v2972_v58 }
 0x398   : >> { %v2371_v16 = vpop.f32.mrf.mxu2 }
 0x399   : >> { %v3040_v27 = vmax.f32 %v3008_v26, 0.0  ;;  %v2423_v32 = vadd.f32 %v2371_v16, %v2145_v37  ;;  %v2646_v43 = vpop.f32.mrf.mxu3 }
 0x39a   : >> { %v2096_v12 = vpop.f32.mrf.mxu1 }
 0x39b   : >> { %3072 = vst.msk [vmem:[#allocation4 + $0xa8] sm:$0xff] %vm279_vm0, %v3040_v27  ;;  %v2698_v35 = vadd.f32 %v2646_v43, %v2423_v32  ;;  %v2924_v44 = vpop.f32.mrf.mxu0  ;;  %v2146_v52 = vadd.f32 %v2096_v12, %v11606_v14 }
 0x39d   : >> { %v2973_v19 = vadd.f32 %v2921_v0, %v2698_v35 }
 0x39f   : >> { %v3009_v7 = vadd.f32 %v11710_v29, %v2973_v19 }
 0x3a0   : >> { %v2374_v5 = vpop.f32.mrf.mxu2 }
 0x3a1   : >> { %v3041_v24 = vmax.f32 %v3009_v7, 0.0  ;;  %v2424_v51 = vadd.f32 %v2374_v5, %v2146_v52  ;;  %v2649_v6 = vpop.f32.mrf.mxu3 }
 0x3a2   : >> { %v3103_v56 = vld [vmem:[#allocation4 + $0xa0] ss:$2 sm:$0xff]  ;;  %v3135_v50 = vld [vmem:[#allocation4 + $0xa1] ss:$2 sm:$0xff]  ;;  %v2099_v36 = vpop.f32.mrf.mxu1 }
 0x3a3   : >> { %v3156_v25 = vmax.f32 %v3103_v56, %v3135_v50  ;;  %3073 = vst.msk [vmem:[#allocation4 + $0xb0] sm:$0xff] %vm279_vm0, %v3041_v24  ;;  %v2699_v57 = vadd.f32 %v2649_v6, %v2424_v51  ;;  %v2927_v39 = vpop.f32.mrf.mxu0  ;;  %v2147_v46 = vadd.f32 %v2099_v36, %v11617_v15  ;;  %v3182_v36 = vld [vmem:[#allocation5 + $0x40] sm:$0xff] }
 0x3a5   : >> { %3172 = vst.msk [vmem:[#allocation5 + $0x50] sm:$0xff] %vm279_vm0, %v3156_v25  ;;  %v2974_v63 = vadd.f32 %v2924_v44, %v2699_v57 }
 0x3a7   : >> { %v3010_v14 = vadd.f32 %v11710_v29, %v2974_v63 }
 0x3a8   : >> { %v2377_v48 = vpop.f32.mrf.mxu2 }
 0x3a9   : >> { %v3042_v55 = vmax.f32 %v3010_v14, 0.0  ;;  %v2425_v45 = vadd.f32 %v2377_v48, %v2147_v46  ;;  %v2652_v49 = vpop.f32.mrf.mxu3 }
 0x3aa   : >> { %v2102_v23 = vpop.f32.mrf.mxu1 }
 0x3ab   : >> { %3074 = vst.msk [vmem:[#allocation4 + $0xb8] sm:$0xff] %vm279_vm0, %v3042_v55  ;;  %v2700_v40 = vadd.f32 %v2652_v49, %v2425_v45  ;;  %v2930_v17 = vpop.f32.mrf.mxu0  ;;  %v2148_v42 = vadd.f32 %v2102_v23, %v11628_v4 }
 0x3ad   : >> { %v2975_v8 = vadd.f32 %v2927_v39, %v2700_v40 }
 0x3af   : >> { %v3011_v10 = vadd.f32 %v11710_v29, %v2975_v8 }
 0x3b0   : >> { %v2380_v13 = vpop.f32.mrf.mxu2 }
 0x3b1   : >> { %v3043_v3 = vmax.f32 %v3011_v10, 0.0  ;;  %v2426_v20 = vadd.f32 %v2380_v13, %v2148_v42  ;;  %v2655_v15 = vpop.f32.mrf.mxu3 }
 0x3b2   : >> { %v3105_v21 = vld [vmem:[#allocation4 + $0xb0] ss:$2 sm:$0xff]  ;;  %v3137_v31 = vld [vmem:[#allocation4 + $0xb1] ss:$2 sm:$0xff]  ;;  %v2105_v41 = vpop.f32.mrf.mxu1 }
 0x3b3   : >> { %v3157_v54 = vmax.f32 %v3105_v21, %v3137_v31  ;;  %3075 = vst.msk [vmem:[#allocation4 + $0xc0] sm:$0xff] %vm279_vm0, %v3043_v3  ;;  %v2701_v30 = vadd.f32 %v2655_v15, %v2426_v20  ;;  %v2933_v62 = vpop.f32.mrf.mxu0  ;;  %v2149_v60 = vadd.f32 %v2105_v41, %v11639_v11  ;;  %v3183_v41 = vld [vmem:[#allocation5 + $0x48] sm:$0xff] }
 0x3b5   : >> { %3173 = vst.msk [vmem:[#allocation5 + $0x58] sm:$0xff] %vm279_vm0, %v3157_v54  ;;  %v2976_v34 = vadd.f32 %v2930_v17, %v2701_v30 }
 0x3b7   : >> { %v3012_v4 = vadd.f32 %v11710_v29, %v2976_v34 }
 0x3b8   : >> { %v2383_v47 = vpop.f32.mrf.mxu2 }
 0x3b9   : >> { %v3044_v18 = vmax.f32 %v3012_v4, 0.0  ;;  %v2427_v38 = vadd.f32 %v2383_v47, %v2149_v60  ;;  %v2658_v2 = vpop.f32.mrf.mxu3 }
 0x3ba   : >> { %v2108_v61 = vpop.f32.mrf.mxu1 }
 0x3bb   : >> { %3076 = vst.msk [vmem:[#allocation4 + $0xc8] sm:$0xff] %vm279_vm0, %v3044_v18  ;;  %v2702_v9 = vadd.f32 %v2658_v2, %v2427_v38  ;;  %v2936_v1 = vpop.f32.mrf.mxu0  ;;  %v2150_v58 = vadd.f32 %v2108_v61, %v11650_v22 }
 0x3bd   : >> { %v2977_v0 = vadd.f32 %v2933_v62, %v2702_v9 }
 0x3bf   : >> { %v3013_v37 = vadd.f32 %v11710_v29, %v2977_v0 }
 0x3c0   : >> { %v2386_v26 = vpop.f32.mrf.mxu2 }
 0x3c1   : >> { %v3045_v16 = vmax.f32 %v3013_v37, 0.0  ;;  %v2428_v27 = vadd.f32 %v2386_v26, %v2150_v58  ;;  %v2661_v11 = vpop.f32.mrf.mxu3  ;;  %v3184_v26 = vld [vmem:[#allocation5 + $0x50] sm:$0xff] }
 0x3c2   : >> { %v3107_v32 = vld [vmem:[#allocation4 + $0xc0] ss:$2 sm:$0xff]  ;;  %v3139_v43 = vld [vmem:[#allocation4 + $0xc1] ss:$2 sm:$0xff]  ;;  %v2111_v12 = vpop.f32.mrf.mxu1 }
 0x3c3   : >> { %v3158_v35 = vmax.f32 %v3107_v32, %v3139_v43  ;;  %3077 = vst.msk [vmem:[#allocation4 + $0xd0] sm:$0xff] %vm279_vm0, %v3045_v16  ;;  %v2703_v44 = vadd.f32 %v2661_v11, %v2428_v27  ;;  %v2939_v19 = vpop.f32.mrf.mxu0  ;;  %v2151_v22 = vadd.f32 %v2111_v12, %v11661_v28  ;;  %v3185_v12 = vld [vmem:[#allocation5 + $0x58] sm:$0xff] }
 0x3c5   : >> { %3174 = vst.msk [vmem:[#allocation5 + $0x60] sm:$0xff] %vm279_vm0, %v3158_v35  ;;  %v2978_v52 = vadd.f32 %v2936_v1, %v2703_v44 }
 0x3c7   : >> { %v3014_v7 = vadd.f32 %v11710_v29, %v2978_v52 }
 0x3c8   : >> { %v2389_v5 = vpop.f32.mrf.mxu2 }
 0x3c9   : >> { %v3046_v24 = vmax.f32 %v3014_v7, 0.0  ;;  %v2429_v51 = vadd.f32 %v2389_v5, %v2151_v22  ;;  %v2664_v6 = vpop.f32.mrf.mxu3 }
 0x3ca   : >> { %v2114_v56 = vpop.f32.mrf.mxu1 }
 0x3cb   : >> { %3078 = vst.msk [vmem:[#allocation4 + $0xd8] sm:$0xff] %vm279_vm0, %v3046_v24  ;;  %v2704_v50 = vadd.f32 %v2664_v6, %v2429_v51  ;;  %v2942_v63 = vpop.f32.mrf.mxu0  ;;  %v2152_v46 = vadd.f32 %v2114_v56, %v11672_v33 }
 0x3cc   : >> { %v3191_v25 = vld [vmem:[#allocation5 + $0x60] sm:$0xff] }
 0x3cd   : >> { %v3199_v57 = vmax.f32 %v3182_v36, %v3191_v25  ;;  %v2979_v39 = vadd.f32 %v2939_v19, %v2704_v50 }
 0x3cf   : >> { %9203 = vst.msk [vmem:[%s11879_s16 + $0x68] sm:$0xff] %vm279_vm0, %v3199_v57  ;;  %v3015_v28 = vadd.f32 %v11710_v29, %v2979_v39 }
 0x3d0   : >> { %v2392_v14 = vpop.f32.mrf.mxu2 }
 0x3d1   : >> { %v3047_v48 = vmax.f32 %v3015_v28, 0.0  ;;  %v2430_v55 = vadd.f32 %v2392_v14, %v2152_v46  ;;  %v2667_v45 = vpop.f32.mrf.mxu3 }
 0x3d2   : >> { %v3109_v49 = vld [vmem:[#allocation4 + $0xd0] ss:$2 sm:$0xff]  ;;  %v3141_v23 = vld [vmem:[#allocation4 + $0xd1] ss:$2 sm:$0xff]  ;;  %v2117_v40 = vpop.f32.mrf.mxu1 }
 0x3d3   : >> { %v3159_v17 = vmax.f32 %v3109_v49, %v3141_v23  ;;  %3079 = vst.msk [vmem:[#allocation4 + $0xe0] sm:$0xff] %vm279_vm0, %v3047_v48  ;;  %v2705_v8 = vadd.f32 %v2667_v45, %v2430_v55  ;;  %v2153_v10 = vadd.f32 %v2117_v40, %v11683_v59  ;;  %v2945_v3 = vpop.f32.mrf.mxu0 }
 0x3d5   : >> { %3175 = vst.msk [vmem:[#allocation5 + $0x68] sm:$0xff] %vm279_vm0, %v3159_v17  ;;  %v2980_v42 = vadd.f32 %v2942_v63, %v2705_v8 }
 0x3d7   : >> { %v3016_v33 = vadd.f32 %v11710_v29, %v2980_v42 }
 0x3d8   : >> { %v2395_v13 = vpop.f32.mrf.mxu2 }
 0x3d9   : >> { %v3048_v20 = vmax.f32 %v3016_v33, 0.0  ;;  %v2431_v15 = vadd.f32 %v2395_v13, %v2153_v10  ;;  %v2670_v21 = vpop.f32.mrf.mxu3 }
 0x3da   : >> { %v2120_v30 = vpop.f32.mrf.mxu1 }
 0x3db   : >> { %3080 = vst.msk [vmem:[#allocation4 + $0xe8] sm:$0xff] %vm279_vm0, %v3048_v20  ;;  %v2706_v31 = vadd.f32 %v2670_v21, %v2431_v15  ;;  %v2154_v60 = vadd.f32 %v2120_v30, %v11696_v53  ;;  %v2948_v9 = vpop.f32.mrf.mxu0  ;;  %v10157_v53 = vld [vmem:[%s14306_s2] ss:$0 sm:$0xff] }
 0x3dc   : >> { %v3192_v54 = vld [vmem:[#allocation5 + $0x68] sm:$0xff] }
 0x3dd   : >> { %v3200_v62 = vmax.f32 %v3183_v41, %v3192_v54  ;;  %v2981_v34 = vadd.f32 %v2945_v3, %v2706_v31 }
 0x3df   : >> { %9204 = vst.msk [vmem:[%s11879_s16 + $0x70] sm:$0xff] %vm279_vm0, %v3200_v62  ;;  %v3017_v59 = vadd.f32 %v11710_v29, %v2981_v34 }
 0x3e0   : >> { %v2398_v4 = vpop.f32.mrf.mxu2 }
 0x3e1   : >> { %v3049_v47 = vmax.f32 %v3017_v59, 0.0  ;;  %v2432_v18 = vadd.f32 %v2398_v4, %v2154_v60  ;;  %v2673_v38 = vpop.f32.mrf.mxu3 }
 0x3e2   : >> { %v3111_v2 = vld [vmem:[#allocation4 + $0xe0] ss:$2 sm:$0xff]  ;;  %v3143_v61 = vld [vmem:[#allocation4 + $0xe1] ss:$2 sm:$0xff] }
 0x3e3   : >> { %v3160_v1 = vmax.f32 %v3111_v2, %v3143_v61  ;;  %3081 = vst.msk [vmem:[#allocation4 + $0xf0] sm:$0xff] %vm279_vm0, %v3049_v47  ;;  %v2707_v0 = vadd.f32 %v2673_v38, %v2432_v18 }
 0x3e5   : >> { %3176 = vst.msk [vmem:[#allocation5 + $0x70] sm:$0xff] %vm279_vm0, %v3160_v1  ;;  %v2982_v58 = vadd.f32 %v2948_v9, %v2707_v0 }
 0x3e7   : >> { %v3018_v29 = vadd.f32 %v10157_v53, %v2982_v58 }
 0x3e9   : >> { %v3050_v37 = vmax.f32 %v3018_v29, 0.0 }
 0x3eb   : >> { %3082 = vst.msk [vmem:[#allocation4 + $0xf8] sm:$0xff] %vm279_vm0, %v3050_v37 }
 0x3ec   : >> { %v3193_v16 = vld [vmem:[#allocation5 + $0x70] sm:$0xff] }
 0x3ed   : >> { %v3201_v27 = vmax.f32 %v3184_v26, %v3193_v16 }
 0x3ef   : >> { %9205 = vst.msk [vmem:[%s11879_s16 + $0x78] sm:$0xff] %vm279_vm0, %v3201_v27 }
 0x3f2   : >> { %v3113_v11 = vld [vmem:[#allocation4 + $0xf0] ss:$2 sm:$0xff]  ;;  %v3145_v32 = vld [vmem:[#allocation4 + $0xf1] ss:$2 sm:$0xff] }
 0x3f3   : >> { %v3161_v43 = vmax.f32 %v3113_v11, %v3145_v32 }
 0x3f5   : >> { %3177 = vst.msk [vmem:[#allocation5 + $0x78] sm:$0xff] %vm279_vm0, %v3161_v43 }
 0x3fb   : > { %561 = sbr.rel (!%p559_p4) target bundleno = 288 (0x120), region = 222 }
 0x3fc   : >> { %v3194_v35 = vld [vmem:[#allocation5 + $0x78] sm:$0xff] }
 0x3fd   : >> { %v3202_v44 = vmax.f32 %v3185_v12, %v3194_v35 }
 0x3ff   : >> { %9206 = vst.msk [vmem:[%s11879_s16 + $0x80] sm:$0xff] %vm279_vm0, %v3202_v44 }
 0x400 LB: >> { %v9212_v19 = vld [vmem:[%s14307_s3 + $0x38] sm:$0xff]  ;;  %v9211_v52 = vld [vmem:[%s14307_s3 + $0x30] sm:$0xff]  ;;  %v9210_v22 = vld [vmem:[%s14307_s3 + $0x28] sm:$0xff]  ;;  %s9208_s25 = smul.u32 384, %s10182_s19  ;;  %s10090_s18 = sshll.u32 %s10182_s19, 7  ;;  %s10182_s19 = sphi %s11988_s19, %s3220_s19  }
 0x401   : >> { %10094 = vmatpush.msra.mxu1 %v9212_v19  ;;  %10095 = vmatpush.msra.mxu2 %v9212_v19  ;;  %v9209_v7 = vld [vmem:[%s14307_s3 + $0x20] sm:$0xff]  ;;  %v9280_v51 = vld [vmem:[%s14307_s3 + $0x58] sm:$0xff]  ;;  %v9279_v25 = vld [vmem:[%s14307_s3 + $0x50] sm:$0xff]  ;;  %s13072_s20 = scalar_lea.vmem [#allocation3], %s10090_s18  ;;  %s3220_s19 = sadd.s32 1, %s10182_s19  }
 0x402   : >> { %10096 = vmatpush.msra.mxu3 %v9212_v19  ;;  %3405 = vmatpush.msra.mxu0 %v9212_v19  ;;  %s12006_s28 = scalar_lea.vmem [#allocation2], %s9208_s25  ;;  %v3259_v56 = vld [vmem:[%s14307_s3 + $0x18] sm:$0xff]  ;;  %v9349_v39 = vld [vmem:[%s14307_s3 + $0x70] sm:$0xff]  ;;  %v9278_v46 = vld [vmem:[%s14307_s3 + $0x48] sm:$0xff]  ;;  %p3217_p5 = scmp.ge.s32.totalorder %s3220_s19, 4  }
 0x403   : >> { %10097 = vmatpush.msra.mxu1 %v9211_v52  ;;  %10098 = vmatpush.msra.mxu2 %v9211_v52  ;;  %v9350_v50 = vld [vmem:[%s14307_s3 + $0x78] sm:$0xff]  ;;  %v3258_v63 = vld [vmem:[%s14307_s3 + $0x10] sm:$0xff]  ;;  %v9348_v14 = vld [vmem:[%s14307_s3 + $0x68] sm:$0xff] }
 0x404   : >> { %10099 = vmatpush.msra.mxu3 %v9211_v52  ;;  %3406 = vmatpush.msra.mxu0 %v9211_v52  ;;  %v9418_v57 = vld [vmem:[%s14307_s3 + $0x98] sm:$0xff]  ;;  %v9417_v28 = vld [vmem:[%s14307_s3 + $0x90] sm:$0xff]  ;;  %v3257_v45 = vld [vmem:[%s14307_s3 + $0x8] sm:$0xff] }
 0x405   : >> { %10100 = vmatpush.msra.mxu1 %v9210_v22  ;;  %10101 = vmatpush.msra.mxu2 %v9210_v22  ;;  %v9416_v40 = vld [vmem:[%s14307_s3 + $0x88] sm:$0xff]  ;;  %v9277_v10 = vld [vmem:[%s14307_s3 + $0x40] sm:$0xff]  ;;  %v9556_v34 = vld [vmem:[%s14307_s3 + $0xd8] sm:$0xff] }
 0x406   : >> { %v12009_v5 = vld [vmem:[%s12006_s28 + $0x68] sm:$0xff]  ;;  %10102 = vmatpush.msra.mxu3 %v9210_v22  ;;  %3407 = vmatpush.msra.mxu0 %v9210_v22  ;;  %v12056_v48 = vld [vmem:[%s12006_s28 + $0x70] sm:$0xff]  ;;  %v12079_v17 = vld [vmem:[%s12006_s28 + $0x78] sm:$0xff] }
 0x407   : >> { %v12012_v24 = vld [vmem:[%s12006_s28 + $0xc8] sm:$0xff]  ;;  %10103 = vmatpush.msra.mxu1 %v9209_v7  ;;  %10104 = vmatpush.msra.mxu2 %v9209_v7  ;;  %v12059_v55 = vld [vmem:[%s12006_s28 + $0xd0] sm:$0xff]  ;;  %v12082_v8 = vld [vmem:[%s12006_s28 + $0xd8] sm:$0xff] }
 0x408   : >> { %v12018_v6 = vld [vmem:[%s12006_s28 + $0x128] sm:$0xff]  ;;  %9221 = vmatmul.msk.f32.vlgmr.msra.gmra.mxu1 %vm279_vm0, %v12009_v5  ;;  %9229 = vmatmul.msk.f32.vlgmr.msra.gmra.mxu2 %vm279_vm0, %v12012_v24  ;;  %v12065_v49 = vld [vmem:[%s12006_s28 + $0x130] sm:$0xff]  ;;  %v12085_v42 = vld [vmem:[%s12006_s28 + $0x138] sm:$0xff] }
 0x409   : >> { %3860 = vmatpush.msrb.mxu2 %v9280_v51  ;;  %10105 = vmatpush.msra.mxu3 %v9209_v7  ;;  %v3260_v36 = vld [vmem:[%s12006_s28 + $0x8] sm:$0xff]  ;;  %v3261_v23 = vld [vmem:[%s12006_s28 + $0x10] sm:$0xff]  ;;  %v3262_v33 = vld [vmem:[%s12006_s28 + $0x18] sm:$0xff] }
 0x40a   : >> { %9237 = vmatmul.msk.f32.vlgmr.msra.gmra.mxu3 %vm279_vm0, %v12018_v6  ;;  %3614 = vmatpush.msrb.mxu1 %v3259_v56  ;;  %v9347_v13 = vld [vmem:[%s14307_s3 + $0x60] sm:$0xff]  ;;  %v12125_v54 = vld [vmem:[%s12006_s28 + $0x98] sm:$0xff]  ;;  %v12171_v9 = vld [vmem:[%s12006_s28 + $0xa8] sm:$0xff] }
 0x40b   : >> { %4141 = vmatpush.msrb.mxu3 %v9350_v50  ;;  %3408 = vmatpush.msra.mxu0 %v9209_v7  ;;  %v3256_v3 = vld [vmem:[%s14307_s3] sm:$0xff]  ;;  %v12128_v30 = vld [vmem:[%s12006_s28 + $0xf8] sm:$0xff]  ;;  %v12174_v1 = vld [vmem:[%s12006_s28 + $0x108] sm:$0xff] }
 0x40c   : >> { %9213 = vmatmul.msk.f32.vlgmr.msra.gmra.mxu0 %vm279_vm0, %v3260_v36  ;;  %3861 = vmatpush.msrb.mxu2 %v9279_v25  ;;  %v12105_v20 = vld [vmem:[%s12006_s28 + $0x80] sm:$0xff]  ;;  %v12131_v62 = vld [vmem:[%s12006_s28 + $0x158] sm:$0xff]  ;;  %v12177_v0 = vld [vmem:[%s12006_s28 + $0x168] sm:$0xff] }
 0x40d   : >> { %4419 = vmatpush.msrb.mxu0 %v9418_v57  ;;  %4142 = vmatpush.msrb.mxu3 %v9349_v39  ;;  %v12108_v15 = vld [vmem:[%s12006_s28 + $0xe0] sm:$0xff]  ;;  %v3264_v60 = vld [vmem:[%s12006_s28 + $0x38] sm:$0xff]  ;;  %v3266_v58 = vld [vmem:[%s12006_s28 + $0x48] sm:$0xff] }
 0x40e   : >> { %3615 = vmatpush.msrb.mxu1 %v3258_v63  ;;  %3862 = vmatpush.msrb.mxu2 %v9278_v46  ;;  %v12111_v21 = vld [vmem:[%s12006_s28 + $0x140] sm:$0xff]  ;;  %v9624_v59 = vld [vmem:[%s14307_s3 + $0xf8] sm:$0xff]  ;;  %v12188_v53 = vld [vmem:[%s12006_s28 + $0xb0] sm:$0xff] }
 0x40f   : >> { %4420 = vmatpush.msrb.mxu0 %v9417_v28  ;;  %4143 = vmatpush.msrb.mxu3 %v9348_v14  ;;  %v3263_v31 = vld [vmem:[%s12006_s28 + $0x20] sm:$0xff]  ;;  %v9486_v4 = vld [vmem:[%s14307_s3 + $0xb8] sm:$0xff]  ;;  %v12191_v29 = vld [vmem:[%s12006_s28 + $0x110] sm:$0xff] }
 0x410   : >> { %9222 = vmatmul.msk.f32.gmra.mxu1 %vm279_vm0, %v12056_v48  ;;  %9230 = vmatmul.msk.f32.gmra.mxu2 %vm279_vm0, %v12059_v55  ;;  %v9415_v41 = vld [vmem:[%s14307_s3 + $0x80] sm:$0xff]  ;;  %v9692_v61 = vld [vmem:[%s14307_s3 + $0x118] sm:$0xff]  ;;  %v12194_v37 = vld [vmem:[%s12006_s28 + $0x170] sm:$0xff] }
 0x411   : >> { %3616 = vmatpush.msrb.mxu1 %v3257_v45  ;;  %4421 = vmatpush.msrb.mxu0 %v9416_v40  ;;  %v12151_v47 = vld [vmem:[%s12006_s28 + $0xa0] sm:$0xff]  ;;  %v3267_v26 = vld [vmem:[%s12006_s28 + $0x50] sm:$0xff] }
 0x412   : >> { %9238 = vmatmul.msk.f32.gmra.mxu3 %vm279_vm0, %v12065_v49  ;;  %3863 = vmatpush.msrb.mxu2 %v9277_v10  ;;  %v12154_v18 = vld [vmem:[%s12006_s28 + $0x100] sm:$0xff]  ;;  %v3715_v27 = vld [vmem:[%s12006_s28 + $0x9] sm:$0xff]  ;;  %v9315_v11 = vld [vmem:[%s12006_s28 + $0x37] sm:$0xff] }
 0x413   : >> { %4144 = vmatpush.msrb.mxu3 %v9347_v13  ;;  %3617 = vmatpush.msrb.mxu1 %v3256_v3  ;;  %v12157_v38 = vld [vmem:[%s12006_s28 + $0x160] sm:$0xff]  ;;  %v3225_v32 = vld [vmem:[%s12006_s28 + $0xf] sm:$0xff]  ;;  %v3226_v35 = vld [vmem:[%s12006_s28 + $0x17] sm:$0xff] }
 0x414   : >> { %9214 = vmatmul.msk.f32.gmra.mxu0 %vm279_vm0, %v3261_v23  ;;  %4978 = vmatpush.msra.mxu2 %v9556_v34  ;;  %v3265_v2 = vld [vmem:[%s12006_s28 + $0x40] sm:$0xff]  ;;  %v3716_v43 = vld [vmem:[%s12006_s28 + $0x11] sm:$0xff]  ;;  %v12299_v45 = vld [vmem:[%s12006_s28 + $0x69] sm:$0xff] }
 0x415   : >> { %4422 = vmatpush.msrb.mxu0 %v9415_v41  ;;  %5256 = vmatpush.msra.mxu3 %v9624_v59  ;;  %v3224_v16 = vld [vmem:[%s12006_s28 + $0x7] sm:$0xff]  ;;  %v9316_v12 = vld [vmem:[%s12006_s28 + $0x3f] sm:$0xff]  ;;  %v9318_v7 = vld [vmem:[%s12006_s28 + $0x4f] sm:$0xff] }
 0x416   : >> { %4697 = vmatpush.msra.mxu1 %v9486_v4  ;;  %v3717_v44 = vld [vmem:[%s12006_s28 + $0x19] sm:$0xff]  ;;  %v9317_v19 = vld [vmem:[%s12006_s28 + $0x47] sm:$0xff]  ;;  %v9555_v50 = vld [vmem:[%s14307_s3 + $0xd0] sm:$0xff] }
 0x417   : >> { %5534 = vmatpush.msra.mxu0 %v9692_v61  ;;  %v3227_v52 = vld [vmem:[%s12006_s28 + $0x1f] sm:$0xff]  ;;  %v12236_v56 = vld [vmem:[%s12006_s28 + $0x67] sm:$0xff]  ;;  %4979 = vmatpush.msra.mxu2 %v9555_v50  ;;  %v9623_v36 = vld [vmem:[%s14307_s3 + $0xf0] sm:$0xff] }
 0x418   : >> { %9223 = vmatmul.msk.f32.gmra.mxu1 %vm279_vm0, %v12079_v17  ;;  %9231 = vmatmul.msk.f32.gmra.mxu2 %vm279_vm0, %v12082_v8  ;;  %v3718_v22 = vld [vmem:[%s12006_s28 + $0x21] sm:$0xff]  ;;  %v12233_v51 = vld [vmem:[%s12006_s28 + $0x39] sm:$0xff]  ;;  %v9485_v25 = vld [vmem:[%s14307_s3 + $0xb0] sm:$0xff] }
 0x419   : >> { %5257 = vmatpush.msra.mxu3 %v9623_v36  ;;  %4698 = vmatpush.msra.mxu1 %v9485_v25  ;;  %v12255_v57 = vld [vmem:[%s12006_s28 + $0x41] sm:$0xff]  ;;  %v12258_v39 = vld [vmem:[%s12006_s28 + $0x6f] sm:$0xff]  ;;  %v12274_v46 = vld [vmem:[%s12006_s28 + $0x77] sm:$0xff] }
 0x41a   : >> { %9239 = vmatmul.msk.f32.gmra.mxu3 %vm279_vm0, %v12085_v42  ;;  %v9691_v63 = vld [vmem:[%s14307_s3 + $0x110] sm:$0xff]  ;;  %v12287_v14 = vld [vmem:[%s12006_s28 + $0x7f] sm:$0xff]  ;;  %v9690_v50 = vld [vmem:[%s14307_s3 + $0x108] sm:$0xff] }
 0x41b   : >> { %5535 = vmatpush.msra.mxu0 %v9691_v63  ;;  %v12284_v28 = vld [vmem:[%s12006_s28 + $0x51] sm:$0xff]  ;;  %v12324_v3 = vld [vmem:[%s12006_s28 + $0x9f] sm:$0xff] }
 0x41c   : >> { %9215 = vmatmul.msk.f32.gmra.mxu0 %vm279_vm0, %v3262_v33  ;;  %v12302_v23 = vld [vmem:[%s12006_s28 + $0x97] sm:$0xff]  ;;  %v12365_v61 = vld [vmem:[%s12006_s28 + $0x81] sm:$0xff] }
 0x41d   : >> { %v12321_v13 = vld [vmem:[%s12006_s28 + $0x71] sm:$0xff]  ;;  %v12343_v34 = vld [vmem:[%s12006_s28 + $0x79] sm:$0xff]  ;;  %5536 = vmatpush.msra.mxu0 %v9690_v50 }
 0x420   : >> { %9224 = vmatmul.msk.f32.gmra.mxu1 %vm279_vm0, %v12105_v20  ;;  %9232 = vmatmul.msk.f32.gmra.mxu2 %vm279_vm0, %v12108_v15 }
 0x422   : >> { %9240 = vmatmul.msk.f32.gmra.mxu3 %vm279_vm0, %v12111_v21 }
 0x424   : >> { %9216 = vmatmul.msk.f32.gmra.mxu0 %vm279_vm0, %v3263_v31 }
 0x428   : >> { %9225 = vmatmul.msk.f32.gmra.mxu1 %vm279_vm0, %v12125_v54  ;;  %9233 = vmatmul.msk.f32.gmra.mxu2 %vm279_vm0, %v12128_v30 }
 0x42a   : >> { %9241 = vmatmul.msk.f32.gmra.mxu3 %vm279_vm0, %v12131_v62 }
 0x42c   : >> { %9217 = vmatmul.msk.f32.gmra.mxu0 %vm279_vm0, %v3264_v60 }
 0x430   : >> { %9226 = vmatmul.msk.f32.gmra.mxu1 %vm279_vm0, %v12151_v47  ;;  %9234 = vmatmul.msk.f32.gmra.mxu2 %vm279_vm0, %v12154_v18 }
 0x432   : >> { %9242 = vmatmul.msk.f32.gmra.mxu3 %vm279_vm0, %v12157_v38 }
 0x434   : >> { %9218 = vmatmul.msk.f32.gmra.mxu0 %vm279_vm0, %v3265_v2 }
 0x438   : >> { %9227 = vmatmul.msk.f32.gmra.mxu1 %vm279_vm0, %v12171_v9  ;;  %9235 = vmatmul.msk.f32.gmra.mxu2 %vm279_vm0, %v12174_v1 }
 0x43a   : >> { %9243 = vmatmul.msk.f32.gmra.mxu3 %vm279_vm0, %v12177_v0 }
 0x43c   : >> { %9219 = vmatmul.msk.f32.gmra.mxu0 %vm279_vm0, %v3266_v58 }
 0x440   : >> { %9228 = vmatmul.msk.f32.gmra.mxu1 %vm279_vm0, %v12188_v53  ;;  %9236 = vmatmul.msk.f32.gmra.mxu2 %vm279_vm0, %v12191_v29 }
 0x442   : >> { %9244 = vmatmul.msk.f32.gmra.mxu3 %vm279_vm0, %v12194_v37 }
 0x444   : >> { %9220 = vmatmul.msk.f32.gmra.mxu0 %vm279_vm0, %v3267_v26 }
 0x448   : >> { %9245 = vmatmul.msk.f32.vlgmr.msrb.gmra.mxu1 %vm279_vm0, %v3224_v16  ;;  %9281 = vmatmul.msk.f32.vlgmr.msrb.gmra.mxu2 %vm279_vm0, %v3715_v27 }
 0x44a   : >> { %9351 = vmatmul.msk.f32.vlgmr.msrb.gmra.mxu3 %vm279_vm0, %v9315_v11 }
 0x44c   : >> { %9419 = vmatmul.msk.f32.vlgmr.msrb.gmra.mxu0 %vm279_vm0, %v3264_v60  ;;  %v12346_v60 = vld [vmem:[%s12006_s28 + $0xa7] sm:$0xff] }
 0x44d   : >> { %14445 = vst [vmem:[#allocation49_spill] sm:$0xff] %v12346_v60 }
 0x450   : >> { %9246 = vmatmul.msk.f32.gmra.mxu1 %vm279_vm0, %v3225_v32  ;;  %9282 = vmatmul.msk.f32.gmra.mxu2 %vm279_vm0, %v3716_v43  ;;  %v12390_v32 = vld [vmem:[%s12006_s28 + $0xc7] sm:$0xff] }
 0x451   : >> { %14449 = vst [vmem:[#allocation53_spill] sm:$0xff] %v12390_v32 }
 0x452   : >> { %9352 = vmatmul.msk.f32.gmra.mxu3 %vm279_vm0, %v9316_v12 }
 0x454   : >> { %9420 = vmatmul.msk.f32.gmra.mxu0 %vm279_vm0, %v3265_v2 }
 0x458   : >> { %9247 = vmatmul.msk.f32.gmra.mxu1 %vm279_vm0, %v3226_v35  ;;  %9283 = vmatmul.msk.f32.gmra.mxu2 %vm279_vm0, %v3717_v44  ;;  %v9484_v44 = vld [vmem:[%s14307_s3 + $0xa8] sm:$0xff] }
 0x459   : >> { %4699 = vmatpush.msra.mxu1 %v9484_v44 }
 0x45a   : >> { %9353 = vmatmul.msk.f32.gmra.mxu3 %vm279_vm0, %v9317_v19 }
 0x45c   : >> { %9421 = vmatmul.msk.f32.gmra.mxu0 %vm279_vm0, %v3266_v58  ;;  %v12368_v58 = vld [vmem:[%s12006_s28 + $0xaf] sm:$0xff] }
 0x45d   : >> { %14447 = vst [vmem:[#allocation51_spill] sm:$0xff] %v12368_v58 }
 0x460   : >> { %9248 = vmatmul.msk.f32.gmra.mxu1 %vm279_vm0, %v3227_v52  ;;  %9284 = vmatmul.msk.f32.gmra.mxu2 %vm279_vm0, %v3718_v22  ;;  %v12418_v22 = vld [vmem:[%s12006_s28 + $0xa1] sm:$0xff] }
 0x461   : >> { %14451 = vst [vmem:[#allocation55_spill] sm:$0xff] %v12418_v22 }
 0x462   : >> { %9354 = vmatmul.msk.f32.gmra.mxu3 %vm279_vm0, %v9318_v7 }
 0x464   : >> { %9422 = vmatmul.msk.f32.gmra.mxu0 %vm279_vm0, %v3267_v26 }
 0x468   : >> { %9249 = vmatmul.msk.f32.gmra.mxu1 %vm279_vm0, %v9315_v11  ;;  %9285 = vmatmul.msk.f32.gmra.mxu2 %vm279_vm0, %v12233_v51  ;;  %v12387_v11 = vld [vmem:[%s12006_s28 + $0x99] sm:$0xff] }
 0x46a   : >> { %9355 = vmatmul.msk.f32.gmra.mxu3 %vm279_vm0, %v12236_v56 }
 0x46c   : >> { %9423 = vmatmul.msk.f32.gmra.mxu0 %vm279_vm0, %v12009_v5  ;;  %v12271_v5 = vld [vmem:[%s12006_s28 + $0x49] sm:$0xff] }
 0x470   : >> { %9250 = vmatmul.msk.f32.gmra.mxu1 %vm279_vm0, %v9316_v12  ;;  %9286 = vmatmul.msk.f32.gmra.mxu2 %vm279_vm0, %v12255_v57  ;;  %v9622_v12 = vld [vmem:[%s14307_s3 + $0xe8] sm:$0xff] }
 0x471   : >> { %5258 = vmatpush.msra.mxu3 %v9622_v12  ;;  %v12446_v12 = vld [vmem:[%s12006_s28 + $0xd7] sm:$0xff] }
 0x472   : >> { %9356 = vmatmul.msk.f32.gmra.mxu3 %vm279_vm0, %v12258_v39 }
 0x474   : >> { %9424 = vmatmul.msk.f32.gmra.mxu0 %vm279_vm0, %v12056_v48 }
 0x478   : >> { %9251 = vmatmul.msk.f32.gmra.mxu1 %vm279_vm0, %v9317_v19  ;;  %9287 = vmatmul.msk.f32.gmra.mxu2 %vm279_vm0, %v12271_v5 }
 0x47a   : >> { %9357 = vmatmul.msk.f32.gmra.mxu3 %vm279_vm0, %v12274_v46 }
 0x47c   : >> { %9425 = vmatmul.msk.f32.gmra.mxu0 %vm279_vm0, %v12079_v17 }
 0x480   : >> { %9252 = vmatmul.msk.f32.gmra.mxu1 %vm279_vm0, %v9318_v7  ;;  %9288 = vmatmul.msk.f32.gmra.mxu2 %vm279_vm0, %v12284_v28  ;;  %v12421_v7 = vld [vmem:[%s12006_s28 + $0xcf] sm:$0xff] }
 0x482   : >> { %9358 = vmatmul.msk.f32.gmra.mxu3 %vm279_vm0, %v12287_v14 }
 0x484   : >> { %9426 = vmatmul.msk.f32.gmra.mxu0 %vm279_vm0, %v12105_v20 }
 0x485   : >> { %v12296_v48 = vpop.f32.mrf.mxu1 }
 0x488   : >> { %9253 = vmatmul.msk.f32.gmra.mxu1 %vm279_vm0, %v12236_v56  ;;  %9289 = vmatmul.msk.f32.gmra.mxu2 %vm279_vm0, %v12299_v45 }
 0x489   : >> { %v12308_v40 = vpop.f32.mrf.mxu0 }
 0x48a   : >> { %9359 = vmatmul.msk.f32.gmra.mxu3 %vm279_vm0, %v12302_v23 }
 0x48b   : >> { %v12312_v17 = vpop.f32.mrf.mxu2 }
 0x48c   : >> { %9427 = vmatmul.msk.f32.gmra.mxu0 %vm279_vm0, %v12125_v54 }
 0x48d   : >> { %v12316_v10 = vpop.f32.mrf.mxu1  ;;  %v12318_v33 = vpop.f32.mrf.mxu3 }
 0x48e   : >> { %14443 = vst [vmem:[#allocation47_spill] sm:$0xff] %v12318_v33  ;;  %v12485_v33 = vld [vmem:[%s12006_s28 + $0xc9] sm:$0xff] }
 0x48f   : >> { %14459 = vst [vmem:[#allocation63_spill] sm:$0xff] %v12485_v33 }
 0x490   : >> { %9254 = vmatmul.msk.f32.gmra.mxu1 %vm279_vm0, %v12258_v39  ;;  %9290 = vmatmul.msk.f32.gmra.mxu2 %vm279_vm0, %v12321_v13 }
 0x491   : >> { %v12330_v20 = vpop.f32.mrf.mxu0 }
 0x492   : >> { %9360 = vmatmul.msk.f32.gmra.mxu3 %vm279_vm0, %v12324_v3 }
 0x493   : >> { %v12334_v31 = vpop.f32.mrf.mxu2 }
 0x494   : >> { %9428 = vmatmul.msk.f32.gmra.mxu0 %vm279_vm0, %v12151_v47 }
 0x495   : >> { %v12338_v41 = vpop.f32.mrf.mxu1  ;;  %v12340_v54 = vpop.f32.mrf.mxu3 }
 0x496   : >> { %14444 = vst [vmem:[#allocation48_spill] sm:$0xff] %v12340_v54 }
 0x498   : >> { %9255 = vmatmul.msk.f32.gmra.mxu1 %vm279_vm0, %v12274_v46  ;;  %9291 = vmatmul.msk.f32.gmra.mxu2 %vm279_vm0, %v12343_v34 }
 0x499   : >> { %v12352_v59 = vpop.f32.mrf.mxu0 }
 0x49a   : >> { %9361 = vmatmul.msk.f32.gmra.mxu3 %vm279_vm0, %v12346_v60 }
 0x49b   : >> { %v12356_v4 = vpop.f32.mrf.mxu2 }
 0x49c   : >> { %9429 = vmatmul.msk.f32.gmra.mxu0 %vm279_vm0, %v12171_v9 }
 0x49d   : >> { %v12360_v47 = vpop.f32.mrf.mxu1  ;;  %v12362_v2 = vpop.f32.mrf.mxu3 }
 0x49e   : >> { %14446 = vst [vmem:[#allocation50_spill] sm:$0xff] %v12362_v2 }
 0x4a0   : >> { %9256 = vmatmul.msk.f32.gmra.mxu1 %vm279_vm0, %v12287_v14  ;;  %9292 = vmatmul.msk.f32.gmra.mxu2 %vm279_vm0, %v12365_v61 }
 0x4a1   : >> { %v12374_v26 = vpop.f32.mrf.mxu0 }
 0x4a2   : >> { %9362 = vmatmul.msk.f32.gmra.mxu3 %vm279_vm0, %v12368_v58 }
 0x4a3   : >> { %v12378_v9 = vpop.f32.mrf.mxu2 }
 0x4a4   : >> { %9430 = vmatmul.msk.f32.gmra.mxu0 %vm279_vm0, %v12188_v53  ;;  %v9554_v53 = vld [vmem:[%s14307_s3 + $0xc8] sm:$0xff] }
 0x4a5   : >> { %v12382_v16 = vpop.f32.mrf.mxu1  ;;  %v12384_v27 = vpop.f32.mrf.mxu3  ;;  %4980 = vmatpush.msra.mxu2 %v9554_v53  ;;  %v12443_v53 = vld [vmem:[%s12006_s28 + $0xa9] sm:$0xff] }
 0x4a6   : >> { %14448 = vst [vmem:[#allocation52_spill] sm:$0xff] %v12384_v27  ;;  %v12468_v27 = vld [vmem:[%s12006_s28 + $0xdf] sm:$0xff] }
 0x4a7   : >> { %14453 = vst [vmem:[#allocation57_spill] sm:$0xff] %v12443_v53 }
 0x4a8   : >> { %9257 = vmatmul.msk.f32.gmra.mxu1 %vm279_vm0, %v12302_v23  ;;  %9293 = vmatmul.msk.f32.gmra.mxu2 %vm279_vm0, %v12387_v11 }
 0x4a9   : >> { %v12399_v43 = vpop.f32.mrf.mxu0 }
 0x4aa   : >> { %9363 = vmatmul.msk.f32.gmra.mxu3 %vm279_vm0, %v12390_v32 }
 0x4ab   : >> { %v12406_v35 = vpop.f32.mrf.mxu2 }
 0x4ac   : >> { %9431 = vmatmul.msk.f32.gmra.mxu0 %vm279_vm0, %v12012_v24 }
 0x4ad   : >> { %v12413_v19 = vpop.f32.mrf.mxu1  ;;  %v12415_v52 = vpop.f32.mrf.mxu3 }
 0x4ae   : >> { %14450 = vst [vmem:[#allocation54_spill] sm:$0xff] %v12415_v52  ;;  %v12465_v52 = vld [vmem:[%s12006_s28 + $0xb1] sm:$0xff] }
 0x4af   : >> { %14456 = vst [vmem:[#allocation60_spill] sm:$0xff] %v12465_v52 }
 0x4b0   : >> { %9258 = vmatmul.msk.f32.gmra.mxu1 %vm279_vm0, %v12324_v3  ;;  %9294 = vmatmul.msk.f32.gmra.mxu2 %vm279_vm0, %v12418_v22  ;;  %v12503_v22 = vld [vmem:[%s12006_s28 + $0xff] sm:$0xff] }
 0x4b1   : >> { %v12427_v24 = vpop.f32.mrf.mxu0 }
 0x4b2   : >> { %9364 = vmatmul.msk.f32.gmra.mxu3 %vm279_vm0, %v12421_v7 }
 0x4b3   : >> { %v12434_v36 = vpop.f32.mrf.mxu2 }
 0x4b4   : >> { %9432 = vmatmul.msk.f32.gmra.mxu0 %vm279_vm0, %v12059_v55 }
 0x4b5   : >> { %v12438_v25 = vpop.f32.mrf.mxu1  ;;  %v12440_v63 = vpop.f32.mrf.mxu3 }
 0x4b6   : >> { %14452 = vst [vmem:[#allocation56_spill] sm:$0xff] %v12440_v63 }
 0x4b8   : >> { %9259 = vmatmul.msk.f32.gmra.mxu1 %vm279_vm0, %v12346_v60  ;;  %9295 = vmatmul.msk.f32.gmra.mxu2 %vm279_vm0, %v12443_v53  ;;  %v12500_v60 = vld [vmem:[%s12006_s28 + $0xd1] sm:$0xff] }
 0x4b9   : >> { %v12452_v44 = vpop.f32.mrf.mxu0 }
 0x4ba   : >> { %9365 = vmatmul.msk.f32.gmra.mxu3 %vm279_vm0, %v12446_v12 }
 0x4bb   : >> { %v12456_v55 = vpop.f32.mrf.mxu2 }
 0x4bc   : >> { %14454 = vst [vmem:[#allocation58_spill] sm:$0xff] %v12456_v55  ;;  %9433 = vmatmul.msk.f32.gmra.mxu0 %vm279_vm0, %v12082_v8 }
 0x4bd   : >> { %v12460_v50 = vpop.f32.mrf.mxu1  ;;  %v12462_v63 = vpop.f32.mrf.mxu3 }
 0x4be   : >> { %14455 = vst [vmem:[#allocation59_spill] sm:$0xff] %v12462_v63 }
 0x4c0   : >> { %9260 = vmatmul.msk.f32.gmra.mxu1 %vm279_vm0, %v12368_v58  ;;  %9296 = vmatmul.msk.f32.gmra.mxu2 %vm279_vm0, %v12465_v52  ;;  %v12488_v58 = vld [vmem:[%s12006_s28 + $0xf7] sm:$0xff] }
 0x4c1   : >> { %v12474_v2 = vpop.f32.mrf.mxu0 }
 0x4c2   : >> { %9366 = vmatmul.msk.f32.gmra.mxu3 %vm279_vm0, %v12468_v27 }
 0x4c3   : >> { %v12478_v8 = vpop.f32.mrf.mxu2 }
 0x4c4   : >> { %14457 = vst [vmem:[#allocation61_spill] sm:$0xff] %v12478_v8  ;;  %9434 = vmatmul.msk.f32.gmra.mxu0 %vm279_vm0, %v12108_v15 }
 0x4c5   : >> { %v12482_v63 = vpop.f32.mrf.mxu3  ;;  %v3619_v54 = vpop.f32.mrf.mxu1 }
 0x4c6   : >> { %14458 = vst [vmem:[#allocation62_spill] sm:$0xff] %v12482_v63  ;;  %v3620_v8 = vadd.f32 %v3619_v54, %v12308_v40 }
 0x4c8   : >> { %9261 = vmatmul.msk.f32.gmra.mxu1 %vm279_vm0, %v12390_v32  ;;  %9297 = vmatmul.msk.f32.gmra.mxu2 %vm279_vm0, %v12485_v33 }
 0x4c9   : >> { %v4424_v52 = vpop.f32.mrf.mxu0 }
 0x4ca   : >> { %9367 = vmatmul.msk.f32.gmra.mxu3 %vm279_vm0, %v12488_v58 }
 0x4cb   : >> { %v3865_v15 = vpop.f32.mrf.mxu2 }
 0x4cc   : >> { %v3961_v63 = vadd.f32 %v3865_v15, %v3620_v8  ;;  %9435 = vmatmul.msk.f32.gmra.mxu0 %vm279_vm0, %v12128_v30  ;;  %v12520_v15 = vld [vmem:[%s12006_s28 + $0x107] sm:$0xff] }
 0x4cd   : >> { %v3622_v53 = vpop.f32.mrf.mxu1  ;;  %v4146_v55 = vpop.f32.mrf.mxu3 }
 0x4ce   : >> { %v4242_v32 = vadd.f32 %v4146_v55, %v3961_v63  ;;  %v3623_v30 = vadd.f32 %v3622_v53, %v12330_v20 }
 0x4d0   : >> { %v12505_v33 = vadd.f32 %v4424_v52, %v4242_v32  ;;  %9262 = vmatmul.msk.f32.gmra.mxu1 %vm279_vm0, %v12421_v7  ;;  %9298 = vmatmul.msk.f32.gmra.mxu2 %vm279_vm0, %v12500_v60  ;;  %v12517_v52 = vld [vmem:[%s12006_s28 + $0xd9] sm:$0xff] }
 0x4d1   : >> { %v4427_v40 = vpop.f32.mrf.mxu0 }
 0x4d2   : >> { %14460 = vst [vmem:[#allocation64_spill] sm:$0xff] %v12505_v33  ;;  %9368 = vmatmul.msk.f32.gmra.mxu3 %vm279_vm0, %v12503_v22 }
 0x4d3   : >> { %v3868_v54 = vpop.f32.mrf.mxu2 }
 0x4d4   : >> { %v3962_v8 = vadd.f32 %v3868_v54, %v3623_v30  ;;  %9436 = vmatmul.msk.f32.gmra.mxu0 %vm279_vm0, %v12154_v18 }
 0x4d5   : >> { %v3625_v63 = vpop.f32.mrf.mxu1  ;;  %v4149_v32 = vpop.f32.mrf.mxu3 }
 0x4d6   : >> { %v4243_v55 = vadd.f32 %v4149_v32, %v3962_v8  ;;  %v3626_v18 = vadd.f32 %v3625_v63, %v12352_v59  ;;  %v12534_v8 = vld [vmem:[%s12006_s28 + $0xe1] sm:$0xff] }
 0x4d8   : >> { %v12522_v33 = vadd.f32 %v4427_v40, %v4243_v55  ;;  %9263 = vmatmul.msk.f32.gmra.mxu1 %vm279_vm0, %v12446_v12  ;;  %9299 = vmatmul.msk.f32.gmra.mxu2 %vm279_vm0, %v12517_v52  ;;  %v12537_v55 = vld [vmem:[%s12006_s28 + $0x10f] sm:$0xff] }
 0x4d9   : >> { %v4430_v20 = vpop.f32.mrf.mxu0 }
 0x4da   : >> { %14461 = vst [vmem:[#allocation65_spill] sm:$0xff] %v12522_v33  ;;  %9369 = vmatmul.msk.f32.gmra.mxu3 %vm279_vm0, %v12520_v15 }
 0x4db   : >> { %v3871_v53 = vpop.f32.mrf.mxu2 }
 0x4dc   : >> { %v3963_v30 = vadd.f32 %v3871_v53, %v3626_v18  ;;  %9437 = vmatmul.msk.f32.gmra.mxu0 %vm279_vm0, %v12174_v1 }
 0x4dd   : >> { %v3628_v54 = vpop.f32.mrf.mxu1  ;;  %v4152_v40 = vpop.f32.mrf.mxu3 }
 0x4de   : >> { %v4244_v32 = vadd.f32 %v4152_v40, %v3963_v30  ;;  %v3629_v1 = vadd.f32 %v3628_v54, %v12374_v26  ;;  %v12551_v30 = vld [vmem:[%s12006_s28 + $0xf9] sm:$0xff] }
 0x4e0   : >> { %v12539_v33 = vadd.f32 %v4430_v20, %v4244_v32  ;;  %9264 = vmatmul.msk.f32.gmra.mxu1 %vm279_vm0, %v12468_v27  ;;  %9300 = vmatmul.msk.f32.gmra.mxu2 %vm279_vm0, %v12534_v8  ;;  %v12554_v32 = vld [vmem:[%s12006_s28 + $0x127] sm:$0xff] }
 0x4e1   : >> { %v4433_v59 = vpop.f32.mrf.mxu0 }
 0x4e2   : >> { %14462 = vst [vmem:[#allocation66_spill] sm:$0xff] %v12539_v33  ;;  %9370 = vmatmul.msk.f32.gmra.mxu3 %vm279_vm0, %v12537_v55 }
 0x4e3   : >> { %v3874_v63 = vpop.f32.mrf.mxu2 }
 0x4e4   : >> { %v3964_v18 = vadd.f32 %v3874_v63, %v3629_v1  ;;  %9438 = vmatmul.msk.f32.gmra.mxu0 %vm279_vm0, %v12191_v29  ;;  %v9553_v29 = vld [vmem:[%s14307_s3 + $0xc0] sm:$0xff] }
 0x4e5   : >> { %v3631_v53 = vpop.f32.mrf.mxu1  ;;  %v4155_v20 = vpop.f32.mrf.mxu3  ;;  %4981 = vmatpush.msra.mxu2 %v9553_v29  ;;  %v12580_v29 = vld [vmem:[%s12006_s28 + $0x12f] sm:$0xff] }
 0x4e6   : >> { %v4245_v40 = vadd.f32 %v4155_v20, %v3964_v18  ;;  %v3632_v54 = vadd.f32 %v3631_v53, %v12399_v43  ;;  %v9483_v18 = vld [vmem:[%s14307_s3 + $0xa0] sm:$0xff] }
 0x4e7   : >> { %v12577_v43 = vld [vmem:[%s12006_s28 + $0x101] sm:$0xff]  ;;  %4700 = vmatpush.msra.mxu1 %v9483_v18 }
 0x4e8   : >> { %v12556_v33 = vadd.f32 %v4433_v59, %v4245_v40  ;;  %9265 = vmatmul.msk.f32.gmra.mxu1 %vm279_vm0, %v12488_v58  ;;  %9301 = vmatmul.msk.f32.gmra.mxu2 %vm279_vm0, %v12551_v30  ;;  %v9621_v59 = vld [vmem:[%s14307_s3 + $0xe0] sm:$0xff] }
 0x4e9   : >> { %v4436_v26 = vpop.f32.mrf.mxu0  ;;  %5259 = vmatpush.msra.mxu3 %v9621_v59  ;;  %v9689_v59 = vld [vmem:[%s14307_s3 + $0x100] sm:$0xff] }
 0x4ea   : >> { %14463 = vst [vmem:[#allocation67_spill] sm:$0xff] %v12556_v33  ;;  %9371 = vmatmul.msk.f32.gmra.mxu3 %vm279_vm0, %v12554_v32  ;;  %5537 = vmatpush.msra.mxu0 %v9689_v59 }
 0x4eb   : >> { %v3877_v1 = vpop.f32.mrf.mxu2 }
 0x4ec   : >> { %v3965_v63 = vadd.f32 %v3877_v1, %v3632_v54  ;;  %9439 = vmatmul.msk.f32.gmra.mxu0 %vm279_vm0, %v12018_v6 }
 0x4ed   : >> { %v3634_v20 = vpop.f32.mrf.mxu1  ;;  %v4158_v40 = vpop.f32.mrf.mxu3 }
 0x4ee   : >> { %v4246_v53 = vadd.f32 %v4158_v40, %v3965_v63  ;;  %v3635_v54 = vadd.f32 %v3634_v20, %v12427_v24  ;;  %v12597_v40 = vld [vmem:[%s12006_s28 + $0x109] sm:$0xff]  ;;  %v12600_v20 = vld [vmem:[%s12006_s28 + $0x137] sm:$0xff] }
 0x4f0   : >> { %v12582_v33 = vadd.f32 %v4436_v26, %v4246_v53  ;;  %9266 = vmatmul.msk.f32.gmra.mxu1 %vm279_vm0, %v12503_v22  ;;  %9302 = vmatmul.msk.f32.gmra.mxu2 %vm279_vm0, %v12577_v43 }
 0x4f1   : >> { %v4439_v6 = vpop.f32.mrf.mxu0 }
 0x4f2   : >> { %14464 = vst [vmem:[#allocation68_spill] sm:$0xff] %v12582_v33  ;;  %9372 = vmatmul.msk.f32.gmra.mxu3 %vm279_vm0, %v12580_v29 }
 0x4f3   : >> { %v3880_v1 = vpop.f32.mrf.mxu2 }
 0x4f4   : >> { %v3966_v26 = vadd.f32 %v3880_v1, %v3635_v54  ;;  %9440 = vmatmul.msk.f32.gmra.mxu0 %vm279_vm0, %v12065_v49 }
 0x4f5   : >> { %v3637_v63 = vpop.f32.mrf.mxu1  ;;  %v4161_v18 = vpop.f32.mrf.mxu3 }
 0x4f6   : >> { %v4247_v24 = vadd.f32 %v4161_v18, %v3966_v26  ;;  %v3638_v49 = vadd.f32 %v3637_v63, %v12452_v44  ;;  %v12614_v18 = vld [vmem:[%s12006_s28 + $0x111] sm:$0xff] }
 0x4f8   : >> { %v12602_v53 = vadd.f32 %v4439_v6, %v4247_v24  ;;  %9267 = vmatmul.msk.f32.gmra.mxu1 %vm279_vm0, %v12520_v15  ;;  %9303 = vmatmul.msk.f32.gmra.mxu2 %vm279_vm0, %v12597_v40 }
 0x4f9   : >> { %v4442_v54 = vpop.f32.mrf.mxu0 }
 0x4fa   : >> { %14465 = vst [vmem:[#allocation69_spill] sm:$0xff] %v12602_v53  ;;  %9373 = vmatmul.msk.f32.gmra.mxu3 %vm279_vm0, %v12600_v20  ;;  %v12617_v53 = vld [vmem:[%s12006_s28 + $0x13f] sm:$0xff] }
 0x4fb   : >> { %v3883_v59 = vpop.f32.mrf.mxu2 }
 0x4fc   : >> { %v3967_v1 = vadd.f32 %v3883_v59, %v3638_v49  ;;  %9441 = vmatmul.msk.f32.gmra.mxu0 %vm279_vm0, %v12085_v42 }
 0x4fd   : >> { %v3640_v26 = vpop.f32.mrf.mxu1  ;;  %v4164_v6 = vpop.f32.mrf.mxu3 }
 0x4fe   : >> { %v4248_v24 = vadd.f32 %v4164_v6, %v3967_v1  ;;  %v3641_v42 = vadd.f32 %v3640_v26, %v12474_v2  ;;  %v12631_v1 = vld [vmem:[%s12006_s28 + $0x129] sm:$0xff] }
 0x500   : >> { %v12619_v33 = vadd.f32 %v4442_v54, %v4248_v24  ;;  %9268 = vmatmul.msk.f32.gmra.mxu1 %vm279_vm0, %v12537_v55  ;;  %9304 = vmatmul.msk.f32.gmra.mxu2 %vm279_vm0, %v12614_v18  ;;  %v12634_v24 = vld [vmem:[%s12006_s28 + $0x157] sm:$0xff] }
 0x501   : >> { %v4445_v44 = vpop.f32.mrf.mxu0 }
 0x502   : >> { %14466 = vst [vmem:[#allocation70_spill] sm:$0xff] %v12619_v33  ;;  %9374 = vmatmul.msk.f32.gmra.mxu3 %vm279_vm0, %v12617_v53 }
 0x503   : >> { %v3886_v63 = vpop.f32.mrf.mxu2 }
 0x504   : >> { %v3968_v49 = vadd.f32 %v3886_v63, %v3641_v42  ;;  %9442 = vmatmul.msk.f32.gmra.mxu0 %vm279_vm0, %v12111_v21 }
 0x505   : >> { %v3643_v59 = vpop.f32.mrf.mxu1  ;;  %v4167_v54 = vpop.f32.mrf.mxu3 }
 0x506   : >> { %v4249_v6 = vadd.f32 %v4167_v54, %v3968_v49  ;;  %v3644_v21 = vadd.f32 %v3643_v59, %v12296_v48  ;;  %v12648_v49 = vld [vmem:[%s12006_s28 + $0x131] sm:$0xff] }
 0x508   : >> { %v12636_v33 = vadd.f32 %v4445_v44, %v4249_v6  ;;  %9269 = vmatmul.msk.f32.gmra.mxu1 %vm279_vm0, %v12554_v32  ;;  %9305 = vmatmul.msk.f32.gmra.mxu2 %vm279_vm0, %v12631_v1  ;;  %v12651_v6 = vld [vmem:[%s12006_s28 + $0x15f] sm:$0xff] }
 0x509   : >> { %v4448_v2 = vpop.f32.mrf.mxu0 }
 0x50a   : >> { %14467 = vst [vmem:[#allocation71_spill] sm:$0xff] %v12636_v33  ;;  %9375 = vmatmul.msk.f32.gmra.mxu3 %vm279_vm0, %v12634_v24 }
 0x50b   : >> { %v3889_v26 = vpop.f32.mrf.mxu2 }
 0x50c   : >> { %v3969_v42 = vadd.f32 %v3889_v26, %v3644_v21  ;;  %9443 = vmatmul.msk.f32.gmra.mxu0 %vm279_vm0, %v12131_v62 }
 0x50d   : >> { %v3646_v63 = vpop.f32.mrf.mxu1  ;;  %v4170_v44 = vpop.f32.mrf.mxu3 }
 0x50e   : >> { %v4250_v54 = vadd.f32 %v4170_v44, %v3969_v42  ;;  %v3647_v62 = vadd.f32 %v3646_v63, %v12316_v10  ;;  %v12665_v42 = vld [vmem:[%s12006_s28 + $0x139] sm:$0xff] }
 0x510   : >> { %v12653_v33 = vadd.f32 %v4448_v2, %v4250_v54  ;;  %9270 = vmatmul.msk.f32.gmra.mxu1 %vm279_vm0, %v12580_v29  ;;  %9306 = vmatmul.msk.f32.gmra.mxu2 %vm279_vm0, %v12648_v49  ;;  %v12668_v54 = vld [vmem:[%s12006_s28 + $0x167] sm:$0xff] }
 0x511   : >> { %v4451_v48 = vpop.f32.mrf.mxu0 }
 0x512   : >> { %14468 = vst [vmem:[#allocation72_spill] sm:$0xff] %v12653_v33  ;;  %9376 = vmatmul.msk.f32.gmra.mxu3 %vm279_vm0, %v12651_v6 }
 0x513   : >> { %v3892_v59 = vpop.f32.mrf.mxu2 }
 0x514   : >> { %v3970_v21 = vadd.f32 %v3892_v59, %v3647_v62  ;;  %9444 = vmatmul.msk.f32.gmra.mxu0 %vm279_vm0, %v12157_v38 }
 0x515   : >> { %v3649_v26 = vpop.f32.mrf.mxu1  ;;  %v4173_v2 = vpop.f32.mrf.mxu3 }
 0x516   : >> { %v4251_v44 = vadd.f32 %v4173_v2, %v3970_v21  ;;  %v3650_v38 = vadd.f32 %v3649_v26, %v12338_v41  ;;  %v12682_v21 = vld [vmem:[%s12006_s28 + $0x141] sm:$0xff] }
 0x518   : >> { %v12670_v33 = vadd.f32 %v4451_v48, %v4251_v44  ;;  %9271 = vmatmul.msk.f32.gmra.mxu1 %vm279_vm0, %v12600_v20  ;;  %9307 = vmatmul.msk.f32.gmra.mxu2 %vm279_vm0, %v12665_v42  ;;  %v12685_v44 = vld [vmem:[%s12006_s28 + $0x16f] sm:$0xff] }
 0x519   : >> { %v4454_v10 = vpop.f32.mrf.mxu0 }
 0x51a   : >> { %14469 = vst [vmem:[#allocation73_spill] sm:$0xff] %v12670_v33  ;;  %9377 = vmatmul.msk.f32.gmra.mxu3 %vm279_vm0, %v12668_v54 }
 0x51b   : >> { %v3895_v63 = vpop.f32.mrf.mxu2 }
 0x51c   : >> { %v3971_v62 = vadd.f32 %v3895_v63, %v3650_v38  ;;  %9445 = vmatmul.msk.f32.gmra.mxu0 %vm279_vm0, %v12177_v0 }
 0x51d   : >> { %v3652_v59 = vpop.f32.mrf.mxu1  ;;  %v4176_v48 = vpop.f32.mrf.mxu3 }
 0x51e   : >> { %v4252_v2 = vadd.f32 %v4176_v48, %v3971_v62  ;;  %v3653_v0 = vadd.f32 %v3652_v59, %v12360_v47  ;;  %v12699_v62 = vld [vmem:[%s12006_s28 + $0x159] sm:$0xff] }
 0x51f   : >> { %14471 = vst [vmem:[#allocation75_spill] sm:$0xff] %v12699_v62 }
 0x520   : >> { %v12687_v33 = vadd.f32 %v4454_v10, %v4252_v2  ;;  %9272 = vmatmul.msk.f32.gmra.mxu1 %vm279_vm0, %v12617_v53  ;;  %9308 = vmatmul.msk.f32.gmra.mxu2 %vm279_vm0, %v12682_v21  ;;  %v12702_v2 = vld [vmem:[%s12006_s28 + $0x187] sm:$0xff] }
 0x521   : >> { %v4457_v41 = vpop.f32.mrf.mxu0  ;;  %14472 = vst [vmem:[#allocation76_spill] sm:$0xff] %v12702_v2 }
 0x522   : >> { %14470 = vst [vmem:[#allocation74_spill] sm:$0xff] %v12687_v33  ;;  %9378 = vmatmul.msk.f32.gmra.mxu3 %vm279_vm0, %v12685_v44 }
 0x523   : >> { %v3898_v26 = vpop.f32.mrf.mxu2 }
 0x524   : >> { %v3972_v38 = vadd.f32 %v3898_v26, %v3653_v0  ;;  %9446 = vmatmul.msk.f32.gmra.mxu0 %vm279_vm0, %v12194_v37  ;;  %v12711_v37 = vld [vmem:[%s12006_s28 + $0x188] sm:$0xff] }
 0x525   : >> { %v3655_v10 = vpop.f32.mrf.mxu1  ;;  %v4179_v63 = vpop.f32.mrf.mxu3  ;;  %14474 = vst [vmem:[#allocation78_spill] sm:$0xff] %v12711_v37 }
 0x526   : >> { %v4253_v48 = vadd.f32 %v4179_v63, %v3972_v38  ;;  %v3656_v59 = vadd.f32 %v3655_v10, %v12382_v16  ;;  %v12719_v63 = vld [vmem:[%s12006_s28 + $0x161] sm:$0xff]  ;;  %v12731_v10 = vld [vmem:[%s12006_s28 + $0x190] sm:$0xff] }
 0x527   : >> { %14477 = vst [vmem:[#allocation81_spill] sm:$0xff] %v12731_v10 }
 0x528   : >> { %v12704_v33 = vadd.f32 %v4457_v41, %v4253_v48  ;;  %9273 = vmatmul.msk.f32.gmra.mxu1 %vm279_vm0, %v12634_v24  ;;  %9309 = vmatmul.msk.f32.gmra.mxu2 %vm279_vm0, %v12699_v62 }
 0x529   : >> { %v4460_v47 = vpop.f32.mrf.mxu0 }
 0x52a   : >> { %14473 = vst [vmem:[#allocation77_spill] sm:$0xff] %v12704_v33  ;;  %9379 = vmatmul.msk.f32.gmra.mxu3 %vm279_vm0, %v12702_v2  ;;  %v12722_v33 = vld [vmem:[%s12006_s28 + $0x18f] sm:$0xff] }
 0x52b   : >> { %v3901_v0 = vpop.f32.mrf.mxu2  ;;  %14475 = vst [vmem:[#allocation79_spill] sm:$0xff] %v12722_v33 }
 0x52c   : >> { %v3973_v26 = vadd.f32 %v3901_v0, %v3656_v59  ;;  %9447 = vmatmul.msk.f32.gmra.mxu0 %vm279_vm0, %v12711_v37  ;;  %v12742_v37 = vld [vmem:[%s12006_s28 + $0x197] sm:$0xff] }
 0x52d   : >> { %v3658_v41 = vpop.f32.mrf.mxu1  ;;  %v4182_v38 = vpop.f32.mrf.mxu3 }
 0x52e   : >> { %v4254_v48 = vadd.f32 %v4182_v38, %v3973_v26  ;;  %v3659_v59 = vadd.f32 %v3658_v41, %v12413_v19  ;;  %v12751_v41 = vld [vmem:[%s12006_s28 + $0x198] sm:$0xff] }
 0x52f   : >> { %14479 = vst [vmem:[#allocation83_spill] sm:$0xff] %v12751_v41 }
 0x530   : >> { %v12724_v62 = vadd.f32 %v4460_v47, %v4254_v48  ;;  %9274 = vmatmul.msk.f32.gmra.mxu1 %vm279_vm0, %v12651_v6  ;;  %9310 = vmatmul.msk.f32.gmra.mxu2 %vm279_vm0, %v12719_v63  ;;  %v12739_v48 = vld [vmem:[%s12006_s28 + $0x169] sm:$0xff] }
 0x531   : >> { %v4463_v16 = vpop.f32.mrf.mxu0 }
 0x532   : >> { %14476 = vst [vmem:[#allocation80_spill] sm:$0xff] %v12724_v62  ;;  %9380 = vmatmul.msk.f32.gmra.mxu3 %vm279_vm0, %v12722_v33 }
 0x533   : >> { %v3904_v0 = vpop.f32.mrf.mxu2 }
 0x534   : >> { %v3974_v26 = vadd.f32 %v3904_v0, %v3659_v59  ;;  %9448 = vmatmul.msk.f32.gmra.mxu0 %vm279_vm0, %v12731_v10  ;;  %v12762_v10 = vld [vmem:[%s12006_s28 + $0x19f] sm:$0xff] }
 0x535   : >> { %v3661_v47 = vpop.f32.mrf.mxu1  ;;  %v4185_v38 = vpop.f32.mrf.mxu3 }
 0x536   : >> { %v4255_v62 = vadd.f32 %v4185_v38, %v3974_v26  ;;  %v3662_v59 = vadd.f32 %v3661_v47, %v12438_v25  ;;  %v12759_v38 = vld [vmem:[%s12006_s28 + $0x171] sm:$0xff]  ;;  %v12771_v47 = vld [vmem:[%s12006_s28 + $0x1a0] sm:$0xff] }
 0x538   : >> { %v12744_v2 = vadd.f32 %v4463_v16, %v4255_v62  ;;  %9275 = vmatmul.msk.f32.gmra.mxu1 %vm279_vm0, %v12668_v54  ;;  %9311 = vmatmul.msk.f32.gmra.mxu2 %vm279_vm0, %v12739_v48 }
 0x539   : >> { %v4466_v19 = vpop.f32.mrf.mxu0 }
 0x53a   : >> { %14478 = vst [vmem:[#allocation82_spill] sm:$0xff] %v12744_v2  ;;  %9381 = vmatmul.msk.f32.gmra.mxu3 %vm279_vm0, %v12742_v37 }
 0x53b   : >> { %v3907_v0 = vpop.f32.mrf.mxu2 }
 0x53c   : >> { %v3975_v26 = vadd.f32 %v3907_v0, %v3662_v59  ;;  %9449 = vmatmul.msk.f32.gmra.mxu0 %vm279_vm0, %v12751_v41 }
 0x53d   : >> { %v3664_v62 = vpop.f32.mrf.mxu1  ;;  %v4188_v16 = vpop.f32.mrf.mxu3 }
 0x53e   : >> { %v4256_v2 = vadd.f32 %v4188_v16, %v3975_v26  ;;  %v3665_v59 = vadd.f32 %v3664_v62, %v12460_v50 }
 0x540   : >> { %v12764_v33 = vadd.f32 %v4466_v19, %v4256_v2  ;;  %9276 = vmatmul.msk.f32.gmra.mxu1 %vm279_vm0, %v12685_v44  ;;  %9312 = vmatmul.msk.f32.gmra.mxu2 %vm279_vm0, %v12759_v38 }
 0x541   : >> { %v4469_v25 = vpop.f32.mrf.mxu0 }
 0x542   : >> { %14480 = vst [vmem:[#allocation84_spill] sm:$0xff] %v12764_v33  ;;  %9382 = vmatmul.msk.f32.gmra.mxu3 %vm279_vm0, %v12762_v10  ;;  %v9589_v33 = vld [vmem:[%s12006_s28 + $0x68] sm:$0xff] }
 0x543   : >> { %v3910_v0 = vpop.f32.mrf.mxu2 }
 0x544   : >> { %v3976_v26 = vadd.f32 %v3910_v0, %v3665_v59  ;;  %9450 = vmatmul.msk.f32.gmra.mxu0 %vm279_vm0, %v12771_v47 }
 0x545   : >> { %v3667_v2 = vpop.f32.mrf.mxu1  ;;  %v4191_v19 = vpop.f32.mrf.mxu3 }
 0x546   : >> { %v4257_v16 = vadd.f32 %v4191_v19, %v3976_v26  ;;  %v3668_v62 = vadd.f32 %v3667_v2, %v12312_v17 }
 0x548   : >> { %v12779_v41 = vadd.f32 %v4469_v25, %v4257_v16  ;;  %9487 = vmatmul.msk.f32.vlgmr.msra.gmra.mxu1 %vm279_vm0, %v12233_v51  ;;  %9557 = vmatmul.msk.f32.vlgmr.msra.gmra.mxu2 %vm279_vm0, %v12236_v56  ;;  %v9590_v16 = vld [vmem:[%s12006_s28 + $0x70] sm:$0xff] }
 0x549   : >> { %v4472_v50 = vpop.f32.mrf.mxu0 }
 0x54a   : >> { %14481 = vst [vmem:[#allocation85_spill] sm:$0xff] %v12779_v41  ;;  %9625 = vmatmul.msk.f32.vlgmr.msra.gmra.mxu3 %vm279_vm0, %v9589_v33 }
 0x54b   : >> { %v3913_v59 = vpop.f32.mrf.mxu2 }
 0x54c   : >> { %v3977_v0 = vadd.f32 %v3913_v59, %v3668_v62  ;;  %9693 = vmatmul.msk.f32.vlgmr.msra.gmra.mxu0 %vm279_vm0, %v12299_v45  ;;  %v9591_v59 = vld [vmem:[%s12006_s28 + $0x78] sm:$0xff] }
 0x54d   : >> { %v3670_v26 = vpop.f32.mrf.mxu1  ;;  %v4194_v25 = vpop.f32.mrf.mxu3 }
 0x54e   : >> { %v4258_v19 = vadd.f32 %v4194_v25, %v3977_v0  ;;  %v3671_v56 = vadd.f32 %v3670_v26, %v12334_v31 }
 0x550   : >> { %v12790_v41 = vadd.f32 %v4472_v50, %v4258_v19  ;;  %9488 = vmatmul.msk.f32.gmra.mxu1 %vm279_vm0, %v12255_v57  ;;  %9558 = vmatmul.msk.f32.gmra.mxu2 %vm279_vm0, %v12258_v39 }
 0x551   : >> { %v4475_v51 = vpop.f32.mrf.mxu0 }
 0x552   : >> { %9626 = vmatmul.msk.f32.gmra.mxu3 %vm279_vm0, %v9590_v16 }
 0x553   : >> { %v3916_v17 = vpop.f32.mrf.mxu2 }
 0x554   : >> { %v3978_v33 = vadd.f32 %v3916_v17, %v3671_v56  ;;  %9694 = vmatmul.msk.f32.gmra.mxu0 %vm279_vm0, %v12321_v13 }
 0x555   : >> { %v3673_v2 = vpop.f32.mrf.mxu1  ;;  %v4197_v50 = vpop.f32.mrf.mxu3 }
 0x556   : >> { %v4259_v62 = vadd.f32 %v4197_v50, %v3978_v33  ;;  %v3674_v39 = vadd.f32 %v3673_v2, %v12356_v4 }
 0x558   : >> { %v12801_v0 = vadd.f32 %v4475_v51, %v4259_v62  ;;  %9489 = vmatmul.msk.f32.gmra.mxu1 %vm279_vm0, %v12271_v5  ;;  %9559 = vmatmul.msk.f32.gmra.mxu2 %vm279_vm0, %v12274_v46  ;;  %v9592_v51 = vld [vmem:[%s12006_s28 + $0x80] sm:$0xff]  ;;  %v9593_v62 = vld [vmem:[%s12006_s28 + $0x98] sm:$0xff] }
 0x559   : >> { %v4478_v57 = vpop.f32.mrf.mxu0 }
 0x55a   : >> { %9627 = vmatmul.msk.f32.gmra.mxu3 %vm279_vm0, %v9591_v59 }
 0x55b   : >> { %v3919_v31 = vpop.f32.mrf.mxu2 }
 0x55c   : >> { %v3979_v26 = vadd.f32 %v3919_v31, %v3674_v39  ;;  %9695 = vmatmul.msk.f32.gmra.mxu0 %vm279_vm0, %v12343_v34 }
 0x55d   : >> { %v3676_v25 = vpop.f32.mrf.mxu1  ;;  %v4200_v19 = vpop.f32.mrf.mxu3 }
 0x55e   : >> { %v4260_v16 = vadd.f32 %v4200_v19, %v3979_v26  ;;  %v3677_v46 = vadd.f32 %v3676_v25, %v12378_v9  ;;  %v9594_v25 = vld [vmem:[%s12006_s28 + $0xa0] sm:$0xff] }
 0x560   : >> { %v12812_v56 = vadd.f32 %v4478_v57, %v4260_v16  ;;  %9490 = vmatmul.msk.f32.gmra.mxu1 %vm279_vm0, %v12284_v28  ;;  %9560 = vmatmul.msk.f32.gmra.mxu2 %vm279_vm0, %v12287_v14 }
 0x561   : >> { %v4481_v5 = vpop.f32.mrf.mxu0 }
 0x562   : >> { %9628 = vmatmul.msk.f32.gmra.mxu3 %vm279_vm0, %v9592_v51  ;;  %v14482_v51 = vld [vmem:[#allocation55_spill] sm:$0xff] }
 0x563   : >> { %v3922_v4 = vpop.f32.mrf.mxu2 }
 0x564   : >> { %v3980_v17 = vadd.f32 %v3922_v4, %v3677_v46  ;;  %9696 = vmatmul.msk.f32.gmra.mxu0 %vm279_vm0, %v12365_v61 }
 0x565   : >> { %v3679_v33 = vpop.f32.mrf.mxu1  ;;  %v4203_v2 = vpop.f32.mrf.mxu3 }
 0x566   : >> { %v4261_v50 = vadd.f32 %v4203_v2, %v3980_v17  ;;  %v3680_v14 = vadd.f32 %v3679_v33, %v12406_v35  ;;  %v9595_v17 = vld [vmem:[%s12006_s28 + $0xa8] sm:$0xff] }
 0x568   : >> { %v12823_v59 = vadd.f32 %v4481_v5, %v4261_v50  ;;  %9491 = vmatmul.msk.f32.gmra.mxu1 %vm279_vm0, %v12299_v45  ;;  %9561 = vmatmul.msk.f32.gmra.mxu2 %vm279_vm0, %v12302_v23 }
 0x569   : >> { %v4484_v28 = vpop.f32.mrf.mxu0 }
 0x56a   : >> { %9629 = vmatmul.msk.f32.gmra.mxu3 %vm279_vm0, %v9593_v62 }
 0x56b   : >> { %v3925_v9 = vpop.f32.mrf.mxu2 }
 0x56c   : >> { %v3981_v57 = vadd.f32 %v3925_v9, %v3680_v14  ;;  %9697 = vmatmul.msk.f32.gmra.mxu0 %vm279_vm0, %v12387_v11 }
 0x56d   : >> { %v3682_v39 = vpop.f32.mrf.mxu1  ;;  %v4206_v31 = vpop.f32.mrf.mxu3 }
 0x56e   : >> { %v4262_v26 = vadd.f32 %v4206_v31, %v3981_v57  ;;  %v3683_v23 = vadd.f32 %v3682_v39, %v12434_v36  ;;  %v14484_v36 = vld [vmem:[#allocation58_spill] sm:$0xff]  ;;  %v9596_v39 = vld [vmem:[%s12006_s28 + $0xb0] sm:$0xff] }
 0x570   : >> { %v12834_v19 = vadd.f32 %v4484_v28, %v4262_v26  ;;  %9492 = vmatmul.msk.f32.gmra.mxu1 %vm279_vm0, %v12321_v13  ;;  %9562 = vmatmul.msk.f32.gmra.mxu2 %vm279_vm0, %v12324_v3  ;;  %v14483_v13 = vld [vmem:[#allocation49_spill] sm:$0xff] }
 0x571   : >> { %v4487_v45 = vpop.f32.mrf.mxu0  ;;  %v14485_v28 = vld [vmem:[#allocation57_spill] sm:$0xff] }
 0x572   : >> { %9630 = vmatmul.msk.f32.gmra.mxu3 %vm279_vm0, %v9594_v25  ;;  %v14487_v25 = vld [vmem:[#allocation61_spill] sm:$0xff] }
 0x573   : >> { %v3928_v35 = vpop.f32.mrf.mxu2 }
 0x574   : >> { %v3982_v16 = vadd.f32 %v3928_v35, %v3683_v23  ;;  %9698 = vmatmul.msk.f32.gmra.mxu0 %vm279_vm0, %v14482_v51 }
 0x575   : >> { %v3685_v5 = vpop.f32.mrf.mxu1  ;;  %v4209_v46 = vpop.f32.mrf.mxu3 }
 0x576   : >> { %v4263_v4 = vadd.f32 %v4209_v46, %v3982_v16  ;;  %v3686_v2 = vadd.f32 %v3685_v5, %v14484_v36  ;;  %v14488_v16 = vld [vmem:[#allocation60_spill] sm:$0xff]  ;;  %v14490_v36 = vld [vmem:[#allocation47_spill] sm:$0xff] }
 0x578   : >> { %v12845_v33 = vadd.f32 %v4487_v45, %v4263_v4  ;;  %9493 = vmatmul.msk.f32.gmra.mxu1 %vm279_vm0, %v12343_v34  ;;  %9563 = vmatmul.msk.f32.gmra.mxu2 %vm279_vm0, %v14483_v13  ;;  %v14486_v34 = vld [vmem:[#allocation51_spill] sm:$0xff] }
 0x579   : >> { %v4490_v3 = vpop.f32.mrf.mxu0 }
 0x57a   : >> { %9631 = vmatmul.msk.f32.gmra.mxu3 %vm279_vm0, %v9595_v17  ;;  %v9597_v17 = vld [vmem:[%s12006_s28 + $0xc8] sm:$0xff] }
 0x57b   : >> { %v3931_v50 = vpop.f32.mrf.mxu2 }
 0x57c   : >> { %v3983_v62 = vadd.f32 %v3931_v50, %v3686_v2  ;;  %9699 = vmatmul.msk.f32.gmra.mxu0 %vm279_vm0, %v14485_v28 }
 0x57d   : >> { %v3688_v14 = vpop.f32.mrf.mxu1  ;;  %v4212_v9 = vpop.f32.mrf.mxu3 }
 0x57e   : >> { %v4264_v57 = vadd.f32 %v4212_v9, %v3983_v62  ;;  %v3689_v45 = vadd.f32 %v3688_v14, %v14487_v25  ;;  %v14491_v14 = vld [vmem:[#allocation63_spill] sm:$0xff]  ;;  %v14492_v25 = vld [vmem:[#allocation48_spill] sm:$0xff] }
 0x580   : >> { %v12856_v31 = vadd.f32 %v4490_v3, %v4264_v57  ;;  %9494 = vmatmul.msk.f32.gmra.mxu1 %vm279_vm0, %v12365_v61  ;;  %9564 = vmatmul.msk.f32.gmra.mxu2 %vm279_vm0, %v14486_v34  ;;  %v14489_v61 = vld [vmem:[#allocation53_spill] sm:$0xff]  ;;  %v9598_v34 = vld [vmem:[%s12006_s28 + $0xd0] sm:$0xff] }
 0x581   : >> { %v4493_v26 = vpop.f32.mrf.mxu0 }
 0x582   : >> { %9632 = vmatmul.msk.f32.gmra.mxu3 %vm279_vm0, %v9596_v39 }
 0x583   : >> { %v3934_v23 = vpop.f32.mrf.mxu2 }
 0x584   : >> { %v3984_v35 = vadd.f32 %v3934_v23, %v3689_v45  ;;  %9700 = vmatmul.msk.f32.gmra.mxu0 %vm279_vm0, %v14488_v16 }
 0x585   : >> { %v3691_v5 = vpop.f32.mrf.mxu1  ;;  %v4215_v46 = vpop.f32.mrf.mxu3 }
 0x586   : >> { %v4265_v4 = vadd.f32 %v4215_v46, %v3984_v35  ;;  %v3692_v2 = vadd.f32 %v3691_v5, %v14490_v36 }
 0x588   : >> { %v12867_v13 = vadd.f32 %v4493_v26, %v4265_v4  ;;  %9495 = vmatmul.msk.f32.gmra.mxu1 %vm279_vm0, %v12387_v11  ;;  %9565 = vmatmul.msk.f32.gmra.mxu2 %vm279_vm0, %v14489_v61 }
 0x589   : >> { %v4496_v3 = vpop.f32.mrf.mxu0 }
 0x58a   : >> { %9633 = vmatmul.msk.f32.gmra.mxu3 %vm279_vm0, %v9597_v17  ;;  %v9599_v17 = vld [vmem:[%s12006_s28 + $0xd8] sm:$0xff] }
 0x58b   : >> { %v3937_v50 = vpop.f32.mrf.mxu2 }
 0x58c   : >> { %v3985_v62 = vadd.f32 %v3937_v50, %v3692_v2  ;;  %9701 = vmatmul.msk.f32.gmra.mxu0 %vm279_vm0, %v14491_v14 }
 0x58d   : >> { %v3694_v9 = vpop.f32.mrf.mxu1  ;;  %v4218_v57 = vpop.f32.mrf.mxu3 }
 0x58e   : >> { %v4266_v39 = vadd.f32 %v4218_v57, %v3985_v62  ;;  %v3695_v45 = vadd.f32 %v3694_v9, %v14492_v25  ;;  %v9600_v57 = vld [vmem:[%s12006_s28 + $0xe0] sm:$0xff] }
 0x590   : >> { %v12878_v26 = vadd.f32 %v4496_v3, %v4266_v39  ;;  %9496 = vmatmul.msk.f32.gmra.mxu1 %vm279_vm0, %v14482_v51  ;;  %9566 = vmatmul.msk.f32.gmra.mxu2 %vm279_vm0, %v12421_v7  ;;  %v14493_v51 = vld [vmem:[#allocation50_spill] sm:$0xff] }
 0x591   : >> { %v4499_v11 = vpop.f32.mrf.mxu0 }
 0x592   : >> { %9634 = vmatmul.msk.f32.gmra.mxu3 %vm279_vm0, %v9598_v34 }
 0x593   : >> { %v3940_v23 = vpop.f32.mrf.mxu2 }
 0x594   : >> { %v3986_v35 = vadd.f32 %v3940_v23, %v3695_v45  ;;  %9702 = vmatmul.msk.f32.gmra.mxu0 %vm279_vm0, %v12500_v60 }
 0x595   : >> { %v3697_v5 = vpop.f32.mrf.mxu1  ;;  %v4221_v46 = vpop.f32.mrf.mxu3 }
 0x596   : >> { %v4267_v4 = vadd.f32 %v4221_v46, %v3986_v35  ;;  %v3698_v3 = vadd.f32 %v3697_v5, %v14493_v51  ;;  %v9601_v5 = vld [vmem:[%s12006_s28 + $0xf8] sm:$0xff] }
 0x598   : >> { %v12889_v61 = vadd.f32 %v4499_v11, %v4267_v4  ;;  %9497 = vmatmul.msk.f32.gmra.mxu1 %vm279_vm0, %v14485_v28  ;;  %9567 = vmatmul.msk.f32.gmra.mxu2 %vm279_vm0, %v12446_v12  ;;  %v14494_v28 = vld [vmem:[#allocation52_spill] sm:$0xff] }
 0x599   : >> { %v4502_v7 = vpop.f32.mrf.mxu0 }
 0x59a   : >> { %9635 = vmatmul.msk.f32.gmra.mxu3 %vm279_vm0, %v9599_v17 }
 0x59b   : >> { %v3943_v36 = vpop.f32.mrf.mxu2 }
 0x59c   : >> { %v3987_v2 = vadd.f32 %v3943_v36, %v3698_v3  ;;  %9703 = vmatmul.msk.f32.gmra.mxu0 %vm279_vm0, %v12517_v52 }
 0x59d   : >> { %v3700_v50 = vpop.f32.mrf.mxu1  ;;  %v4224_v62 = vpop.f32.mrf.mxu3 }
 0x59e   : >> { %v4268_v9 = vadd.f32 %v4224_v62, %v3987_v2  ;;  %v3701_v34 = vadd.f32 %v3700_v50, %v14494_v28  ;;  %v9602_v2 = vld [vmem:[%s12006_s28 + $0x100] sm:$0xff] }
 0x5a0   : >> { %v12900_v39 = vadd.f32 %v4502_v7, %v4268_v9  ;;  %9498 = vmatmul.msk.f32.gmra.mxu1 %vm279_vm0, %v14488_v16  ;;  %9568 = vmatmul.msk.f32.gmra.mxu2 %vm279_vm0, %v12468_v27  ;;  %v14495_v16 = vld [vmem:[#allocation54_spill] sm:$0xff] }
 0x5a1   : >> { %v4505_v12 = vpop.f32.mrf.mxu0 }
 0x5a2   : >> { %9636 = vmatmul.msk.f32.gmra.mxu3 %vm279_vm0, %v9600_v57 }
 0x5a3   : >> { %v3946_v11 = vpop.f32.mrf.mxu2 }
 0x5a4   : >> { %v3988_v25 = vadd.f32 %v3946_v11, %v3701_v34  ;;  %9704 = vmatmul.msk.f32.gmra.mxu0 %vm279_vm0, %v12534_v8  ;;  %v9603_v11 = vld [vmem:[%s12006_s28 + $0x108] sm:$0xff] }
 0x5a5   : >> { %v3703_v45 = vpop.f32.mrf.mxu1  ;;  %v4227_v23 = vpop.f32.mrf.mxu3 }
 0x5a6   : >> { %v4269_v35 = vadd.f32 %v4227_v23, %v3988_v25  ;;  %v3704_v4 = vadd.f32 %v3703_v45, %v14495_v16 }
 0x5a8   : >> { %v12911_v46 = vadd.f32 %v4505_v12, %v4269_v35  ;;  %9499 = vmatmul.msk.f32.gmra.mxu1 %vm279_vm0, %v14491_v14  ;;  %9569 = vmatmul.msk.f32.gmra.mxu2 %vm279_vm0, %v12488_v58  ;;  %v14496_v14 = vld [vmem:[#allocation56_spill] sm:$0xff] }
 0x5a9   : >> { %v4508_v27 = vpop.f32.mrf.mxu0 }
 0x5aa   : >> { %9637 = vmatmul.msk.f32.gmra.mxu3 %vm279_vm0, %v9601_v5 }
 0x5ab   : >> { %v3949_v17 = vpop.f32.mrf.mxu2 }
 0x5ac   : >> { %v3989_v7 = vadd.f32 %v3949_v17, %v3704_v4  ;;  %9705 = vmatmul.msk.f32.gmra.mxu0 %vm279_vm0, %v12551_v30  ;;  %v9604_v4 = vld [vmem:[%s12006_s28 + $0x110] sm:$0xff] }
 0x5ad   : >> { %v3706_v51 = vpop.f32.mrf.mxu1  ;;  %v4230_v3 = vpop.f32.mrf.mxu3 }
 0x5ae   : >> { %v4270_v36 = vadd.f32 %v4230_v3, %v3989_v7  ;;  %v3707_v62 = vadd.f32 %v3706_v51, %v14496_v14  ;;  %v9605_v14 = vld [vmem:[%s12006_s28 + $0x128] sm:$0xff] }
 0x5b0   : >> { %v12922_v50 = vadd.f32 %v4508_v27, %v4270_v36  ;;  %9500 = vmatmul.msk.f32.gmra.mxu1 %vm279_vm0, %v12500_v60  ;;  %9570 = vmatmul.msk.f32.gmra.mxu2 %vm279_vm0, %v12503_v22  ;;  %v14497_v22 = vld [vmem:[#allocation59_spill] sm:$0xff] }
 0x5b1   : >> { %v4511_v58 = vpop.f32.mrf.mxu0 }
 0x5b2   : >> { %9638 = vmatmul.msk.f32.gmra.mxu3 %vm279_vm0, %v9602_v2 }
 0x5b3   : >> { %v3952_v9 = vpop.f32.mrf.mxu2 }
 0x5b4   : >> { %v3990_v57 = vadd.f32 %v3952_v9, %v3707_v62  ;;  %9706 = vmatmul.msk.f32.gmra.mxu0 %vm279_vm0, %v12577_v43 }
 0x5b5   : >> { %v3709_v12 = vpop.f32.mrf.mxu1  ;;  %v4233_v28 = vpop.f32.mrf.mxu3 }
 0x5b6   : >> { %v4271_v34 = vadd.f32 %v4233_v28, %v3990_v57  ;;  %v3710_v45 = vadd.f32 %v3709_v12, %v14497_v22 }
 0x5b8   : >> { %v12933_v25 = vadd.f32 %v4511_v58, %v4271_v34  ;;  %9501 = vmatmul.msk.f32.gmra.mxu1 %vm279_vm0, %v12517_v52  ;;  %9571 = vmatmul.msk.f32.gmra.mxu2 %vm279_vm0, %v12520_v15  ;;  %v14498_v15 = vld [vmem:[#allocation62_spill] sm:$0xff] }
 0x5b9   : >> { %v4514_v60 = vpop.f32.mrf.mxu0 }
 0x5ba   : >> { %9639 = vmatmul.msk.f32.gmra.mxu3 %vm279_vm0, %v9603_v11 }
 0x5bb   : >> { %v3955_v23 = vpop.f32.mrf.mxu2 }
 0x5bc   : >> { %v3991_v35 = vadd.f32 %v3955_v23, %v3710_v45  ;;  %9707 = vmatmul.msk.f32.gmra.mxu0 %vm279_vm0, %v12597_v40  ;;  %v14500_v45 = vld [vmem:[#allocation65_spill] sm:$0xff] }
 0x5bd   : >> { %v3712_v5 = vpop.f32.mrf.mxu1  ;;  %v4236_v27 = vpop.f32.mrf.mxu3 }
 0x5be   : >> { %v4272_v16 = vadd.f32 %v4236_v27, %v3991_v35  ;;  %v3713_v7 = vadd.f32 %v3712_v5, %v14498_v15  ;;  %v9607_v15 = vld [vmem:[%s12006_s28 + $0x138] sm:$0xff] }
 0x5c0   : >> { %v12944_v17 = vadd.f32 %v4514_v60, %v4272_v16  ;;  %9502 = vmatmul.msk.f32.gmra.mxu1 %vm279_vm0, %v12534_v8  ;;  %9572 = vmatmul.msk.f32.gmra.mxu2 %vm279_vm0, %v12537_v55  ;;  %v14499_v55 = vld [vmem:[#allocation64_spill] sm:$0xff] }
 0x5c1   : >> { %v4517_v52 = vpop.f32.mrf.mxu0  ;;  %v9606_v60 = vld [vmem:[%s12006_s28 + $0x130] sm:$0xff] }
 0x5c2   : >> { %9640 = vmatmul.msk.f32.gmra.mxu3 %vm279_vm0, %v9604_v4 }
 0x5c3   : >> { %v3958_v51 = vpop.f32.mrf.mxu2 }
 0x5c4   : >> { %v3992_v3 = vadd.f32 %v3958_v51, %v3713_v7  ;;  %9708 = vmatmul.msk.f32.gmra.mxu0 %vm279_vm0, %v12614_v18  ;;  %v14501_v51 = vld [vmem:[#allocation66_spill] sm:$0xff] }
 0x5c5   : >> { %v4239_v36 = vpop.f32.mrf.mxu3  ;;  %v4702_v2 = vpop.f32.mrf.mxu1 }
 0x5c6   : >> { %v4273_v58 = vadd.f32 %v4239_v36, %v3992_v3  ;;  %v4798_v9 = vadd.f32 %v4702_v2, %v14499_v55 }
 0x5c8   : >> { %v12955_v62 = vadd.f32 %v4517_v52, %v4273_v58  ;;  %9503 = vmatmul.msk.f32.gmra.mxu1 %vm279_vm0, %v12551_v30  ;;  %9573 = vmatmul.msk.f32.gmra.mxu2 %vm279_vm0, %v12554_v32  ;;  %v12968_v30 = vld [vmem:[%s14308_s4] ss:$0 sm:$0xff] }
 0x5c9   : >> { %v5539_v8 = vpop.f32.mrf.mxu0 }
 0x5ca   : >> { %9641 = vmatmul.msk.f32.gmra.mxu3 %vm279_vm0, %v9605_v14 }
 0x5cb   : >> { %v4983_v57 = vpop.f32.mrf.mxu2 }
 0x5cc   : >> { %v5079_v12 = vadd.f32 %v4983_v57, %v4798_v9  ;;  %9709 = vmatmul.msk.f32.gmra.mxu0 %vm279_vm0, %v12631_v1  ;;  %v9608_v9 = vld [vmem:[%s12006_s28 + $0x140] sm:$0xff] }
 0x5cd   : >> { %v4705_v28 = vpop.f32.mrf.mxu1  ;;  %v5261_v34 = vpop.f32.mrf.mxu3 }
 0x5ce   : >> { %v5357_v11 = vadd.f32 %v5261_v34, %v5079_v12  ;;  %v4799_v23 = vadd.f32 %v4705_v28, %v14500_v45  ;;  %v14502_v12 = vld [vmem:[#allocation67_spill] sm:$0xff] }
 0x5d0   : >> { %v5635_v32 = vadd.f32 %v5539_v8, %v5357_v11  ;;  %9504 = vmatmul.msk.f32.gmra.mxu1 %vm279_vm0, %v12577_v43  ;;  %9574 = vmatmul.msk.f32.gmra.mxu2 %vm279_vm0, %v12580_v29 }
 0x5d1   : >> { %v5542_v22 = vpop.f32.mrf.mxu0 }
 0x5d2   : >> { %v5671_v35 = vadd.f32 %v12968_v30, %v5635_v32  ;;  %9642 = vmatmul.msk.f32.gmra.mxu3 %vm279_vm0, %v9606_v60 }
 0x5d3   : >> { %v4986_v5 = vpop.f32.mrf.mxu2 }
 0x5d4   : >> { %v5703_v27 = vmax.f32 %v5671_v35, 0.0  ;;  %v5080_v16 = vadd.f32 %v4986_v5, %v4799_v23  ;;  %9710 = vmatmul.msk.f32.gmra.mxu0 %vm279_vm0, %v12648_v49  ;;  %v9609_v5 = vld [vmem:[%s12006_s28 + $0x158] sm:$0xff] }
 0x5d5   : >> { %v4708_v4 = vpop.f32.mrf.mxu1  ;;  %v5264_v52 = vpop.f32.mrf.mxu3 }
 0x5d6   : >> { %5735 = vst.msk [vmem:[#allocation6] sm:$0xff] %vm484_vm1, %v5703_v27  ;;  %v5358_v43 = vadd.f32 %v5264_v52, %v5080_v16  ;;  %v4800_v3 = vadd.f32 %v4708_v4, %v14501_v51  ;;  %v14503_v4 = vld [vmem:[#allocation68_spill] sm:$0xff]  ;;  %v14504_v51 = vld [vmem:[#allocation75_spill] sm:$0xff] }
 0x5d8   : >> { %v5636_v29 = vadd.f32 %v5542_v22, %v5358_v43  ;;  %9505 = vmatmul.msk.f32.gmra.mxu1 %vm279_vm0, %v12597_v40  ;;  %9575 = vmatmul.msk.f32.gmra.mxu2 %vm279_vm0, %v12600_v20 }
 0x5d9   : >> { %v5545_v7 = vpop.f32.mrf.mxu0 }
 0x5da   : >> { %v5672_v36 = vadd.f32 %v12968_v30, %v5636_v29  ;;  %9643 = vmatmul.msk.f32.gmra.mxu3 %vm279_vm0, %v9607_v15 }
 0x5db   : >> { %v4989_v2 = vpop.f32.mrf.mxu2 }
 0x5dc   : >> { %v5704_v58 = vmax.f32 %v5672_v36, 0.0  ;;  %v5081_v14 = vadd.f32 %v4989_v2, %v4800_v3  ;;  %9711 = vmatmul.msk.f32.gmra.mxu0 %vm279_vm0, %v12665_v42  ;;  %v9610_v2 = vld [vmem:[%s12006_s28 + $0x160] sm:$0xff] }
 0x5dd   : >> { %v4711_v8 = vpop.f32.mrf.mxu1  ;;  %v5267_v55 = vpop.f32.mrf.mxu3 }
 0x5de   : >> { %5736 = vst.msk [vmem:[#allocation6 + $0x8] sm:$0xff] %vm484_vm1, %v5704_v58  ;;  %v5359_v40 = vadd.f32 %v5267_v55, %v5081_v14  ;;  %v4801_v28 = vadd.f32 %v4711_v8, %v14502_v12  ;;  %v14505_v14 = vld [vmem:[#allocation69_spill] sm:$0xff] }
 0x5e0   : >> { %v5637_v20 = vadd.f32 %v5545_v7, %v5359_v40  ;;  %9506 = vmatmul.msk.f32.gmra.mxu1 %vm279_vm0, %v12614_v18  ;;  %9576 = vmatmul.msk.f32.gmra.mxu2 %vm279_vm0, %v12617_v53 }
 0x5e1   : >> { %v5548_v57 = vpop.f32.mrf.mxu0 }
 0x5e2   : >> { %v5673_v34 = vadd.f32 %v12968_v30, %v5637_v20  ;;  %9644 = vmatmul.msk.f32.gmra.mxu3 %vm279_vm0, %v9608_v9 }
 0x5e3   : >> { %v4992_v11 = vpop.f32.mrf.mxu2 }
 0x5e4   : >> { %v5705_v60 = vmax.f32 %v5673_v34, 0.0  ;;  %v5082_v32 = vadd.f32 %v4992_v11, %v4801_v28  ;;  %9712 = vmatmul.msk.f32.gmra.mxu0 %vm279_vm0, %v12682_v21  ;;  %v9611_v11 = vld [vmem:[%s12006_s28 + $0x168] sm:$0xff] }
 0x5e5   : >> { %v5767_v22 = vld [vmem:[#allocation6] ss:$2 sm:$0xff]  ;;  %v5799_v45 = vld [vmem:[#allocation6 + $0x1] ss:$2 sm:$0xff]  ;;  %v4714_v18 = vpop.f32.mrf.mxu1  ;;  %v5270_v23 = vpop.f32.mrf.mxu3 }
 0x5e6   : >> { %v5830_v35 = vmax.f32 %v5767_v22, %v5799_v45  ;;  %5737 = vst.msk [vmem:[#allocation6 + $0x10] sm:$0xff] %vm484_vm1, %v5705_v60  ;;  %v5360_v53 = vadd.f32 %v5270_v23, %v5082_v32  ;;  %v4802_v52 = vadd.f32 %v4714_v18, %v14503_v4  ;;  %v14506_v22 = vld [vmem:[#allocation70_spill] sm:$0xff] }
 0x5e8   : >> { %5846 = vst.msk [vmem:[#allocation7] sm:$0xff] %vm484_vm1, %v5830_v35  ;;  %v5638_v27 = vadd.f32 %v5548_v57, %v5360_v53  ;;  %9507 = vmatmul.msk.f32.gmra.mxu1 %vm279_vm0, %v12631_v1  ;;  %9577 = vmatmul.msk.f32.gmra.mxu2 %vm279_vm0, %v12634_v24 }
 0x5e9   : >> { %v5551_v16 = vpop.f32.mrf.mxu0 }
 0x5ea   : >> { %v5674_v43 = vadd.f32 %v12968_v30, %v5638_v27  ;;  %9645 = vmatmul.msk.f32.gmra.mxu3 %vm279_vm0, %v9609_v5 }
 0x5eb   : >> { %v4995_v15 = vpop.f32.mrf.mxu2 }
 0x5ec   : >> { %v5706_v29 = vmax.f32 %v5674_v43, 0.0  ;;  %v5083_v7 = vadd.f32 %v4995_v15, %v4802_v52  ;;  %9713 = vmatmul.msk.f32.gmra.mxu0 %vm279_vm0, %v14504_v51  ;;  %v14507_v52 = vld [vmem:[#allocation71_spill] sm:$0xff] }
 0x5ed   : >> { %v4717_v3 = vpop.f32.mrf.mxu1  ;;  %v5273_v36 = vpop.f32.mrf.mxu3 }
 0x5ee   : >> { %5738 = vst.msk [vmem:[#allocation6 + $0x18] sm:$0xff] %vm484_vm1, %v5706_v29  ;;  %v5361_v1 = vadd.f32 %v5273_v36, %v5083_v7  ;;  %v4803_v8 = vadd.f32 %v4717_v3, %v14505_v14  ;;  %v14508_v14 = vld [vmem:[#allocation76_spill] sm:$0xff] }
 0x5f0   : >> { %v5639_v24 = vadd.f32 %v5551_v16, %v5361_v1  ;;  %9508 = vmatmul.msk.f32.gmra.mxu1 %vm279_vm0, %v12648_v49  ;;  %9578 = vmatmul.msk.f32.gmra.mxu2 %vm279_vm0, %v12651_v6  ;;  %v9612_v16 = vld [vmem:[%s12006_s28 + $0x170] sm:$0xff] }
 0x5f1   : >> { %v5554_v58 = vpop.f32.mrf.mxu0 }
 0x5f2   : >> { %v5675_v55 = vadd.f32 %v12968_v30, %v5639_v24  ;;  %9646 = vmatmul.msk.f32.gmra.mxu3 %vm279_vm0, %v9610_v2 }
 0x5f3   : >> { %v4998_v40 = vpop.f32.mrf.mxu2 }
 0x5f4   : >> { %v5707_v9 = vmax.f32 %v5675_v55, 0.0  ;;  %v5084_v20 = vadd.f32 %v4998_v40, %v4803_v8  ;;  %9714 = vmatmul.msk.f32.gmra.mxu0 %vm279_vm0, %v12719_v63  ;;  %v13055_v55 = vld [vmem:[%s12006_s28 + $0x189] sm:$0xff] }
 0x5f5   : >> { %v5769_v57 = vld [vmem:[#allocation6 + $0x10] ss:$2 sm:$0xff]  ;;  %v5801_v12 = vld [vmem:[#allocation6 + $0x11] ss:$2 sm:$0xff]  ;;  %v4720_v49 = vpop.f32.mrf.mxu1  ;;  %v5276_v28 = vpop.f32.mrf.mxu3 }
 0x5f6   : >> { %v5831_v34 = vmax.f32 %v5769_v57, %v5801_v12  ;;  %5739 = vst.msk [vmem:[#allocation6 + $0x20] sm:$0xff] %vm484_vm1, %v5707_v9  ;;  %v5362_v6 = vadd.f32 %v5276_v28, %v5084_v20  ;;  %v4804_v45 = vadd.f32 %v4720_v49, %v14506_v22  ;;  %v14509_v40 = vld [vmem:[#allocation72_spill] sm:$0xff]  ;;  %v14510_v57 = vld [vmem:[#allocation78_spill] sm:$0xff] }
 0x5f8   : >> { %5847 = vst.msk [vmem:[#allocation7 + $0x8] sm:$0xff] %vm484_vm1, %v5831_v34  ;;  %v5640_v60 = vadd.f32 %v5554_v58, %v5362_v6  ;;  %9509 = vmatmul.msk.f32.gmra.mxu1 %vm279_vm0, %v12665_v42  ;;  %9579 = vmatmul.msk.f32.gmra.mxu2 %vm279_vm0, %v12668_v54 }
 0x5f9   : >> { %v5557_v32 = vpop.f32.mrf.mxu0 }
 0x5fa   : >> { %v5676_v18 = vadd.f32 %v12968_v30, %v5640_v60  ;;  %9647 = vmatmul.msk.f32.gmra.mxu3 %vm279_vm0, %v9611_v11  ;;  %v5862_v11 = vld [vmem:[#allocation7] sm:$0xff] }
 0x5fb   : >> { %v5001_v23 = vpop.f32.mrf.mxu2 }
 0x5fc   : >> { %v5708_v35 = vmax.f32 %v5676_v18, 0.0  ;;  %v5085_v53 = vadd.f32 %v5001_v23, %v4804_v45  ;;  %9715 = vmatmul.msk.f32.gmra.mxu0 %vm279_vm0, %v12739_v48  ;;  %v14511_v45 = vld [vmem:[#allocation79_spill] sm:$0xff]  ;;  %v13070_v23 = vld [vmem:[%s12006_s28 + $0x191] sm:$0xff] }
 0x5fd   : >> { %v4723_v5 = vpop.f32.mrf.mxu1  ;;  %v5279_v27 = vpop.f32.mrf.mxu3 }
 0x5fe   : >> { %5740 = vst.msk [vmem:[#allocation6 + $0x28] sm:$0xff] %vm484_vm1, %v5708_v35  ;;  %v5363_v42 = vadd.f32 %v5279_v27, %v5085_v53  ;;  %v4805_v43 = vadd.f32 %v4723_v5, %v14507_v52  ;;  %v14512_v35 = vld [vmem:[#allocation73_spill] sm:$0xff] }
 0x5ff   : >> { %v14513_v27 = vld [vmem:[#allocation81_spill] sm:$0xff] }
 0x600   : >> { %v5641_v54 = vadd.f32 %v5557_v32, %v5363_v42  ;;  %9510 = vmatmul.msk.f32.gmra.mxu1 %vm279_vm0, %v12682_v21  ;;  %9580 = vmatmul.msk.f32.gmra.mxu2 %vm279_vm0, %v12685_v44 }
 0x601   : >> { %v5560_v4 = vpop.f32.mrf.mxu0 }
 0x602   : >> { %v5677_v15 = vadd.f32 %v12968_v30, %v5641_v54  ;;  %9648 = vmatmul.msk.f32.gmra.mxu3 %vm279_vm0, %v9612_v16 }
 0x603   : >> { %v5004_v29 = vpop.f32.mrf.mxu2 }
 0x604   : >> { %v5709_v7 = vmax.f32 %v5677_v15, 0.0  ;;  %v5086_v3 = vadd.f32 %v5004_v29, %v4805_v43  ;;  %9716 = vmatmul.msk.f32.gmra.mxu0 %vm279_vm0, %v12759_v38 }
 0x605   : >> { %v5771_v36 = vld [vmem:[#allocation6 + $0x20] ss:$2 sm:$0xff]  ;;  %v5803_v1 = vld [vmem:[#allocation6 + $0x21] ss:$2 sm:$0xff]  ;;  %v4726_v21 = vpop.f32.mrf.mxu1  ;;  %v5282_v2 = vpop.f32.mrf.mxu3 }
 0x606   : >> { %v5832_v44 = vmax.f32 %v5771_v36, %v5803_v1  ;;  %5741 = vst.msk [vmem:[#allocation6 + $0x30] sm:$0xff] %vm484_vm1, %v5709_v7  ;;  %v5364_v24 = vadd.f32 %v5282_v2, %v5086_v3  ;;  %v4806_v9 = vadd.f32 %v4726_v21, %v14509_v40  ;;  %v13089_v36 = vld [vmem:[%s12006_s28 + $0x199] sm:$0xff]  ;;  %v5863_v40 = vld [vmem:[#allocation7 + $0x8] sm:$0xff] }
 0x607   : >> { %v14514_v1 = vld [vmem:[#allocation74_spill] sm:$0xff] }
 0x608   : >> { %5848 = vst.msk [vmem:[#allocation7 + $0x10] sm:$0xff] %vm484_vm1, %v5832_v44  ;;  %v5642_v58 = vadd.f32 %v5560_v4, %v5364_v24  ;;  %9511 = vmatmul.msk.f32.gmra.mxu1 %vm279_vm0, %v14504_v51  ;;  %9581 = vmatmul.msk.f32.gmra.mxu2 %vm279_vm0, %v14508_v14  ;;  %v14515_v44 = vld [vmem:[#allocation83_spill] sm:$0xff] }
 0x609   : >> { %v5563_v8 = vpop.f32.mrf.mxu0 }
 0x60a   : >> { %v5678_v20 = vadd.f32 %v12968_v30, %v5642_v58  ;;  %9649 = vmatmul.msk.f32.gmra.mxu3 %vm279_vm0, %v14510_v57 }
 0x60b   : >> { %v5007_v12 = vpop.f32.mrf.mxu2 }
 0x60c   : >> { %v5710_v49 = vmax.f32 %v5678_v20, 0.0  ;;  %v5087_v28 = vadd.f32 %v5007_v12, %v4806_v9  ;;  %9717 = vmatmul.msk.f32.gmra.mxu0 %vm279_vm0, %v13055_v55 }
 0x60d   : >> { %v4729_v51 = vpop.f32.mrf.mxu1  ;;  %v5285_v34 = vpop.f32.mrf.mxu3 }
 0x60e   : >> { %5742 = vst.msk [vmem:[#allocation6 + $0x38] sm:$0xff] %vm484_vm1, %v5710_v49  ;;  %v5365_v6 = vadd.f32 %v5285_v34, %v5087_v28  ;;  %v4807_v53 = vadd.f32 %v4729_v51, %v14512_v35  ;;  %v13103_v49 = vld [vmem:[%s12006_s28 + $0x1a1] sm:$0xff]  ;;  %v14516_v28 = vld [vmem:[#allocation77_spill] sm:$0xff] }
 0x60f   : >> { %v5871_v60 = vld [vmem:[#allocation7 + $0x10] sm:$0xff] }
 0x610   : >> { %v5879_v32 = vmax.f32 %v5862_v11, %v5871_v60  ;;  %v5643_v22 = vadd.f32 %v5563_v8, %v5365_v6  ;;  %9512 = vmatmul.msk.f32.gmra.mxu1 %vm279_vm0, %v12719_v63  ;;  %9582 = vmatmul.msk.f32.gmra.mxu2 %vm279_vm0, %v14511_v45  ;;  %v9549_v45 = vld [vmem:[%s12006_s28 + $0x1b7] sm:$0xff] }
 0x611   : >> { %v5566_v18 = vpop.f32.mrf.mxu0 }
 0x612   : >> { %9727 = vst.msk [vmem:[%s13072_s20 + $0x28] sm:$0xff] %vm484_vm1, %v5879_v32  ;;  %v5679_v5 = vadd.f32 %v12968_v30, %v5643_v22  ;;  %9650 = vmatmul.msk.f32.gmra.mxu3 %vm279_vm0, %v14513_v27  ;;  %v9685_v27 = vld [vmem:[%s12006_s28 + $0x1b9] sm:$0xff] }
 0x613   : >> { %v5010_v42 = vpop.f32.mrf.mxu2 }
 0x614   : >> { %v5711_v63 = vmax.f32 %v5679_v5, 0.0  ;;  %v5088_v16 = vadd.f32 %v5010_v42, %v4807_v53  ;;  %9718 = vmatmul.msk.f32.gmra.mxu0 %vm279_vm0, %v13070_v23  ;;  %v9617_v53 = vld [vmem:[%s12006_s28 + $0x1b8] sm:$0xff]  ;;  %v14517_v42 = vld [vmem:[#allocation80_spill] sm:$0xff] }
 0x615   : >> { %v5773_v54 = vld [vmem:[#allocation6 + $0x30] ss:$2 sm:$0xff]  ;;  %v5805_v4 = vld [vmem:[#allocation6 + $0x31] ss:$2 sm:$0xff]  ;;  %v4732_v52 = vpop.f32.mrf.mxu1  ;;  %v5288_v43 = vpop.f32.mrf.mxu3 }
 0x616   : >> { %v5833_v15 = vmax.f32 %v5773_v54, %v5805_v4  ;;  %5743 = vst.msk [vmem:[#allocation6 + $0x40] sm:$0xff] %vm484_vm1, %v5711_v63  ;;  %v5366_v29 = vadd.f32 %v5288_v43, %v5088_v16  ;;  %v4808_v21 = vadd.f32 %v4732_v52, %v14514_v1 }
 0x618   : >> { %5849 = vst.msk [vmem:[#allocation7 + $0x18] sm:$0xff] %vm484_vm1, %v5833_v15  ;;  %v5644_v7 = vadd.f32 %v5566_v18, %v5366_v29  ;;  %9513 = vmatmul.msk.f32.gmra.mxu1 %vm279_vm0, %v12739_v48  ;;  %9583 = vmatmul.msk.f32.gmra.mxu2 %vm279_vm0, %v12742_v37 }
 0x619   : >> { %v5569_v3 = vpop.f32.mrf.mxu0 }
 0x61a   : >> { %v5680_v2 = vadd.f32 %v12968_v30, %v5644_v7  ;;  %9651 = vmatmul.msk.f32.gmra.mxu3 %vm279_vm0, %v14515_v44  ;;  %v9618_v7 = vld [vmem:[%s12006_s28 + $0x1c0] sm:$0xff] }
 0x61b   : >> { %v5013_v24 = vpop.f32.mrf.mxu2 }
 0x61c   : >> { %v5712_v58 = vmax.f32 %v5680_v2, 0.0  ;;  %v5089_v14 = vadd.f32 %v5013_v24, %v4808_v21  ;;  %9719 = vmatmul.msk.f32.gmra.mxu0 %vm279_vm0, %v13089_v36  ;;  %v9686_v21 = vld [vmem:[%s12006_s28 + $0x1c1] sm:$0xff] }
 0x61d   : >> { %v4735_v48 = vpop.f32.mrf.mxu1  ;;  %v5291_v37 = vpop.f32.mrf.mxu3  ;;  %v14518_v2 = vld [vmem:[#allocation82_spill] sm:$0xff] }
 0x61e   : >> { %5744 = vst.msk [vmem:[#allocation6 + $0x48] sm:$0xff] %vm484_vm1, %v5712_v58  ;;  %v5367_v8 = vadd.f32 %v5291_v37, %v5089_v14  ;;  %v4809_v51 = vadd.f32 %v4735_v48, %v14516_v28 }
 0x61f   : >> { %v5872_v9 = vld [vmem:[#allocation7 + $0x18] sm:$0xff] }
 0x620   : >> { %v5880_v20 = vmax.f32 %v5863_v40, %v5872_v9  ;;  %v5645_v57 = vadd.f32 %v5569_v3, %v5367_v8  ;;  %9514 = vmatmul.msk.f32.gmra.mxu1 %vm279_vm0, %v12759_v38  ;;  %9584 = vmatmul.msk.f32.gmra.mxu2 %vm279_vm0, %v12762_v10  ;;  %v9551_v9 = vld [vmem:[%s12006_s28 + $0x1c7] sm:$0xff] }
 0x621   : >> { %v5572_v12 = vpop.f32.mrf.mxu0 }
 0x622   : >> { %9728 = vst.msk [vmem:[%s13072_s20 + $0x30] sm:$0xff] %vm484_vm1, %v5880_v20  ;;  %v5681_v34 = vadd.f32 %v12968_v30, %v5645_v57  ;;  %9652 = vmatmul.msk.f32.gmra.mxu3 %vm279_vm0, %v12771_v47 }
 0x623   : >> { %v5016_v6 = vpop.f32.mrf.mxu2 }
 0x624   : >> { %v5713_v11 = vmax.f32 %v5681_v34, 0.0  ;;  %v5090_v38 = vadd.f32 %v5016_v6, %v4809_v51  ;;  %9720 = vmatmul.msk.f32.gmra.mxu0 %vm279_vm0, %v13103_v49  ;;  %v9687_v34 = vld [vmem:[%s12006_s28 + $0x1c9] sm:$0xff] }
 0x625   : >> { %v5775_v10 = vld [vmem:[#allocation6 + $0x40] ss:$2 sm:$0xff]  ;;  %v5807_v60 = vld [vmem:[#allocation6 + $0x41] ss:$2 sm:$0xff]  ;;  %v4738_v32 = vpop.f32.mrf.mxu1  ;;  %v5294_v22 = vpop.f32.mrf.mxu3  ;;  %v14519_v6 = vld [vmem:[#allocation84_spill] sm:$0xff] }
 0x626   : >> { %v5834_v18 = vmax.f32 %v5775_v10, %v5807_v60  ;;  %5745 = vst.msk [vmem:[#allocation6 + $0x50] sm:$0xff] %vm484_vm1, %v5713_v11  ;;  %v5368_v35 = vadd.f32 %v5294_v22, %v5090_v38  ;;  %v4810_v63 = vadd.f32 %v4738_v32, %v14517_v42 }
 0x628   : >> { %5850 = vst.msk [vmem:[#allocation7 + $0x20] sm:$0xff] %vm484_vm1, %v5834_v18  ;;  %v5646_v47 = vadd.f32 %v5572_v12, %v5368_v35  ;;  %9515 = vmatmul.msk.f32.gmra.mxu1 %vm279_vm0, %v13055_v55  ;;  %9585 = vmatmul.msk.f32.gmra.mxu2 %vm279_vm0, %v9549_v45  ;;  %v9550_v55 = vld [vmem:[%s12006_s28 + $0x1bf] sm:$0xff]  ;;  %v9619_v12 = vld [vmem:[%s12006_s28 + $0x1c8] sm:$0xff]  ;;  %v9620_v35 = vld [vmem:[%s12006_s28 + $0x1d0] sm:$0xff] }
 0x629   : >> { %v5575_v5 = vpop.f32.mrf.mxu0 }
 0x62a   : >> { %v5682_v16 = vadd.f32 %v12968_v30, %v5646_v47  ;;  %9653 = vmatmul.msk.f32.gmra.mxu3 %vm279_vm0, %v9617_v53 }
 0x62b   : >> { %v5019_v54 = vpop.f32.mrf.mxu2 }
 0x62c   : >> { %v5714_v4 = vmax.f32 %v5682_v16, 0.0  ;;  %v5091_v52 = vadd.f32 %v5019_v54, %v4810_v63  ;;  %9721 = vmatmul.msk.f32.gmra.mxu0 %vm279_vm0, %v9685_v27  ;;  %v14520_v27 = vld [vmem:[#allocation85_spill] sm:$0xff] }
 0x62d   : >> { %v4741_v43 = vpop.f32.mrf.mxu1  ;;  %v5297_v15 = vpop.f32.mrf.mxu3 }
 0x62e   : >> { %5746 = vst.msk [vmem:[#allocation6 + $0x58] sm:$0xff] %vm484_vm1, %v5714_v4  ;;  %v5369_v29 = vadd.f32 %v5297_v15, %v5091_v52  ;;  %v4811_v44 = vadd.f32 %v4741_v43, %v14518_v2 }
 0x630   : >> { %v5647_v3 = vadd.f32 %v5575_v5, %v5369_v29  ;;  %9516 = vmatmul.msk.f32.gmra.mxu1 %vm279_vm0, %v13070_v23  ;;  %9586 = vmatmul.msk.f32.gmra.mxu2 %vm279_vm0, %v9550_v55  ;;  %v9688_v5 = vld [vmem:[%s12006_s28 + $0x1d1] sm:$0xff] }
 0x631   : >> { %v5578_v1 = vpop.f32.mrf.mxu0 }
 0x632   : >> { %v5683_v24 = vadd.f32 %v12968_v30, %v5647_v3  ;;  %9654 = vmatmul.msk.f32.gmra.mxu3 %vm279_vm0, %v9618_v7 }
 0x633   : >> { %v5022_v58 = vpop.f32.mrf.mxu2 }
 0x634   : >> { %v5715_v14 = vmax.f32 %v5683_v24, 0.0  ;;  %v5092_v48 = vadd.f32 %v5022_v58, %v4811_v44  ;;  %9722 = vmatmul.msk.f32.gmra.mxu0 %vm279_vm0, %v9686_v21 }
 0x635   : >> { %v5777_v37 = vld [vmem:[#allocation6 + $0x50] ss:$2 sm:$0xff]  ;;  %v5809_v8 = vld [vmem:[#allocation6 + $0x51] ss:$2 sm:$0xff]  ;;  %v4744_v23 = vpop.f32.mrf.mxu1  ;;  %v5300_v40 = vpop.f32.mrf.mxu3 }
 0x636   : >> { %v5835_v20 = vmax.f32 %v5777_v37, %v5809_v8  ;;  %5747 = vst.msk [vmem:[#allocation6 + $0x60] sm:$0xff] %vm484_vm1, %v5715_v14  ;;  %v5370_v57 = vadd.f32 %v5300_v40, %v5092_v48  ;;  %v4812_v11 = vadd.f32 %v4744_v23, %v14519_v6  ;;  %v5864_v37 = vld [vmem:[#allocation7 + $0x20] sm:$0xff] }
 0x638   : >> { %5851 = vst.msk [vmem:[#allocation7 + $0x28] sm:$0xff] %vm484_vm1, %v5835_v20  ;;  %v5648_v28 = vadd.f32 %v5578_v1, %v5370_v57  ;;  %9517 = vmatmul.msk.f32.gmra.mxu1 %vm279_vm0, %v13089_v36  ;;  %9587 = vmatmul.msk.f32.gmra.mxu2 %vm279_vm0, %v9551_v9  ;;  %v9552_v36 = vld [vmem:[%s12006_s28 + $0x1cf] sm:$0xff] }
 0x639   : >> { %v5581_v51 = vpop.f32.mrf.mxu0 }
 0x63a   : >> { %v5684_v38 = vadd.f32 %v12968_v30, %v5648_v28  ;;  %9655 = vmatmul.msk.f32.gmra.mxu3 %vm279_vm0, %v9619_v12 }
 0x63b   : >> { %v5025_v10 = vpop.f32.mrf.mxu2 }
 0x63c   : >> { %v5716_v60 = vmax.f32 %v5684_v38, 0.0  ;;  %v5093_v32 = vadd.f32 %v5025_v10, %v4812_v11  ;;  %9723 = vmatmul.msk.f32.gmra.mxu0 %vm279_vm0, %v9687_v34 }
 0x63d   : >> { %v4747_v22 = vpop.f32.mrf.mxu1  ;;  %v5303_v45 = vpop.f32.mrf.mxu3 }
 0x63e   : >> { %5748 = vst.msk [vmem:[#allocation6 + $0x68] sm:$0xff] %vm484_vm1, %v5716_v60  ;;  %v5371_v18 = vadd.f32 %v5303_v45, %v5093_v32  ;;  %v4813_v42 = vadd.f32 %v4747_v22, %v14520_v27 }
 0x640   : >> { %v5649_v53 = vadd.f32 %v5581_v51, %v5371_v18  ;;  %9518 = vmatmul.msk.f32.gmra.mxu1 %vm279_vm0, %v13103_v49  ;;  %9588 = vmatmul.msk.f32.gmra.mxu2 %vm279_vm0, %v9552_v36 }
 0x641   : >> { %v5584_v47 = vpop.f32.mrf.mxu0 }
 0x642   : >> { %v5685_v63 = vadd.f32 %v12968_v30, %v5649_v53  ;;  %9656 = vmatmul.msk.f32.gmra.mxu3 %vm279_vm0, %v9620_v35 }
 0x643   : >> { %v5028_v16 = vpop.f32.mrf.mxu2 }
 0x644   : >> { %v5717_v54 = vmax.f32 %v5685_v63, 0.0  ;;  %v5094_v4 = vadd.f32 %v5028_v16, %v4813_v42  ;;  %9724 = vmatmul.msk.f32.gmra.mxu0 %vm279_vm0, %v9688_v5  ;;  %v5865_v5 = vld [vmem:[#allocation7 + $0x28] sm:$0xff] }
 0x645   : >> { %v5779_v52 = vld [vmem:[#allocation6 + $0x60] ss:$2 sm:$0xff]  ;;  %v5811_v43 = vld [vmem:[#allocation6 + $0x61] ss:$2 sm:$0xff]  ;;  %v4750_v15 = vpop.f32.mrf.mxu1  ;;  %v5306_v55 = vpop.f32.mrf.mxu3 }
 0x646   : >> { %v5836_v49 = vmax.f32 %v5779_v52, %v5811_v43  ;;  %5749 = vst.msk [vmem:[#allocation6 + $0x70] sm:$0xff] %vm484_vm1, %v5717_v54  ;;  %v5372_v29 = vadd.f32 %v5306_v55, %v5094_v4  ;;  %v4814_v1 = vadd.f32 %v4750_v15, %v12790_v41 }
 0x648   : >> { %5852 = vst.msk [vmem:[#allocation7 + $0x30] sm:$0xff] %vm484_vm1, %v5836_v49  ;;  %v5650_v7 = vadd.f32 %v5584_v47, %v5372_v29 }
 0x649   : >> { %v5587_v3 = vpop.f32.mrf.mxu0 }
 0x64a   : >> { %v5686_v21 = vadd.f32 %v12968_v30, %v5650_v7 }
 0x64b   : >> { %v5031_v2 = vpop.f32.mrf.mxu2 }
 0x64c   : >> { %v5718_v44 = vmax.f32 %v5686_v21, 0.0  ;;  %v5095_v24 = vadd.f32 %v5031_v2, %v4814_v1 }
 0x64d   : >> { %v4753_v58 = vpop.f32.mrf.mxu1  ;;  %v5309_v14 = vpop.f32.mrf.mxu3 }
 0x64e   : >> { %5750 = vst.msk [vmem:[#allocation6 + $0x78] sm:$0xff] %vm484_vm1, %v5718_v44  ;;  %v5373_v48 = vadd.f32 %v5309_v14, %v5095_v24  ;;  %v4815_v20 = vadd.f32 %v4753_v58, %v12801_v0 }
 0x64f   : >> { %v5873_v8 = vld [vmem:[#allocation7 + $0x30] sm:$0xff] }
 0x650   : >> { %v5881_v23 = vmax.f32 %v5864_v37, %v5873_v8  ;;  %v5651_v40 = vadd.f32 %v5587_v3, %v5373_v48 }
 0x651   : >> { %v5590_v9 = vpop.f32.mrf.mxu0 }
 0x652   : >> { %9729 = vst.msk [vmem:[%s13072_s20 + $0x48] sm:$0xff] %vm484_vm1, %v5881_v23  ;;  %v5687_v41 = vadd.f32 %v12968_v30, %v5651_v40 }
 0x653   : >> { %v5034_v57 = vpop.f32.mrf.mxu2 }
 0x654   : >> { %v5719_v12 = vmax.f32 %v5687_v41, 0.0  ;;  %v5096_v28 = vadd.f32 %v5034_v57, %v4815_v20 }
 0x655   : >> { %v5781_v51 = vld [vmem:[#allocation6 + $0x70] ss:$2 sm:$0xff]  ;;  %v5813_v34 = vld [vmem:[#allocation6 + $0x71] ss:$2 sm:$0xff]  ;;  %v4756_v6 = vpop.f32.mrf.mxu1  ;;  %v5312_v11 = vpop.f32.mrf.mxu3 }
 0x656   : >> { %v5837_v38 = vmax.f32 %v5781_v51, %v5813_v34  ;;  %5751 = vst.msk [vmem:[#allocation6 + $0x80] sm:$0xff] %vm484_vm1, %v5719_v12  ;;  %v5374_v10 = vadd.f32 %v5312_v11, %v5096_v28  ;;  %v4816_v0 = vadd.f32 %v4756_v6, %v12812_v56 }
 0x658   : >> { %5853 = vst.msk [vmem:[#allocation7 + $0x38] sm:$0xff] %vm484_vm1, %v5837_v38  ;;  %v5652_v60 = vadd.f32 %v5590_v9, %v5374_v10 }
 0x659   : >> { %v5593_v32 = vpop.f32.mrf.mxu0 }
 0x65a   : >> { %v5688_v22 = vadd.f32 %v12968_v30, %v5652_v60 }
 0x65b   : >> { %v5037_v45 = vpop.f32.mrf.mxu2 }
 0x65c   : >> { %v5720_v36 = vmax.f32 %v5688_v22, 0.0  ;;  %v5097_v18 = vadd.f32 %v5037_v45, %v4816_v0 }
 0x65d   : >> { %v4759_v35 = vpop.f32.mrf.mxu1  ;;  %v5315_v53 = vpop.f32.mrf.mxu3 }
 0x65e   : >> { %5752 = vst.msk [vmem:[#allocation6 + $0x88] sm:$0xff] %vm484_vm1, %v5720_v36  ;;  %v5375_v47 = vadd.f32 %v5315_v53, %v5097_v18  ;;  %v4817_v54 = vadd.f32 %v4759_v35, %v12823_v59 }
 0x65f   : >> { %v5874_v27 = vld [vmem:[#allocation7 + $0x38] sm:$0xff] }
 0x660   : >> { %v5882_v42 = vmax.f32 %v5865_v5, %v5874_v27  ;;  %v5653_v63 = vadd.f32 %v5593_v32, %v5375_v47 }
 0x661   : >> { %v5596_v16 = vpop.f32.mrf.mxu0 }
 0x662   : >> { %9730 = vst.msk [vmem:[%s13072_s20 + $0x50] sm:$0xff] %vm484_vm1, %v5882_v42  ;;  %v5689_v56 = vadd.f32 %v12968_v30, %v5653_v63 }
 0x663   : >> { %v5040_v4 = vpop.f32.mrf.mxu2 }
 0x664   : >> { %v5721_v52 = vmax.f32 %v5689_v56, 0.0  ;;  %v5098_v43 = vadd.f32 %v5040_v4, %v4817_v54 }
 0x665   : >> { %v5783_v15 = vld [vmem:[#allocation6 + $0x80] ss:$2 sm:$0xff]  ;;  %v5815_v55 = vld [vmem:[#allocation6 + $0x81] ss:$2 sm:$0xff]  ;;  %v4762_v49 = vpop.f32.mrf.mxu1  ;;  %v5318_v29 = vpop.f32.mrf.mxu3 }
 0x666   : >> { %v5838_v7 = vmax.f32 %v5783_v15, %v5815_v55  ;;  %5753 = vst.msk [vmem:[#allocation6 + $0x90] sm:$0xff] %vm484_vm1, %v5721_v52  ;;  %v5376_v3 = vadd.f32 %v5318_v29, %v5098_v43  ;;  %v4818_v2 = vadd.f32 %v4762_v49, %v12834_v19 }
 0x668   : >> { %5854 = vst.msk [vmem:[#allocation7 + $0x40] sm:$0xff] %vm484_vm1, %v5838_v7  ;;  %v5654_v1 = vadd.f32 %v5596_v16, %v5376_v3 }
 0x669   : >> { %v5599_v21 = vpop.f32.mrf.mxu0 }
 0x66a   : >> { %v5690_v59 = vadd.f32 %v12968_v30, %v5654_v1 }
 0x66b   : >> { %v5043_v44 = vpop.f32.mrf.mxu2 }
 0x66c   : >> { %v5722_v24 = vmax.f32 %v5690_v59, 0.0  ;;  %v5099_v58 = vadd.f32 %v5043_v44, %v4818_v2 }
 0x66d   : >> { %v4765_v14 = vpop.f32.mrf.mxu1  ;;  %v5321_v48 = vpop.f32.mrf.mxu3 }
 0x66e   : >> { %5754 = vst.msk [vmem:[#allocation6 + $0x98] sm:$0xff] %vm484_vm1, %v5722_v24  ;;  %v5377_v37 = vadd.f32 %v5321_v48, %v5099_v58  ;;  %v4819_v40 = vadd.f32 %v4765_v14, %v12845_v33 }
 0x670   : >> { %v5655_v8 = vadd.f32 %v5599_v21, %v5377_v37  ;;  %v5866_v21 = vld [vmem:[#allocation7 + $0x40] sm:$0xff] }
 0x671   : >> { %v5602_v23 = vpop.f32.mrf.mxu0 }
 0x672   : >> { %v5691_v9 = vadd.f32 %v12968_v30, %v5655_v8 }
 0x673   : >> { %v5046_v20 = vpop.f32.mrf.mxu2 }
 0x674   : >> { %v5723_v41 = vmax.f32 %v5691_v9, 0.0  ;;  %v5100_v57 = vadd.f32 %v5046_v20, %v4819_v40 }
 0x675   : >> { %v5785_v19 = vld [vmem:[#allocation6 + $0x90] ss:$2 sm:$0xff]  ;;  %v5817_v12 = vld [vmem:[#allocation6 + $0x91] ss:$2 sm:$0xff]  ;;  %v4768_v28 = vpop.f32.mrf.mxu1  ;;  %v5324_v51 = vpop.f32.mrf.mxu3 }
 0x676   : >> { %v5839_v34 = vmax.f32 %v5785_v19, %v5817_v12  ;;  %5755 = vst.msk [vmem:[#allocation6 + $0xa0] sm:$0xff] %vm484_vm1, %v5723_v41  ;;  %v5378_v6 = vadd.f32 %v5324_v51, %v5100_v57  ;;  %v4820_v10 = vadd.f32 %v4768_v28, %v12856_v31 }
 0x678   : >> { %5855 = vst.msk [vmem:[#allocation7 + $0x48] sm:$0xff] %vm484_vm1, %v5839_v34  ;;  %v5656_v11 = vadd.f32 %v5602_v23, %v5378_v6 }
 0x679   : >> { %v5605_v38 = vpop.f32.mrf.mxu0 }
 0x67a   : >> { %v5692_v33 = vadd.f32 %v12968_v30, %v5656_v11 }
 0x67b   : >> { %v5049_v60 = vpop.f32.mrf.mxu2 }
 0x67c   : >> { %v5724_v32 = vmax.f32 %v5692_v33, 0.0  ;;  %v5101_v0 = vadd.f32 %v5049_v60, %v4820_v10 }
 0x67d   : >> { %v4771_v22 = vpop.f32.mrf.mxu1  ;;  %v5327_v45 = vpop.f32.mrf.mxu3 }
 0x67e   : >> { %5756 = vst.msk [vmem:[#allocation6 + $0xa8] sm:$0xff] %vm484_vm1, %v5724_v32  ;;  %v5379_v36 = vadd.f32 %v5327_v45, %v5101_v0  ;;  %v4821_v53 = vadd.f32 %v4771_v22, %v12867_v13 }
 0x67f   : >> { %v5867_v10 = vld [vmem:[#allocation7 + $0x48] sm:$0xff] }
 0x680   : >> { %v5657_v18 = vadd.f32 %v5605_v38, %v5379_v36 }
 0x681   : >> { %v5608_v35 = vpop.f32.mrf.mxu0 }
 0x682   : >> { %v5693_v47 = vadd.f32 %v12968_v30, %v5657_v18 }
 0x683   : >> { %v5052_v5 = vpop.f32.mrf.mxu2 }
 0x684   : >> { %v5725_v27 = vmax.f32 %v5693_v47, 0.0  ;;  %v5102_v42 = vadd.f32 %v5052_v5, %v4821_v53 }
 0x685   : >> { %v5787_v31 = vld [vmem:[#allocation6 + $0xa0] ss:$2 sm:$0xff]  ;;  %v5819_v63 = vld [vmem:[#allocation6 + $0xa1] ss:$2 sm:$0xff]  ;;  %v4774_v16 = vpop.f32.mrf.mxu1  ;;  %v5330_v54 = vpop.f32.mrf.mxu3 }
 0x686   : >> { %v5840_v56 = vmax.f32 %v5787_v31, %v5819_v63  ;;  %5757 = vst.msk [vmem:[#allocation6 + $0xb0] sm:$0xff] %vm484_vm1, %v5725_v27  ;;  %v5380_v4 = vadd.f32 %v5330_v54, %v5102_v42  ;;  %v4822_v13 = vadd.f32 %v4774_v16, %v12878_v26 }
 0x688   : >> { %5856 = vst.msk [vmem:[#allocation7 + $0x50] sm:$0xff] %vm484_vm1, %v5840_v56  ;;  %v5658_v52 = vadd.f32 %v5608_v35, %v5380_v4 }
 0x689   : >> { %v5611_v43 = vpop.f32.mrf.mxu0 }
 0x68a   : >> { %v5694_v15 = vadd.f32 %v12968_v30, %v5658_v52 }
 0x68b   : >> { %v5055_v55 = vpop.f32.mrf.mxu2 }
 0x68c   : >> { %v5726_v49 = vmax.f32 %v5694_v15, 0.0  ;;  %v5103_v29 = vadd.f32 %v5055_v55, %v4822_v13 }
 0x68d   : >> { %v4777_v7 = vpop.f32.mrf.mxu1  ;;  %v5333_v3 = vpop.f32.mrf.mxu3 }
 0x68e   : >> { %5758 = vst.msk [vmem:[#allocation6 + $0xb8] sm:$0xff] %vm484_vm1, %v5726_v49  ;;  %v5381_v1 = vadd.f32 %v5333_v3, %v5103_v29  ;;  %v4823_v58 = vadd.f32 %v4777_v7, %v12889_v61 }
 0x68f   : >> { %v5875_v2 = vld [vmem:[#allocation7 + $0x50] sm:$0xff] }
 0x690   : >> { %v5883_v59 = vmax.f32 %v5866_v21, %v5875_v2  ;;  %v5659_v44 = vadd.f32 %v5611_v43, %v5381_v1 }
 0x691   : >> { %v5614_v24 = vpop.f32.mrf.mxu0 }
 0x692   : >> { %9731 = vst.msk [vmem:[%s13072_s20 + $0x68] sm:$0xff] %vm484_vm1, %v5883_v59  ;;  %v5695_v26 = vadd.f32 %v12968_v30, %v5659_v44 }
 0x693   : >> { %v5058_v14 = vpop.f32.mrf.mxu2 }
 0x694   : >> { %v5727_v48 = vmax.f32 %v5695_v26, 0.0  ;;  %v5104_v37 = vadd.f32 %v5058_v14, %v4823_v58 }
 0x695   : >> { %v5789_v8 = vld [vmem:[#allocation6 + $0xb0] ss:$2 sm:$0xff]  ;;  %v5821_v23 = vld [vmem:[#allocation6 + $0xb1] ss:$2 sm:$0xff]  ;;  %v4780_v40 = vpop.f32.mrf.mxu1  ;;  %v5336_v9 = vpop.f32.mrf.mxu3 }
 0x696   : >> { %v5841_v20 = vmax.f32 %v5789_v8, %v5821_v23  ;;  %5759 = vst.msk [vmem:[#allocation6 + $0xc0] sm:$0xff] %vm484_vm1, %v5727_v48  ;;  %v5382_v41 = vadd.f32 %v5336_v9, %v5104_v37  ;;  %v4824_v61 = vadd.f32 %v4780_v40, %v12900_v39 }
 0x698   : >> { %5857 = vst.msk [vmem:[#allocation7 + $0x58] sm:$0xff] %vm484_vm1, %v5841_v20  ;;  %v5660_v57 = vadd.f32 %v5614_v24, %v5382_v41 }
 0x699   : >> { %v5617_v19 = vpop.f32.mrf.mxu0 }
 0x69a   : >> { %v5696_v12 = vadd.f32 %v12968_v30, %v5660_v57 }
 0x69b   : >> { %v5061_v28 = vpop.f32.mrf.mxu2 }
 0x69c   : >> { %v5728_v51 = vmax.f32 %v5696_v12, 0.0  ;;  %v5105_v34 = vadd.f32 %v5061_v28, %v4824_v61 }
 0x69d   : >> { %v4783_v6 = vpop.f32.mrf.mxu1  ;;  %v5339_v11 = vpop.f32.mrf.mxu3 }
 0x69e   : >> { %5760 = vst.msk [vmem:[#allocation6 + $0xc8] sm:$0xff] %vm484_vm1, %v5728_v51  ;;  %v5383_v38 = vadd.f32 %v5339_v11, %v5105_v34  ;;  %v4825_v22 = vadd.f32 %v4783_v6, %v12911_v46 }
 0x69f   : >> { %v5876_v33 = vld [vmem:[#allocation7 + $0x58] sm:$0xff] }
 0x6a0   : >> { %v5884_v60 = vmax.f32 %v5867_v10, %v5876_v33  ;;  %v5661_v32 = vadd.f32 %v5617_v19, %v5383_v38 }
 0x6a1   : >> { %v5620_v0 = vpop.f32.mrf.mxu0 }
 0x6a2   : >> { %9732 = vst.msk [vmem:[%s13072_s20 + $0x70] sm:$0xff] %vm484_vm1, %v5884_v60  ;;  %v5697_v39 = vadd.f32 %v12968_v30, %v5661_v32 }
 0x6a3   : >> { %v5064_v45 = vpop.f32.mrf.mxu2 }
 0x6a4   : >> { %v5729_v36 = vmax.f32 %v5697_v39, 0.0  ;;  %v5106_v18 = vadd.f32 %v5064_v45, %v4825_v22 }
 0x6a5   : >> { %v5791_v35 = vld [vmem:[#allocation6 + $0xc0] ss:$2 sm:$0xff]  ;;  %v5823_v53 = vld [vmem:[#allocation6 + $0xc1] ss:$2 sm:$0xff]  ;;  %v4786_v47 = vpop.f32.mrf.mxu1  ;;  %v5342_v5 = vpop.f32.mrf.mxu3 }
 0x6a6   : >> { %v5842_v27 = vmax.f32 %v5791_v35, %v5823_v53  ;;  %5761 = vst.msk [vmem:[#allocation6 + $0xd0] sm:$0xff] %vm484_vm1, %v5729_v36  ;;  %v5384_v42 = vadd.f32 %v5342_v5, %v5106_v18  ;;  %v4826_v16 = vadd.f32 %v4786_v47, %v12922_v50  ;;  %v9741_v35 = vld [vmem:[%s14309_s5 + $0x70] sm:$0xff] (%p3217_p5)  ;;  %v9740_v53 = vld [vmem:[%s14309_s5 + $0x68] sm:$0xff] (%p3217_p5)  ;;  %v9739_v47 = vld [vmem:[%s14309_s5 + $0x60] sm:$0xff] (%p3217_p5) }
 0x6a7   : > { %v9738_v5 = vld [vmem:[%s14309_s5 + $0x58] sm:$0xff] (%p3217_p5) }
 0x6a8   : >> { %5858 = vst.msk [vmem:[#allocation7 + $0x60] sm:$0xff] %vm484_vm1, %v5842_v27  ;;  %v5662_v31 = vadd.f32 %v5620_v0, %v5384_v42  ;;  %v9737_v27 = vld [vmem:[%s14309_s5 + $0x50] sm:$0xff] (%p3217_p5)  ;;  %v9736_v42 = vld [vmem:[%s14309_s5 + $0x48] sm:$0xff] (%p3217_p5) }
 0x6a9   : >> { %v5623_v63 = vpop.f32.mrf.mxu0 }
 0x6aa   : >> { %v5698_v46 = vadd.f32 %v12968_v30, %v5662_v31  ;;  %v9735_v31 = vld [vmem:[%s14309_s5 + $0x40] sm:$0xff] (%p3217_p5) }
 0x6ab   : >> { %v5067_v54 = vpop.f32.mrf.mxu2 }
 0x6ac   : >> { %v5730_v56 = vmax.f32 %v5698_v46, 0.0  ;;  %v5107_v4 = vadd.f32 %v5067_v54, %v4826_v16  ;;  %v9814_v46 = vld [vmem:[%s14309_s5 + $0xb8] sm:$0xff] (%p3217_p5) }
 0x6ad   : >> { %v4789_v52 = vpop.f32.mrf.mxu1  ;;  %v5345_v43 = vpop.f32.mrf.mxu3 }
 0x6ae   : >> { %5762 = vst.msk [vmem:[#allocation6 + $0xd8] sm:$0xff] %vm484_vm1, %v5730_v56  ;;  %v5385_v13 = vadd.f32 %v5345_v43, %v5107_v4  ;;  %v4827_v49 = vadd.f32 %v4789_v52, %v12933_v25  ;;  %v5938_v56 = vld [vmem:[%s14309_s5 + $0x38] sm:$0xff] (%p3217_p5)  ;;  %v9813_v52 = vld [vmem:[%s14309_s5 + $0xb0] sm:$0xff] (%p3217_p5) }
 0x6af   : >> { %v5868_v33 = vld [vmem:[#allocation7 + $0x60] sm:$0xff]  ;;  %v9854_v4 = vld [vmem:[%s14309_s5 + $0xf8] sm:$0xff] (%p3217_p5)  ;;  %v5937_v43 = vld [vmem:[%s14309_s5 + $0x30] sm:$0xff] (%p3217_p5) }
 0x6b0   : >> { %v5663_v15 = vadd.f32 %v5623_v63, %v5385_v13 }
 0x6b1   : >> { %v5626_v55 = vpop.f32.mrf.mxu0 }
 0x6b2   : >> { %v5699_v29 = vadd.f32 %v12968_v30, %v5663_v15  ;;  %v9853_v15 = vld [vmem:[%s14309_s5 + $0xf0] sm:$0xff] (%p3217_p5) }
 0x6b3   : >> { %v5070_v7 = vpop.f32.mrf.mxu2 }
 0x6b4   : >> { %v5731_v3 = vmax.f32 %v5699_v29, 0.0  ;;  %v5108_v1 = vadd.f32 %v5070_v7, %v4827_v49  ;;  %v9812_v49 = vld [vmem:[%s14309_s5 + $0xa8] sm:$0xff] (%p3217_p5) }
 0x6b5   : >> { %v5793_v50 = vld [vmem:[#allocation6 + $0xd0] ss:$2 sm:$0xff]  ;;  %v5825_v21 = vld [vmem:[#allocation6 + $0xd1] ss:$2 sm:$0xff]  ;;  %v4792_v2 = vpop.f32.mrf.mxu1  ;;  %v5348_v59 = vpop.f32.mrf.mxu3  ;;  %v9852_v29 = vld [vmem:[%s14309_s5 + $0xe8] sm:$0xff] (%p3217_p5) }
 0x6b6   : >> { %v5843_v44 = vmax.f32 %v5793_v50, %v5825_v21  ;;  %5763 = vst.msk [vmem:[#allocation6 + $0xe0] sm:$0xff] %vm484_vm1, %v5731_v3  ;;  %v5386_v24 = vadd.f32 %v5348_v59, %v5108_v1  ;;  %v4828_v26 = vadd.f32 %v4792_v2, %v12944_v17  ;;  %v5936_v7 = vld [vmem:[%s14309_s5 + $0x28] sm:$0xff] (%p3217_p5)  ;;  %v9893_v50 = vld [vmem:[%s14309_s5 + $0x130] sm:$0xff] (%p3217_p5)  ;;  %v9811_v21 = vld [vmem:[%s14309_s5 + $0xa0] sm:$0xff] (%p3217_p5) }
 0x6b7   : > { %v5935_v59 = vld [vmem:[%s14309_s5 + $0x20] sm:$0xff] (%p3217_p5) }
 0x6b8   : >> { %5859 = vst.msk [vmem:[#allocation7 + $0x68] sm:$0xff] %vm484_vm1, %v5843_v44  ;;  %v5664_v58 = vadd.f32 %v5626_v55, %v5386_v24  ;;  %v9894_v55 = vld [vmem:[%s14309_s5 + $0x138] sm:$0xff] (%p3217_p5)  ;;  %v9851_v44 = vld [vmem:[%s14309_s5 + $0xe0] sm:$0xff] (%p3217_p5)  ;;  %v9892_v24 = vld [vmem:[%s14309_s5 + $0x128] sm:$0xff] (%p3217_p5) }
 0x6b9   : >> { %v5629_v48 = vpop.f32.mrf.mxu0 }
 0x6ba   : >> { %v5700_v25 = vadd.f32 %v12968_v30, %v5664_v58  ;;  %v9810_v58 = vld [vmem:[%s14309_s5 + $0x98] sm:$0xff] (%p3217_p5) }
 0x6bb   : >> { %v5073_v14 = vpop.f32.mrf.mxu2 }
 0x6bc   : >> { %v5732_v37 = vmax.f32 %v5700_v25, 0.0  ;;  %v5109_v8 = vadd.f32 %v5073_v14, %v4828_v26  ;;  %v5934_v26 = vld [vmem:[%s14309_s5 + $0x18] sm:$0xff] (%p3217_p5) }
 0x6bd   : >> { %v5351_v23 = vpop.f32.mrf.mxu3  ;;  %v4795_v9 = vpop.f32.mrf.mxu1  ;;  %v9850_v14 = vld [vmem:[%s14309_s5 + $0xd8] sm:$0xff] (%p3217_p5) }
 0x6be   : >> { %5764 = vst.msk [vmem:[#allocation6 + $0xe8] sm:$0xff] %vm484_vm1, %v5732_v37  ;;  %v5387_v40 = vadd.f32 %v5351_v23, %v5109_v8  ;;  %v4829_v41 = vadd.f32 %v4795_v9, %v12955_v62  ;;  %v9809_v37 = vld [vmem:[%s14309_s5 + $0x90] sm:$0xff] (%p3217_p5) }
 0x6bf   : >> { %v5869_v45 = vld [vmem:[#allocation7 + $0x68] sm:$0xff]  ;;  %v9849_v8 = vld [vmem:[%s14309_s5 + $0xd0] sm:$0xff] (%p3217_p5) }
 0x6c0   : >> { %v5665_v20 = vadd.f32 %v5629_v48, %v5387_v40  ;;  %v9891_v48 = vld [vmem:[%s14309_s5 + $0x120] sm:$0xff] (%p3217_p5)  ;;  %v5933_v23 = vld [vmem:[%s14309_s5 + $0x10] sm:$0xff] (%p3217_p5) }
 0x6c1   : >> { %v5632_v34 = vpop.f32.mrf.mxu0 }
 0x6c2   : >> { %v5701_v57 = vadd.f32 %v12968_v30, %v5665_v20  ;;  %v9890_v20 = vld [vmem:[%s14309_s5 + $0x118] sm:$0xff] (%p3217_p5) }
 0x6c3   : >> { %v5076_v19 = vpop.f32.mrf.mxu2 }
 0x6c4   : >> { %v5733_v61 = vmax.f32 %v5701_v57, 0.0  ;;  %v5110_v12 = vadd.f32 %v5076_v19, %v4829_v41  ;;  %v9808_v57 = vld [vmem:[%s14309_s5 + $0x88] sm:$0xff] (%p3217_p5) }
 0x6c5   : >> { %v5795_v17 = vld [vmem:[#allocation6 + $0xe0] ss:$2 sm:$0xff]  ;;  %v5827_v28 = vld [vmem:[#allocation6 + $0xe1] ss:$2 sm:$0xff]  ;;  %v5354_v51 = vpop.f32.mrf.mxu3 }
 0x6c6   : >> { %v5844_v6 = vmax.f32 %v5795_v17, %v5827_v28  ;;  %5765 = vst.msk [vmem:[#allocation6 + $0xf0] sm:$0xff] %vm484_vm1, %v5733_v61  ;;  %v5388_v11 = vadd.f32 %v5354_v51, %v5110_v12  ;;  %v9848_v61 = vld [vmem:[%s14309_s5 + $0xc8] sm:$0xff] (%p3217_p5)  ;;  %v9889_v12 = vld [vmem:[%s14309_s5 + $0x110] sm:$0xff] (%p3217_p5) }
 0x6c7   : > { %v5932_v17 = vld [vmem:[%s14309_s5 + $0x8] sm:$0xff] (%p3217_p5) }
 0x6c8   : >> { %5860 = vst.msk [vmem:[#allocation7 + $0x70] sm:$0xff] %vm484_vm1, %v5844_v6  ;;  %v5666_v38 = vadd.f32 %v5632_v34, %v5388_v11  ;;  %v9807_v6 = vld [vmem:[%s14309_s5 + $0x80] sm:$0xff] (%p3217_p5) }
 0x6ca   : >> { %v5702_v62 = vadd.f32 %v12968_v30, %v5666_v38  ;;  %v9742_v30 = vld [vmem:[%s14309_s5 + $0x78] sm:$0xff] (%p3217_p5)  ;;  %v9847_v38 = vld [vmem:[%s14309_s5 + $0xc0] sm:$0xff] (%p3217_p5) }
 0x6cb   : > { %10106 = vmatpush.msra.mxu1 (%p3217_p5), %v9742_v30  ;;  %10107 = vmatpush.msra.mxu2 (%p3217_p5), %v9742_v30 }
 0x6cc   : >> { %v5734_v10 = vmax.f32 %v5702_v62, 0.0  ;;  %10108 = vmatpush.msra.mxu3 (%p3217_p5), %v9742_v30  ;;  %6084 = vmatpush.msra.mxu0 (%p3217_p5), %v9742_v30  ;;  %v9888_v62 = vld [vmem:[%s14309_s5 + $0x108] sm:$0xff] (%p3217_p5) }
 0x6cd   : > { %10109 = vmatpush.msra.mxu1 (%p3217_p5), %v9741_v35  ;;  %10110 = vmatpush.msra.mxu2 (%p3217_p5), %v9741_v35 }
 0x6ce   : >> { %5766 = vst.msk [vmem:[#allocation6 + $0xf8] sm:$0xff] %vm484_vm1, %v5734_v10  ;;  %10111 = vmatpush.msra.mxu3 (%p3217_p5), %v9741_v35  ;;  %6085 = vmatpush.msra.mxu0 (%p3217_p5), %v9741_v35  ;;  %v5931_v10 = vld [vmem:[%s14309_s5] sm:$0xff] (%p3217_p5) }
 0x6cf   : >> { %v5877_v60 = vld [vmem:[#allocation7 + $0x70] sm:$0xff]  ;;  %10112 = vmatpush.msra.mxu1 (%p3217_p5), %v9740_v53  ;;  %10113 = vmatpush.msra.mxu2 (%p3217_p5), %v9740_v53 }
 0x6d0   : >> { %v5885_v32 = vmax.f32 %v5868_v33, %v5877_v60  ;;  %10114 = vmatpush.msra.mxu3 (%p3217_p5), %v9740_v53  ;;  %6086 = vmatpush.msra.mxu0 (%p3217_p5), %v9740_v53 }
 0x6d1   : > { %10115 = vmatpush.msra.mxu1 (%p3217_p5), %v9739_v47  ;;  %10116 = vmatpush.msra.mxu2 (%p3217_p5), %v9739_v47 }
 0x6d2   : >> { %9733 = vst.msk [vmem:[%s13072_s20 + $0x88] sm:$0xff] %vm484_vm1, %v5885_v32  ;;  %10117 = vmatpush.msra.mxu3 (%p3217_p5), %v9739_v47  ;;  %6087 = vmatpush.msra.mxu0 (%p3217_p5), %v9739_v47  ;;  %v10054_v47 = vld [vmem:[%s14309_s5 + $0x238] sm:$0xff] (%p3217_p5) }
 0x6d3   : > { %10118 = vmatpush.msra.mxu1 (%p3217_p5), %v9738_v5  ;;  %10119 = vmatpush.msra.mxu2 (%p3217_p5), %v9738_v5 }
 0x6d4   : > { %10120 = vmatpush.msra.mxu3 (%p3217_p5), %v9738_v5  ;;  %6088 = vmatpush.msra.mxu0 (%p3217_p5), %v9738_v5 }
 0x6d5   : >> { %v5797_v0 = vld [vmem:[#allocation6 + $0xf0] ss:$2 sm:$0xff]  ;;  %v5829_v22 = vld [vmem:[#allocation6 + $0xf1] ss:$2 sm:$0xff]  ;;  %10121 = vmatpush.msra.mxu1 (%p3217_p5), %v9737_v27  ;;  %10122 = vmatpush.msra.mxu2 (%p3217_p5), %v9737_v27 }
 0x6d6   : >> { %v5845_v39 = vmax.f32 %v5797_v0, %v5829_v22  ;;  %10123 = vmatpush.msra.mxu3 (%p3217_p5), %v9737_v27  ;;  %6089 = vmatpush.msra.mxu0 (%p3217_p5), %v9737_v27  ;;  %v9974_v0 = vld [vmem:[%s14309_s5 + $0x1b8] sm:$0xff] (%p3217_p5) }
 0x6d7   : > { %10124 = vmatpush.msra.mxu1 (%p3217_p5), %v9736_v42  ;;  %10125 = vmatpush.msra.mxu2 (%p3217_p5), %v9736_v42 }
 0x6d8   : >> { %5861 = vst.msk [vmem:[#allocation7 + $0x78] sm:$0xff] %vm484_vm1, %v5845_v39  ;;  %10126 = vmatpush.msra.mxu3 (%p3217_p5), %v9736_v42  ;;  %6090 = vmatpush.msra.mxu0 (%p3217_p5), %v9736_v42  ;;  %v9887_v39 = vld [vmem:[%s14309_s5 + $0x100] sm:$0xff] (%p3217_p5) }
 0x6d9   : > { %10127 = vmatpush.msra.mxu1 (%p3217_p5), %v9735_v31  ;;  %10128 = vmatpush.msra.mxu2 (%p3217_p5), %v9735_v31 }
 0x6da   : > { %10129 = vmatpush.msra.mxu3 (%p3217_p5), %v9735_v31  ;;  %6091 = vmatpush.msra.mxu0 (%p3217_p5), %v9735_v31 }
 0x6db   : > { %6543 = vmatpush.msrb.mxu2 (%p3217_p5), %v9814_v46  ;;  %6293 = vmatpush.msrb.mxu1 (%p3217_p5), %v5938_v56 }
 0x6dc   : > { %6826 = vmatpush.msrb.mxu3 (%p3217_p5), %v9854_v4  ;;  %7108 = vmatpush.msrb.mxu0 (%p3217_p5), %v9894_v55  ;;  %v9973_v55 = vld [vmem:[%s14309_s5 + $0x1b0] sm:$0xff] (%p3217_p5) }
 0x6dd   : > { %6544 = vmatpush.msrb.mxu2 (%p3217_p5), %v9813_v52  ;;  %6294 = vmatpush.msrb.mxu1 (%p3217_p5), %v5937_v43 }
 0x6de   : > { %3219 = sbr.rel (!%p3217_p5) target bundleno = 1024 (0x400), region = 233  ;;  %6827 = vmatpush.msrb.mxu3 (%p3217_p5), %v9853_v15  ;;  %7109 = vmatpush.msrb.mxu0 (%p3217_p5), %v9893_v50 }
 0x6df   : >> { %v5878_v36 = vld [vmem:[#allocation7 + $0x78] sm:$0xff]  ;;  %6545 = vmatpush.msrb.mxu2 (%p3217_p5), %v9812_v49  ;;  %6295 = vmatpush.msrb.mxu1 (%p3217_p5), %v5936_v7  ;;  %v10013_v49 = vld [vmem:[%s14309_s5 + $0x1f0] sm:$0xff] (%p3217_p5) }
 0x6e0   : >> { %v5886_v18 = vmax.f32 %v5869_v45, %v5878_v36  ;;  %6828 = vmatpush.msrb.mxu3 (%p3217_p5), %v9852_v29  ;;  %7110 = vmatpush.msrb.mxu0 (%p3217_p5), %v9892_v24  ;;  %v10014_v45 = vld [vmem:[%s14309_s5 + $0x1f8] sm:$0xff] (%p3217_p5)  ;;  %v9933_v29 = vld [vmem:[%s14309_s5 + $0x170] sm:$0xff] (%p3217_p5) }
 0x6e1   : > { %6546 = vmatpush.msrb.mxu2 (%p3217_p5), %v9811_v21  ;;  %6296 = vmatpush.msrb.mxu1 (%p3217_p5), %v5935_v59  ;;  %v9934_v36 = vld [vmem:[%s14309_s5 + $0x178] sm:$0xff] (%p3217_p5)  ;;  %v10053_v59 = vld [vmem:[%s14309_s5 + $0x230] sm:$0xff] (%p3217_p5) }
 0x6e2   : >> { %9734 = vst.msk [vmem:[%s13072_s20 + $0x90] sm:$0xff] %vm484_vm1, %v5886_v18  ;;  %6829 = vmatpush.msrb.mxu3 (%p3217_p5), %v9851_v44  ;;  %7111 = vmatpush.msrb.mxu0 (%p3217_p5), %v9891_v48  ;;  %v9972_v48 = vld [vmem:[%s14309_s5 + $0x1a8] sm:$0xff] (%p3217_p5) }
 0x6e3   : > { %6547 = vmatpush.msrb.mxu2 %v9810_v58  ;;  %6297 = vmatpush.msrb.mxu1 %v5934_v26 }
 0x6e4   : > { %6830 = vmatpush.msrb.mxu3 %v9850_v14  ;;  %7112 = vmatpush.msrb.mxu0 %v9890_v20 }
 0x6e5   : > { %6548 = vmatpush.msrb.mxu2 %v9809_v37  ;;  %6298 = vmatpush.msrb.mxu1 %v5933_v23  ;;  %v10012_v37 = vld [vmem:[%s14309_s5 + $0x1e8] sm:$0xff] }
 0x6e6   : > { %6831 = vmatpush.msrb.mxu3 %v9849_v8  ;;  %7113 = vmatpush.msrb.mxu0 %v9889_v12  ;;  %v9932_v8 = vld [vmem:[%s14309_s5 + $0x168] sm:$0xff] }
 0x6e7   : > { %6549 = vmatpush.msrb.mxu2 %v9808_v57  ;;  %6299 = vmatpush.msrb.mxu1 %v5932_v17  ;;  %v10052_v57 = vld [vmem:[%s14309_s5 + $0x228] sm:$0xff] }
 0x6e8   : > { %6832 = vmatpush.msrb.mxu3 %v9848_v61  ;;  %7114 = vmatpush.msrb.mxu0 %v9888_v62 }
 0x6e9   : > { %v13259_v63 = vld [vmem:[#allocation3 + $0x88] sm:$0xff]  ;;  %v13301_v3 = vld [vmem:[#allocation3 + $0x90] sm:$0xff]  ;;  %6550 = vmatpush.msrb.mxu2 %v9807_v6  ;;  %6300 = vmatpush.msrb.mxu1 %v5931_v10 }
 0x6ea   : > { %v13261_v16 = vld [vmem:[#allocation3 + $0x108] sm:$0xff]  ;;  %9751 = vmatmul.msk.f32.vlgmr.msra.gmra.mxu1 %vm484_vm1, %v13259_v63  ;;  %v13303_v1 = vld [vmem:[#allocation3 + $0x110] sm:$0xff]  ;;  %6833 = vmatpush.msrb.mxu3 %v9847_v38 }
 0x6eb   : > { %v13266_v54 = vld [vmem:[#allocation3 + $0x188] sm:$0xff]  ;;  %9759 = vmatmul.msk.f32.vlgmr.msra.gmra.mxu2 %vm484_vm1, %v13261_v16  ;;  %v13312_v2 = vld [vmem:[#allocation3 + $0x190] sm:$0xff]  ;;  %7115 = vmatpush.msrb.mxu0 %v9887_v39 }
 0x6ec   : > { %9767 = vmatmul.msk.f32.vlgmr.msra.gmra.mxu3 %vm484_vm1, %v13266_v54  ;;  %v5939_v13 = vld [vmem:[#allocation3 + $0x8] sm:$0xff]  ;;  %v5940_v25 = vld [vmem:[#allocation3 + $0x10] sm:$0xff]  ;;  %7673 = vmatpush.msra.mxu2 %v9974_v0  ;;  %v9931_v0 = vld [vmem:[%s14309_s5 + $0x160] sm:$0xff] }
 0x6ed   : > { %9743 = vmatmul.msk.f32.vlgmr.msra.gmra.mxu0 %vm484_vm1, %v5939_v13  ;;  %v13350_v40 = vld [vmem:[#allocation3 + $0xa8] sm:$0xff]  ;;  %v13380_v28 = vld [vmem:[#allocation3 + $0xb0] sm:$0xff]  ;;  %7955 = vmatpush.msra.mxu3 %v10014_v45 }
 0x6ee   : > { %v13352_v9 = vld [vmem:[#allocation3 + $0x128] sm:$0xff]  ;;  %v13382_v51 = vld [vmem:[#allocation3 + $0x130] sm:$0xff]  ;;  %7390 = vmatpush.msra.mxu1 %v9934_v36  ;;  %8237 = vmatpush.msra.mxu0 %v10054_v47  ;;  %v10051_v47 = vld [vmem:[%s14309_s5 + $0x220] sm:$0xff] }
 0x6ef   : > { %v13358_v41 = vld [vmem:[#allocation3 + $0x1a8] sm:$0xff]  ;;  %v13386_v34 = vld [vmem:[#allocation3 + $0x1b0] sm:$0xff]  ;;  %7674 = vmatpush.msra.mxu2 %v9973_v55  ;;  %7956 = vmatpush.msra.mxu3 %v10013_v49 }
 0x6f0   : > { %v13367_v19 = vld [vmem:[#allocation3 + $0x28] sm:$0xff]  ;;  %v13395_v11 = vld [vmem:[#allocation3 + $0x30] sm:$0xff]  ;;  %7391 = vmatpush.msra.mxu1 %v9933_v29  ;;  %8238 = vmatpush.msra.mxu0 %v10053_v59 }
 0x6f1   : > { %v13408_v33 = vld [vmem:[#allocation3 + $0xc8] sm:$0xff]  ;;  %v13436_v18 = vld [vmem:[#allocation3 + $0xd0] sm:$0xff]  ;;  %7675 = vmatpush.msra.mxu2 %v9972_v48  ;;  %7957 = vmatpush.msra.mxu3 %v10012_v37 }
 0x6f2   : > { %9752 = vmatmul.msk.f32.gmra.mxu1 %vm484_vm1, %v13301_v3  ;;  %v13410_v60 = vld [vmem:[#allocation3 + $0x148] sm:$0xff]  ;;  %v13438_v30 = vld [vmem:[#allocation3 + $0x150] sm:$0xff]  ;;  %8239 = vmatpush.msra.mxu0 %v10052_v57 }
 0x6f3   : > { %9760 = vmatmul.msk.f32.gmra.mxu2 %vm484_vm1, %v13303_v1  ;;  %v13414_v32 = vld [vmem:[#allocation3 + $0x1c8] sm:$0xff]  ;;  %v13442_v35 = vld [vmem:[#allocation3 + $0x1d0] sm:$0xff]  ;;  %7392 = vmatpush.msra.mxu1 %v9932_v8  ;;  %v9970_v8 = vld [vmem:[%s14309_s5 + $0x198] sm:$0xff] }
 0x6f4   : > { %9768 = vmatmul.msk.f32.gmra.mxu3 %vm484_vm1, %v13312_v2  ;;  %v13423_v22 = vld [vmem:[#allocation3 + $0x48] sm:$0xff]  ;;  %v5944_v53 = vld [vmem:[#allocation3 + $0x50] sm:$0xff]  ;;  %8240 = vmatpush.msra.mxu0 %v10051_v47 }
 0x6f5   : > { %9744 = vmatmul.msk.f32.gmra.mxu0 %vm484_vm1, %v5940_v25  ;;  %v13453_v5 = vld [vmem:[#allocation3 + $0xe8] sm:$0xff]  ;;  %v13466_v46 = vld [vmem:[#allocation3 + $0xf0] sm:$0xff]  ;;  %7393 = vmatpush.msra.mxu1 %v9931_v0 }
 0x6f6   : > { %v13455_v27 = vld [vmem:[#allocation3 + $0x168] sm:$0xff]  ;;  %v13468_v56 = vld [vmem:[#allocation3 + $0x170] sm:$0xff] }
 0x6f7   : > { %v13458_v42 = vld [vmem:[#allocation3 + $0x1e8] sm:$0xff]  ;;  %v13471_v4 = vld [vmem:[#allocation3 + $0x1f0] sm:$0xff] }
 0x6f8   : > { %v5945_v31 = vld [vmem:[#allocation3 + $0x68] sm:$0xff]  ;;  %v5946_v52 = vld [vmem:[#allocation3 + $0x70] sm:$0xff] }
 0x6f9   : > { %v5899_v43 = vld [vmem:[#allocation3 + $0x7] sm:$0xff]  ;;  %v5900_v7 = vld [vmem:[#allocation3 + $0xf] sm:$0xff] }
 0x6fa   : > { %9753 = vmatmul.msk.f32.gmra.mxu1 %vm484_vm1, %v13350_v40  ;;  %v6398_v13 = vld [vmem:[#allocation3 + $0x9] sm:$0xff]  ;;  %v6399_v50 = vld [vmem:[#allocation3 + $0x11] sm:$0xff] }
 0x6fb   : > { %9761 = vmatmul.msk.f32.gmra.mxu2 %vm484_vm1, %v13352_v9  ;;  %v6681_v15 = vld [vmem:[#allocation3 + $0x27] sm:$0xff]  ;;  %v6682_v21 = vld [vmem:[#allocation3 + $0x2f] sm:$0xff] }
 0x6fc   : > { %9769 = vmatmul.msk.f32.gmra.mxu3 %vm484_vm1, %v13358_v41  ;;  %v13500_v44 = vld [vmem:[#allocation3 + $0x29] sm:$0xff]  ;;  %v13511_v58 = vld [vmem:[#allocation3 + $0x31] sm:$0xff] }
 0x6fd   : > { %9745 = vmatmul.msk.f32.gmra.mxu0 %vm484_vm1, %v13367_v19  ;;  %v13504_v24 = vld [vmem:[#allocation3 + $0x47] sm:$0xff]  ;;  %v13515_v26 = vld [vmem:[#allocation3 + $0x4f] sm:$0xff] }
 0x6fe   : > { %v13522_v25 = vld [vmem:[#allocation3 + $0x49] sm:$0xff]  ;;  %v13542_v23 = vld [vmem:[#allocation3 + $0x51] sm:$0xff] }
 0x6ff   : > { %v13525_v14 = vld [vmem:[#allocation3 + $0x67] sm:$0xff]  ;;  %v13545_v20 = vld [vmem:[#allocation3 + $0x6f] sm:$0xff] }
 0x700   : > { %v13559_v61 = vld [vmem:[#allocation3 + $0x87] sm:$0xff]  ;;  %v13567_v12 = vld [vmem:[#allocation3 + $0x71] sm:$0xff] }
 0x701   : > { %v13571_v17 = vld [vmem:[#allocation3 + $0x8f] sm:$0xff]  ;;  %v13585_v38 = vld [vmem:[#allocation3 + $0xa7] sm:$0xff] }
 0x702   : > { %9754 = vmatmul.msk.f32.gmra.mxu1 %vm484_vm1, %v13380_v28  ;;  %v13610_v45 = vld [vmem:[#allocation3 + $0x91] sm:$0xff]  ;;  %v13677_v37 = vld [vmem:[#allocation3 + $0xe7] sm:$0xff] }
 0x703   : > { %9762 = vmatmul.msk.f32.gmra.mxu2 %vm484_vm1, %v13382_v51  ;;  %v13614_v36 = vld [vmem:[#allocation3 + $0xaf] sm:$0xff]  ;;  %14531 = vst [vmem:[#allocation96_spill] sm:$0xff] %v13677_v37 }
 0x704   : > { %9770 = vmatmul.msk.f32.gmra.mxu3 %vm484_vm1, %v13386_v34  ;;  %14522 = vst [vmem:[#allocation87_spill] sm:$0xff] %v13614_v36 }
 0x705   : > { %9746 = vmatmul.msk.f32.gmra.mxu0 %vm484_vm1, %v13395_v11 }
 0x70a   : > { %9755 = vmatmul.msk.f32.gmra.mxu1 %vm484_vm1, %v13408_v33 }
 0x70b   : > { %9763 = vmatmul.msk.f32.gmra.mxu2 %vm484_vm1, %v13410_v60 }
 0x70c   : > { %9771 = vmatmul.msk.f32.gmra.mxu3 %vm484_vm1, %v13414_v32 }
 0x70d   : > { %9747 = vmatmul.msk.f32.gmra.mxu0 %vm484_vm1, %v13423_v22 }
 0x712   : > { %9756 = vmatmul.msk.f32.gmra.mxu1 %vm484_vm1, %v13436_v18 }
 0x713   : > { %9764 = vmatmul.msk.f32.gmra.mxu2 %vm484_vm1, %v13438_v30 }
 0x714   : > { %9772 = vmatmul.msk.f32.gmra.mxu3 %vm484_vm1, %v13442_v35 }
 0x715   : > { %9748 = vmatmul.msk.f32.gmra.mxu0 %vm484_vm1, %v5944_v53 }
 0x71a   : > { %9757 = vmatmul.msk.f32.gmra.mxu1 %vm484_vm1, %v13453_v5 }
 0x71b   : > { %9765 = vmatmul.msk.f32.gmra.mxu2 %vm484_vm1, %v13455_v27 }
 0x71c   : > { %9773 = vmatmul.msk.f32.gmra.mxu3 %vm484_vm1, %v13458_v42 }
 0x71d   : > { %9749 = vmatmul.msk.f32.gmra.mxu0 %vm484_vm1, %v5945_v31 }
 0x722   : > { %9758 = vmatmul.msk.f32.gmra.mxu1 %vm484_vm1, %v13466_v46 }
 0x723   : > { %9766 = vmatmul.msk.f32.gmra.mxu2 %vm484_vm1, %v13468_v56 }
 0x724   : > { %9774 = vmatmul.msk.f32.gmra.mxu3 %vm484_vm1, %v13471_v4 }
 0x725   : > { %9750 = vmatmul.msk.f32.gmra.mxu0 %vm484_vm1, %v5946_v52 }
 0x72a   : > { %9775 = vmatmul.msk.f32.vlgmr.msrb.gmra.mxu1 %vm484_vm1, %v5899_v43  ;;  %v13633_v43 = vld [vmem:[#allocation3 + $0xa9] sm:$0xff] }
 0x72b   : > { %9815 = vmatmul.msk.f32.vlgmr.msrb.gmra.mxu2 %vm484_vm1, %v6398_v13  ;;  %14524 = vst [vmem:[#allocation89_spill] sm:$0xff] %v13633_v43  ;;  %v13637_v13 = vld [vmem:[#allocation3 + $0xc7] sm:$0xff] }
 0x72c   : > { %9855 = vmatmul.msk.f32.vlgmr.msrb.gmra.mxu3 %vm484_vm1, %v6681_v15  ;;  %14525 = vst [vmem:[#allocation90_spill] sm:$0xff] %v13637_v13 }
 0x72d   : > { %9895 = vmatmul.msk.f32.vlgmr.msrb.gmra.mxu0 %vm484_vm1, %v13367_v19  ;;  %v13556_v19 = vld [vmem:[#allocation3 + $0x69] sm:$0xff] }
 0x732   : > { %9776 = vmatmul.msk.f32.gmra.mxu1 %vm484_vm1, %v5900_v7  ;;  %v13657_v7 = vld [vmem:[#allocation3 + $0xcf] sm:$0xff] }
 0x733   : > { %9816 = vmatmul.msk.f32.gmra.mxu2 %vm484_vm1, %v6399_v50  ;;  %14528 = vst [vmem:[#allocation93_spill] sm:$0xff] %v13657_v7 }
 0x734   : > { %9856 = vmatmul.msk.f32.gmra.mxu3 %vm484_vm1, %v6682_v21 }
 0x735   : > { %9896 = vmatmul.msk.f32.gmra.mxu0 %vm484_vm1, %v13395_v11  ;;  %v13581_v11 = vld [vmem:[#allocation3 + $0x89] sm:$0xff] }
 0x73a   : > { %9777 = vmatmul.msk.f32.gmra.mxu1 %vm484_vm1, %v6681_v15 }
 0x73b   : > { %9817 = vmatmul.msk.f32.gmra.mxu2 %vm484_vm1, %v13500_v44 }
 0x73c   : > { %9857 = vmatmul.msk.f32.gmra.mxu3 %vm484_vm1, %v13504_v24 }
 0x73d   : > { %9897 = vmatmul.msk.f32.gmra.mxu0 %vm484_vm1, %v13423_v22 }
 0x742   : > { %9778 = vmatmul.msk.f32.gmra.mxu1 %vm484_vm1, %v6682_v21 }
 0x743   : > { %9818 = vmatmul.msk.f32.gmra.mxu2 %vm484_vm1, %v13511_v58 }
 0x744   : > { %9858 = vmatmul.msk.f32.gmra.mxu3 %vm484_vm1, %v13515_v26 }
 0x745   : > { %9898 = vmatmul.msk.f32.gmra.mxu0 %vm484_vm1, %v5944_v53 }
 0x74a   : > { %9779 = vmatmul.msk.f32.gmra.mxu1 %vm484_vm1, %v13504_v24 }
 0x74b   : > { %9819 = vmatmul.msk.f32.gmra.mxu2 %vm484_vm1, %v13522_v25 }
 0x74c   : > { %9859 = vmatmul.msk.f32.gmra.mxu3 %vm484_vm1, %v13525_v14 }
 0x74d   : > { %9899 = vmatmul.msk.f32.gmra.mxu0 %vm484_vm1, %v5945_v31 }
 0x752   : > { %9780 = vmatmul.msk.f32.gmra.mxu1 %vm484_vm1, %v13515_v26 }
 0x753   : > { %9820 = vmatmul.msk.f32.gmra.mxu2 %vm484_vm1, %v13542_v23 }
 0x754   : > { %9860 = vmatmul.msk.f32.gmra.mxu3 %vm484_vm1, %v13545_v20 }
 0x755   : > { %9900 = vmatmul.msk.f32.gmra.mxu0 %vm484_vm1, %v5946_v52 }
 0x75a   : > { %9781 = vmatmul.msk.f32.gmra.mxu1 %vm484_vm1, %v13525_v14 }
 0x75b   : > { %9821 = vmatmul.msk.f32.gmra.mxu2 %vm484_vm1, %v13556_v19 }
 0x75c   : > { %9861 = vmatmul.msk.f32.gmra.mxu3 %vm484_vm1, %v13559_v61 }
 0x75d   : > { %9901 = vmatmul.msk.f32.gmra.mxu0 %vm484_vm1, %v13259_v63  ;;  %v9971_v63 = vld [vmem:[%s14309_s5 + $0x1a0] sm:$0xff] }
 0x75e   : > { %7676 = vmatpush.msra.mxu2 %v9971_v63 }
 0x760   : > { %7677 = vmatpush.msra.mxu2 %v9970_v8  ;;  %v13702_v8 = vld [vmem:[#allocation3 + $0xd1] sm:$0xff] }
 0x761   : > { %14533 = vst [vmem:[#allocation98_spill] sm:$0xff] %v13702_v8 }
 0x762   : > { %9782 = vmatmul.msk.f32.gmra.mxu1 %vm484_vm1, %v13545_v20 }
 0x763   : > { %9822 = vmatmul.msk.f32.gmra.mxu2 %vm484_vm1, %v13567_v12 }
 0x764   : > { %9862 = vmatmul.msk.f32.gmra.mxu3 %vm484_vm1, %v13571_v17 }
 0x765   : > { %9902 = vmatmul.msk.f32.gmra.mxu0 %vm484_vm1, %v13301_v3  ;;  %v10011_v3 = vld [vmem:[%s14309_s5 + $0x1e0] sm:$0xff] }
 0x766   : > { %7958 = vmatpush.msra.mxu3 %v10011_v3  ;;  %v9930_v3 = vld [vmem:[%s14309_s5 + $0x158] sm:$0xff] }
 0x767   : > { %v13579_v6 = vpop.f32.mrf.mxu1  ;;  %7394 = vmatpush.msra.mxu1 %v9930_v3 }
 0x76a   : > { %9783 = vmatmul.msk.f32.gmra.mxu1 %vm484_vm1, %v13559_v61  ;;  %v13596_v62 = vpop.f32.mrf.mxu0 }
 0x76b   : > { %9823 = vmatmul.msk.f32.gmra.mxu2 %vm484_vm1, %v13581_v11 }
 0x76c   : > { %9863 = vmatmul.msk.f32.gmra.mxu3 %vm484_vm1, %v13585_v38 }
 0x76d   : > { %9903 = vmatmul.msk.f32.gmra.mxu0 %vm484_vm1, %v13350_v40 }
 0x76e   : > { %v13601_v10 = vpop.f32.mrf.mxu2 }
 0x76f   : > { %v13606_v22 = vpop.f32.mrf.mxu1  ;;  %v13608_v39 = vpop.f32.mrf.mxu3 }
 0x770   : > { %14521 = vst [vmem:[#allocation86_spill] sm:$0xff] %v13608_v39 }
 0x772   : > { %9784 = vmatmul.msk.f32.gmra.mxu1 %vm484_vm1, %v13571_v17  ;;  %v13622_v53 = vpop.f32.mrf.mxu0 }
 0x773   : > { %9824 = vmatmul.msk.f32.gmra.mxu2 %vm484_vm1, %v13610_v45 }
 0x774   : > { %9864 = vmatmul.msk.f32.gmra.mxu3 %vm484_vm1, %v13614_v36 }
 0x775   : > { %9904 = vmatmul.msk.f32.gmra.mxu0 %vm484_vm1, %v13380_v28  ;;  %v13653_v28 = vld [vmem:[#allocation3 + $0xb1] sm:$0xff] }
 0x776   : > { %v13627_v31 = vpop.f32.mrf.mxu2  ;;  %14527 = vst [vmem:[#allocation92_spill] sm:$0xff] %v13653_v28 }
 0x777   : > { %v13629_v40 = vpop.f32.mrf.mxu1  ;;  %v13631_v52 = vpop.f32.mrf.mxu3 }
 0x778   : > { %14523 = vst [vmem:[#allocation88_spill] sm:$0xff] %v13631_v52  ;;  %v13725_v52 = vld [vmem:[#allocation3 + $0xe9] sm:$0xff] }
 0x779   : > { %14536 = vst [vmem:[#allocation101_spill] sm:$0xff] %v13725_v52 }
 0x77a   : > { %9785 = vmatmul.msk.f32.gmra.mxu1 %vm484_vm1, %v13585_v38  ;;  %v13645_v15 = vpop.f32.mrf.mxu0 }
 0x77b   : > { %9825 = vmatmul.msk.f32.gmra.mxu2 %vm484_vm1, %v13633_v43 }
 0x77c   : > { %9865 = vmatmul.msk.f32.gmra.mxu3 %vm484_vm1, %v13637_v13 }
 0x77d   : > { %9905 = vmatmul.msk.f32.gmra.mxu0 %vm484_vm1, %v13408_v33  ;;  %v13673_v33 = vld [vmem:[#allocation3 + $0xc9] sm:$0xff] }
 0x77e   : > { %v13647_v55 = vpop.f32.mrf.mxu2  ;;  %14530 = vst [vmem:[#allocation95_spill] sm:$0xff] %v13673_v33 }
 0x77f   : > { %v13649_v49 = vpop.f32.mrf.mxu1  ;;  %v13651_v29 = vpop.f32.mrf.mxu3 }
 0x780   : > { %14526 = vst [vmem:[#allocation91_spill] sm:$0xff] %v13651_v29 }
 0x782   : > { %9786 = vmatmul.msk.f32.gmra.mxu1 %vm484_vm1, %v13614_v36  ;;  %v13665_v50 = vpop.f32.mrf.mxu0 }
 0x783   : > { %9826 = vmatmul.msk.f32.gmra.mxu2 %vm484_vm1, %v13653_v28  ;;  %v13763_v28 = vld [vmem:[#allocation3 + $0x109] sm:$0xff] }
 0x784   : > { %9866 = vmatmul.msk.f32.gmra.mxu3 %vm484_vm1, %v13657_v7  ;;  %14543 = vst [vmem:[#allocation108_spill] sm:$0xff] %v13763_v28 }
 0x785   : > { %9906 = vmatmul.msk.f32.gmra.mxu0 %vm484_vm1, %v13436_v18  ;;  %v10010_v18 = vld [vmem:[%s14309_s5 + $0x1d8] sm:$0xff] }
 0x786   : > { %v13667_v21 = vpop.f32.mrf.mxu2  ;;  %7959 = vmatpush.msra.mxu3 %v10010_v18 }
 0x787   : > { %v13669_v59 = vpop.f32.mrf.mxu1  ;;  %v13671_v48 = vpop.f32.mrf.mxu3 }
 0x788   : > { %14529 = vst [vmem:[#allocation94_spill] sm:$0xff] %v13671_v48  ;;  %v13706_v48 = vld [vmem:[#allocation3 + $0xef] sm:$0xff] }
 0x789   : > { %14534 = vst [vmem:[#allocation99_spill] sm:$0xff] %v13706_v48 }
 0x78a   : > { %9787 = vmatmul.msk.f32.gmra.mxu1 %vm484_vm1, %v13637_v13  ;;  %v13688_v57 = vpop.f32.mrf.mxu0 }
 0x78b   : > { %9827 = vmatmul.msk.f32.gmra.mxu2 %vm484_vm1, %v13673_v33 }
 0x78c   : > { %9867 = vmatmul.msk.f32.gmra.mxu3 %vm484_vm1, %v13677_v37 }
 0x78d   : > { %9907 = vmatmul.msk.f32.gmra.mxu0 %vm484_vm1, %v13453_v5 }
 0x78e   : > { %v13693_v63 = vpop.f32.mrf.mxu2 }
 0x78f   : > { %v13698_v0 = vpop.f32.mrf.mxu1  ;;  %v13700_v47 = vpop.f32.mrf.mxu3 }
 0x790   : > { %14532 = vst [vmem:[#allocation97_spill] sm:$0xff] %v13700_v47  ;;  %v10050_v47 = vld [vmem:[%s14309_s5 + $0x218] sm:$0xff] }
 0x791   : > { %8241 = vmatpush.msra.mxu0 %v10050_v47 }
 0x792   : > { %9788 = vmatmul.msk.f32.gmra.mxu1 %vm484_vm1, %v13657_v7  ;;  %v13714_v18 = vpop.f32.mrf.mxu0 }
 0x793   : > { %9828 = vmatmul.msk.f32.gmra.mxu2 %vm484_vm1, %v13702_v8  ;;  %v13729_v8 = vld [vmem:[#allocation3 + $0x107] sm:$0xff] }
 0x794   : > { %9868 = vmatmul.msk.f32.gmra.mxu3 %vm484_vm1, %v13706_v48  ;;  %14537 = vst [vmem:[#allocation102_spill] sm:$0xff] %v13729_v8 }
 0x795   : > { %9908 = vmatmul.msk.f32.gmra.mxu0 %vm484_vm1, %v13466_v46  ;;  %v13745_v46 = vld [vmem:[#allocation3 + $0xf1] sm:$0xff] }
 0x796   : > { %v13719_v29 = vpop.f32.mrf.mxu2  ;;  %14540 = vst [vmem:[#allocation105_spill] sm:$0xff] %v13745_v46 }
 0x797   : > { %v13721_v5 = vpop.f32.mrf.mxu1  ;;  %v13723_v3 = vpop.f32.mrf.mxu3 }
 0x798   : > { %14535 = vst [vmem:[#allocation100_spill] sm:$0xff] %v13723_v3 }
 0x79a   : > { %9789 = vmatmul.msk.f32.gmra.mxu1 %vm484_vm1, %v13677_v37  ;;  %v13737_v47 = vpop.f32.mrf.mxu0  ;;  %v13749_v37 = vld [vmem:[#allocation3 + $0x10f] sm:$0xff] }
 0x79b   : > { %9829 = vmatmul.msk.f32.gmra.mxu2 %vm484_vm1, %v13725_v52 }
 0x79c   : > { %9869 = vmatmul.msk.f32.gmra.mxu3 %vm484_vm1, %v13729_v8 }
 0x79d   : > { %9909 = vmatmul.msk.f32.gmra.mxu0 %vm484_vm1, %v13261_v16  ;;  %v13767_v16 = vld [vmem:[#allocation3 + $0x127] sm:$0xff] }
 0x79e   : > { %v13739_v7 = vpop.f32.mrf.mxu2 }
 0x79f   : > { %14538 = vst [vmem:[#allocation103_spill] sm:$0xff] %v13739_v7  ;;  %v13741_v3 = vpop.f32.mrf.mxu1  ;;  %v13743_v33 = vpop.f32.mrf.mxu3 }
 0x7a0   : > { %14539 = vst [vmem:[#allocation104_spill] sm:$0xff] %v13743_v33 }
 0x7a2   : > { %9790 = vmatmul.msk.f32.gmra.mxu1 %vm484_vm1, %v13706_v48  ;;  %v13757_v52 = vpop.f32.mrf.mxu0 }
 0x7a3   : > { %9830 = vmatmul.msk.f32.gmra.mxu2 %vm484_vm1, %v13745_v46  ;;  %v9969_v46 = vld [vmem:[%s14309_s5 + $0x190] sm:$0xff] }
 0x7a4   : > { %9870 = vmatmul.msk.f32.gmra.mxu3 %vm484_vm1, %v13749_v37  ;;  %7678 = vmatpush.msra.mxu2 %v9969_v46  ;;  %v13785_v46 = vld [vmem:[#allocation3 + $0x111] sm:$0xff] }
 0x7a5   : > { %9910 = vmatmul.msk.f32.gmra.mxu0 %vm484_vm1, %v13303_v1  ;;  %v10009_v1 = vld [vmem:[%s14309_s5 + $0x1d0] sm:$0xff] }
 0x7a6   : > { %v13759_v39 = vpop.f32.mrf.mxu2  ;;  %7960 = vmatpush.msra.mxu3 %v10009_v1  ;;  %v13803_v1 = vld [vmem:[#allocation3 + $0x129] sm:$0xff] }
 0x7a7   : > { %14541 = vst [vmem:[#allocation106_spill] sm:$0xff] %v13759_v39  ;;  %v13761_v33 = vpop.f32.mrf.mxu3  ;;  %v6302_v13 = vpop.f32.mrf.mxu1 }
 0x7a8   : > { %14542 = vst [vmem:[#allocation107_spill] sm:$0xff] %v13761_v33  ;;  %v6303_v33 = vadd.f32 %v6302_v13, %v13596_v62  ;;  %v13789_v13 = vld [vmem:[#allocation3 + $0x12f] sm:$0xff] }
 0x7aa   : > { %9791 = vmatmul.msk.f32.gmra.mxu1 %vm484_vm1, %v13729_v8  ;;  %v7117_v48 = vpop.f32.mrf.mxu0 }
 0x7ab   : > { %9831 = vmatmul.msk.f32.gmra.mxu2 %vm484_vm1, %v13763_v28  ;;  %v9929_v28 = vld [vmem:[%s14309_s5 + $0x150] sm:$0xff] }
 0x7ac   : > { %9871 = vmatmul.msk.f32.gmra.mxu3 %vm484_vm1, %v13767_v16  ;;  %7395 = vmatpush.msra.mxu1 %v9929_v28 }
 0x7ad   : > { %9911 = vmatmul.msk.f32.gmra.mxu0 %vm484_vm1, %v13352_v9  ;;  %v10049_v9 = vld [vmem:[%s14309_s5 + $0x210] sm:$0xff] }
 0x7ae   : > { %v6552_v39 = vpop.f32.mrf.mxu2  ;;  %8242 = vmatpush.msra.mxu0 %v10049_v9 }
 0x7af   : > { %v6648_v8 = vadd.f32 %v6552_v39, %v6303_v33  ;;  %v6305_v36 = vpop.f32.mrf.mxu1  ;;  %v6835_v43 = vpop.f32.mrf.mxu3 }
 0x7b0   : > { %v6306_v39 = vadd.f32 %v6305_v36, %v13622_v53  ;;  %v13807_v36 = vld [vmem:[#allocation3 + $0x147] sm:$0xff] }
 0x7b1   : > { %v6931_v62 = vadd.f32 %v6835_v43, %v6648_v8 }
 0x7b2   : > { %9792 = vmatmul.msk.f32.gmra.mxu1 %vm484_vm1, %v13749_v37  ;;  %v7120_v33 = vpop.f32.mrf.mxu0 }
 0x7b3   : > { %v13791_v7 = vadd.f32 %v7117_v48, %v6931_v62  ;;  %9832 = vmatmul.msk.f32.gmra.mxu2 %vm484_vm1, %v13785_v46 }
 0x7b4   : > { %9872 = vmatmul.msk.f32.gmra.mxu3 %vm484_vm1, %v13789_v13 }
 0x7b5   : > { %14544 = vst [vmem:[#allocation109_spill] sm:$0xff] %v13791_v7  ;;  %9912 = vmatmul.msk.f32.gmra.mxu0 %vm484_vm1, %v13382_v51 }
 0x7b6   : > { %v6555_v43 = vpop.f32.mrf.mxu2 }
 0x7b7   : > { %v6649_v28 = vadd.f32 %v6555_v43, %v6306_v39  ;;  %v6308_v48 = vpop.f32.mrf.mxu1  ;;  %v6838_v8 = vpop.f32.mrf.mxu3 }
 0x7b8   : > { %v6309_v39 = vadd.f32 %v6308_v48, %v13645_v15 }
 0x7b9   : > { %v6932_v62 = vadd.f32 %v6838_v8, %v6649_v28  ;;  %v13818_v8 = vld [vmem:[#allocation3 + $0x131] sm:$0xff] }
 0x7ba   : > { %9793 = vmatmul.msk.f32.gmra.mxu1 %vm484_vm1, %v13767_v16  ;;  %v7123_v9 = vpop.f32.mrf.mxu0 }
 0x7bb   : > { %v13809_v53 = vadd.f32 %v7120_v33, %v6932_v62  ;;  %9833 = vmatmul.msk.f32.gmra.mxu2 %vm484_vm1, %v13803_v1  ;;  %v13822_v62 = vld [vmem:[#allocation3 + $0x14f] sm:$0xff] }
 0x7bc   : > { %9873 = vmatmul.msk.f32.gmra.mxu3 %vm484_vm1, %v13807_v36  ;;  %14546 = vst [vmem:[#allocation111_spill] sm:$0xff] %v13822_v62 }
 0x7bd   : > { %14545 = vst [vmem:[#allocation110_spill] sm:$0xff] %v13809_v53  ;;  %9913 = vmatmul.msk.f32.gmra.mxu0 %vm484_vm1, %v13410_v60 }
 0x7be   : > { %v6558_v43 = vpop.f32.mrf.mxu2 }
 0x7bf   : > { %v6650_v7 = vadd.f32 %v6558_v43, %v6309_v39  ;;  %v6311_v51 = vpop.f32.mrf.mxu1  ;;  %v6841_v28 = vpop.f32.mrf.mxu3 }
 0x7c0   : > { %v6312_v15 = vadd.f32 %v6311_v51, %v13665_v50  ;;  %v9968_v50 = vld [vmem:[%s14309_s5 + $0x188] sm:$0xff] }
 0x7c1   : > { %v6933_v33 = vadd.f32 %v6841_v28, %v6650_v7  ;;  %v13833_v28 = vld [vmem:[#allocation3 + $0x149] sm:$0xff]  ;;  %7679 = vmatpush.msra.mxu2 %v9968_v50  ;;  %v13857_v50 = vld [vmem:[#allocation3 + $0x151] sm:$0xff] }
 0x7c2   : > { %9794 = vmatmul.msk.f32.gmra.mxu1 %vm484_vm1, %v13789_v13  ;;  %v7126_v48 = vpop.f32.mrf.mxu0  ;;  %14549 = vst [vmem:[#allocation114_spill] sm:$0xff] %v13857_v50 }
 0x7c3   : > { %v13824_v53 = vadd.f32 %v7123_v9, %v6933_v33  ;;  %9834 = vmatmul.msk.f32.gmra.mxu2 %vm484_vm1, %v13818_v8  ;;  %v13837_v33 = vld [vmem:[#allocation3 + $0x167] sm:$0xff] }
 0x7c4   : > { %9874 = vmatmul.msk.f32.gmra.mxu3 %vm484_vm1, %v13822_v62 }
 0x7c5   : > { %14547 = vst [vmem:[#allocation112_spill] sm:$0xff] %v13824_v53  ;;  %9914 = vmatmul.msk.f32.gmra.mxu0 %vm484_vm1, %v13438_v30 }
 0x7c6   : > { %v6561_v39 = vpop.f32.mrf.mxu2 }
 0x7c7   : > { %v6651_v43 = vadd.f32 %v6561_v39, %v6312_v15  ;;  %v6314_v60 = vpop.f32.mrf.mxu1  ;;  %v6844_v7 = vpop.f32.mrf.mxu3  ;;  %v10008_v15 = vld [vmem:[%s14309_s5 + $0x1c8] sm:$0xff] }
 0x7c8   : > { %v6315_v51 = vadd.f32 %v6314_v60, %v13688_v57  ;;  %7961 = vmatpush.msra.mxu3 %v10008_v15  ;;  %v13861_v60 = vld [vmem:[#allocation3 + $0x16f] sm:$0xff] }
 0x7c9   : > { %v6934_v9 = vadd.f32 %v6844_v7, %v6651_v43  ;;  %v9928_v43 = vld [vmem:[%s14309_s5 + $0x148] sm:$0xff] }
 0x7ca   : > { %9795 = vmatmul.msk.f32.gmra.mxu1 %vm484_vm1, %v13807_v36  ;;  %v7129_v30 = vpop.f32.mrf.mxu0 }
 0x7cb   : > { %v13839_v53 = vadd.f32 %v7126_v48, %v6934_v9  ;;  %9835 = vmatmul.msk.f32.gmra.mxu2 %vm484_vm1, %v13833_v28  ;;  %7396 = vmatpush.msra.mxu1 %v9928_v43 }
 0x7cc   : > { %9875 = vmatmul.msk.f32.gmra.mxu3 %vm484_vm1, %v13837_v33 }
 0x7cd   : > { %14548 = vst [vmem:[#allocation113_spill] sm:$0xff] %v13839_v53  ;;  %9915 = vmatmul.msk.f32.gmra.mxu0 %vm484_vm1, %v13455_v27  ;;  %v10048_v27 = vld [vmem:[%s14309_s5 + $0x208] sm:$0xff] }
 0x7ce   : > { %v6564_v48 = vpop.f32.mrf.mxu2  ;;  %8243 = vmatpush.msra.mxu0 %v10048_v27 }
 0x7cf   : > { %v6652_v39 = vadd.f32 %v6564_v48, %v6315_v51  ;;  %v6317_v7 = vpop.f32.mrf.mxu1  ;;  %v6847_v9 = vpop.f32.mrf.mxu3 }
 0x7d0   : > { %v6318_v51 = vadd.f32 %v6317_v7, %v13714_v18  ;;  %v6703_v18 = vld [vmem:[#allocation3 + $0x187] sm:$0xff] }
 0x7d1   : > { %v6935_v57 = vadd.f32 %v6847_v9, %v6652_v39  ;;  %v13875_v9 = vld [vmem:[#allocation3 + $0x169] sm:$0xff] }
 0x7d2   : > { %9796 = vmatmul.msk.f32.gmra.mxu1 %vm484_vm1, %v13822_v62  ;;  %v7132_v15 = vpop.f32.mrf.mxu0 }
 0x7d3   : > { %v13863_v53 = vadd.f32 %v7129_v30, %v6935_v57  ;;  %9836 = vmatmul.msk.f32.gmra.mxu2 %vm484_vm1, %v13857_v50 }
 0x7d4   : > { %9876 = vmatmul.msk.f32.gmra.mxu3 %vm484_vm1, %v13861_v60 }
 0x7d5   : > { %14550 = vst [vmem:[#allocation115_spill] sm:$0xff] %v13863_v53  ;;  %9916 = vmatmul.msk.f32.gmra.mxu0 %vm484_vm1, %v13468_v56  ;;  %v13887_v56 = vld [vmem:[#allocation3 + $0x171] sm:$0xff] }
 0x7d6   : > { %v6567_v48 = vpop.f32.mrf.mxu2 }
 0x7d7   : > { %v6653_v30 = vadd.f32 %v6567_v48, %v6318_v51  ;;  %v6320_v39 = vpop.f32.mrf.mxu1  ;;  %v6850_v43 = vpop.f32.mrf.mxu3 }
 0x7d8   : > { %v6321_v27 = vadd.f32 %v6320_v39, %v13737_v47 }
 0x7d9   : > { %v6936_v57 = vadd.f32 %v6850_v43, %v6653_v30  ;;  %v6704_v30 = vld [vmem:[#allocation3 + $0x18f] sm:$0xff] }
 0x7da   : > { %9797 = vmatmul.msk.f32.gmra.mxu1 %vm484_vm1, %v13837_v33  ;;  %v7135_v51 = vpop.f32.mrf.mxu0 }
 0x7db   : > { %v13879_v7 = vadd.f32 %v7132_v15, %v6936_v57  ;;  %9837 = vmatmul.msk.f32.gmra.mxu2 %vm484_vm1, %v13875_v9 }
 0x7dc   : > { %9877 = vmatmul.msk.f32.gmra.mxu3 %vm484_vm1, %v6703_v18 }
 0x7dd   : > { %14551 = vst [vmem:[#allocation116_spill] sm:$0xff] %v13879_v7  ;;  %9917 = vmatmul.msk.f32.gmra.mxu0 %vm484_vm1, %v13266_v54  ;;  %v13899_v54 = vld [vmem:[#allocation3 + $0x189] sm:$0xff] }
 0x7de   : > { %v6570_v48 = vpop.f32.mrf.mxu2 }
 0x7df   : > { %v6654_v53 = vadd.f32 %v6570_v48, %v6321_v27  ;;  %v6323_v50 = vpop.f32.mrf.mxu1  ;;  %v6853_v62 = vpop.f32.mrf.mxu3 }
 0x7e0   : > { %v6324_v47 = vadd.f32 %v6323_v50, %v13757_v52  ;;  %v9967_v52 = vld [vmem:[%s14309_s5 + $0x180] sm:$0xff] }
 0x7e1   : > { %v6937_v15 = vadd.f32 %v6853_v62, %v6654_v53  ;;  %v6705_v62 = vld [vmem:[#allocation3 + $0x1a7] sm:$0xff]  ;;  %7680 = vmatpush.msra.mxu2 %v9967_v52 }
 0x7e2   : > { %9798 = vmatmul.msk.f32.gmra.mxu1 %vm484_vm1, %v13861_v60  ;;  %v7138_v39 = vpop.f32.mrf.mxu0 }
 0x7e3   : > { %v13891_v43 = vadd.f32 %v7135_v51, %v6937_v15  ;;  %9838 = vmatmul.msk.f32.gmra.mxu2 %vm484_vm1, %v13887_v56 }
 0x7e4   : > { %9878 = vmatmul.msk.f32.gmra.mxu3 %vm484_vm1, %v6704_v30 }
 0x7e5   : > { %9918 = vmatmul.msk.f32.gmra.mxu0 %vm484_vm1, %v13312_v2  ;;  %v10007_v2 = vld [vmem:[%s14309_s5 + $0x1c0] sm:$0xff] }
 0x7e6   : > { %v6573_v57 = vpop.f32.mrf.mxu2  ;;  %7962 = vmatpush.msra.mxu3 %v10007_v2  ;;  %v10047_v2 = vld [vmem:[%s14309_s5 + $0x200] sm:$0xff] }
 0x7e7   : > { %v6655_v27 = vadd.f32 %v6573_v57, %v6324_v47  ;;  %v6326_v48 = vpop.f32.mrf.mxu1  ;;  %v6856_v7 = vpop.f32.mrf.mxu3  ;;  %v9927_v47 = vld [vmem:[%s14309_s5 + $0x140] sm:$0xff]  ;;  %8244 = vmatpush.msra.mxu0 %v10047_v2 }
 0x7e8   : > { %v6327_v50 = vadd.f32 %v6326_v48, %v13579_v6  ;;  %7397 = vmatpush.msra.mxu1 %v9927_v47  ;;  %v6706_v48 = vld [vmem:[#allocation3 + $0x1af] sm:$0xff] }
 0x7e9   : > { %v6938_v53 = vadd.f32 %v6856_v7, %v6655_v27  ;;  %v13919_v27 = vld [vmem:[#allocation3 + $0x191] sm:$0xff]  ;;  %v13933_v47 = vld [vmem:[#allocation3 + $0x1a9] sm:$0xff] }
 0x7ea   : > { %9799 = vmatmul.msk.f32.gmra.mxu1 %vm484_vm1, %v6703_v18  ;;  %v7141_v15 = vpop.f32.mrf.mxu0 }
 0x7eb   : > { %v13903_v51 = vadd.f32 %v7138_v39, %v6938_v53  ;;  %9839 = vmatmul.msk.f32.gmra.mxu2 %vm484_vm1, %v13899_v54 }
 0x7ec   : > { %9879 = vmatmul.msk.f32.gmra.mxu3 %vm484_vm1, %v6705_v62 }
 0x7ed   : > { %14552 = vst [vmem:[#allocation117_spill] sm:$0xff] %v13903_v51  ;;  %9919 = vmatmul.msk.f32.gmra.mxu0 %vm484_vm1, %v13358_v41  ;;  %v6425_v51 = vld [vmem:[#allocation3 + $0x1b1] sm:$0xff] }
 0x7ee   : > { %v6576_v7 = vpop.f32.mrf.mxu2 }
 0x7ef   : > { %v6656_v18 = vadd.f32 %v6576_v7, %v6327_v50  ;;  %v6329_v39 = vpop.f32.mrf.mxu1  ;;  %v6859_v57 = vpop.f32.mrf.mxu3 }
 0x7f0   : > { %v6330_v52 = vadd.f32 %v6329_v39, %v13606_v22 }
 0x7f1   : > { %v6939_v6 = vadd.f32 %v6859_v57, %v6656_v18  ;;  %v6707_v57 = vld [vmem:[#allocation3 + $0x1c7] sm:$0xff] }
 0x7f2   : > { %9800 = vmatmul.msk.f32.gmra.mxu1 %vm484_vm1, %v6704_v30  ;;  %v7144_v50 = vpop.f32.mrf.mxu0 }
 0x7f3   : > { %v13923_v53 = vadd.f32 %v7141_v15, %v6939_v6  ;;  %9840 = vmatmul.msk.f32.gmra.mxu2 %vm484_vm1, %v13919_v27 }
 0x7f4   : > { %9880 = vmatmul.msk.f32.gmra.mxu3 %vm484_vm1, %v6706_v48 }
 0x7f5   : > { %14553 = vst [vmem:[#allocation118_spill] sm:$0xff] %v13923_v53  ;;  %9920 = vmatmul.msk.f32.gmra.mxu0 %vm484_vm1, %v13386_v34 }
 0x7f6   : > { %v6579_v41 = vpop.f32.mrf.mxu2 }
 0x7f7   : > { %v6657_v7 = vadd.f32 %v6579_v41, %v6330_v52  ;;  %v6332_v18 = vpop.f32.mrf.mxu1  ;;  %v6862_v15 = vpop.f32.mrf.mxu3 }
 0x7f8   : > { %v6333_v39 = vadd.f32 %v6332_v18, %v13629_v40 }
 0x7f9   : > { %v6940_v30 = vadd.f32 %v6862_v15, %v6657_v7 }
 0x7fa   : > { %9801 = vmatmul.msk.f32.gmra.mxu1 %vm484_vm1, %v6705_v62  ;;  %v7147_v6 = vpop.f32.mrf.mxu0 }
 0x7fb   : > { %v13937_v22 = vadd.f32 %v7144_v50, %v6940_v30  ;;  %9841 = vmatmul.msk.f32.gmra.mxu2 %vm484_vm1, %v13933_v47  ;;  %v6708_v50 = vld [vmem:[#allocation3 + $0x1cf] sm:$0xff] }
 0x7fc   : > { %9881 = vmatmul.msk.f32.gmra.mxu3 %vm484_vm1, %v6707_v57 }
 0x7fd   : > { %9921 = vmatmul.msk.f32.gmra.mxu0 %vm484_vm1, %v13414_v32 }
 0x7fe   : > { %v6582_v52 = vpop.f32.mrf.mxu2 }
 0x7ff   : > { %v6658_v2 = vadd.f32 %v6582_v52, %v6333_v39  ;;  %v6335_v41 = vpop.f32.mrf.mxu1  ;;  %v6865_v53 = vpop.f32.mrf.mxu3  ;;  %v6426_v52 = vld [vmem:[#allocation3 + $0x1c9] sm:$0xff] }
 0x800   : > { %v6336_v40 = vadd.f32 %v6335_v41, %v13649_v49 }
 0x801   : > { %v6941_v34 = vadd.f32 %v6865_v53, %v6658_v2  ;;  %v6709_v53 = vld [vmem:[#allocation3 + $0x1e7] sm:$0xff] }
 0x802   : > { %9802 = vmatmul.msk.f32.gmra.mxu1 %vm484_vm1, %v6706_v48  ;;  %v7150_v62 = vpop.f32.mrf.mxu0 }
 0x803   : > { %v13946_v7 = vadd.f32 %v7147_v6, %v6941_v34  ;;  %9842 = vmatmul.msk.f32.gmra.mxu2 %vm484_vm1, %v6425_v51 }
 0x804   : > { %9882 = vmatmul.msk.f32.gmra.mxu3 %vm484_vm1, %v6708_v50 }
 0x805   : > { %9922 = vmatmul.msk.f32.gmra.mxu0 %vm484_vm1, %v13442_v35 }
 0x806   : > { %v6585_v18 = vpop.f32.mrf.mxu2 }
 0x807   : > { %v6659_v15 = vadd.f32 %v6585_v18, %v6336_v40  ;;  %v6338_v30 = vpop.f32.mrf.mxu1  ;;  %v6868_v39 = vpop.f32.mrf.mxu3  ;;  %v6427_v40 = vld [vmem:[#allocation3 + $0x1d1] sm:$0xff] }
 0x808   : > { %v6339_v49 = vadd.f32 %v6338_v30, %v13669_v59 }
 0x809   : > { %v6942_v32 = vadd.f32 %v6868_v39, %v6659_v15 }
 0x80a   : > { %9803 = vmatmul.msk.f32.gmra.mxu1 %vm484_vm1, %v6707_v57  ;;  %v7153_v51 = vpop.f32.mrf.mxu0 }
 0x80b   : > { %v13954_v6 = vadd.f32 %v7150_v62, %v6942_v32  ;;  %9843 = vmatmul.msk.f32.gmra.mxu2 %vm484_vm1, %v6426_v52  ;;  %v6710_v62 = vld [vmem:[#allocation3 + $0x1ef] sm:$0xff] }
 0x80c   : > { %9883 = vmatmul.msk.f32.gmra.mxu3 %vm484_vm1, %v6709_v53  ;;  %v6428_v32 = vld [vmem:[#allocation3 + $0x1e9] sm:$0xff] }
 0x80d   : > { %9923 = vmatmul.msk.f32.gmra.mxu0 %vm484_vm1, %v13458_v42 }
 0x80e   : > { %v6588_v48 = vpop.f32.mrf.mxu2 }
 0x80f   : > { %v6660_v2 = vadd.f32 %v6588_v48, %v6339_v49  ;;  %v6341_v41 = vpop.f32.mrf.mxu1  ;;  %v6871_v34 = vpop.f32.mrf.mxu3  ;;  %v6711_v49 = vld [vmem:[#allocation3 + $0x207] sm:$0xff] }
 0x810   : > { %v6342_v59 = vadd.f32 %v6341_v41, %v13698_v0  ;;  %v6993_v48 = vld [vmem:[#allocation3 + $0x208] sm:$0xff] }
 0x811   : > { %v6943_v35 = vadd.f32 %v6871_v34, %v6660_v2 }
 0x812   : > { %9804 = vmatmul.msk.f32.gmra.mxu1 %vm484_vm1, %v6708_v50  ;;  %v7156_v57 = vpop.f32.mrf.mxu0 }
 0x813   : > { %v13962_v18 = vadd.f32 %v7153_v51, %v6943_v35  ;;  %9844 = vmatmul.msk.f32.gmra.mxu2 %vm484_vm1, %v6427_v40  ;;  %v6429_v35 = vld [vmem:[#allocation3 + $0x1f1] sm:$0xff] }
 0x814   : > { %9884 = vmatmul.msk.f32.gmra.mxu3 %vm484_vm1, %v6710_v62 }
 0x815   : > { %9924 = vmatmul.msk.f32.gmra.mxu0 %vm484_vm1, %v13471_v4 }
 0x816   : > { %v6591_v15 = vpop.f32.mrf.mxu2 }
 0x817   : > { %v6661_v30 = vadd.f32 %v6591_v15, %v6342_v59  ;;  %v6344_v39 = vpop.f32.mrf.mxu1  ;;  %v6874_v52 = vpop.f32.mrf.mxu3  ;;  %v6712_v59 = vld [vmem:[#allocation3 + $0x20f] sm:$0xff] }
 0x818   : > { %v6345_v0 = vadd.f32 %v6344_v39, %v13721_v5  ;;  %v6994_v15 = vld [vmem:[#allocation3 + $0x210] sm:$0xff] }
 0x819   : > { %v6944_v42 = vadd.f32 %v6874_v52, %v6661_v30 }
 0x81a   : > { %9805 = vmatmul.msk.f32.gmra.mxu1 %vm484_vm1, %v6709_v53  ;;  %v7159_v50 = vpop.f32.mrf.mxu0 }
 0x81b   : > { %v13970_v51 = vadd.f32 %v7156_v57, %v6944_v42  ;;  %9845 = vmatmul.msk.f32.gmra.mxu2 %vm484_vm1, %v6428_v32 }
 0x81c   : > { %9885 = vmatmul.msk.f32.gmra.mxu3 %vm484_vm1, %v6711_v49  ;;  %v7810_v49 = vld [vmem:[#allocation3 + $0x48] sm:$0xff] }
 0x81d   : > { %9925 = vmatmul.msk.f32.gmra.mxu0 %vm484_vm1, %v6993_v48 }
 0x81e   : > { %v6594_v2 = vpop.f32.mrf.mxu2 }
 0x81f   : > { %v6662_v41 = vadd.f32 %v6594_v2, %v6345_v0  ;;  %v6347_v34 = vpop.f32.mrf.mxu1  ;;  %v6877_v40 = vpop.f32.mrf.mxu3 }
 0x820   : > { %v6348_v5 = vadd.f32 %v6347_v34, %v13741_v3 }
 0x821   : > { %v6945_v4 = vadd.f32 %v6877_v40, %v6662_v41  ;;  %v7811_v40 = vld [vmem:[#allocation3 + $0x50] sm:$0xff] }
 0x822   : > { %9806 = vmatmul.msk.f32.gmra.mxu1 %vm484_vm1, %v6710_v62  ;;  %v7162_v53 = vpop.f32.mrf.mxu0 }
 0x823   : > { %v13977_v57 = vadd.f32 %v7159_v50, %v6945_v4  ;;  %9846 = vmatmul.msk.f32.gmra.mxu2 %vm484_vm1, %v6429_v35 }
 0x824   : > { %9886 = vmatmul.msk.f32.gmra.mxu3 %vm484_vm1, %v6712_v59 }
 0x825   : > { %9926 = vmatmul.msk.f32.gmra.mxu0 %vm484_vm1, %v6994_v15  ;;  %v7812_v15 = vld [vmem:[#allocation3 + $0x68] sm:$0xff] }
 0x826   : > { %v6597_v30 = vpop.f32.mrf.mxu2 }
 0x827   : > { %v6663_v39 = vadd.f32 %v6597_v30, %v6348_v5  ;;  %v6350_v52 = vpop.f32.mrf.mxu1  ;;  %v6880_v32 = vpop.f32.mrf.mxu3 }
 0x828   : > { %v6351_v3 = vadd.f32 %v6350_v52, %v13601_v10 }
 0x829   : > { %v6946_v42 = vadd.f32 %v6880_v32, %v6663_v39 }
 0x82a   : > { %9935 = vmatmul.msk.f32.vlgmr.msra.gmra.mxu1 %vm484_vm1, %v13500_v44  ;;  %v7165_v62 = vpop.f32.mrf.mxu0 }
 0x82b   : > { %v13984_v0 = vadd.f32 %v7162_v53, %v6946_v42  ;;  %9975 = vmatmul.msk.f32.vlgmr.msra.gmra.mxu2 %vm484_vm1, %v13504_v24 }
 0x82c   : > { %10015 = vmatmul.msk.f32.vlgmr.msra.gmra.mxu3 %vm484_vm1, %v7810_v49  ;;  %v7813_v49 = vld [vmem:[#allocation3 + $0x70] sm:$0xff] }
 0x82d   : > { %10055 = vmatmul.msk.f32.vlgmr.msra.gmra.mxu0 %vm484_vm1, %v13522_v25 }
 0x82e   : > { %v6600_v50 = vpop.f32.mrf.mxu2 }
 0x82f   : > { %v6664_v48 = vadd.f32 %v6600_v50, %v6351_v3  ;;  %v6353_v2 = vpop.f32.mrf.mxu1  ;;  %v6883_v41 = vpop.f32.mrf.mxu3 }
 0x830   : > { %v6354_v44 = vadd.f32 %v6353_v2, %v13627_v31 }
 0x831   : > { %v6947_v34 = vadd.f32 %v6883_v41, %v6664_v48  ;;  %v7814_v41 = vld [vmem:[#allocation3 + $0x88] sm:$0xff] }
 0x832   : > { %9936 = vmatmul.msk.f32.gmra.mxu1 %vm484_vm1, %v13511_v58  ;;  %v7168_v24 = vpop.f32.mrf.mxu0 }
 0x833   : > { %v13994_v35 = vadd.f32 %v7165_v62, %v6947_v34  ;;  %9976 = vmatmul.msk.f32.gmra.mxu2 %vm484_vm1, %v13515_v26 }
 0x834   : > { %10016 = vmatmul.msk.f32.gmra.mxu3 %vm484_vm1, %v7811_v40 }
 0x835   : > { %10056 = vmatmul.msk.f32.gmra.mxu0 %vm484_vm1, %v13542_v23 }
 0x836   : > { %v6603_v10 = vpop.f32.mrf.mxu2 }
 0x837   : > { %v6665_v4 = vadd.f32 %v6603_v10, %v6354_v44  ;;  %v6356_v59 = vpop.f32.mrf.mxu1  ;;  %v6886_v5 = vpop.f32.mrf.mxu3 }
 0x838   : > { %v6357_v58 = vadd.f32 %v6356_v59, %v13647_v55 }
 0x839   : > { %v6948_v53 = vadd.f32 %v6886_v5, %v6665_v4  ;;  %v7815_v4 = vld [vmem:[#allocation3 + $0x90] sm:$0xff] }
 0x83a   : > { %9937 = vmatmul.msk.f32.gmra.mxu1 %vm484_vm1, %v13522_v25  ;;  %v7171_v26 = vpop.f32.mrf.mxu0 }
 0x83b   : > { %v14004_v30 = vadd.f32 %v7168_v24, %v6948_v53  ;;  %9977 = vmatmul.msk.f32.gmra.mxu2 %vm484_vm1, %v13525_v14 }
 0x83c   : > { %10017 = vmatmul.msk.f32.gmra.mxu3 %vm484_vm1, %v7812_v15 }
 0x83d   : > { %10057 = vmatmul.msk.f32.gmra.mxu0 %vm484_vm1, %v13556_v19 }
 0x83e   : > { %v6606_v31 = vpop.f32.mrf.mxu2 }
 0x83f   : > { %v6666_v39 = vadd.f32 %v6606_v31, %v6357_v58  ;;  %v6359_v52 = vpop.f32.mrf.mxu1  ;;  %v6889_v32 = vpop.f32.mrf.mxu3 }
 0x840   : > { %v6360_v25 = vadd.f32 %v6359_v52, %v13667_v21 }
 0x841   : > { %v6949_v42 = vadd.f32 %v6889_v32, %v6666_v39 }
 0x842   : > { %9938 = vmatmul.msk.f32.gmra.mxu1 %vm484_vm1, %v13542_v23  ;;  %v7174_v14 = vpop.f32.mrf.mxu0 }
 0x843   : > { %v14014_v3 = vadd.f32 %v7171_v26, %v6949_v42  ;;  %9978 = vmatmul.msk.f32.gmra.mxu2 %vm484_vm1, %v13545_v20  ;;  %v7816_v26 = vld [vmem:[#allocation3 + $0xa8] sm:$0xff] }
 0x844   : > { %10018 = vmatmul.msk.f32.gmra.mxu3 %vm484_vm1, %v7813_v49  ;;  %v14555_v49 = vld [vmem:[#allocation89_spill] sm:$0xff] }
 0x845   : > { %10058 = vmatmul.msk.f32.gmra.mxu0 %vm484_vm1, %v13567_v12 }
 0x846   : > { %v6609_v55 = vpop.f32.mrf.mxu2 }
 0x847   : > { %v6667_v62 = vadd.f32 %v6609_v55, %v6360_v25  ;;  %v6362_v50 = vpop.f32.mrf.mxu1  ;;  %v6892_v48 = vpop.f32.mrf.mxu3 }
 0x848   : > { %v6363_v23 = vadd.f32 %v6362_v50, %v13693_v63 }
 0x849   : > { %v6950_v2 = vadd.f32 %v6892_v48, %v6667_v62 }
 0x84a   : > { %9939 = vmatmul.msk.f32.gmra.mxu1 %vm484_vm1, %v13556_v19  ;;  %v7177_v20 = vpop.f32.mrf.mxu0 }
 0x84b   : > { %v14024_v34 = vadd.f32 %v7174_v14, %v6950_v2  ;;  %9979 = vmatmul.msk.f32.gmra.mxu2 %vm484_vm1, %v13559_v61  ;;  %v7817_v14 = vld [vmem:[#allocation3 + $0xb0] sm:$0xff] }
 0x84c   : > { %10019 = vmatmul.msk.f32.gmra.mxu3 %vm484_vm1, %v7814_v41 }
 0x84d   : > { %10059 = vmatmul.msk.f32.gmra.mxu0 %vm484_vm1, %v13581_v11 }
 0x84e   : > { %v6612_v21 = vpop.f32.mrf.mxu2 }
 0x84f   : > { %v6668_v40 = vadd.f32 %v6612_v21, %v6363_v23  ;;  %v6365_v44 = vpop.f32.mrf.mxu1  ;;  %v6895_v24 = vpop.f32.mrf.mxu3 }
 0x850   : > { %v6366_v19 = vadd.f32 %v6365_v44, %v13719_v29 }
 0x851   : > { %v6951_v10 = vadd.f32 %v6895_v24, %v6668_v40  ;;  %v7818_v40 = vld [vmem:[#allocation3 + $0xc8] sm:$0xff]  ;;  %v14560_v24 = vld [vmem:[#allocation86_spill] sm:$0xff] }
 0x852   : > { %9940 = vmatmul.msk.f32.gmra.mxu1 %vm484_vm1, %v13567_v12  ;;  %v7180_v61 = vpop.f32.mrf.mxu0  ;;  %v14554_v12 = vld [vmem:[#allocation103_spill] sm:$0xff] }
 0x853   : > { %v14034_v59 = vadd.f32 %v7177_v20, %v6951_v10  ;;  %9980 = vmatmul.msk.f32.gmra.mxu2 %vm484_vm1, %v13571_v17  ;;  %v14558_v20 = vld [vmem:[#allocation92_spill] sm:$0xff] }
 0x854   : > { %10020 = vmatmul.msk.f32.gmra.mxu3 %vm484_vm1, %v7815_v4 }
 0x855   : > { %10060 = vmatmul.msk.f32.gmra.mxu0 %vm484_vm1, %v13610_v45 }
 0x856   : > { %v6615_v63 = vpop.f32.mrf.mxu2 }
 0x857   : > { %v6669_v5 = vadd.f32 %v6615_v63, %v6366_v19  ;;  %v6368_v53 = vpop.f32.mrf.mxu1  ;;  %v6898_v15 = vpop.f32.mrf.mxu3 }
 0x858   : > { %v6369_v17 = vadd.f32 %v6368_v53, %v14554_v12  ;;  %v14561_v53 = vld [vmem:[#allocation95_spill] sm:$0xff]  ;;  %v14562_v12 = vld [vmem:[#allocation93_spill] sm:$0xff] }
 0x859   : > { %v6952_v58 = vadd.f32 %v6898_v15, %v6669_v5 }
 0x85a   : > { %9941 = vmatmul.msk.f32.gmra.mxu1 %vm484_vm1, %v13581_v11  ;;  %v7183_v29 = vpop.f32.mrf.mxu0  ;;  %v14556_v11 = vld [vmem:[#allocation87_spill] sm:$0xff] }
 0x85b   : > { %v14044_v31 = vadd.f32 %v7180_v61, %v6952_v58  ;;  %9981 = vmatmul.msk.f32.gmra.mxu2 %vm484_vm1, %v13585_v38  ;;  %v14557_v38 = vld [vmem:[#allocation106_spill] sm:$0xff]  ;;  %v7819_v58 = vld [vmem:[#allocation3 + $0xd0] sm:$0xff] }
 0x85c   : > { %10021 = vmatmul.msk.f32.gmra.mxu3 %vm484_vm1, %v7816_v26 }
 0x85d   : > { %10061 = vmatmul.msk.f32.gmra.mxu0 %vm484_vm1, %v14555_v49 }
 0x85e   : > { %v6618_v39 = vpop.f32.mrf.mxu2 }
 0x85f   : > { %v6670_v52 = vadd.f32 %v6618_v39, %v6369_v17  ;;  %v6371_v32 = vpop.f32.mrf.mxu1  ;;  %v6901_v42 = vpop.f32.mrf.mxu3  ;;  %v14563_v17 = vld [vmem:[#allocation88_spill] sm:$0xff] }
 0x860   : > { %v6372_v62 = vadd.f32 %v6371_v32, %v14557_v38 }
 0x861   : > { %v6953_v25 = vadd.f32 %v6901_v42, %v6670_v52 }
 0x862   : > { %9942 = vmatmul.msk.f32.gmra.mxu1 %vm484_vm1, %v13610_v45  ;;  %v7186_v50 = vpop.f32.mrf.mxu0  ;;  %v14559_v45 = vld [vmem:[#allocation90_spill] sm:$0xff] }
 0x863   : > { %v14054_v55 = vadd.f32 %v7183_v29, %v6953_v25  ;;  %9982 = vmatmul.msk.f32.gmra.mxu2 %vm484_vm1, %v14556_v11  ;;  %v14564_v25 = vld [vmem:[#allocation98_spill] sm:$0xff]  ;;  %v7820_v11 = vld [vmem:[#allocation3 + $0xe8] sm:$0xff] }
 0x864   : > { %10022 = vmatmul.msk.f32.gmra.mxu3 %vm484_vm1, %v7817_v14 }
 0x865   : > { %10062 = vmatmul.msk.f32.gmra.mxu0 %vm484_vm1, %v14558_v20 }
 0x866   : > { %v6621_v48 = vpop.f32.mrf.mxu2 }
 0x867   : > { %v6671_v2 = vadd.f32 %v6621_v48, %v6372_v62  ;;  %v6374_v41 = vpop.f32.mrf.mxu1  ;;  %v6904_v23 = vpop.f32.mrf.mxu3  ;;  %v14565_v62 = vld [vmem:[#allocation96_spill] sm:$0xff] }
 0x868   : > { %v6375_v10 = vadd.f32 %v6374_v41, %v14560_v24  ;;  %v7821_v24 = vld [vmem:[#allocation3 + $0xf0] sm:$0xff] }
 0x869   : > { %v6954_v21 = vadd.f32 %v6904_v23, %v6671_v2 }
 0x86a   : > { %9943 = vmatmul.msk.f32.gmra.mxu1 %vm484_vm1, %v14555_v49  ;;  %v7189_v4 = vpop.f32.mrf.mxu0 }
 0x86b   : > { %v14064_v44 = vadd.f32 %v7186_v50, %v6954_v21  ;;  %9983 = vmatmul.msk.f32.gmra.mxu2 %vm484_vm1, %v14559_v45  ;;  %v14566_v50 = vld [vmem:[#allocation91_spill] sm:$0xff] }
 0x86c   : > { %10023 = vmatmul.msk.f32.gmra.mxu3 %vm484_vm1, %v7818_v40  ;;  %v14567_v40 = vld [vmem:[#allocation101_spill] sm:$0xff] }
 0x86d   : > { %10063 = vmatmul.msk.f32.gmra.mxu0 %vm484_vm1, %v14561_v53 }
 0x86e   : > { %v6624_v19 = vpop.f32.mrf.mxu2 }
 0x86f   : > { %v6672_v61 = vadd.f32 %v6624_v19, %v6375_v10  ;;  %v6377_v63 = vpop.f32.mrf.mxu1  ;;  %v6907_v5 = vpop.f32.mrf.mxu3  ;;  %v14569_v19 = vld [vmem:[#allocation94_spill] sm:$0xff] }
 0x870   : > { %v6378_v29 = vadd.f32 %v6377_v63, %v14563_v17 }
 0x871   : > { %v6955_v15 = vadd.f32 %v6907_v5, %v6672_v61 }
 0x872   : > { %9944 = vmatmul.msk.f32.gmra.mxu1 %vm484_vm1, %v14558_v20  ;;  %v7192_v39 = vpop.f32.mrf.mxu0 }
 0x873   : > { %v14074_v26 = vadd.f32 %v7189_v4, %v6955_v15  ;;  %9984 = vmatmul.msk.f32.gmra.mxu2 %vm484_vm1, %v14562_v12  ;;  %v14568_v4 = vld [vmem:[#allocation99_spill] sm:$0xff]  ;;  %v14570_v12 = vld [vmem:[#allocation105_spill] sm:$0xff] }
 0x874   : > { %10024 = vmatmul.msk.f32.gmra.mxu3 %vm484_vm1, %v7819_v58 }
 0x875   : > { %10064 = vmatmul.msk.f32.gmra.mxu0 %vm484_vm1, %v14564_v25 }
 0x876   : > { %v6627_v52 = vpop.f32.mrf.mxu2 }
 0x877   : > { %v6673_v32 = vadd.f32 %v6627_v52, %v6378_v29  ;;  %v6380_v42 = vpop.f32.mrf.mxu1  ;;  %v6910_v49 = vpop.f32.mrf.mxu3  ;;  %v7822_v29 = vld [vmem:[#allocation3 + $0x108] sm:$0xff]  ;;  %v14571_v52 = vld [vmem:[#allocation102_spill] sm:$0xff] }
 0x878   : > { %v6381_v48 = vadd.f32 %v6380_v42, %v14566_v50  ;;  %v14573_v50 = vld [vmem:[#allocation108_spill] sm:$0xff] }
 0x879   : > { %v6956_v14 = vadd.f32 %v6910_v49, %v6673_v32  ;;  %v14572_v32 = vld [vmem:[#allocation97_spill] sm:$0xff] }
 0x87a   : > { %9945 = vmatmul.msk.f32.gmra.mxu1 %vm484_vm1, %v14561_v53  ;;  %v7195_v2 = vpop.f32.mrf.mxu0 }
 0x87b   : > { %v14084_v38 = vadd.f32 %v7192_v39, %v6956_v14  ;;  %9985 = vmatmul.msk.f32.gmra.mxu2 %vm484_vm1, %v14565_v62 }
 0x87c   : > { %10025 = vmatmul.msk.f32.gmra.mxu3 %vm484_vm1, %v7820_v11 }
 0x87d   : > { %10065 = vmatmul.msk.f32.gmra.mxu0 %vm484_vm1, %v14567_v40 }
 0x87e   : > { %v6630_v41 = vpop.f32.mrf.mxu2 }
 0x87f   : > { %v6674_v23 = vadd.f32 %v6630_v41, %v6381_v48  ;;  %v6383_v20 = vpop.f32.mrf.mxu1  ;;  %v6913_v21 = vpop.f32.mrf.mxu3 }
 0x880   : > { %v6384_v61 = vadd.f32 %v6383_v20, %v14569_v19 }
 0x881   : > { %v6957_v45 = vadd.f32 %v6913_v21, %v6674_v23  ;;  %v14574_v23 = vld [vmem:[#allocation100_spill] sm:$0xff] }
 0x882   : > { %9946 = vmatmul.msk.f32.gmra.mxu1 %vm484_vm1, %v14564_v25  ;;  %v7198_v63 = vpop.f32.mrf.mxu0 }
 0x883   : > { %v14094_v10 = vadd.f32 %v7195_v2, %v6957_v45  ;;  %9986 = vmatmul.msk.f32.gmra.mxu2 %vm484_vm1, %v14568_v4  ;;  %v7823_v2 = vld [vmem:[#allocation3 + $0x110] sm:$0xff] }
 0x884   : > { %10026 = vmatmul.msk.f32.gmra.mxu3 %vm484_vm1, %v7821_v24 }
 0x885   : > { %10066 = vmatmul.msk.f32.gmra.mxu0 %vm484_vm1, %v14570_v12 }
 0x886   : > { %v6633_v5 = vpop.f32.mrf.mxu2 }
 0x887   : > { %v6675_v53 = vadd.f32 %v6633_v5, %v6384_v61  ;;  %v6386_v15 = vpop.f32.mrf.mxu1  ;;  %v6916_v58 = vpop.f32.mrf.mxu3  ;;  %v7824_v61 = vld [vmem:[#allocation3 + $0x128] sm:$0xff] }
 0x888   : > { %v6387_v42 = vadd.f32 %v6386_v15, %v14572_v32 }
 0x889   : > { %v6958_v17 = vadd.f32 %v6916_v58, %v6675_v53 }
 0x88a   : > { %9947 = vmatmul.msk.f32.gmra.mxu1 %vm484_vm1, %v14567_v40  ;;  %v7201_v49 = vpop.f32.mrf.mxu0 }
 0x88b   : > { %v14104_v39 = vadd.f32 %v7198_v63, %v6958_v17  ;;  %9987 = vmatmul.msk.f32.gmra.mxu2 %vm484_vm1, %v14571_v52  ;;  %v7825_v52 = vld [vmem:[#allocation3 + $0x130] sm:$0xff] }
 0x88c   : > { %10027 = vmatmul.msk.f32.gmra.mxu3 %vm484_vm1, %v7822_v29 }
 0x88d   : > { %10067 = vmatmul.msk.f32.gmra.mxu0 %vm484_vm1, %v14573_v50 }
 0x88e   : > { %v6636_v25 = vpop.f32.mrf.mxu2 }
 0x88f   : > { %v6676_v14 = vadd.f32 %v6636_v25, %v6387_v42  ;;  %v6389_v11 = vpop.f32.mrf.mxu1  ;;  %v6919_v62 = vpop.f32.mrf.mxu3 }
 0x890   : > { %v6390_v20 = vadd.f32 %v6389_v11, %v14574_v23 }
 0x891   : > { %v6959_v48 = vadd.f32 %v6919_v62, %v6676_v14 }
 0x892   : > { %9948 = vmatmul.msk.f32.gmra.mxu1 %vm484_vm1, %v14570_v12  ;;  %v7204_v21 = vpop.f32.mrf.mxu0 }
 0x893   : > { %v14114_v41 = vadd.f32 %v7201_v49, %v6959_v48  ;;  %9988 = vmatmul.msk.f32.gmra.mxu2 %vm484_vm1, %v13749_v37  ;;  %v14575_v37 = vld [vmem:[#allocation104_spill] sm:$0xff]  ;;  %v7826_v48 = vld [vmem:[#allocation3 + $0x148] sm:$0xff] }
 0x894   : > { %10028 = vmatmul.msk.f32.gmra.mxu3 %vm484_vm1, %v7823_v2 }
 0x895   : > { %10068 = vmatmul.msk.f32.gmra.mxu0 %vm484_vm1, %v13785_v46 }
 0x896   : > { %v6639_v40 = vpop.f32.mrf.mxu2 }
 0x897   : > { %v6677_v45 = vadd.f32 %v6639_v40, %v6390_v20  ;;  %v6392_v24 = vpop.f32.mrf.mxu1  ;;  %v6922_v4 = vpop.f32.mrf.mxu3 }
 0x898   : > { %v6393_v5 = vadd.f32 %v6392_v24, %v14575_v37 }
 0x899   : > { %v6960_v19 = vadd.f32 %v6922_v4, %v6677_v45  ;;  %v7827_v4 = vld [vmem:[#allocation3 + $0x150] sm:$0xff] }
 0x89a   : > { %9949 = vmatmul.msk.f32.gmra.mxu1 %vm484_vm1, %v14573_v50  ;;  %v7207_v53 = vpop.f32.mrf.mxu0 }
 0x89b   : > { %v14124_v63 = vadd.f32 %v7204_v21, %v6960_v19  ;;  %9989 = vmatmul.msk.f32.gmra.mxu2 %vm484_vm1, %v13767_v16  ;;  %v14576_v16 = vld [vmem:[#allocation107_spill] sm:$0xff] }
 0x89c   : > { %10029 = vmatmul.msk.f32.gmra.mxu3 %vm484_vm1, %v7824_v61  ;;  %v14578_v19 = vld [vmem:[#allocation111_spill] sm:$0xff]  ;;  %v14579_v61 = vld [vmem:[#allocation110_spill] sm:$0xff] }
 0x89d   : > { %10069 = vmatmul.msk.f32.gmra.mxu0 %vm484_vm1, %v13803_v1 }
 0x89e   : > { %v6642_v15 = vpop.f32.mrf.mxu2 }
 0x89f   : > { %v6678_v58 = vadd.f32 %v6642_v15, %v6393_v5  ;;  %v6395_v12 = vpop.f32.mrf.mxu1  ;;  %v6925_v17 = vpop.f32.mrf.mxu3 }
 0x8a0   : > { %v6396_v42 = vadd.f32 %v6395_v12, %v14576_v16  ;;  %v7828_v16 = vld [vmem:[#allocation3 + $0x168] sm:$0xff] }
 0x8a1   : > { %v6961_v29 = vadd.f32 %v6925_v17, %v6678_v58 }
 0x8a2   : > { %9950 = vmatmul.msk.f32.gmra.mxu1 %vm484_vm1, %v13785_v46  ;;  %v7210_v49 = vpop.f32.mrf.mxu0  ;;  %v14577_v46 = vld [vmem:[#allocation109_spill] sm:$0xff] }
 0x8a3   : > { %v14134_v32 = vadd.f32 %v7207_v53, %v6961_v29  ;;  %9990 = vmatmul.msk.f32.gmra.mxu2 %vm484_vm1, %v13789_v13  ;;  %v7263_v29 = vld [vmem:[#allocation3 + $0x149] sm:$0xff] }
 0x8a4   : > { %10030 = vmatmul.msk.f32.gmra.mxu3 %vm484_vm1, %v7825_v52  ;;  %v14580_v52 = vld [vmem:[#allocation114_spill] sm:$0xff] }
 0x8a5   : > { %10070 = vmatmul.msk.f32.gmra.mxu0 %vm484_vm1, %v13818_v8 }
 0x8a6   : > { %v6645_v25 = vpop.f32.mrf.mxu2 }
 0x8a7   : > { %v6679_v14 = vadd.f32 %v6645_v25, %v6396_v42  ;;  %v6928_v11 = vpop.f32.mrf.mxu3  ;;  %v7399_v62 = vpop.f32.mrf.mxu1 }
 0x8a8   : > { %v7495_v13 = vadd.f32 %v7399_v62, %v14577_v46 }
 0x8a9   : > { %v6962_v50 = vadd.f32 %v6928_v11, %v6679_v14 }
 0x8aa   : > { %9951 = vmatmul.msk.f32.gmra.mxu1 %vm484_vm1, %v13803_v1  ;;  %v8246_v23 = vpop.f32.mrf.mxu0  ;;  %v14157_v1 = vld [vmem:[%s14310_s6] ss:$0 sm:$0xff] }
 0x8ab   : > { %v14144_v2 = vadd.f32 %v7210_v49, %v6962_v50  ;;  %9991 = vmatmul.msk.f32.gmra.mxu2 %vm484_vm1, %v13807_v36  ;;  %v14581_v49 = vld [vmem:[#allocation112_spill] sm:$0xff] }
 0x8ac   : > { %10031 = vmatmul.msk.f32.gmra.mxu3 %vm484_vm1, %v7826_v48 }
 0x8ad   : > { %10071 = vmatmul.msk.f32.gmra.mxu0 %vm484_vm1, %v13833_v28 }
 0x8ae   : > { %v7682_v20 = vpop.f32.mrf.mxu2 }
 0x8af   : > { %v7778_v21 = vadd.f32 %v7682_v20, %v7495_v13  ;;  %v7402_v40 = vpop.f32.mrf.mxu1  ;;  %v7964_v45 = vpop.f32.mrf.mxu3  ;;  %v7829_v20 = vld [vmem:[#allocation3 + $0x170] sm:$0xff] }
 0x8b0   : > { %v7496_v37 = vadd.f32 %v7402_v40, %v14579_v61 }
 0x8b1   : > { %v8060_v24 = vadd.f32 %v7964_v45, %v7778_v21 }
 0x8b2   : > { %9952 = vmatmul.msk.f32.gmra.mxu1 %vm484_vm1, %v13818_v8  ;;  %v8249_v28 = vpop.f32.mrf.mxu0 }
 0x8b3   : > { %v8342_v36 = vadd.f32 %v8246_v23, %v8060_v24  ;;  %9992 = vmatmul.msk.f32.gmra.mxu2 %vm484_vm1, %v14578_v19 }
 0x8b4   : > { %10032 = vmatmul.msk.f32.gmra.mxu3 %vm484_vm1, %v7827_v4 }
 0x8b5   : > { %v8378_v5 = vadd.f32 %v14157_v1, %v8342_v36  ;;  %10072 = vmatmul.msk.f32.gmra.mxu0 %vm484_vm1, %v14580_v52 }
 0x8b6   : > { %v7685_v53 = vpop.f32.mrf.mxu2 }
 0x8b7   : > { %v8410_v15 = vmax.f32 %v8378_v5, 0.0  ;;  %v7779_v58 = vadd.f32 %v7685_v53, %v7496_v37  ;;  %v7405_v12 = vpop.f32.mrf.mxu1  ;;  %v7967_v17 = vpop.f32.mrf.mxu3  ;;  %v7265_v37 = vld [vmem:[#allocation3 + $0x169] sm:$0xff] }
 0x8b8   : > { %v7497_v25 = vadd.f32 %v7405_v12, %v14581_v49  ;;  %v7548_v5 = vld [vmem:[#allocation3 + $0x187] sm:$0xff]  ;;  %v7549_v49 = vld [vmem:[#allocation3 + $0x18f] sm:$0xff] }
 0x8b9   : > { %8442 = vst [vmem:[#allocation8] sm:$0xff] %v8410_v15  ;;  %v8061_v8 = vadd.f32 %v7967_v17, %v7779_v58  ;;  %v14583_v15 = vld [vmem:[#allocation115_spill] sm:$0xff] }
 0x8ba   : > { %9953 = vmatmul.msk.f32.gmra.mxu1 %vm484_vm1, %v7263_v29  ;;  %v8252_v11 = vpop.f32.mrf.mxu0 }
 0x8bb   : > { %v8343_v42 = vadd.f32 %v8249_v28, %v8061_v8  ;;  %9993 = vmatmul.msk.f32.gmra.mxu2 %vm484_vm1, %v13837_v33  ;;  %v14582_v33 = vld [vmem:[#allocation113_spill] sm:$0xff] }
 0x8bc   : > { %10033 = vmatmul.msk.f32.gmra.mxu3 %vm484_vm1, %v7828_v16 }
 0x8bd   : > { %v8379_v14 = vadd.f32 %v14157_v1, %v8343_v42  ;;  %10073 = vmatmul.msk.f32.gmra.mxu0 %vm484_vm1, %v13875_v9  ;;  %v7266_v42 = vld [vmem:[#allocation3 + $0x171] sm:$0xff] }
 0x8be   : > { %v7688_v62 = vpop.f32.mrf.mxu2 }
 0x8bf   : > { %v8411_v50 = vmax.f32 %v8379_v14, 0.0  ;;  %v7780_v48 = vadd.f32 %v7688_v62, %v7497_v25  ;;  %v7408_v46 = vpop.f32.mrf.mxu1  ;;  %v7970_v13 = vpop.f32.mrf.mxu3  ;;  %v7831_v14 = vld [vmem:[#allocation3 + $0x190] sm:$0xff] }
 0x8c0   : > { %v7498_v40 = vadd.f32 %v7408_v46, %v14582_v33  ;;  %v14584_v62 = vld [vmem:[#allocation116_spill] sm:$0xff] }
 0x8c1   : > { %8443 = vst [vmem:[#allocation8 + $0x8] sm:$0xff] %v8411_v50  ;;  %v8062_v23 = vadd.f32 %v7970_v13, %v7780_v48  ;;  %v7267_v33 = vld [vmem:[#allocation3 + $0x189] sm:$0xff] }
 0x8c2   : > { %9954 = vmatmul.msk.f32.gmra.mxu1 %vm484_vm1, %v14580_v52  ;;  %v8255_v24 = vpop.f32.mrf.mxu0 }
 0x8c3   : > { %v8344_v21 = vadd.f32 %v8252_v11, %v8062_v23  ;;  %9994 = vmatmul.msk.f32.gmra.mxu2 %vm484_vm1, %v13861_v60  ;;  %v7830_v60 = vld [vmem:[#allocation3 + $0x188] sm:$0xff] }
 0x8c4   : > { %10034 = vmatmul.msk.f32.gmra.mxu3 %vm484_vm1, %v7829_v20 }
 0x8c5   : > { %v8380_v45 = vadd.f32 %v14157_v1, %v8344_v21  ;;  %10074 = vmatmul.msk.f32.gmra.mxu0 %vm484_vm1, %v13887_v56 }
 0x8c6   : > { %v7691_v4 = vpop.f32.mrf.mxu2 }
 0x8c7   : > { %v8412_v36 = vmax.f32 %v8380_v45, 0.0  ;;  %v7781_v9 = vadd.f32 %v7691_v4, %v7498_v40  ;;  %v7411_v19 = vpop.f32.mrf.mxu1  ;;  %v7973_v61 = vpop.f32.mrf.mxu3 }
 0x8c8   : > { %v7499_v58 = vadd.f32 %v7411_v19, %v14583_v15  ;;  %v8474_v13 = vld [vmem:[#allocation8] ss:$2 sm:$0xff]  ;;  %v8506_v23 = vld [vmem:[#allocation8 + $0x1] ss:$2 sm:$0xff] }
 0x8c9   : > { %8444 = vst [vmem:[#allocation8 + $0x10] sm:$0xff] %v8412_v36  ;;  %v8063_v28 = vadd.f32 %v7973_v61, %v7781_v9  ;;  %v7550_v36 = vld [vmem:[#allocation3 + $0x1a7] sm:$0xff]  ;;  %v8537_v9 = vmax.f32 %v8474_v13, %v8506_v23 }
 0x8ca   : > { %9955 = vmatmul.msk.f32.gmra.mxu1 %vm484_vm1, %v7265_v37  ;;  %v8258_v17 = vpop.f32.mrf.mxu0  ;;  %v7832_v37 = vld [vmem:[#allocation3 + $0x1a8] sm:$0xff] }
 0x8cb   : > { %v8345_v53 = vadd.f32 %v8255_v24, %v8063_v28  ;;  %9995 = vmatmul.msk.f32.gmra.mxu2 %vm484_vm1, %v7548_v5  ;;  %v7269_v13 = vld [vmem:[#allocation3 + $0x1a9] sm:$0xff] }
 0x8cc   : > { %10035 = vmatmul.msk.f32.gmra.mxu3 %vm484_vm1, %v7830_v60  ;;  %v7552_v23 = vld [vmem:[#allocation3 + $0x1c7] sm:$0xff] }
 0x8cd   : > { %v8381_v12 = vadd.f32 %v14157_v1, %v8345_v53  ;;  %10075 = vmatmul.msk.f32.gmra.mxu0 %vm484_vm1, %v13899_v54 }
 0x8ce   : > { %v7694_v29 = vpop.f32.mrf.mxu2 }
 0x8cf   : > { %v8413_v52 = vmax.f32 %v8381_v12, 0.0  ;;  %v7782_v8 = vadd.f32 %v7694_v29, %v7499_v58  ;;  %v7414_v16 = vpop.f32.mrf.mxu1  ;;  %v7976_v56 = vpop.f32.mrf.mxu3 }
 0x8d0   : > { %v7500_v50 = vadd.f32 %v7414_v16, %v14584_v62 }
 0x8d1   : > { %8445 = vst [vmem:[#allocation8 + $0x18] sm:$0xff] %v8413_v52  ;;  %v8064_v25 = vadd.f32 %v7976_v56, %v7782_v8  ;;  %v7268_v52 = vld [vmem:[#allocation3 + $0x191] sm:$0xff] }
 0x8d2   : > { %9956 = vmatmul.msk.f32.gmra.mxu1 %vm484_vm1, %v7266_v42  ;;  %v8261_v46 = vpop.f32.mrf.mxu0  ;;  %v7551_v8 = vld [vmem:[#allocation3 + $0x1af] sm:$0xff] }
 0x8d3   : > { %v8346_v11 = vadd.f32 %v8258_v17, %v8064_v25  ;;  %9996 = vmatmul.msk.f32.gmra.mxu2 %vm484_vm1, %v7549_v49  ;;  %v7833_v56 = vld [vmem:[#allocation3 + $0x1b0] sm:$0xff] }
 0x8d4   : > { %10036 = vmatmul.msk.f32.gmra.mxu3 %vm484_vm1, %v7831_v14 }
 0x8d5   : > { %v8382_v48 = vadd.f32 %v14157_v1, %v8346_v11  ;;  %10076 = vmatmul.msk.f32.gmra.mxu0 %vm484_vm1, %v13919_v27  ;;  %v8115_v11 = vld [vmem:[#allocation3 + $0x1b1] sm:$0xff] }
 0x8d6   : > { %v7697_v20 = vpop.f32.mrf.mxu2 }
 0x8d7   : > { %v8414_v21 = vmax.f32 %v8382_v48, 0.0  ;;  %v7783_v54 = vadd.f32 %v7697_v20, %v7500_v50  ;;  %v7417_v24 = vpop.f32.mrf.mxu1  ;;  %v7979_v4 = vpop.f32.mrf.mxu3 }
 0x8d8   : > { %v8476_v40 = vld [vmem:[#allocation8 + $0x10] ss:$2 sm:$0xff]  ;;  %v8508_v45 = vld [vmem:[#allocation8 + $0x11] ss:$2 sm:$0xff]  ;;  %v7501_v60 = vadd.f32 %v7417_v24, %v13891_v43 }
 0x8d9   : > { %v8538_v19 = vmax.f32 %v8476_v40, %v8508_v45  ;;  %8446 = vst [vmem:[#allocation8 + $0x20] sm:$0xff] %v8414_v21  ;;  %v8065_v61 = vadd.f32 %v7979_v4, %v7783_v54  ;;  %v14585_v43 = vld [vmem:[#allocation117_spill] sm:$0xff]  ;;  %v7834_v21 = vld [vmem:[#allocation3 + $0x1c8] sm:$0xff] }
 0x8da   : > { %9957 = vmatmul.msk.f32.gmra.mxu1 %vm484_vm1, %v7267_v33  ;;  %v8264_v15 = vpop.f32.mrf.mxu0  ;;  %v14586_v33 = vld [vmem:[#allocation118_spill] sm:$0xff]  ;;  %v8116_v4 = vld [vmem:[#allocation3 + $0x1c9] sm:$0xff] }
 0x8db   : > { %v8586_v5 = vmax.f32 %v8537_v9, %v8538_v19  ;;  %v8347_v28 = vadd.f32 %v8261_v46, %v8065_v61  ;;  %9997 = vmatmul.msk.f32.gmra.mxu2 %vm484_vm1, %v7550_v36 }
 0x8dc   : > { %10037 = vmatmul.msk.f32.gmra.mxu3 %vm484_vm1, %v7832_v37 }
 0x8dd   : > { %8594 = vst [vmem:[%s10244_s30] sm:$0xff] %v8586_v5  ;;  %v8383_v53 = vadd.f32 %v14157_v1, %v8347_v28  ;;  %10077 = vmatmul.msk.f32.gmra.mxu0 %vm484_vm1, %v13933_v47  ;;  %v7553_v5 = vld [vmem:[#allocation3 + $0x1cf] sm:$0xff] }
 0x8de   : > { %v7700_v27 = vpop.f32.mrf.mxu2 }
 0x8df   : > { %v8415_v58 = vmax.f32 %v8383_v53, 0.0  ;;  %v7784_v12 = vadd.f32 %v7700_v27, %v7501_v60  ;;  %v7420_v17 = vpop.f32.mrf.mxu1  ;;  %v7982_v29 = vpop.f32.mrf.mxu3  ;;  %v7835_v60 = vld [vmem:[#allocation3 + $0x1d0] sm:$0xff] }
 0x8e0   : > { %v7502_v49 = vadd.f32 %v7420_v17, %v14585_v43 }
 0x8e1   : > { %8447 = vst [vmem:[#allocation8 + $0x28] sm:$0xff] %v8415_v58  ;;  %v8066_v16 = vadd.f32 %v7982_v29, %v7784_v12  ;;  %v8117_v12 = vld [vmem:[#allocation3 + $0x1d1] sm:$0xff] }
 0x8e2   : > { %9958 = vmatmul.msk.f32.gmra.mxu1 %vm484_vm1, %v7268_v52  ;;  %v8267_v14 = vpop.f32.mrf.mxu0 }
 0x8e3   : > { %v8348_v42 = vadd.f32 %v8264_v15, %v8066_v16  ;;  %9998 = vmatmul.msk.f32.gmra.mxu2 %vm484_vm1, %v7551_v8 }
 0x8e4   : > { %10038 = vmatmul.msk.f32.gmra.mxu3 %vm484_vm1, %v7833_v56 }
 0x8e5   : > { %v8384_v25 = vadd.f32 %v14157_v1, %v8348_v42  ;;  %10078 = vmatmul.msk.f32.gmra.mxu0 %vm484_vm1, %v8115_v11 }
 0x8e6   : > { %v7703_v62 = vpop.f32.mrf.mxu2 }
 0x8e7   : > { %v8416_v50 = vmax.f32 %v8384_v25, 0.0  ;;  %v7785_v48 = vadd.f32 %v7703_v62, %v7502_v49  ;;  %v7423_v47 = vpop.f32.mrf.mxu1  ;;  %v7985_v46 = vpop.f32.mrf.mxu3  ;;  %v7554_v25 = vld [vmem:[#allocation3 + $0x1e7] sm:$0xff] }
 0x8e8   : > { %v7503_v40 = vadd.f32 %v7423_v47, %v14586_v33  ;;  %v8478_v17 = vld [vmem:[#allocation8 + $0x20] ss:$2 sm:$0xff]  ;;  %v8510_v29 = vld [vmem:[#allocation8 + $0x21] ss:$2 sm:$0xff] }
 0x8e9   : > { %8448 = vst [vmem:[#allocation8 + $0x30] sm:$0xff] %v8416_v50  ;;  %v8067_v20 = vadd.f32 %v7985_v46, %v7785_v48  ;;  %v7836_v62 = vld [vmem:[#allocation3 + $0x1e8] sm:$0xff] }
 0x8ea   : > { %9959 = vmatmul.msk.f32.gmra.mxu1 %vm484_vm1, %v7269_v13  ;;  %v8270_v24 = vpop.f32.mrf.mxu0 }
 0x8eb   : > { %v8349_v54 = vadd.f32 %v8267_v14, %v8067_v20  ;;  %9999 = vmatmul.msk.f32.gmra.mxu2 %vm484_vm1, %v7552_v23  ;;  %v8118_v23 = vld [vmem:[#allocation3 + $0x1e9] sm:$0xff] }
 0x8ec   : > { %10039 = vmatmul.msk.f32.gmra.mxu3 %vm484_vm1, %v7834_v21 }
 0x8ed   : > { %v8385_v45 = vadd.f32 %v14157_v1, %v8349_v54  ;;  %10079 = vmatmul.msk.f32.gmra.mxu0 %vm484_vm1, %v8116_v4 }
 0x8ee   : > { %v7706_v36 = vpop.f32.mrf.mxu2 }
 0x8ef   : > { %v8417_v9 = vmax.f32 %v8385_v45, 0.0  ;;  %v7786_v19 = vadd.f32 %v7706_v36, %v7503_v40  ;;  %v7426_v61 = vpop.f32.mrf.mxu1  ;;  %v7988_v37 = vpop.f32.mrf.mxu3  ;;  %v7555_v45 = vld [vmem:[#allocation3 + $0x1ef] sm:$0xff] }
 0x8f0   : > { %v7504_v15 = vadd.f32 %v7426_v61, %v13937_v22  ;;  %v8539_v22 = vmax.f32 %v8478_v17, %v8510_v29  ;;  %v8119_v61 = vld [vmem:[#allocation3 + $0x1f1] sm:$0xff] }
 0x8f1   : > { %8449 = vst [vmem:[#allocation8 + $0x38] sm:$0xff] %v8417_v9  ;;  %v8068_v28 = vadd.f32 %v7988_v37, %v7786_v19 }
 0x8f2   : > { %9960 = vmatmul.msk.f32.gmra.mxu1 %vm484_vm1, %v8115_v11  ;;  %v8273_v58 = vpop.f32.mrf.mxu0 }
 0x8f3   : > { %v8350_v53 = vadd.f32 %v8270_v24, %v8068_v28  ;;  %10000 = vmatmul.msk.f32.gmra.mxu2 %vm484_vm1, %v7553_v5 }
 0x8f4   : > { %10040 = vmatmul.msk.f32.gmra.mxu3 %vm484_vm1, %v7835_v60 }
 0x8f5   : > { %v8386_v27 = vadd.f32 %v14157_v1, %v8350_v53  ;;  %10080 = vmatmul.msk.f32.gmra.mxu0 %vm484_vm1, %v8117_v12 }
 0x8f6   : > { %v7709_v52 = vpop.f32.mrf.mxu2 }
 0x8f7   : > { %v8418_v8 = vmax.f32 %v8386_v27, 0.0  ;;  %v7787_v16 = vadd.f32 %v7709_v52, %v7504_v15  ;;  %v7429_v43 = vpop.f32.mrf.mxu1  ;;  %v7991_v49 = vpop.f32.mrf.mxu3  ;;  %v7556_v15 = vld [vmem:[#allocation3 + $0x207] sm:$0xff] }
 0x8f8   : > { %v8480_v56 = vld [vmem:[#allocation8 + $0x30] ss:$2 sm:$0xff]  ;;  %v8512_v42 = vld [vmem:[#allocation8 + $0x31] ss:$2 sm:$0xff]  ;;  %v7505_v47 = vadd.f32 %v7429_v43, %v13946_v7 }
 0x8f9   : > { %v8540_v14 = vmax.f32 %v8480_v56, %v8512_v42  ;;  %8450 = vst [vmem:[#allocation8 + $0x40] sm:$0xff] %v8418_v8  ;;  %v8069_v11 = vadd.f32 %v7991_v49, %v7787_v16  ;;  %v8120_v52 = vld [vmem:[#allocation3 + $0x209] sm:$0xff] }
 0x8fa   : > { %9961 = vmatmul.msk.f32.gmra.mxu1 %vm484_vm1, %v8116_v4  ;;  %v8276_v13 = vpop.f32.mrf.mxu0  ;;  %v7837_v4 = vld [vmem:[#allocation3 + $0x1f0] sm:$0xff] }
 0x8fb   : > { %v8587_v50 = vmax.f32 %v8539_v22, %v8540_v14  ;;  %v8351_v48 = vadd.f32 %v8273_v58, %v8069_v11  ;;  %10001 = vmatmul.msk.f32.gmra.mxu2 %vm484_vm1, %v7554_v25  ;;  %v7838_v58 = vld [vmem:[#allocation3 + $0x208] sm:$0xff]  ;;  %v7839_v22 = vld [vmem:[#allocation3 + $0x210] sm:$0xff] }
 0x8fc   : > { %10041 = vmatmul.msk.f32.gmra.mxu3 %vm484_vm1, %v7836_v62  ;;  %v7557_v49 = vld [vmem:[#allocation3 + $0x20f] sm:$0xff] }
 0x8fd   : > { %8595 = vst [vmem:[%s10244_s30 + $0x8] sm:$0xff] %v8587_v50  ;;  %v8387_v46 = vadd.f32 %v14157_v1, %v8351_v48  ;;  %10081 = vmatmul.msk.f32.gmra.mxu0 %vm484_vm1, %v8118_v23  ;;  %v8121_v50 = vld [vmem:[#allocation3 + $0x211] sm:$0xff] }
 0x8fe   : > { %v7712_v20 = vpop.f32.mrf.mxu2 }
 0x8ff   : > { %v8419_v21 = vmax.f32 %v8387_v46, 0.0  ;;  %v7788_v54 = vadd.f32 %v7712_v20, %v7505_v47  ;;  %v7432_v33 = vpop.f32.mrf.mxu1  ;;  %v7994_v40 = vpop.f32.mrf.mxu3 }
 0x900   : > { %v7506_v7 = vadd.f32 %v7432_v33, %v13954_v6 }
 0x901   : > { %8451 = vst [vmem:[#allocation8 + $0x48] sm:$0xff] %v8419_v21  ;;  %v8070_v24 = vadd.f32 %v7994_v40, %v7788_v54  ;;  %v7558_v40 = vld [vmem:[#allocation3 + $0x227] sm:$0xff] }
 0x902   : > { %9962 = vmatmul.msk.f32.gmra.mxu1 %vm484_vm1, %v8117_v12  ;;  %v8279_v19 = vpop.f32.mrf.mxu0 }
 0x903   : > { %v8352_v36 = vadd.f32 %v8276_v13, %v8070_v24  ;;  %10002 = vmatmul.msk.f32.gmra.mxu2 %vm484_vm1, %v7555_v45 }
 0x904   : > { %10042 = vmatmul.msk.f32.gmra.mxu3 %vm484_vm1, %v7837_v4  ;;  %v7840_v4 = vld [vmem:[#allocation3 + $0x228] sm:$0xff] }
 0x905   : > { %v8388_v9 = vadd.f32 %v14157_v1, %v8352_v36  ;;  %10082 = vmatmul.msk.f32.gmra.mxu0 %vm484_vm1, %v8119_v61 }
 0x906   : > { %v7715_v37 = vpop.f32.mrf.mxu2 }
 0x907   : > { %v8420_v5 = vmax.f32 %v8388_v9, 0.0  ;;  %v7789_v28 = vadd.f32 %v7715_v37, %v7506_v7  ;;  %v7435_v60 = vpop.f32.mrf.mxu1  ;;  %v7997_v53 = vpop.f32.mrf.mxu3  ;;  %v8122_v37 = vld [vmem:[#allocation3 + $0x229] sm:$0xff] }
 0x908   : > { %v7507_v6 = vadd.f32 %v7435_v60, %v13962_v18  ;;  %v8482_v48 = vld [vmem:[#allocation8 + $0x40] ss:$2 sm:$0xff]  ;;  %v8514_v47 = vld [vmem:[#allocation8 + $0x41] ss:$2 sm:$0xff] }
 0x909   : > { %8452 = vst [vmem:[#allocation8 + $0x50] sm:$0xff] %v8420_v5  ;;  %v8071_v27 = vadd.f32 %v7997_v53, %v7789_v28 }
 0x90a   : > { %9963 = vmatmul.msk.f32.gmra.mxu1 %vm484_vm1, %v8118_v23  ;;  %v8282_v29 = vpop.f32.mrf.mxu0 }
 0x90b   : > { %v8353_v12 = vadd.f32 %v8279_v19, %v8071_v27  ;;  %10003 = vmatmul.msk.f32.gmra.mxu2 %vm484_vm1, %v7556_v15  ;;  %v7559_v27 = vld [vmem:[#allocation3 + $0x22f] sm:$0xff] }
 0x90c   : > { %10043 = vmatmul.msk.f32.gmra.mxu3 %vm484_vm1, %v7838_v58 }
 0x90d   : > { %v8389_v17 = vadd.f32 %v14157_v1, %v8353_v12  ;;  %10083 = vmatmul.msk.f32.gmra.mxu0 %vm484_vm1, %v8120_v52  ;;  %v7841_v12 = vld [vmem:[#allocation3 + $0x230] sm:$0xff] }
 0x90e   : > { %v7718_v8 = vpop.f32.mrf.mxu2 }
 0x90f   : > { %v8421_v16 = vmax.f32 %v8389_v17, 0.0  ;;  %v7790_v56 = vadd.f32 %v7718_v8, %v7507_v6  ;;  %v7438_v42 = vpop.f32.mrf.mxu1  ;;  %v8000_v43 = vpop.f32.mrf.mxu3 }
 0x910   : > { %v7508_v18 = vadd.f32 %v7438_v42, %v13970_v51  ;;  %v8541_v51 = vmax.f32 %v8482_v48, %v8514_v47 }
 0x911   : > { %8453 = vst [vmem:[#allocation8 + $0x58] sm:$0xff] %v8421_v16  ;;  %v8072_v25 = vadd.f32 %v8000_v43, %v7790_v56 }
 0x912   : > { %9964 = vmatmul.msk.f32.gmra.mxu1 %vm484_vm1, %v8119_v61  ;;  %v8285_v62 = vpop.f32.mrf.mxu0 }
 0x913   : > { %v8354_v14 = vadd.f32 %v8282_v29, %v8072_v25  ;;  %10004 = vmatmul.msk.f32.gmra.mxu2 %vm484_vm1, %v7557_v49 }
 0x914   : > { %10044 = vmatmul.msk.f32.gmra.mxu3 %vm484_vm1, %v7839_v22 }
 0x915   : > { %v8390_v11 = vadd.f32 %v14157_v1, %v8354_v14  ;;  %10084 = vmatmul.msk.f32.gmra.mxu0 %vm484_vm1, %v8121_v50 }
 0x916   : > { %v7721_v46 = vpop.f32.mrf.mxu2 }
 0x917   : > { %v8422_v13 = vmax.f32 %v8390_v11, 0.0  ;;  %v7791_v23 = vadd.f32 %v7721_v46, %v7508_v18  ;;  %v7441_v54 = vpop.f32.mrf.mxu1  ;;  %v8003_v33 = vpop.f32.mrf.mxu3 }
 0x918   : > { %v8484_v20 = vld [vmem:[#allocation8 + $0x50] ss:$2 sm:$0xff]  ;;  %v8516_v21 = vld [vmem:[#allocation8 + $0x51] ss:$2 sm:$0xff]  ;;  %v7509_v9 = vadd.f32 %v7441_v54, %v13977_v57 }
 0x919   : > { %v8542_v45 = vmax.f32 %v8484_v20, %v8516_v21  ;;  %8454 = vst [vmem:[#allocation8 + $0x60] sm:$0xff] %v8422_v13  ;;  %v8073_v24 = vadd.f32 %v8003_v33, %v7791_v23 }
 0x91a   : > { %9965 = vmatmul.msk.f32.gmra.mxu1 %vm484_vm1, %v8120_v52  ;;  %v8288_v61 = vpop.f32.mrf.mxu0  ;;  %v8123_v52 = vld [vmem:[#allocation3 + $0x231] sm:$0xff] }
 0x91b   : > { %v8588_v36 = vmax.f32 %v8541_v51, %v8542_v45  ;;  %v8355_v7 = vadd.f32 %v8285_v62, %v8073_v24  ;;  %10005 = vmatmul.msk.f32.gmra.mxu2 %vm484_vm1, %v7558_v40 }
 0x91c   : > { %10045 = vmatmul.msk.f32.gmra.mxu3 %vm484_vm1, %v7840_v4 }
 0x91d   : > { %8596 = vst [vmem:[%s10244_s30 + $0x10] sm:$0xff] %v8588_v36  ;;  %v8391_v19 = vadd.f32 %v14157_v1, %v8355_v7  ;;  %10085 = vmatmul.msk.f32.gmra.mxu0 %vm484_vm1, %v8122_v37 }
 0x91e   : > { %v7724_v5 = vpop.f32.mrf.mxu2 }
 0x91f   : > { %v8423_v28 = vmax.f32 %v8391_v19, 0.0  ;;  %v7792_v60 = vadd.f32 %v7724_v5, %v7509_v9  ;;  %v7444_v53 = vpop.f32.mrf.mxu1  ;;  %v8006_v15 = vpop.f32.mrf.mxu3 }
 0x920   : > { %v7510_v57 = vadd.f32 %v7444_v53, %v13984_v0 }
 0x921   : > { %8455 = vst [vmem:[#allocation8 + $0x68] sm:$0xff] %v8423_v28  ;;  %v8074_v58 = vadd.f32 %v8006_v15, %v7792_v60 }
 0x922   : > { %9966 = vmatmul.msk.f32.gmra.mxu1 %vm484_vm1, %v8121_v50  ;;  %v8291_v29 = vpop.f32.mrf.mxu0 }
 0x923   : > { %v8356_v6 = vadd.f32 %v8288_v61, %v8074_v58  ;;  %10006 = vmatmul.msk.f32.gmra.mxu2 %vm484_vm1, %v7559_v27 }
 0x924   : > { %10046 = vmatmul.msk.f32.gmra.mxu3 %vm484_vm1, %v7841_v12 }
 0x925   : > { %v8392_v17 = vadd.f32 %v14157_v1, %v8356_v6  ;;  %10086 = vmatmul.msk.f32.gmra.mxu0 %vm484_vm1, %v8123_v52 }
 0x926   : > { %v7727_v8 = vpop.f32.mrf.mxu2 }
 0x927   : > { %v8424_v16 = vmax.f32 %v8392_v17, 0.0  ;;  %v7793_v56 = vadd.f32 %v7727_v8, %v7510_v57  ;;  %v7447_v42 = vpop.f32.mrf.mxu1  ;;  %v8009_v43 = vpop.f32.mrf.mxu3 }
 0x928   : > { %v7511_v22 = vadd.f32 %v7447_v42, %v13994_v35  ;;  %v8486_v21 = vld [vmem:[#allocation8 + $0x60] ss:$2 sm:$0xff]  ;;  %v8518_v54 = vld [vmem:[#allocation8 + $0x61] ss:$2 sm:$0xff] }
 0x929   : > { %8456 = vst [vmem:[#allocation8 + $0x70] sm:$0xff] %v8424_v16  ;;  %v8075_v49 = vadd.f32 %v8009_v43, %v7793_v56  ;;  %v8543_v36 = vmax.f32 %v8486_v21, %v8518_v54 }
 0x92a   : > { %v8294_v14 = vpop.f32.mrf.mxu0 }
 0x92b   : > { %v8357_v25 = vadd.f32 %v8291_v29, %v8075_v49 }
 0x92d   : > { %v8393_v0 = vadd.f32 %v14157_v1, %v8357_v25 }
 0x92e   : > { %v7730_v18 = vpop.f32.mrf.mxu2 }
 0x92f   : > { %v8425_v11 = vmax.f32 %v8393_v0, 0.0  ;;  %v7794_v62 = vadd.f32 %v7730_v18, %v7511_v22  ;;  %v7450_v50 = vpop.f32.mrf.mxu1  ;;  %v8012_v48 = vpop.f32.mrf.mxu3 }
 0x930   : > { %v7512_v13 = vadd.f32 %v7450_v50, %v14004_v30 }
 0x931   : > { %8457 = vst [vmem:[#allocation8 + $0x78] sm:$0xff] %v8425_v11  ;;  %v8076_v47 = vadd.f32 %v8012_v48, %v7794_v62 }
 0x932   : > { %v8297_v20 = vpop.f32.mrf.mxu0 }
 0x933   : > { %v8358_v46 = vadd.f32 %v8294_v14, %v8076_v47 }
 0x935   : > { %v8394_v23 = vadd.f32 %v14157_v1, %v8358_v46 }
 0x936   : > { %v7733_v35 = vpop.f32.mrf.mxu2 }
 0x937   : > { %v8426_v33 = vmax.f32 %v8394_v23, 0.0  ;;  %v7795_v40 = vadd.f32 %v7733_v35, %v7512_v13  ;;  %v7453_v24 = vpop.f32.mrf.mxu1  ;;  %v8015_v4 = vpop.f32.mrf.mxu3 }
 0x938   : > { %v8488_v51 = vld [vmem:[#allocation8 + $0x70] ss:$2 sm:$0xff]  ;;  %v8520_v45 = vld [vmem:[#allocation8 + $0x71] ss:$2 sm:$0xff]  ;;  %v7513_v30 = vadd.f32 %v7453_v24, %v14014_v3 }
 0x939   : > { %v8544_v7 = vmax.f32 %v8488_v51, %v8520_v45  ;;  %8458 = vst [vmem:[#allocation8 + $0x80] sm:$0xff] %v8426_v33  ;;  %v8077_v9 = vadd.f32 %v8015_v4, %v7795_v40 }
 0x93a   : > { %v8300_v5 = vpop.f32.mrf.mxu0 }
 0x93b   : > { %v8589_v19 = vmax.f32 %v8543_v36, %v8544_v7  ;;  %v8359_v61 = vadd.f32 %v8297_v20, %v8077_v9 }
 0x93d   : > { %8597 = vst [vmem:[%s10244_s30 + $0x18] sm:$0xff] %v8589_v19  ;;  %v8395_v37 = vadd.f32 %v14157_v1, %v8359_v61 }
 0x93e   : > { %v7736_v28 = vpop.f32.mrf.mxu2 }
 0x93f   : > { %v8427_v60 = vmax.f32 %v8395_v37, 0.0  ;;  %v7796_v53 = vadd.f32 %v7736_v28, %v7513_v30  ;;  %v7456_v15 = vpop.f32.mrf.mxu1  ;;  %v8018_v27 = vpop.f32.mrf.mxu3 }
 0x940   : > { %v7514_v6 = vadd.f32 %v7456_v15, %v14024_v34 }
 0x941   : > { %8459 = vst [vmem:[#allocation8 + $0x88] sm:$0xff] %v8427_v60  ;;  %v8078_v58 = vadd.f32 %v8018_v27, %v7796_v53 }
 0x942   : > { %v8303_v17 = vpop.f32.mrf.mxu0 }
 0x943   : > { %v8360_v12 = vadd.f32 %v8300_v5, %v8078_v58 }
 0x945   : > { %v8396_v57 = vadd.f32 %v14157_v1, %v8360_v12 }
 0x946   : > { %v7739_v29 = vpop.f32.mrf.mxu2 }
 0x947   : > { %v8428_v52 = vmax.f32 %v8396_v57, 0.0  ;;  %v7797_v8 = vadd.f32 %v7739_v29, %v7514_v6  ;;  %v7459_v3 = vpop.f32.mrf.mxu1  ;;  %v8021_v16 = vpop.f32.mrf.mxu3 }
 0x948   : > { %v7515_v43 = vadd.f32 %v7459_v3, %v14034_v59  ;;  %v8490_v46 = vld [vmem:[#allocation8 + $0x80] ss:$2 sm:$0xff]  ;;  %v8522_v13 = vld [vmem:[#allocation8 + $0x81] ss:$2 sm:$0xff] }
 0x949   : > { %8460 = vst [vmem:[#allocation8 + $0x90] sm:$0xff] %v8428_v52  ;;  %v8079_v56 = vadd.f32 %v8021_v16, %v7797_v8  ;;  %v8545_v40 = vmax.f32 %v8490_v46, %v8522_v13 }
 0x94a   : > { %v8306_v25 = vpop.f32.mrf.mxu0 }
 0x94b   : > { %v8361_v42 = vadd.f32 %v8303_v17, %v8079_v56 }
 0x94d   : > { %v8397_v49 = vadd.f32 %v14157_v1, %v8361_v42 }
 0x94e   : > { %v7742_v22 = vpop.f32.mrf.mxu2 }
 0x94f   : > { %v8429_v0 = vmax.f32 %v8397_v49, 0.0  ;;  %v7798_v14 = vadd.f32 %v7742_v22, %v7515_v43  ;;  %v7462_v34 = vpop.f32.mrf.mxu1  ;;  %v8024_v18 = vpop.f32.mrf.mxu3 }
 0x950   : > { %v7516_v50 = vadd.f32 %v7462_v34, %v14044_v31 }
 0x951   : > { %8461 = vst [vmem:[#allocation8 + $0x98] sm:$0xff] %v8429_v0  ;;  %v8080_v11 = vadd.f32 %v8024_v18, %v7798_v14 }
 0x952   : > { %v8309_v47 = vpop.f32.mrf.mxu0 }
 0x953   : > { %v8362_v62 = vadd.f32 %v8306_v25, %v8080_v11 }
 0x955   : > { %v8398_v48 = vadd.f32 %v14157_v1, %v8362_v62 }
 0x956   : > { %v7745_v59 = vpop.f32.mrf.mxu2 }
 0x957   : > { %v8430_v23 = vmax.f32 %v8398_v48, 0.0  ;;  %v7799_v20 = vadd.f32 %v7745_v59, %v7516_v50  ;;  %v7465_v35 = vpop.f32.mrf.mxu1  ;;  %v8027_v33 = vpop.f32.mrf.mxu3 }
 0x958   : > { %v8492_v21 = vld [vmem:[#allocation8 + $0x90] ss:$2 sm:$0xff]  ;;  %v8524_v54 = vld [vmem:[#allocation8 + $0x91] ss:$2 sm:$0xff]  ;;  %v7517_v31 = vadd.f32 %v7465_v35, %v14054_v55 }
 0x959   : > { %v8546_v51 = vmax.f32 %v8492_v21, %v8524_v54  ;;  %8462 = vst [vmem:[#allocation8 + $0xa0] sm:$0xff] %v8430_v23  ;;  %v8081_v45 = vadd.f32 %v8027_v33, %v7799_v20 }
 0x95a   : > { %v8312_v7 = vpop.f32.mrf.mxu0 }
 0x95b   : > { %v8590_v24 = vmax.f32 %v8545_v40, %v8546_v51  ;;  %v8363_v4 = vadd.f32 %v8309_v47, %v8081_v45 }
 0x95d   : > { %8598 = vst [vmem:[%s10244_s30 + $0x20] sm:$0xff] %v8590_v24  ;;  %v8399_v36 = vadd.f32 %v14157_v1, %v8363_v4 }
 0x95e   : > { %v7748_v9 = vpop.f32.mrf.mxu2 }
 0x95f   : > { %v8431_v19 = vmax.f32 %v8399_v36, 0.0  ;;  %v7800_v61 = vadd.f32 %v7748_v9, %v7517_v31  ;;  %v7468_v30 = vpop.f32.mrf.mxu1  ;;  %v8030_v37 = vpop.f32.mrf.mxu3 }
 0x960   : > { %v7518_v60 = vadd.f32 %v7468_v30, %v14064_v44 }
 0x961   : > { %8463 = vst [vmem:[#allocation8 + $0xa8] sm:$0xff] %v8431_v19  ;;  %v8082_v5 = vadd.f32 %v8030_v37, %v7800_v61 }
 0x962   : > { %v8315_v15 = vpop.f32.mrf.mxu0 }
 0x963   : > { %v8364_v28 = vadd.f32 %v8312_v7, %v8082_v5 }
 0x965   : > { %v8400_v53 = vadd.f32 %v14157_v1, %v8364_v28 }
 0x966   : > { %v7751_v27 = vpop.f32.mrf.mxu2 }
 0x967   : > { %v8432_v58 = vmax.f32 %v8400_v53, 0.0  ;;  %v7801_v12 = vadd.f32 %v7751_v27, %v7518_v60  ;;  %v7471_v55 = vpop.f32.mrf.mxu1  ;;  %v8033_v6 = vpop.f32.mrf.mxu3 }
 0x968   : > { %v7519_v29 = vadd.f32 %v7471_v55, %v14074_v26  ;;  %v8494_v14 = vld [vmem:[#allocation8 + $0xa0] ss:$2 sm:$0xff]  ;;  %v8526_v34 = vld [vmem:[#allocation8 + $0xa1] ss:$2 sm:$0xff] }
 0x969   : > { %8464 = vst [vmem:[#allocation8 + $0xb0] sm:$0xff] %v8432_v58  ;;  %v8083_v57 = vadd.f32 %v8033_v6, %v7801_v12  ;;  %v8547_v46 = vmax.f32 %v8494_v14, %v8526_v34 }
 0x96a   : > { %v8318_v8 = vpop.f32.mrf.mxu0 }
 0x96b   : > { %v8365_v17 = vadd.f32 %v8315_v15, %v8083_v57 }
 0x96d   : > { %v8401_v52 = vadd.f32 %v14157_v1, %v8365_v17 }
 0x96e   : > { %v7754_v3 = vpop.f32.mrf.mxu2 }
 0x96f   : > { %v8433_v16 = vmax.f32 %v8401_v52, 0.0  ;;  %v7802_v56 = vadd.f32 %v7754_v3, %v7519_v29  ;;  %v7474_v44 = vpop.f32.mrf.mxu1  ;;  %v8036_v42 = vpop.f32.mrf.mxu3 }
 0x970   : > { %v7520_v25 = vadd.f32 %v7474_v44, %v14084_v38 }
 0x971   : > { %8465 = vst [vmem:[#allocation8 + $0xb8] sm:$0xff] %v8433_v16  ;;  %v8084_v43 = vadd.f32 %v8036_v42, %v7802_v56 }
 0x972   : > { %v8321_v0 = vpop.f32.mrf.mxu0 }
 0x973   : > { %v8366_v49 = vadd.f32 %v8318_v8, %v8084_v43 }
 0x975   : > { %v8402_v22 = vadd.f32 %v14157_v1, %v8366_v49 }
 0x976   : > { %v7757_v26 = vpop.f32.mrf.mxu2 }
 0x977   : > { %v8434_v18 = vmax.f32 %v8402_v22, 0.0  ;;  %v7803_v11 = vadd.f32 %v7757_v26, %v7520_v25  ;;  %v7477_v48 = vpop.f32.mrf.mxu1  ;;  %v8039_v47 = vpop.f32.mrf.mxu3 }
 0x978   : > { %v8496_v62 = vld [vmem:[#allocation8 + $0xb0] ss:$2 sm:$0xff]  ;;  %v8528_v50 = vld [vmem:[#allocation8 + $0xb1] ss:$2 sm:$0xff]  ;;  %v7521_v38 = vadd.f32 %v7477_v48, %v14094_v10 }
 0x979   : > { %v8548_v13 = vmax.f32 %v8496_v62, %v8528_v50  ;;  %8466 = vst [vmem:[#allocation8 + $0xc0] sm:$0xff] %v8434_v18  ;;  %v8085_v59 = vadd.f32 %v8039_v47, %v7803_v11 }
 0x97a   : > { %v8324_v54 = vpop.f32.mrf.mxu0 }
 0x97b   : > { %v8591_v23 = vmax.f32 %v8547_v46, %v8548_v13  ;;  %v8367_v20 = vadd.f32 %v8321_v0, %v8085_v59 }
 0x97d   : > { %8599 = vst [vmem:[%s10244_s30 + $0x28] sm:$0xff] %v8591_v23  ;;  %v8403_v21 = vadd.f32 %v14157_v1, %v8367_v20 }
 0x97e   : > { %v7760_v35 = vpop.f32.mrf.mxu2 }
 0x97f   : > { %v8435_v33 = vmax.f32 %v8403_v21, 0.0  ;;  %v7804_v40 = vadd.f32 %v7760_v35, %v7521_v38  ;;  %v7480_v51 = vpop.f32.mrf.mxu1  ;;  %v8042_v45 = vpop.f32.mrf.mxu3 }
 0x980   : > { %v7522_v31 = vadd.f32 %v7480_v51, %v14104_v39 }
 0x981   : > { %8467 = vst [vmem:[#allocation8 + $0xc8] sm:$0xff] %v8435_v33  ;;  %v8086_v24 = vadd.f32 %v8042_v45, %v7804_v40 }
 0x982   : > { %v8327_v7 = vpop.f32.mrf.mxu0 }
 0x983   : > { %v8368_v4 = vadd.f32 %v8324_v54, %v8086_v24 }
 0x985   : > { %v8404_v36 = vadd.f32 %v14157_v1, %v8368_v4 }
 0x986   : > { %v7763_v9 = vpop.f32.mrf.mxu2 }
 0x987   : > { %v8436_v19 = vmax.f32 %v8404_v36, 0.0  ;;  %v7805_v61 = vadd.f32 %v7763_v9, %v7522_v31  ;;  %v7483_v10 = vpop.f32.mrf.mxu1  ;;  %v8045_v30 = vpop.f32.mrf.mxu3 }
 0x988   : > { %v7523_v28 = vadd.f32 %v7483_v10, %v14114_v41  ;;  %v8498_v52 = vld [vmem:[#allocation8 + $0xc0] ss:$2 sm:$0xff]  ;;  %v8530_v8 = vld [vmem:[#allocation8 + $0xc1] ss:$2 sm:$0xff] }
 0x989   : > { %8468 = vst [vmem:[#allocation8 + $0xd0] sm:$0xff] %v8436_v19  ;;  %v8087_v37 = vadd.f32 %v8045_v30, %v7805_v61  ;;  %v8549_v49 = vmax.f32 %v8498_v52, %v8530_v8 }
 0x98a   : > { %v8330_v53 = vpop.f32.mrf.mxu0 }
 0x98b   : > { %v8369_v5 = vadd.f32 %v8327_v7, %v8087_v37 }
 0x98d   : > { %v8405_v60 = vadd.f32 %v14157_v1, %v8369_v5 }
 0x98e   : > { %v7766_v15 = vpop.f32.mrf.mxu2 }
 0x98f   : > { %v8437_v27 = vmax.f32 %v8405_v60, 0.0  ;;  %v7806_v58 = vadd.f32 %v7766_v15, %v7523_v28  ;;  %v7486_v39 = vpop.f32.mrf.mxu1  ;;  %v8048_v12 = vpop.f32.mrf.mxu3 }
 0x990   : > { %v7524_v57 = vadd.f32 %v7486_v39, %v14124_v63 }
 0x991   : > { %8469 = vst [vmem:[#allocation8 + $0xd8] sm:$0xff] %v8437_v27  ;;  %v8088_v55 = vadd.f32 %v8048_v12, %v7806_v58 }
 0x992   : > { %v8333_v29 = vpop.f32.mrf.mxu0 }
 0x993   : > { %v8370_v6 = vadd.f32 %v8330_v53, %v8088_v55 }
 0x995   : > { %v8406_v17 = vadd.f32 %v14157_v1, %v8370_v6 }
 0x996   : > { %v7769_v41 = vpop.f32.mrf.mxu2 }
 0x997   : > { %v8438_v3 = vmax.f32 %v8406_v17, 0.0  ;;  %v7807_v16 = vadd.f32 %v7769_v41, %v7524_v57  ;;  %v7489_v42 = vpop.f32.mrf.mxu1  ;;  %v8051_v43 = vpop.f32.mrf.mxu3 }
 0x998   : > { %v8500_v56 = vld [vmem:[#allocation8 + $0xd0] ss:$2 sm:$0xff]  ;;  %v8532_v44 = vld [vmem:[#allocation8 + $0xd1] ss:$2 sm:$0xff]  ;;  %v7525_v63 = vadd.f32 %v7489_v42, %v14134_v32 }
 0x999   : > { %v8550_v25 = vmax.f32 %v8500_v56, %v8532_v44  ;;  %8470 = vst [vmem:[#allocation8 + $0xe0] sm:$0xff] %v8438_v3  ;;  %v8089_v22 = vadd.f32 %v8051_v43, %v7807_v16 }
 0x99a   : > { %v8336_v18 = vpop.f32.mrf.mxu0 }
 0x99b   : > { %v8592_v0 = vmax.f32 %v8549_v49, %v8550_v25  ;;  %v8371_v14 = vadd.f32 %v8333_v29, %v8089_v22 }
 0x99d   : > { %8600 = vst [vmem:[%s10244_s30 + $0x30] sm:$0xff] %v8592_v0  ;;  %v8407_v34 = vadd.f32 %v14157_v1, %v8371_v14 }
 0x99e   : > { %v7772_v26 = vpop.f32.mrf.mxu2 }
 0x99f   : > { %v8439_v11 = vmax.f32 %v8407_v34, 0.0  ;;  %v7808_v62 = vadd.f32 %v7772_v26, %v7525_v63  ;;  %v8054_v50 = vpop.f32.mrf.mxu3  ;;  %v7492_v47 = vpop.f32.mrf.mxu1 }
 0x9a0   : > { %v7526_v13 = vadd.f32 %v7492_v47, %v14144_v2 }
 0x9a1   : > { %8471 = vst [vmem:[#allocation8 + $0xe8] sm:$0xff] %v8439_v11  ;;  %v8090_v48 = vadd.f32 %v8054_v50, %v7808_v62 }
 0x9a2   : > { %v8339_v21 = vpop.f32.mrf.mxu0 }
 0x9a3   : > { %v8372_v46 = vadd.f32 %v8336_v18, %v8090_v48 }
 0x9a5   : > { %v8408_v59 = vadd.f32 %v14157_v1, %v8372_v46 }
 0x9a6   : > { %v7775_v23 = vpop.f32.mrf.mxu2 }
 0x9a7   : > { %v8440_v20 = vmax.f32 %v8408_v59, 0.0  ;;  %v7809_v38 = vadd.f32 %v7775_v23, %v7526_v13  ;;  %v8057_v32 = vpop.f32.mrf.mxu3 }
 0x9a8   : > { %v8502_v51 = vld [vmem:[#allocation8 + $0xe0] ss:$2 sm:$0xff]  ;;  %v8534_v45 = vld [vmem:[#allocation8 + $0xe1] ss:$2 sm:$0xff] }
 0x9a9   : > { %8472 = vst [vmem:[#allocation8 + $0xf0] sm:$0xff] %v8440_v20  ;;  %v8091_v54 = vadd.f32 %v8057_v32, %v7809_v38  ;;  %v8551_v2 = vmax.f32 %v8502_v51, %v8534_v45 }
 0x9ab   : > { %v8373_v35 = vadd.f32 %v8339_v21, %v8091_v54 }
 0x9ad   : > { %v8409_v33 = vadd.f32 %v14157_v1, %v8373_v35 }
 0x9af   : > { %v8441_v40 = vmax.f32 %v8409_v33, 0.0 }
 0x9b1   : > { %8473 = vst [vmem:[#allocation8 + $0xf8] sm:$0xff] %v8441_v40 }
 0x9b8   : > { %v8504_v24 = vld [vmem:[#allocation8 + $0xf0] ss:$2 sm:$0xff]  ;;  %v8536_v4 = vld [vmem:[#allocation8 + $0xf1] ss:$2 sm:$0xff] }
 0x9b9   : > { %v8552_v31 = vmax.f32 %v8504_v24, %v8536_v4 }
 0x9bb   : > { %v8593_v36 = vmax.f32 %v8551_v2, %v8552_v31 }
 0x9bd   : > { %8601 = vst [vmem:[%s10244_s30 + $0x38] sm:$0xff] %v8593_v36 }
 0x9be PF: > { %s17_s24 = sadd.s32 1, %s10174_s24  }
 0x9bf   : > { %p14_p6 = scmp.ge.s32.totalorder %s17_s24, 4  }
 0x9c1   :  { %16 = sbr.rel (!%p14_p6) target bundleno = 1 (0x1), region = 244 }

</bundles_post_ra>
